<compile_context>
chip_gen: v6e
topology: v6e:2x2x1
jax: 0.10.0
libtpu: 0.0.40
codegen_flags: <defaults>
</compile_context>

<pallas_src>
from functools import partial

import jax
import jax.numpy as jnp
from jax.experimental import pallas as pl
from jax.experimental.pallas import tpu as pltpu


def _vmem():
    return pl.BlockSpec(memory_space=pltpu.MemorySpace.VMEM)


# ----------------------------------- fused forward kernel -----------------------------------
def make_fused_kernel(*, n_layers, B, T, Hh, Lp, pre_len, n_out):
    M = B * Lp          # pooled conv positions over all batches (lane count of conv output)

    def sigmoid(z):
        # exact sigmoid from a single EUP tanh: sigma(z) = 0.5 * tanh(z/2) + 0.5
        return 0.5 * jnp.tanh(0.5 * z) + 0.5

    def kernel(*refs):
        p_ref, wc_ref, bc_ref = refs[0], refs[1], refs[2]
        lstm_refs = refs[3:3 + 3 * n_layers]
        lw_ref, lb_ref = refs[3 + 3 * n_layers], refs[4 + 3 * n_layers]
        o_ref = refs[5 + 3 * n_layers]
        seq_sc = refs[6 + 3 * n_layers]          # (T*B, Hh) scratch, row = t*B + b

        # ---- Conv1d(k3,s2,p1) + ReLU + MaxPool1d(2), transposed layout ----
        # wc: (H, C*3), P: (C*3, 2*M).  Rows = conv out-channels (= LSTM time steps),
        # lanes = b*Lp + p, even conv positions first then odd -> max-pool is a lane max.
        ypre = jnp.dot(wc_ref[...], p_ref[...],
                       preferred_element_type=jnp.float32) + bc_ref[...]
        ypre = jnp.maximum(ypre, 0.0)
        x_seq = jnp.maximum(ypre[:, :M], ypre[:, M:2 * M])          # (T, B*Lp)

        # ---- stacked LSTM, batch on the sublane axis ----
        for layer in range(n_layers):
            wih_ref, whh_ref, b_ref = lstm_refs[3 * layer: 3 * layer + 3]
            is_last = layer == n_layers - 1

            if layer == 0:
                # Hoisted input projection: one (T, Lp) @ (Lp, 4*Hh) matmul per batch element
                # (the conv output has batch on lanes; per step we pack the B rows below,
                # which is off the serial h->h critical chain).
                xp_b = [jnp.dot(x_seq[:, b * Lp:(b + 1) * Lp], wih_ref[...],
                                preferred_element_type=jnp.float32) + b_ref[...]
                        for b in range(B)]
                x_part = lambda t: jnp.concatenate([p[t:t + 1, :] for p in xp_b], axis=0)
            else:
                # Previous layer wrote seq_sc in (t-major, b-minor) row order, so one matmul
                # covers all T steps and per-step access is a contiguous B-row slice.
                xp = jnp.dot(seq_sc[...], wih_ref[...],
                             preferred_element_type=jnp.float32) + b_ref[...]   # (T*B, 4*Hh)
                x_part = lambda t: xp[t * B:(t + 1) * B, :]

            h = jnp.zeros((B, Hh), jnp.float32)
            c = jnp.zeros((B, Hh), jnp.float32)
            for t in range(T):                                       # static, fully unrolled
                # one MXU pass: (B, Hh) @ (Hh, 4*Hh), output N = 128 lanes
                g = x_part(t) + jnp.dot(h, whh_ref[...],
                                        preferred_element_type=jnp.float32)
                # packed gate order [i, f, o, g]: one wide sigmoid + one tanh
                s = sigmoid(g[:, :3 * Hh])
                gg = jnp.tanh(g[:, 3 * Hh:])
                c = s[:, Hh:2 * Hh] * c + s[:, :Hh] * gg
                h = s[:, 2 * Hh:3 * Hh] * jnp.tanh(c)
                if (not is_last) or (t >= T - pre_len):             # keep only what's needed
                    seq_sc[t * B:(t + 1) * B, :] = h

        # ---- final Linear on the last pre_len steps (aligned tail slice of the scratch) ----
        hs = seq_sc[(T - pre_len) * B:T * B, :]                      # (pre_len*B, Hh)
        y = jnp.dot(hs, lw_ref[...], preferred_element_type=jnp.float32) + lb_ref[...]
        o_ref[...] = y                                               # (pre_len*B, n_out)

    return kernel


# ------------------------------------- parameter setup --------------------------------------
def init_params(key, input_size, output_size, pre_len, hidden_size, n_layers, seq_len):
    """Canonical (PyTorch-shaped) parameters."""
    eff_len = seq_len - pre_len                      # self.seq_len in the module
    L_c = (eff_len + 2 - 3) // 2 + 1                 # Conv1d output length
    last_dim = L_c // 2                              # after MaxPool1d(2) -> LSTM input size
    keys = jax.random.split(key, 4 + 4 * n_layers)

    kb = 1.0 / jnp.sqrt(jnp.float32(input_size * 3))
    conv_w = jax.random.uniform(keys[0], (hidden_size, input_size, 3), jnp.float32, -kb, kb)
    conv_b = jax.random.uniform(keys[1], (hidden_size,), jnp.float32, -kb, kb)

    s = 1.0 / jnp.sqrt(jnp.float32(hidden_size))
    lstm = []
    ki = 4
    for layer in range(n_layers):
        in_dim = last_dim if layer == 0 else hidden_size
        w_ih = jax.random.uniform(keys[ki], (4 * hidden_size, in_dim), jnp.float32, -s, s); ki += 1
        w_hh = jax.random.uniform(keys[ki], (4 * hidden_size, hidden_size), jnp.float32, -s, s); ki += 1
        b_ih = jax.random.uniform(keys[ki], (4 * hidden_size,), jnp.float32, -s, s); ki += 1
        b_hh = jax.random.uniform(keys[ki], (4 * hidden_size,), jnp.float32, -s, s); ki += 1
        lstm.append((w_ih, w_hh, b_ih + b_hh))       # PyTorch gate order i, f, g, o
    lb = 1.0 / jnp.sqrt(jnp.float32(hidden_size))
    lin_w = jax.random.uniform(keys[2], (output_size, hidden_size), jnp.float32, -lb, lb)
    lin_b = jax.random.uniform(keys[3], (output_size,), jnp.float32, -lb, lb)
    return dict(conv_w=conv_w, conv_b=conv_b, lstm=lstm, lin_w=lin_w, lin_b=lin_b)


def pack_params(params):
    """One-time re-layout: right-multiplying weights, gates reordered to [i, f, o, g]."""
    conv_w = params["conv_w"]                                   # (H, C, 3)
    H, C, K = conv_w.shape
    w2d = conv_w.reshape(H, C * K)                              # (H, C*3), row layout c*3+k
    bconv = params["conv_b"].reshape(H, 1)

    order = (0, 1, 3, 2)                                        # [i,f,g,o] -> [i,f,o,g]
    lstm_packed = []
    for (w_ih, w_hh, bias) in params["lstm"]:
        fourH, F = w_ih.shape
        Hh = fourH // 4
        wih_g = w_ih.reshape(4, Hh, F)
        whh_g = w_hh.reshape(4, Hh, Hh)
        wih = jnp.concatenate([wih_g[g].T for g in order], axis=1)   # (F, 4*Hh)
        whh = jnp.concatenate([whh_g[g].T for g in order], axis=1)   # (Hh, 4*Hh)
        b4 = bias.reshape(4, Hh)
        b = jnp.concatenate([b4[g] for g in order]).reshape(1, -1)   # (1, 4*Hh)
        lstm_packed.append((wih, whh, b))

    lw = params["lin_w"].T                                       # (Hh, n_out)
    lb = params["lin_b"].reshape(1, -1)                          # (1, n_out)
    return dict(w2d=w2d, bconv=bconv, lstm=lstm_packed, lw=lw, lb=lb)


# ---------------------------------------- forward pass --------------------------------------
def cnn_lstm_forward(x, packed, *, pre_len, hidden_size, n_layers, output_size):
    B, L, C = x.shape
    T = hidden_size                                  # LSTM seq_len == conv out-channels (module quirk)
    L_c = (L + 2 - 3) // 2 + 1
    Lp = L_c // 2
    M = B * Lp

    # im2col glue for Conv1d(k=3, s=2, p=1), built transposed: (C*3, 2*M), columns ordered
    # [even conv positions (b-major, p-minor) | odd conv positions].  Tiny; XLA fuses it.
    xpad = jnp.pad(x, ((0, 0), (1, 1), (0, 0)))
    idx = 2 * jnp.arange(L_c)[:, None] + jnp.arange(3)[None, :]          # (L_c, 3)
    patches = xpad[:, idx, :]                                            # (B, L_c, 3, C)
    pm = jnp.transpose(patches, (0, 1, 3, 2)).reshape(B, L_c, C * 3)     # row layout c*3+k
    pe = pm[:, 0:2 * Lp:2, :].reshape(M, C * 3)                          # even conv positions
    po = pm[:, 1:2 * Lp:2, :].reshape(M, C * 3)                          # odd conv positions
    P = jnp.concatenate([pe, po], axis=0).T                              # (C*3, 2*M)

    kern = make_fused_kernel(n_layers=n_layers, B=B, T=T, Hh=hidden_size, Lp=Lp,
                             pre_len=pre_len, n_out=output_size)

    args = [P, packed["w2d"], packed["bconv"]]
    for (wih, whh, b) in packed["lstm"]:
        args += [wih, whh, b]
    args += [packed["lw"], packed["lb"]]

    y = pl.pallas_call(
        kern,
        out_shape=jax.ShapeDtypeStruct((pre_len * B, output_size), jnp.float32),
        in_specs=[_vmem()] * len(args),
        out_specs=_vmem(),
        scratch_shapes=[pltpu.VMEM((T * B, hidden_size), jnp.float32)],
    )(*args)
    # row r = rel_t*B + b  ->  (B, pre_len, n_out); dense reshape lives in the wrapper
    return jnp.transpose(y.reshape(pre_len, B, output_size), (1, 0, 2))


if __name__ == "__main__":
    # module hyper-params (output_size == input_size, as the module's get_last_dim requires)
    input_size = 4
    output_size = 4
    pre_len = 4
    hidden_size = 32
    n_layers = 2
    seq_len = 20                       # effective CNN input length = seq_len - pre_len = 16
    batch = 2

    key = jax.random.PRNGKey(0)
    kx, kp = jax.random.split(key)
    params = init_params(kp, input_size, output_size, pre_len, hidden_size, n_layers, seq_len)
    packed = pack_params(params)                   # one-time weight packing (outside the hot path)
    x = jax.random.normal(kx, (batch, seq_len - pre_len, input_size), jnp.float32)

    fwd = jax.jit(partial(cnn_lstm_forward, pre_len=pre_len, hidden_size=hidden_size,
                          n_layers=n_layers, output_size=output_size))
    out = fwd(x, packed)
    jax.block_until_ready(out)
    assert out.shape == (batch, pre_len, output_size), out.shape
    assert out.dtype == jnp.float32
    print("KERNEL_OK")
</pallas_src>

<mosaic_0001>
module attributes {stable_mosaic.version = 11 : i64} {
  func.func @kernel(%arg0: memref<12x16xf32, #tpu.memory_space<vmem>>, %arg1: memref<32x12xf32, #tpu.memory_space<vmem>>, %arg2: memref<32x1xf32, #tpu.memory_space<vmem>>, %arg3: memref<4x128xf32, #tpu.memory_space<vmem>>, %arg4: memref<32x128xf32, #tpu.memory_space<vmem>>, %arg5: memref<1x128xf32, #tpu.memory_space<vmem>>, %arg6: memref<32x128xf32, #tpu.memory_space<vmem>>, %arg7: memref<32x128xf32, #tpu.memory_space<vmem>>, %arg8: memref<1x128xf32, #tpu.memory_space<vmem>>, %arg9: memref<32x4xf32, #tpu.memory_space<vmem>>, %arg10: memref<1x4xf32, #tpu.memory_space<vmem>>, %arg11: memref<8x4xf32, #tpu.memory_space<vmem>>, %arg12: memref<64x32xf32, #tpu.memory_space<vmem>>) attributes {dimension_semantics = [], scalar_prefetch = 0 : i64, scratch_operands = 1 : i64, tpu.core_type = #tpu.core_type<tc>} {
    %c0 = arith.constant 0 : index
    %c0_0 = arith.constant 0 : index
    %0 = vector.load %arg1[%c0, %c0_0] : memref<32x12xf32, #tpu.memory_space<vmem>>, vector<32x12xf32>
    %c0_1 = arith.constant 0 : index
    %c0_2 = arith.constant 0 : index
    %1 = vector.load %arg0[%c0_1, %c0_2] : memref<12x16xf32, #tpu.memory_space<vmem>>, vector<12x16xf32>
    %cst = arith.constant dense<0.000000e+00> : vector<32x16xf32>
    %2 = tpu.matmul %0, %1, %cst {dimension_numbers = #tpu.dot_dimension_numbers<[1], [0], [0], [1], [0, 0, 1, 1], [], []>} : vector<32x12xf32>, vector<12x16xf32>, vector<32x16xf32> -> vector<32x16xf32>
    %c0_3 = arith.constant 0 : index
    %c0_4 = arith.constant 0 : index
    %3 = vector.load %arg2[%c0_3, %c0_4] : memref<32x1xf32, #tpu.memory_space<vmem>>, vector<32x1xf32>
    %4 = vector.broadcast %3 : vector<32x1xf32> to vector<32x16xf32>
    %5 = arith.addf %2, %4 : vector<32x16xf32>
    %cst_5 = arith.constant 0.000000e+00 : f32
    %6 = vector.broadcast %cst_5 : f32 to vector<32x16xf32>
    %7 = arith.maximumf %5, %6 : vector<32x16xf32>
    %8 = vector.extract_strided_slice %7 {offsets = [0, 0], sizes = [32, 8], strides = [1, 1]} : vector<32x16xf32> to vector<32x8xf32>
    %9 = vector.extract_strided_slice %7 {offsets = [0, 8], sizes = [32, 8], strides = [1, 1]} : vector<32x16xf32> to vector<32x8xf32>
    %10 = arith.maximumf %8, %9 : vector<32x8xf32>
    %11 = vector.extract_strided_slice %10 {offsets = [0, 0], sizes = [32, 4], strides = [1, 1]} : vector<32x8xf32> to vector<32x4xf32>
    %c0_6 = arith.constant 0 : index
    %c0_7 = arith.constant 0 : index
    %12 = vector.load %arg3[%c0_6, %c0_7] : memref<4x128xf32, #tpu.memory_space<vmem>>, vector<4x128xf32>
    %cst_8 = arith.constant dense<0.000000e+00> : vector<32x128xf32>
    %13 = tpu.matmul %11, %12, %cst_8 {dimension_numbers = #tpu.dot_dimension_numbers<[1], [0], [0], [1], [0, 0, 1, 1], [], []>} : vector<32x4xf32>, vector<4x128xf32>, vector<32x128xf32> -> vector<32x128xf32>
    %c0_9 = arith.constant 0 : index
    %c0_10 = arith.constant 0 : index
    %14 = vector.load %arg5[%c0_9, %c0_10] : memref<1x128xf32, #tpu.memory_space<vmem>>, vector<1x128xf32>
    %15 = vector.broadcast %14 : vector<1x128xf32> to vector<32x128xf32>
    %16 = arith.addf %13, %15 : vector<32x128xf32>
    %17 = vector.extract_strided_slice %10 {offsets = [0, 4], sizes = [32, 4], strides = [1, 1]} : vector<32x8xf32> to vector<32x4xf32>
    %c0_11 = arith.constant 0 : index
    %c0_12 = arith.constant 0 : index
    %18 = vector.load %arg3[%c0_11, %c0_12] : memref<4x128xf32, #tpu.memory_space<vmem>>, vector<4x128xf32>
    %cst_13 = arith.constant dense<0.000000e+00> : vector<32x128xf32>
    %19 = tpu.matmul %17, %18, %cst_13 {dimension_numbers = #tpu.dot_dimension_numbers<[1], [0], [0], [1], [0, 0, 1, 1], [], []>} : vector<32x4xf32>, vector<4x128xf32>, vector<32x128xf32> -> vector<32x128xf32>
    %c0_14 = arith.constant 0 : index
    %c0_15 = arith.constant 0 : index
    %20 = vector.load %arg5[%c0_14, %c0_15] : memref<1x128xf32, #tpu.memory_space<vmem>>, vector<1x128xf32>
    %21 = vector.broadcast %20 : vector<1x128xf32> to vector<32x128xf32>
    %22 = arith.addf %19, %21 : vector<32x128xf32>
    %cst_16 = arith.constant 0.000000e+00 : f32
    %23 = vector.broadcast %cst_16 : f32 to vector<2x32xf32>
    %cst_17 = arith.constant 0.000000e+00 : f32
    %24 = vector.broadcast %cst_17 : f32 to vector<2x32xf32>
    %25 = vector.extract_strided_slice %16 {offsets = [0, 0], sizes = [1, 128], strides = [1, 1]} : vector<32x128xf32> to vector<1x128xf32>
    %26 = vector.extract_strided_slice %22 {offsets = [0, 0], sizes = [1, 128], strides = [1, 1]} : vector<32x128xf32> to vector<1x128xf32>
    %27 = tpu.concatenate %25, %26 in 0 : vector<1x128xf32>, vector<1x128xf32> -> vector<2x128xf32>
    %c0_18 = arith.constant 0 : index
    %c0_19 = arith.constant 0 : index
    %28 = vector.load %arg4[%c0_18, %c0_19] : memref<32x128xf32, #tpu.memory_space<vmem>>, vector<32x128xf32>
    %cst_20 = arith.constant dense<0.000000e+00> : vector<2x128xf32>
    %29 = tpu.matmul %23, %28, %cst_20 {dimension_numbers = #tpu.dot_dimension_numbers<[1], [0], [0], [1], [0, 0, 1, 1], [], []>} : vector<2x32xf32>, vector<32x128xf32>, vector<2x128xf32> -> vector<2x128xf32>
    %30 = arith.addf %27, %29 : vector<2x128xf32>
    %31 = vector.extract_strided_slice %30 {offsets = [0, 0], sizes = [2, 96], strides = [1, 1]} : vector<2x128xf32> to vector<2x96xf32>
    %cst_21 = arith.constant 5.000000e-01 : f32
    %32 = vector.broadcast %cst_21 : f32 to vector<2x96xf32>
    %33 = arith.mulf %32, %31 : vector<2x96xf32>
    %34 = math.tanh %33 : vector<2x96xf32>
    %cst_22 = arith.constant 5.000000e-01 : f32
    %35 = vector.broadcast %cst_22 : f32 to vector<2x96xf32>
    %36 = arith.mulf %35, %34 : vector<2x96xf32>
    %cst_23 = arith.constant 5.000000e-01 : f32
    %37 = vector.broadcast %cst_23 : f32 to vector<2x96xf32>
    %38 = arith.addf %36, %37 : vector<2x96xf32>
    %39 = vector.extract_strided_slice %30 {offsets = [0, 96], sizes = [2, 32], strides = [1, 1]} : vector<2x128xf32> to vector<2x32xf32>
    %40 = math.tanh %39 : vector<2x32xf32>
    %41 = vector.extract_strided_slice %38 {offsets = [0, 32], sizes = [2, 32], strides = [1, 1]} : vector<2x96xf32> to vector<2x32xf32>
    %42 = arith.mulf %41, %24 : vector<2x32xf32>
    %43 = vector.extract_strided_slice %38 {offsets = [0, 0], sizes = [2, 32], strides = [1, 1]} : vector<2x96xf32> to vector<2x32xf32>
    %44 = arith.mulf %43, %40 : vector<2x32xf32>
    %45 = arith.addf %42, %44 : vector<2x32xf32>
    %46 = vector.extract_strided_slice %38 {offsets = [0, 64], sizes = [2, 32], strides = [1, 1]} : vector<2x96xf32> to vector<2x32xf32>
    %47 = math.tanh %45 : vector<2x32xf32>
    %48 = arith.mulf %46, %47 : vector<2x32xf32>
    %c0_24 = arith.constant 0 : index
    %c0_25 = arith.constant 0 : index
    %49 = vector.load %arg12[%c0_24, %c0_25] : memref<64x32xf32, #tpu.memory_space<vmem>>, vector<2x32xf32>
    tpu.vector_store %arg12[%c0_24, %c0_25], %48 {strides = array<i32>} : memref<64x32xf32, #tpu.memory_space<vmem>>, vector<2x32xf32>,
    %50 = vector.extract_strided_slice %16 {offsets = [1, 0], sizes = [1, 128], strides = [1, 1]} : vector<32x128xf32> to vector<1x128xf32>
    %51 = vector.extract_strided_slice %22 {offsets = [1, 0], sizes = [1, 128], strides = [1, 1]} : vector<32x128xf32> to vector<1x128xf32>
    %52 = tpu.concatenate %50, %51 in 0 : vector<1x128xf32>, vector<1x128xf32> -> vector<2x128xf32>
    %c0_26 = arith.constant 0 : index
    %c0_27 = arith.constant 0 : index
    %53 = vector.load %arg4[%c0_26, %c0_27] : memref<32x128xf32, #tpu.memory_space<vmem>>, vector<32x128xf32>
    %cst_28 = arith.constant dense<0.000000e+00> : vector<2x128xf32>
    %54 = tpu.matmul %48, %53, %cst_28 {dimension_numbers = #tpu.dot_dimension_numbers<[1], [0], [0], [1], [0, 0, 1, 1], [], []>} : vector<2x32xf32>, vector<32x128xf32>, vector<2x128xf32> -> vector<2x128xf32>
    %55 = arith.addf %52, %54 : vector<2x128xf32>
    %56 = vector.extract_strided_slice %55 {offsets = [0, 0], sizes = [2, 96], strides = [1, 1]} : vector<2x128xf32> to vector<2x96xf32>
    %cst_29 = arith.constant 5.000000e-01 : f32
    %57 = vector.broadcast %cst_29 : f32 to vector<2x96xf32>
    %58 = arith.mulf %57, %56 : vector<2x96xf32>
    %59 = math.tanh %58 : vector<2x96xf32>
    %cst_30 = arith.constant 5.000000e-01 : f32
    %60 = vector.broadcast %cst_30 : f32 to vector<2x96xf32>
    %61 = arith.mulf %60, %59 : vector<2x96xf32>
    %cst_31 = arith.constant 5.000000e-01 : f32
    %62 = vector.broadcast %cst_31 : f32 to vector<2x96xf32>
    %63 = arith.addf %61, %62 : vector<2x96xf32>
    %64 = vector.extract_strided_slice %55 {offsets = [0, 96], sizes = [2, 32], strides = [1, 1]} : vector<2x128xf32> to vector<2x32xf32>
    %65 = math.tanh %64 : vector<2x32xf32>
    %66 = vector.extract_strided_slice %63 {offsets = [0, 32], sizes = [2, 32], strides = [1, 1]} : vector<2x96xf32> to vector<2x32xf32>
    %67 = arith.mulf %66, %45 : vector<2x32xf32>
    %68 = vector.extract_strided_slice %63 {offsets = [0, 0], sizes = [2, 32], strides = [1, 1]} : vector<2x96xf32> to vector<2x32xf32>
    %69 = arith.mulf %68, %65 : vector<2x32xf32>
    %70 = arith.addf %67, %69 : vector<2x32xf32>
    %71 = vector.extract_strided_slice %63 {offsets = [0, 64], sizes = [2, 32], strides = [1, 1]} : vector<2x96xf32> to vector<2x32xf32>
    %72 = math.tanh %70 : vector<2x32xf32>
    %73 = arith.mulf %71, %72 : vector<2x32xf32>
    %c2 = arith.constant 2 : index
    %c0_32 = arith.constant 0 : index
    %74 = vector.load %arg12[%c2, %c0_32] : memref<64x32xf32, #tpu.memory_space<vmem>>, vector<2x32xf32>
    tpu.vector_store %arg12[%c2, %c0_32], %73 {strides = array<i32>} : memref<64x32xf32, #tpu.memory_space<vmem>>, vector<2x32xf32>,
    %75 = vector.extract_strided_slice %16 {offsets = [2, 0], sizes = [1, 128], strides = [1, 1]} : vector<32x128xf32> to vector<1x128xf32>
    %76 = vector.extract_strided_slice %22 {offsets = [2, 0], sizes = [1, 128], strides = [1, 1]} : vector<32x128xf32> to vector<1x128xf32>
    %77 = tpu.concatenate %75, %76 in 0 : vector<1x128xf32>, vector<1x128xf32> -> vector<2x128xf32>
    %c0_33 = arith.constant 0 : index
    %c0_34 = arith.constant 0 : index
    %78 = vector.load %arg4[%c0_33, %c0_34] : memref<32x128xf32, #tpu.memory_space<vmem>>, vector<32x128xf32>
    %cst_35 = arith.constant dense<0.000000e+00> : vector<2x128xf32>
    %79 = tpu.matmul %73, %78, %cst_35 {dimension_numbers = #tpu.dot_dimension_numbers<[1], [0], [0], [1], [0, 0, 1, 1], [], []>} : vector<2x32xf32>, vector<32x128xf32>, vector<2x128xf32> -> vector<2x128xf32>
    %80 = arith.addf %77, %79 : vector<2x128xf32>
    %81 = vector.extract_strided_slice %80 {offsets = [0, 0], sizes = [2, 96], strides = [1, 1]} : vector<2x128xf32> to vector<2x96xf32>
    %cst_36 = arith.constant 5.000000e-01 : f32
    %82 = vector.broadcast %cst_36 : f32 to vector<2x96xf32>
    %83 = arith.mulf %82, %81 : vector<2x96xf32>
    %84 = math.tanh %83 : vector<2x96xf32>
    %cst_37 = arith.constant 5.000000e-01 : f32
    %85 = vector.broadcast %cst_37 : f32 to vector<2x96xf32>
    %86 = arith.mulf %85, %84 : vector<2x96xf32>
    %cst_38 = arith.constant 5.000000e-01 : f32
    %87 = vector.broadcast %cst_38 : f32 to vector<2x96xf32>
    %88 = arith.addf %86, %87 : vector<2x96xf32>
    %89 = vector.extract_strided_slice %80 {offsets = [0, 96], sizes = [2, 32], strides = [1, 1]} : vector<2x128xf32> to vector<2x32xf32>
    %90 = math.tanh %89 : vector<2x32xf32>
    %91 = vector.extract_strided_slice %88 {offsets = [0, 32], sizes = [2, 32], strides = [1, 1]} : vector<2x96xf32> to vector<2x32xf32>
    %92 = arith.mulf %91, %70 : vector<2x32xf32>
    %93 = vector.extract_strided_slice %88 {offsets = [0, 0], sizes = [2, 32], strides = [1, 1]} : vector<2x96xf32> to vector<2x32xf32>
    %94 = arith.mulf %93, %90 : vector<2x32xf32>
    %95 = arith.addf %92, %94 : vector<2x32xf32>
    %96 = vector.extract_strided_slice %88 {offsets = [0, 64], sizes = [2, 32], strides = [1, 1]} : vector<2x96xf32> to vector<2x32xf32>
    %97 = math.tanh %95 : vector<2x32xf32>
    %98 = arith.mulf %96, %97 : vector<2x32xf32>
    %c4 = arith.constant 4 : index
    %c0_39 = arith.constant 0 : index
    %99 = vector.load %arg12[%c4, %c0_39] : memref<64x32xf32, #tpu.memory_space<vmem>>, vector<2x32xf32>
    tpu.vector_store %arg12[%c4, %c0_39], %98 {strides = array<i32>} : memref<64x32xf32, #tpu.memory_space<vmem>>, vector<2x32xf32>,
    %100 = vector.extract_strided_slice %16 {offsets = [3, 0], sizes = [1, 128], strides = [1, 1]} : vector<32x128xf32> to vector<1x128xf32>
    %101 = vector.extract_strided_slice %22 {offsets = [3, 0], sizes = [1, 128], strides = [1, 1]} : vector<32x128xf32> to vector<1x128xf32>
    %102 = tpu.concatenate %100, %101 in 0 : vector<1x128xf32>, vector<1x128xf32> -> vector<2x128xf32>
    %c0_40 = arith.constant 0 : index
    %c0_41 = arith.constant 0 : index
    %103 = vector.load %arg4[%c0_40, %c0_41] : memref<32x128xf32, #tpu.memory_space<vmem>>, vector<32x128xf32>
    %cst_42 = arith.constant dense<0.000000e+00> : vector<2x128xf32>
    %104 = tpu.matmul %98, %103, %cst_42 {dimension_numbers = #tpu.dot_dimension_numbers<[1], [0], [0], [1], [0, 0, 1, 1], [], []>} : vector<2x32xf32>, vector<32x128xf32>, vector<2x128xf32> -> vector<2x128xf32>
    %105 = arith.addf %102, %104 : vector<2x128xf32>
    %106 = vector.extract_strided_slice %105 {offsets = [0, 0], sizes = [2, 96], strides = [1, 1]} : vector<2x128xf32> to vector<2x96xf32>
    %cst_43 = arith.constant 5.000000e-01 : f32
    %107 = vector.broadcast %cst_43 : f32 to vector<2x96xf32>
    %108 = arith.mulf %107, %106 : vector<2x96xf32>
    %109 = math.tanh %108 : vector<2x96xf32>
    %cst_44 = arith.constant 5.000000e-01 : f32
    %110 = vector.broadcast %cst_44 : f32 to vector<2x96xf32>
    %111 = arith.mulf %110, %109 : vector<2x96xf32>
    %cst_45 = arith.constant 5.000000e-01 : f32
    %112 = vector.broadcast %cst_45 : f32 to vector<2x96xf32>
    %113 = arith.addf %111, %112 : vector<2x96xf32>
    %114 = vector.extract_strided_slice %105 {offsets = [0, 96], sizes = [2, 32], strides = [1, 1]} : vector<2x128xf32> to vector<2x32xf32>
    %115 = math.tanh %114 : vector<2x32xf32>
    %116 = vector.extract_strided_slice %113 {offsets = [0, 32], sizes = [2, 32], strides = [1, 1]} : vector<2x96xf32> to vector<2x32xf32>
    %117 = arith.mulf %116, %95 : vector<2x32xf32>
    %118 = vector.extract_strided_slice %113 {offsets = [0, 0], sizes = [2, 32], strides = [1, 1]} : vector<2x96xf32> to vector<2x32xf32>
    %119 = arith.mulf %118, %115 : vector<2x32xf32>
    %120 = arith.addf %117, %119 : vector<2x32xf32>
    %121 = vector.extract_strided_slice %113 {offsets = [0, 64], sizes = [2, 32], strides = [1, 1]} : vector<2x96xf32> to vector<2x32xf32>
    %122 = math.tanh %120 : vector<2x32xf32>
    %123 = arith.mulf %121, %122 : vector<2x32xf32>
    %c6 = arith.constant 6 : index
    %c0_46 = arith.constant 0 : index
    %124 = vector.load %arg12[%c6, %c0_46] : memref<64x32xf32, #tpu.memory_space<vmem>>, vector<2x32xf32>
    tpu.vector_store %arg12[%c6, %c0_46], %123 {strides = array<i32>} : memref<64x32xf32, #tpu.memory_space<vmem>>, vector<2x32xf32>,
    %125 = vector.extract_strided_slice %16 {offsets = [4, 0], sizes = [1, 128], strides = [1, 1]} : vector<32x128xf32> to vector<1x128xf32>
    %126 = vector.extract_strided_slice %22 {offsets = [4, 0], sizes = [1, 128], strides = [1, 1]} : vector<32x128xf32> to vector<1x128xf32>
    %127 = tpu.concatenate %125, %126 in 0 : vector<1x128xf32>, vector<1x128xf32> -> vector<2x128xf32>
    %c0_47 = arith.constant 0 : index
    %c0_48 = arith.constant 0 : index
    %128 = vector.load %arg4[%c0_47, %c0_48] : memref<32x128xf32, #tpu.memory_space<vmem>>, vector<32x128xf32>
    %cst_49 = arith.constant dense<0.000000e+00> : vector<2x128xf32>
    %129 = tpu.matmul %123, %128, %cst_49 {dimension_numbers = #tpu.dot_dimension_numbers<[1], [0], [0], [1], [0, 0, 1, 1], [], []>} : vector<2x32xf32>, vector<32x128xf32>, vector<2x128xf32> -> vector<2x128xf32>
    %130 = arith.addf %127, %129 : vector<2x128xf32>
    %131 = vector.extract_strided_slice %130 {offsets = [0, 0], sizes = [2, 96], strides = [1, 1]} : vector<2x128xf32> to vector<2x96xf32>
    %cst_50 = arith.constant 5.000000e-01 : f32
    %132 = vector.broadcast %cst_50 : f32 to vector<2x96xf32>
    %133 = arith.mulf %132, %131 : vector<2x96xf32>
    %134 = math.tanh %133 : vector<2x96xf32>
    %cst_51 = arith.constant 5.000000e-01 : f32
    %135 = vector.broadcast %cst_51 : f32 to vector<2x96xf32>
    %136 = arith.mulf %135, %134 : vector<2x96xf32>
    %cst_52 = arith.constant 5.000000e-01 : f32
    %137 = vector.broadcast %cst_52 : f32 to vector<2x96xf32>
    %138 = arith.addf %136, %137 : vector<2x96xf32>
    %139 = vector.extract_strided_slice %130 {offsets = [0, 96], sizes = [2, 32], strides = [1, 1]} : vector<2x128xf32> to vector<2x32xf32>
    %140 = math.tanh %139 : vector<2x32xf32>
    %141 = vector.extract_strided_slice %138 {offsets = [0, 32], sizes = [2, 32], strides = [1, 1]} : vector<2x96xf32> to vector<2x32xf32>
    %142 = arith.mulf %141, %120 : vector<2x32xf32>
    %143 = vector.extract_strided_slice %138 {offsets = [0, 0], sizes = [2, 32], strides = [1, 1]} : vector<2x96xf32> to vector<2x32xf32>
    %144 = arith.mulf %143, %140 : vector<2x32xf32>
    %145 = arith.addf %142, %144 : vector<2x32xf32>
    %146 = vector.extract_strided_slice %138 {offsets = [0, 64], sizes = [2, 32], strides = [1, 1]} : vector<2x96xf32> to vector<2x32xf32>
    %147 = math.tanh %145 : vector<2x32xf32>
    %148 = arith.mulf %146, %147 : vector<2x32xf32>
    %c8 = arith.constant 8 : index
    %c0_53 = arith.constant 0 : index
    %149 = vector.load %arg12[%c8, %c0_53] : memref<64x32xf32, #tpu.memory_space<vmem>>, vector<2x32xf32>
    tpu.vector_store %arg12[%c8, %c0_53], %148 {strides = array<i32>} : memref<64x32xf32, #tpu.memory_space<vmem>>, vector<2x32xf32>,
    %150 = vector.extract_strided_slice %16 {offsets = [5, 0], sizes = [1, 128], strides = [1, 1]} : vector<32x128xf32> to vector<1x128xf32>
    %151 = vector.extract_strided_slice %22 {offsets = [5, 0], sizes = [1, 128], strides = [1, 1]} : vector<32x128xf32> to vector<1x128xf32>
    %152 = tpu.concatenate %150, %151 in 0 : vector<1x128xf32>, vector<1x128xf32> -> vector<2x128xf32>
    %c0_54 = arith.constant 0 : index
    %c0_55 = arith.constant 0 : index
    %153 = vector.load %arg4[%c0_54, %c0_55] : memref<32x128xf32, #tpu.memory_space<vmem>>, vector<32x128xf32>
    %cst_56 = arith.constant dense<0.000000e+00> : vector<2x128xf32>
    %154 = tpu.matmul %148, %153, %cst_56 {dimension_numbers = #tpu.dot_dimension_numbers<[1], [0], [0], [1], [0, 0, 1, 1], [], []>} : vector<2x32xf32>, vector<32x128xf32>, vector<2x128xf32> -> vector<2x128xf32>
    %155 = arith.addf %152, %154 : vector<2x128xf32>
    %156 = vector.extract_strided_slice %155 {offsets = [0, 0], sizes = [2, 96], strides = [1, 1]} : vector<2x128xf32> to vector<2x96xf32>
    %cst_57 = arith.constant 5.000000e-01 : f32
    %157 = vector.broadcast %cst_57 : f32 to vector<2x96xf32>
    %158 = arith.mulf %157, %156 : vector<2x96xf32>
    %159 = math.tanh %158 : vector<2x96xf32>
    %cst_58 = arith.constant 5.000000e-01 : f32
    %160 = vector.broadcast %cst_58 : f32 to vector<2x96xf32>
    %161 = arith.mulf %160, %159 : vector<2x96xf32>
    %cst_59 = arith.constant 5.000000e-01 : f32
    %162 = vector.broadcast %cst_59 : f32 to vector<2x96xf32>
    %163 = arith.addf %161, %162 : vector<2x96xf32>
    %164 = vector.extract_strided_slice %155 {offsets = [0, 96], sizes = [2, 32], strides = [1, 1]} : vector<2x128xf32> to vector<2x32xf32>
    %165 = math.tanh %164 : vector<2x32xf32>
    %166 = vector.extract_strided_slice %163 {offsets = [0, 32], sizes = [2, 32], strides = [1, 1]} : vector<2x96xf32> to vector<2x32xf32>
    %167 = arith.mulf %166, %145 : vector<2x32xf32>
    %168 = vector.extract_strided_slice %163 {offsets = [0, 0], sizes = [2, 32], strides = [1, 1]} : vector<2x96xf32> to vector<2x32xf32>
    %169 = arith.mulf %168, %165 : vector<2x32xf32>
    %170 = arith.addf %167, %169 : vector<2x32xf32>
    %171 = vector.extract_strided_slice %163 {offsets = [0, 64], sizes = [2, 32], strides = [1, 1]} : vector<2x96xf32> to vector<2x32xf32>
    %172 = math.tanh %170 : vector<2x32xf32>
    %173 = arith.mulf %171, %172 : vector<2x32xf32>
    %c10 = arith.constant 10 : index
    %c0_60 = arith.constant 0 : index
    %174 = vector.load %arg12[%c10, %c0_60] : memref<64x32xf32, #tpu.memory_space<vmem>>, vector<2x32xf32>
    tpu.vector_store %arg12[%c10, %c0_60], %173 {strides = array<i32>} : memref<64x32xf32, #tpu.memory_space<vmem>>, vector<2x32xf32>,
    %175 = vector.extract_strided_slice %16 {offsets = [6, 0], sizes = [1, 128], strides = [1, 1]} : vector<32x128xf32> to vector<1x128xf32>
    %176 = vector.extract_strided_slice %22 {offsets = [6, 0], sizes = [1, 128], strides = [1, 1]} : vector<32x128xf32> to vector<1x128xf32>
    %177 = tpu.concatenate %175, %176 in 0 : vector<1x128xf32>, vector<1x128xf32> -> vector<2x128xf32>
    %c0_61 = arith.constant 0 : index
    %c0_62 = arith.constant 0 : index
    %178 = vector.load %arg4[%c0_61, %c0_62] : memref<32x128xf32, #tpu.memory_space<vmem>>, vector<32x128xf32>
    %cst_63 = arith.constant dense<0.000000e+00> : vector<2x128xf32>
    %179 = tpu.matmul %173, %178, %cst_63 {dimension_numbers = #tpu.dot_dimension_numbers<[1], [0], [0], [1], [0, 0, 1, 1], [], []>} : vector<2x32xf32>, vector<32x128xf32>, vector<2x128xf32> -> vector<2x128xf32>
    %180 = arith.addf %177, %179 : vector<2x128xf32>
    %181 = vector.extract_strided_slice %180 {offsets = [0, 0], sizes = [2, 96], strides = [1, 1]} : vector<2x128xf32> to vector<2x96xf32>
    %cst_64 = arith.constant 5.000000e-01 : f32
    %182 = vector.broadcast %cst_64 : f32 to vector<2x96xf32>
    %183 = arith.mulf %182, %181 : vector<2x96xf32>
    %184 = math.tanh %183 : vector<2x96xf32>
    %cst_65 = arith.constant 5.000000e-01 : f32
    %185 = vector.broadcast %cst_65 : f32 to vector<2x96xf32>
    %186 = arith.mulf %185, %184 : vector<2x96xf32>
    %cst_66 = arith.constant 5.000000e-01 : f32
    %187 = vector.broadcast %cst_66 : f32 to vector<2x96xf32>
    %188 = arith.addf %186, %187 : vector<2x96xf32>
    %189 = vector.extract_strided_slice %180 {offsets = [0, 96], sizes = [2, 32], strides = [1, 1]} : vector<2x128xf32> to vector<2x32xf32>
    %190 = math.tanh %189 : vector<2x32xf32>
    %191 = vector.extract_strided_slice %188 {offsets = [0, 32], sizes = [2, 32], strides = [1, 1]} : vector<2x96xf32> to vector<2x32xf32>
    %192 = arith.mulf %191, %170 : vector<2x32xf32>
    %193 = vector.extract_strided_slice %188 {offsets = [0, 0], sizes = [2, 32], strides = [1, 1]} : vector<2x96xf32> to vector<2x32xf32>
    %194 = arith.mulf %193, %190 : vector<2x32xf32>
    %195 = arith.addf %192, %194 : vector<2x32xf32>
    %196 = vector.extract_strided_slice %188 {offsets = [0, 64], sizes = [2, 32], strides = [1, 1]} : vector<2x96xf32> to vector<2x32xf32>
    %197 = math.tanh %195 : vector<2x32xf32>
    %198 = arith.mulf %196, %197 : vector<2x32xf32>
    %c12 = arith.constant 12 : index
    %c0_67 = arith.constant 0 : index
    %199 = vector.load %arg12[%c12, %c0_67] : memref<64x32xf32, #tpu.memory_space<vmem>>, vector<2x32xf32>
    tpu.vector_store %arg12[%c12, %c0_67], %198 {strides = array<i32>} : memref<64x32xf32, #tpu.memory_space<vmem>>, vector<2x32xf32>,
    %200 = vector.extract_strided_slice %16 {offsets = [7, 0], sizes = [1, 128], strides = [1, 1]} : vector<32x128xf32> to vector<1x128xf32>
    %201 = vector.extract_strided_slice %22 {offsets = [7, 0], sizes = [1, 128], strides = [1, 1]} : vector<32x128xf32> to vector<1x128xf32>
    %202 = tpu.concatenate %200, %201 in 0 : vector<1x128xf32>, vector<1x128xf32> -> vector<2x128xf32>
    %c0_68 = arith.constant 0 : index
    %c0_69 = arith.constant 0 : index
    %203 = vector.load %arg4[%c0_68, %c0_69] : memref<32x128xf32, #tpu.memory_space<vmem>>, vector<32x128xf32>
    %cst_70 = arith.constant dense<0.000000e+00> : vector<2x128xf32>
    %204 = tpu.matmul %198, %203, %cst_70 {dimension_numbers = #tpu.dot_dimension_numbers<[1], [0], [0], [1], [0, 0, 1, 1], [], []>} : vector<2x32xf32>, vector<32x128xf32>, vector<2x128xf32> -> vector<2x128xf32>
    %205 = arith.addf %202, %204 : vector<2x128xf32>
    %206 = vector.extract_strided_slice %205 {offsets = [0, 0], sizes = [2, 96], strides = [1, 1]} : vector<2x128xf32> to vector<2x96xf32>
    %cst_71 = arith.constant 5.000000e-01 : f32
    %207 = vector.broadcast %cst_71 : f32 to vector<2x96xf32>
    %208 = arith.mulf %207, %206 : vector<2x96xf32>
    %209 = math.tanh %208 : vector<2x96xf32>
    %cst_72 = arith.constant 5.000000e-01 : f32
    %210 = vector.broadcast %cst_72 : f32 to vector<2x96xf32>
    %211 = arith.mulf %210, %209 : vector<2x96xf32>
    %cst_73 = arith.constant 5.000000e-01 : f32
    %212 = vector.broadcast %cst_73 : f32 to vector<2x96xf32>
    %213 = arith.addf %211, %212 : vector<2x96xf32>
    %214 = vector.extract_strided_slice %205 {offsets = [0, 96], sizes = [2, 32], strides = [1, 1]} : vector<2x128xf32> to vector<2x32xf32>
    %215 = math.tanh %214 : vector<2x32xf32>
    %216 = vector.extract_strided_slice %213 {offsets = [0, 32], sizes = [2, 32], strides = [1, 1]} : vector<2x96xf32> to vector<2x32xf32>
    %217 = arith.mulf %216, %195 : vector<2x32xf32>
    %218 = vector.extract_strided_slice %213 {offsets = [0, 0], sizes = [2, 32], strides = [1, 1]} : vector<2x96xf32> to vector<2x32xf32>
    %219 = arith.mulf %218, %215 : vector<2x32xf32>
    %220 = arith.addf %217, %219 : vector<2x32xf32>
    %221 = vector.extract_strided_slice %213 {offsets = [0, 64], sizes = [2, 32], strides = [1, 1]} : vector<2x96xf32> to vector<2x32xf32>
    %222 = math.tanh %220 : vector<2x32xf32>
    %223 = arith.mulf %221, %222 : vector<2x32xf32>
    %c14 = arith.constant 14 : index
    %c0_74 = arith.constant 0 : index
    %224 = vector.load %arg12[%c14, %c0_74] : memref<64x32xf32, #tpu.memory_space<vmem>>, vector<2x32xf32>
    tpu.vector_store %arg12[%c14, %c0_74], %223 {strides = array<i32>} : memref<64x32xf32, #tpu.memory_space<vmem>>, vector<2x32xf32>,
    %225 = vector.extract_strided_slice %16 {offsets = [8, 0], sizes = [1, 128], strides = [1, 1]} : vector<32x128xf32> to vector<1x128xf32>
    %226 = vector.extract_strided_slice %22 {offsets = [8, 0], sizes = [1, 128], strides = [1, 1]} : vector<32x128xf32> to vector<1x128xf32>
    %227 = tpu.concatenate %225, %226 in 0 : vector<1x128xf32>, vector<1x128xf32> -> vector<2x128xf32>
    %c0_75 = arith.constant 0 : index
    %c0_76 = arith.constant 0 : index
    %228 = vector.load %arg4[%c0_75, %c0_76] : memref<32x128xf32, #tpu.memory_space<vmem>>, vector<32x128xf32>
    %cst_77 = arith.constant dense<0.000000e+00> : vector<2x128xf32>
    %229 = tpu.matmul %223, %228, %cst_77 {dimension_numbers = #tpu.dot_dimension_numbers<[1], [0], [0], [1], [0, 0, 1, 1], [], []>} : vector<2x32xf32>, vector<32x128xf32>, vector<2x128xf32> -> vector<2x128xf32>
    %230 = arith.addf %227, %229 : vector<2x128xf32>
    %231 = vector.extract_strided_slice %230 {offsets = [0, 0], sizes = [2, 96], strides = [1, 1]} : vector<2x128xf32> to vector<2x96xf32>
    %cst_78 = arith.constant 5.000000e-01 : f32
    %232 = vector.broadcast %cst_78 : f32 to vector<2x96xf32>
    %233 = arith.mulf %232, %231 : vector<2x96xf32>
    %234 = math.tanh %233 : vector<2x96xf32>
    %cst_79 = arith.constant 5.000000e-01 : f32
    %235 = vector.broadcast %cst_79 : f32 to vector<2x96xf32>
    %236 = arith.mulf %235, %234 : vector<2x96xf32>
    %cst_80 = arith.constant 5.000000e-01 : f32
    %237 = vector.broadcast %cst_80 : f32 to vector<2x96xf32>
    %238 = arith.addf %236, %237 : vector<2x96xf32>
    %239 = vector.extract_strided_slice %230 {offsets = [0, 96], sizes = [2, 32], strides = [1, 1]} : vector<2x128xf32> to vector<2x32xf32>
    %240 = math.tanh %239 : vector<2x32xf32>
    %241 = vector.extract_strided_slice %238 {offsets = [0, 32], sizes = [2, 32], strides = [1, 1]} : vector<2x96xf32> to vector<2x32xf32>
    %242 = arith.mulf %241, %220 : vector<2x32xf32>
    %243 = vector.extract_strided_slice %238 {offsets = [0, 0], sizes = [2, 32], strides = [1, 1]} : vector<2x96xf32> to vector<2x32xf32>
    %244 = arith.mulf %243, %240 : vector<2x32xf32>
    %245 = arith.addf %242, %244 : vector<2x32xf32>
    %246 = vector.extract_strided_slice %238 {offsets = [0, 64], sizes = [2, 32], strides = [1, 1]} : vector<2x96xf32> to vector<2x32xf32>
    %247 = math.tanh %245 : vector<2x32xf32>
    %248 = arith.mulf %246, %247 : vector<2x32xf32>
    %c16 = arith.constant 16 : index
    %c0_81 = arith.constant 0 : index
    %249 = vector.load %arg12[%c16, %c0_81] : memref<64x32xf32, #tpu.memory_space<vmem>>, vector<2x32xf32>
    tpu.vector_store %arg12[%c16, %c0_81], %248 {strides = array<i32>} : memref<64x32xf32, #tpu.memory_space<vmem>>, vector<2x32xf32>,
    %250 = vector.extract_strided_slice %16 {offsets = [9, 0], sizes = [1, 128], strides = [1, 1]} : vector<32x128xf32> to vector<1x128xf32>
    %251 = vector.extract_strided_slice %22 {offsets = [9, 0], sizes = [1, 128], strides = [1, 1]} : vector<32x128xf32> to vector<1x128xf32>
    %252 = tpu.concatenate %250, %251 in 0 : vector<1x128xf32>, vector<1x128xf32> -> vector<2x128xf32>
    %c0_82 = arith.constant 0 : index
    %c0_83 = arith.constant 0 : index
    %253 = vector.load %arg4[%c0_82, %c0_83] : memref<32x128xf32, #tpu.memory_space<vmem>>, vector<32x128xf32>
    %cst_84 = arith.constant dense<0.000000e+00> : vector<2x128xf32>
    %254 = tpu.matmul %248, %253, %cst_84 {dimension_numbers = #tpu.dot_dimension_numbers<[1], [0], [0], [1], [0, 0, 1, 1], [], []>} : vector<2x32xf32>, vector<32x128xf32>, vector<2x128xf32> -> vector<2x128xf32>
    %255 = arith.addf %252, %254 : vector<2x128xf32>
    %256 = vector.extract_strided_slice %255 {offsets = [0, 0], sizes = [2, 96], strides = [1, 1]} : vector<2x128xf32> to vector<2x96xf32>
    %cst_85 = arith.constant 5.000000e-01 : f32
    %257 = vector.broadcast %cst_85 : f32 to vector<2x96xf32>
    %258 = arith.mulf %257, %256 : vector<2x96xf32>
    %259 = math.tanh %258 : vector<2x96xf32>
    %cst_86 = arith.constant 5.000000e-01 : f32
    %260 = vector.broadcast %cst_86 : f32 to vector<2x96xf32>
    %261 = arith.mulf %260, %259 : vector<2x96xf32>
    %cst_87 = arith.constant 5.000000e-01 : f32
    %262 = vector.broadcast %cst_87 : f32 to vector<2x96xf32>
    %263 = arith.addf %261, %262 : vector<2x96xf32>
    %264 = vector.extract_strided_slice %255 {offsets = [0, 96], sizes = [2, 32], strides = [1, 1]} : vector<2x128xf32> to vector<2x32xf32>
    %265 = math.tanh %264 : vector<2x32xf32>
    %266 = vector.extract_strided_slice %263 {offsets = [0, 32], sizes = [2, 32], strides = [1, 1]} : vector<2x96xf32> to vector<2x32xf32>
    %267 = arith.mulf %266, %245 : vector<2x32xf32>
    %268 = vector.extract_strided_slice %263 {offsets = [0, 0], sizes = [2, 32], strides = [1, 1]} : vector<2x96xf32> to vector<2x32xf32>
    %269 = arith.mulf %268, %265 : vector<2x32xf32>
    %270 = arith.addf %267, %269 : vector<2x32xf32>
    %271 = vector.extract_strided_slice %263 {offsets = [0, 64], sizes = [2, 32], strides = [1, 1]} : vector<2x96xf32> to vector<2x32xf32>
    %272 = math.tanh %270 : vector<2x32xf32>
    %273 = arith.mulf %271, %272 : vector<2x32xf32>
    %c18 = arith.constant 18 : index
    %c0_88 = arith.constant 0 : index
    %274 = vector.load %arg12[%c18, %c0_88] : memref<64x32xf32, #tpu.memory_space<vmem>>, vector<2x32xf32>
    tpu.vector_store %arg12[%c18, %c0_88], %273 {strides = array<i32>} : memref<64x32xf32, #tpu.memory_space<vmem>>, vector<2x32xf32>,
    %275 = vector.extract_strided_slice %16 {offsets = [10, 0], sizes = [1, 128], strides = [1, 1]} : vector<32x128xf32> to vector<1x128xf32>
    %276 = vector.extract_strided_slice %22 {offsets = [10, 0], sizes = [1, 128], strides = [1, 1]} : vector<32x128xf32> to vector<1x128xf32>
    %277 = tpu.concatenate %275, %276 in 0 : vector<1x128xf32>, vector<1x128xf32> -> vector<2x128xf32>
    %c0_89 = arith.constant 0 : index
    %c0_90 = arith.constant 0 : index
    %278 = vector.load %arg4[%c0_89, %c0_90] : memref<32x128xf32, #tpu.memory_space<vmem>>, vector<32x128xf32>
    %cst_91 = arith.constant dense<0.000000e+00> : vector<2x128xf32>
    %279 = tpu.matmul %273, %278, %cst_91 {dimension_numbers = #tpu.dot_dimension_numbers<[1], [0], [0], [1], [0, 0, 1, 1], [], []>} : vector<2x32xf32>, vector<32x128xf32>, vector<2x128xf32> -> vector<2x128xf32>
    %280 = arith.addf %277, %279 : vector<2x128xf32>
    %281 = vector.extract_strided_slice %280 {offsets = [0, 0], sizes = [2, 96], strides = [1, 1]} : vector<2x128xf32> to vector<2x96xf32>
    %cst_92 = arith.constant 5.000000e-01 : f32
    %282 = vector.broadcast %cst_92 : f32 to vector<2x96xf32>
    %283 = arith.mulf %282, %281 : vector<2x96xf32>
    %284 = math.tanh %283 : vector<2x96xf32>
    %cst_93 = arith.constant 5.000000e-01 : f32
    %285 = vector.broadcast %cst_93 : f32 to vector<2x96xf32>
    %286 = arith.mulf %285, %284 : vector<2x96xf32>
    %cst_94 = arith.constant 5.000000e-01 : f32
    %287 = vector.broadcast %cst_94 : f32 to vector<2x96xf32>
    %288 = arith.addf %286, %287 : vector<2x96xf32>
    %289 = vector.extract_strided_slice %280 {offsets = [0, 96], sizes = [2, 32], strides = [1, 1]} : vector<2x128xf32> to vector<2x32xf32>
    %290 = math.tanh %289 : vector<2x32xf32>
    %291 = vector.extract_strided_slice %288 {offsets = [0, 32], sizes = [2, 32], strides = [1, 1]} : vector<2x96xf32> to vector<2x32xf32>
    %292 = arith.mulf %291, %270 : vector<2x32xf32>
    %293 = vector.extract_strided_slice %288 {offsets = [0, 0], sizes = [2, 32], strides = [1, 1]} : vector<2x96xf32> to vector<2x32xf32>
    %294 = arith.mulf %293, %290 : vector<2x32xf32>
    %295 = arith.addf %292, %294 : vector<2x32xf32>
    %296 = vector.extract_strided_slice %288 {offsets = [0, 64], sizes = [2, 32], strides = [1, 1]} : vector<2x96xf32> to vector<2x32xf32>
    %297 = math.tanh %295 : vector<2x32xf32>
    %298 = arith.mulf %296, %297 : vector<2x32xf32>
    %c20 = arith.constant 20 : index
    %c0_95 = arith.constant 0 : index
    %299 = vector.load %arg12[%c20, %c0_95] : memref<64x32xf32, #tpu.memory_space<vmem>>, vector<2x32xf32>
    tpu.vector_store %arg12[%c20, %c0_95], %298 {strides = array<i32>} : memref<64x32xf32, #tpu.memory_space<vmem>>, vector<2x32xf32>,
    %300 = vector.extract_strided_slice %16 {offsets = [11, 0], sizes = [1, 128], strides = [1, 1]} : vector<32x128xf32> to vector<1x128xf32>
    %301 = vector.extract_strided_slice %22 {offsets = [11, 0], sizes = [1, 128], strides = [1, 1]} : vector<32x128xf32> to vector<1x128xf32>
    %302 = tpu.concatenate %300, %301 in 0 : vector<1x128xf32>, vector<1x128xf32> -> vector<2x128xf32>
    %c0_96 = arith.constant 0 : index
    %c0_97 = arith.constant 0 : index
    %303 = vector.load %arg4[%c0_96, %c0_97] : memref<32x128xf32, #tpu.memory_space<vmem>>, vector<32x128xf32>
    %cst_98 = arith.constant dense<0.000000e+00> : vector<2x128xf32>
    %304 = tpu.matmul %298, %303, %cst_98 {dimension_numbers = #tpu.dot_dimension_numbers<[1], [0], [0], [1], [0, 0, 1, 1], [], []>} : vector<2x32xf32>, vector<32x128xf32>, vector<2x128xf32> -> vector<2x128xf32>
    %305 = arith.addf %302, %304 : vector<2x128xf32>
    %306 = vector.extract_strided_slice %305 {offsets = [0, 0], sizes = [2, 96], strides = [1, 1]} : vector<2x128xf32> to vector<2x96xf32>
    %cst_99 = arith.constant 5.000000e-01 : f32
    %307 = vector.broadcast %cst_99 : f32 to vector<2x96xf32>
    %308 = arith.mulf %307, %306 : vector<2x96xf32>
    %309 = math.tanh %308 : vector<2x96xf32>
    %cst_100 = arith.constant 5.000000e-01 : f32
    %310 = vector.broadcast %cst_100 : f32 to vector<2x96xf32>
    %311 = arith.mulf %310, %309 : vector<2x96xf32>
    %cst_101 = arith.constant 5.000000e-01 : f32
    %312 = vector.broadcast %cst_101 : f32 to vector<2x96xf32>
    %313 = arith.addf %311, %312 : vector<2x96xf32>
    %314 = vector.extract_strided_slice %305 {offsets = [0, 96], sizes = [2, 32], strides = [1, 1]} : vector<2x128xf32> to vector<2x32xf32>
    %315 = math.tanh %314 : vector<2x32xf32>
    %316 = vector.extract_strided_slice %313 {offsets = [0, 32], sizes = [2, 32], strides = [1, 1]} : vector<2x96xf32> to vector<2x32xf32>
    %317 = arith.mulf %316, %295 : vector<2x32xf32>
    %318 = vector.extract_strided_slice %313 {offsets = [0, 0], sizes = [2, 32], strides = [1, 1]} : vector<2x96xf32> to vector<2x32xf32>
    %319 = arith.mulf %318, %315 : vector<2x32xf32>
    %320 = arith.addf %317, %319 : vector<2x32xf32>
    %321 = vector.extract_strided_slice %313 {offsets = [0, 64], sizes = [2, 32], strides = [1, 1]} : vector<2x96xf32> to vector<2x32xf32>
    %322 = math.tanh %320 : vector<2x32xf32>
    %323 = arith.mulf %321, %322 : vector<2x32xf32>
    %c22 = arith.constant 22 : index
    %c0_102 = arith.constant 0 : index
    %324 = vector.load %arg12[%c22, %c0_102] : memref<64x32xf32, #tpu.memory_space<vmem>>, vector<2x32xf32>
    tpu.vector_store %arg12[%c22, %c0_102], %323 {strides = array<i32>} : memref<64x32xf32, #tpu.memory_space<vmem>>, vector<2x32xf32>,
    %325 = vector.extract_strided_slice %16 {offsets = [12, 0], sizes = [1, 128], strides = [1, 1]} : vector<32x128xf32> to vector<1x128xf32>
    %326 = vector.extract_strided_slice %22 {offsets = [12, 0], sizes = [1, 128], strides = [1, 1]} : vector<32x128xf32> to vector<1x128xf32>
    %327 = tpu.concatenate %325, %326 in 0 : vector<1x128xf32>, vector<1x128xf32> -> vector<2x128xf32>
    %c0_103 = arith.constant 0 : index
    %c0_104 = arith.constant 0 : index
    %328 = vector.load %arg4[%c0_103, %c0_104] : memref<32x128xf32, #tpu.memory_space<vmem>>, vector<32x128xf32>
    %cst_105 = arith.constant dense<0.000000e+00> : vector<2x128xf32>
    %329 = tpu.matmul %323, %328, %cst_105 {dimension_numbers = #tpu.dot_dimension_numbers<[1], [0], [0], [1], [0, 0, 1, 1], [], []>} : vector<2x32xf32>, vector<32x128xf32>, vector<2x128xf32> -> vector<2x128xf32>
    %330 = arith.addf %327, %329 : vector<2x128xf32>
    %331 = vector.extract_strided_slice %330 {offsets = [0, 0], sizes = [2, 96], strides = [1, 1]} : vector<2x128xf32> to vector<2x96xf32>
    %cst_106 = arith.constant 5.000000e-01 : f32
    %332 = vector.broadcast %cst_106 : f32 to vector<2x96xf32>
    %333 = arith.mulf %332, %331 : vector<2x96xf32>
    %334 = math.tanh %333 : vector<2x96xf32>
    %cst_107 = arith.constant 5.000000e-01 : f32
    %335 = vector.broadcast %cst_107 : f32 to vector<2x96xf32>
    %336 = arith.mulf %335, %334 : vector<2x96xf32>
    %cst_108 = arith.constant 5.000000e-01 : f32
    %337 = vector.broadcast %cst_108 : f32 to vector<2x96xf32>
    %338 = arith.addf %336, %337 : vector<2x96xf32>
    %339 = vector.extract_strided_slice %330 {offsets = [0, 96], sizes = [2, 32], strides = [1, 1]} : vector<2x128xf32> to vector<2x32xf32>
    %340 = math.tanh %339 : vector<2x32xf32>
    %341 = vector.extract_strided_slice %338 {offsets = [0, 32], sizes = [2, 32], strides = [1, 1]} : vector<2x96xf32> to vector<2x32xf32>
    %342 = arith.mulf %341, %320 : vector<2x32xf32>
    %343 = vector.extract_strided_slice %338 {offsets = [0, 0], sizes = [2, 32], strides = [1, 1]} : vector<2x96xf32> to vector<2x32xf32>
    %344 = arith.mulf %343, %340 : vector<2x32xf32>
    %345 = arith.addf %342, %344 : vector<2x32xf32>
    %346 = vector.extract_strided_slice %338 {offsets = [0, 64], sizes = [2, 32], strides = [1, 1]} : vector<2x96xf32> to vector<2x32xf32>
    %347 = math.tanh %345 : vector<2x32xf32>
    %348 = arith.mulf %346, %347 : vector<2x32xf32>
    %c24 = arith.constant 24 : index
    %c0_109 = arith.constant 0 : index
    %349 = vector.load %arg12[%c24, %c0_109] : memref<64x32xf32, #tpu.memory_space<vmem>>, vector<2x32xf32>
    tpu.vector_store %arg12[%c24, %c0_109], %348 {strides = array<i32>} : memref<64x32xf32, #tpu.memory_space<vmem>>, vector<2x32xf32>,
    %350 = vector.extract_strided_slice %16 {offsets = [13, 0], sizes = [1, 128], strides = [1, 1]} : vector<32x128xf32> to vector<1x128xf32>
    %351 = vector.extract_strided_slice %22 {offsets = [13, 0], sizes = [1, 128], strides = [1, 1]} : vector<32x128xf32> to vector<1x128xf32>
    %352 = tpu.concatenate %350, %351 in 0 : vector<1x128xf32>, vector<1x128xf32> -> vector<2x128xf32>
    %c0_110 = arith.constant 0 : index
    %c0_111 = arith.constant 0 : index
    %353 = vector.load %arg4[%c0_110, %c0_111] : memref<32x128xf32, #tpu.memory_space<vmem>>, vector<32x128xf32>
    %cst_112 = arith.constant dense<0.000000e+00> : vector<2x128xf32>
    %354 = tpu.matmul %348, %353, %cst_112 {dimension_numbers = #tpu.dot_dimension_numbers<[1], [0], [0], [1], [0, 0, 1, 1], [], []>} : vector<2x32xf32>, vector<32x128xf32>, vector<2x128xf32> -> vector<2x128xf32>
    %355 = arith.addf %352, %354 : vector<2x128xf32>
    %356 = vector.extract_strided_slice %355 {offsets = [0, 0], sizes = [2, 96], strides = [1, 1]} : vector<2x128xf32> to vector<2x96xf32>
    %cst_113 = arith.constant 5.000000e-01 : f32
    %357 = vector.broadcast %cst_113 : f32 to vector<2x96xf32>
    %358 = arith.mulf %357, %356 : vector<2x96xf32>
    %359 = math.tanh %358 : vector<2x96xf32>
    %cst_114 = arith.constant 5.000000e-01 : f32
    %360 = vector.broadcast %cst_114 : f32 to vector<2x96xf32>
    %361 = arith.mulf %360, %359 : vector<2x96xf32>
    %cst_115 = arith.constant 5.000000e-01 : f32
    %362 = vector.broadcast %cst_115 : f32 to vector<2x96xf32>
    %363 = arith.addf %361, %362 : vector<2x96xf32>
    %364 = vector.extract_strided_slice %355 {offsets = [0, 96], sizes = [2, 32], strides = [1, 1]} : vector<2x128xf32> to vector<2x32xf32>
    %365 = math.tanh %364 : vector<2x32xf32>
    %366 = vector.extract_strided_slice %363 {offsets = [0, 32], sizes = [2, 32], strides = [1, 1]} : vector<2x96xf32> to vector<2x32xf32>
    %367 = arith.mulf %366, %345 : vector<2x32xf32>
    %368 = vector.extract_strided_slice %363 {offsets = [0, 0], sizes = [2, 32], strides = [1, 1]} : vector<2x96xf32> to vector<2x32xf32>
    %369 = arith.mulf %368, %365 : vector<2x32xf32>
    %370 = arith.addf %367, %369 : vector<2x32xf32>
    %371 = vector.extract_strided_slice %363 {offsets = [0, 64], sizes = [2, 32], strides = [1, 1]} : vector<2x96xf32> to vector<2x32xf32>
    %372 = math.tanh %370 : vector<2x32xf32>
    %373 = arith.mulf %371, %372 : vector<2x32xf32>
    %c26 = arith.constant 26 : index
    %c0_116 = arith.constant 0 : index
    %374 = vector.load %arg12[%c26, %c0_116] : memref<64x32xf32, #tpu.memory_space<vmem>>, vector<2x32xf32>
    tpu.vector_store %arg12[%c26, %c0_116], %373 {strides = array<i32>} : memref<64x32xf32, #tpu.memory_space<vmem>>, vector<2x32xf32>,
    %375 = vector.extract_strided_slice %16 {offsets = [14, 0], sizes = [1, 128], strides = [1, 1]} : vector<32x128xf32> to vector<1x128xf32>
    %376 = vector.extract_strided_slice %22 {offsets = [14, 0], sizes = [1, 128], strides = [1, 1]} : vector<32x128xf32> to vector<1x128xf32>
    %377 = tpu.concatenate %375, %376 in 0 : vector<1x128xf32>, vector<1x128xf32> -> vector<2x128xf32>
    %c0_117 = arith.constant 0 : index
    %c0_118 = arith.constant 0 : index
    %378 = vector.load %arg4[%c0_117, %c0_118] : memref<32x128xf32, #tpu.memory_space<vmem>>, vector<32x128xf32>
    %cst_119 = arith.constant dense<0.000000e+00> : vector<2x128xf32>
    %379 = tpu.matmul %373, %378, %cst_119 {dimension_numbers = #tpu.dot_dimension_numbers<[1], [0], [0], [1], [0, 0, 1, 1], [], []>} : vector<2x32xf32>, vector<32x128xf32>, vector<2x128xf32> -> vector<2x128xf32>
    %380 = arith.addf %377, %379 : vector<2x128xf32>
    %381 = vector.extract_strided_slice %380 {offsets = [0, 0], sizes = [2, 96], strides = [1, 1]} : vector<2x128xf32> to vector<2x96xf32>
    %cst_120 = arith.constant 5.000000e-01 : f32
    %382 = vector.broadcast %cst_120 : f32 to vector<2x96xf32>
    %383 = arith.mulf %382, %381 : vector<2x96xf32>
    %384 = math.tanh %383 : vector<2x96xf32>
    %cst_121 = arith.constant 5.000000e-01 : f32
    %385 = vector.broadcast %cst_121 : f32 to vector<2x96xf32>
    %386 = arith.mulf %385, %384 : vector<2x96xf32>
    %cst_122 = arith.constant 5.000000e-01 : f32
    %387 = vector.broadcast %cst_122 : f32 to vector<2x96xf32>
    %388 = arith.addf %386, %387 : vector<2x96xf32>
    %389 = vector.extract_strided_slice %380 {offsets = [0, 96], sizes = [2, 32], strides = [1, 1]} : vector<2x128xf32> to vector<2x32xf32>
    %390 = math.tanh %389 : vector<2x32xf32>
    %391 = vector.extract_strided_slice %388 {offsets = [0, 32], sizes = [2, 32], strides = [1, 1]} : vector<2x96xf32> to vector<2x32xf32>
    %392 = arith.mulf %391, %370 : vector<2x32xf32>
    %393 = vector.extract_strided_slice %388 {offsets = [0, 0], sizes = [2, 32], strides = [1, 1]} : vector<2x96xf32> to vector<2x32xf32>
    %394 = arith.mulf %393, %390 : vector<2x32xf32>
    %395 = arith.addf %392, %394 : vector<2x32xf32>
    %396 = vector.extract_strided_slice %388 {offsets = [0, 64], sizes = [2, 32], strides = [1, 1]} : vector<2x96xf32> to vector<2x32xf32>
    %397 = math.tanh %395 : vector<2x32xf32>
    %398 = arith.mulf %396, %397 : vector<2x32xf32>
    %c28 = arith.constant 28 : index
    %c0_123 = arith.constant 0 : index
    %399 = vector.load %arg12[%c28, %c0_123] : memref<64x32xf32, #tpu.memory_space<vmem>>, vector<2x32xf32>
    tpu.vector_store %arg12[%c28, %c0_123], %398 {strides = array<i32>} : memref<64x32xf32, #tpu.memory_space<vmem>>, vector<2x32xf32>,
    %400 = vector.extract_strided_slice %16 {offsets = [15, 0], sizes = [1, 128], strides = [1, 1]} : vector<32x128xf32> to vector<1x128xf32>
    %401 = vector.extract_strided_slice %22 {offsets = [15, 0], sizes = [1, 128], strides = [1, 1]} : vector<32x128xf32> to vector<1x128xf32>
    %402 = tpu.concatenate %400, %401 in 0 : vector<1x128xf32>, vector<1x128xf32> -> vector<2x128xf32>
    %c0_124 = arith.constant 0 : index
    %c0_125 = arith.constant 0 : index
    %403 = vector.load %arg4[%c0_124, %c0_125] : memref<32x128xf32, #tpu.memory_space<vmem>>, vector<32x128xf32>
    %cst_126 = arith.constant dense<0.000000e+00> : vector<2x128xf32>
    %404 = tpu.matmul %398, %403, %cst_126 {dimension_numbers = #tpu.dot_dimension_numbers<[1], [0], [0], [1], [0, 0, 1, 1], [], []>} : vector<2x32xf32>, vector<32x128xf32>, vector<2x128xf32> -> vector<2x128xf32>
    %405 = arith.addf %402, %404 : vector<2x128xf32>
    %406 = vector.extract_strided_slice %405 {offsets = [0, 0], sizes = [2, 96], strides = [1, 1]} : vector<2x128xf32> to vector<2x96xf32>
    %cst_127 = arith.constant 5.000000e-01 : f32
    %407 = vector.broadcast %cst_127 : f32 to vector<2x96xf32>
    %408 = arith.mulf %407, %406 : vector<2x96xf32>
    %409 = math.tanh %408 : vector<2x96xf32>
    %cst_128 = arith.constant 5.000000e-01 : f32
    %410 = vector.broadcast %cst_128 : f32 to vector<2x96xf32>
    %411 = arith.mulf %410, %409 : vector<2x96xf32>
    %cst_129 = arith.constant 5.000000e-01 : f32
    %412 = vector.broadcast %cst_129 : f32 to vector<2x96xf32>
    %413 = arith.addf %411, %412 : vector<2x96xf32>
    %414 = vector.extract_strided_slice %405 {offsets = [0, 96], sizes = [2, 32], strides = [1, 1]} : vector<2x128xf32> to vector<2x32xf32>
    %415 = math.tanh %414 : vector<2x32xf32>
    %416 = vector.extract_strided_slice %413 {offsets = [0, 32], sizes = [2, 32], strides = [1, 1]} : vector<2x96xf32> to vector<2x32xf32>
    %417 = arith.mulf %416, %395 : vector<2x32xf32>
    %418 = vector.extract_strided_slice %413 {offsets = [0, 0], sizes = [2, 32], strides = [1, 1]} : vector<2x96xf32> to vector<2x32xf32>
    %419 = arith.mulf %418, %415 : vector<2x32xf32>
    %420 = arith.addf %417, %419 : vector<2x32xf32>
    %421 = vector.extract_strided_slice %413 {offsets = [0, 64], sizes = [2, 32], strides = [1, 1]} : vector<2x96xf32> to vector<2x32xf32>
    %422 = math.tanh %420 : vector<2x32xf32>
    %423 = arith.mulf %421, %422 : vector<2x32xf32>
    %c30 = arith.constant 30 : index
    %c0_130 = arith.constant 0 : index
    %424 = vector.load %arg12[%c30, %c0_130] : memref<64x32xf32, #tpu.memory_space<vmem>>, vector<2x32xf32>
    tpu.vector_store %arg12[%c30, %c0_130], %423 {strides = array<i32>} : memref<64x32xf32, #tpu.memory_space<vmem>>, vector<2x32xf32>,
    %425 = vector.extract_strided_slice %16 {offsets = [16, 0], sizes = [1, 128], strides = [1, 1]} : vector<32x128xf32> to vector<1x128xf32>
    %426 = vector.extract_strided_slice %22 {offsets = [16, 0], sizes = [1, 128], strides = [1, 1]} : vector<32x128xf32> to vector<1x128xf32>
    %427 = tpu.concatenate %425, %426 in 0 : vector<1x128xf32>, vector<1x128xf32> -> vector<2x128xf32>
    %c0_131 = arith.constant 0 : index
    %c0_132 = arith.constant 0 : index
    %428 = vector.load %arg4[%c0_131, %c0_132] : memref<32x128xf32, #tpu.memory_space<vmem>>, vector<32x128xf32>
    %cst_133 = arith.constant dense<0.000000e+00> : vector<2x128xf32>
    %429 = tpu.matmul %423, %428, %cst_133 {dimension_numbers = #tpu.dot_dimension_numbers<[1], [0], [0], [1], [0, 0, 1, 1], [], []>} : vector<2x32xf32>, vector<32x128xf32>, vector<2x128xf32> -> vector<2x128xf32>
    %430 = arith.addf %427, %429 : vector<2x128xf32>
    %431 = vector.extract_strided_slice %430 {offsets = [0, 0], sizes = [2, 96], strides = [1, 1]} : vector<2x128xf32> to vector<2x96xf32>
    %cst_134 = arith.constant 5.000000e-01 : f32
    %432 = vector.broadcast %cst_134 : f32 to vector<2x96xf32>
    %433 = arith.mulf %432, %431 : vector<2x96xf32>
    %434 = math.tanh %433 : vector<2x96xf32>
    %cst_135 = arith.constant 5.000000e-01 : f32
    %435 = vector.broadcast %cst_135 : f32 to vector<2x96xf32>
    %436 = arith.mulf %435, %434 : vector<2x96xf32>
    %cst_136 = arith.constant 5.000000e-01 : f32
    %437 = vector.broadcast %cst_136 : f32 to vector<2x96xf32>
    %438 = arith.addf %436, %437 : vector<2x96xf32>
    %439 = vector.extract_strided_slice %430 {offsets = [0, 96], sizes = [2, 32], strides = [1, 1]} : vector<2x128xf32> to vector<2x32xf32>
    %440 = math.tanh %439 : vector<2x32xf32>
    %441 = vector.extract_strided_slice %438 {offsets = [0, 32], sizes = [2, 32], strides = [1, 1]} : vector<2x96xf32> to vector<2x32xf32>
    %442 = arith.mulf %441, %420 : vector<2x32xf32>
    %443 = vector.extract_strided_slice %438 {offsets = [0, 0], sizes = [2, 32], strides = [1, 1]} : vector<2x96xf32> to vector<2x32xf32>
    %444 = arith.mulf %443, %440 : vector<2x32xf32>
    %445 = arith.addf %442, %444 : vector<2x32xf32>
    %446 = vector.extract_strided_slice %438 {offsets = [0, 64], sizes = [2, 32], strides = [1, 1]} : vector<2x96xf32> to vector<2x32xf32>
    %447 = math.tanh %445 : vector<2x32xf32>
    %448 = arith.mulf %446, %447 : vector<2x32xf32>
    %c32 = arith.constant 32 : index
    %c0_137 = arith.constant 0 : index
    %449 = vector.load %arg12[%c32, %c0_137] : memref<64x32xf32, #tpu.memory_space<vmem>>, vector<2x32xf32>
    tpu.vector_store %arg12[%c32, %c0_137], %448 {strides = array<i32>} : memref<64x32xf32, #tpu.memory_space<vmem>>, vector<2x32xf32>,
    %450 = vector.extract_strided_slice %16 {offsets = [17, 0], sizes = [1, 128], strides = [1, 1]} : vector<32x128xf32> to vector<1x128xf32>
    %451 = vector.extract_strided_slice %22 {offsets = [17, 0], sizes = [1, 128], strides = [1, 1]} : vector<32x128xf32> to vector<1x128xf32>
    %452 = tpu.concatenate %450, %451 in 0 : vector<1x128xf32>, vector<1x128xf32> -> vector<2x128xf32>
    %c0_138 = arith.constant 0 : index
    %c0_139 = arith.constant 0 : index
    %453 = vector.load %arg4[%c0_138, %c0_139] : memref<32x128xf32, #tpu.memory_space<vmem>>, vector<32x128xf32>
    %cst_140 = arith.constant dense<0.000000e+00> : vector<2x128xf32>
    %454 = tpu.matmul %448, %453, %cst_140 {dimension_numbers = #tpu.dot_dimension_numbers<[1], [0], [0], [1], [0, 0, 1, 1], [], []>} : vector<2x32xf32>, vector<32x128xf32>, vector<2x128xf32> -> vector<2x128xf32>
    %455 = arith.addf %452, %454 : vector<2x128xf32>
    %456 = vector.extract_strided_slice %455 {offsets = [0, 0], sizes = [2, 96], strides = [1, 1]} : vector<2x128xf32> to vector<2x96xf32>
    %cst_141 = arith.constant 5.000000e-01 : f32
    %457 = vector.broadcast %cst_141 : f32 to vector<2x96xf32>
    %458 = arith.mulf %457, %456 : vector<2x96xf32>
    %459 = math.tanh %458 : vector<2x96xf32>
    %cst_142 = arith.constant 5.000000e-01 : f32
    %460 = vector.broadcast %cst_142 : f32 to vector<2x96xf32>
    %461 = arith.mulf %460, %459 : vector<2x96xf32>
    %cst_143 = arith.constant 5.000000e-01 : f32
    %462 = vector.broadcast %cst_143 : f32 to vector<2x96xf32>
    %463 = arith.addf %461, %462 : vector<2x96xf32>
    %464 = vector.extract_strided_slice %455 {offsets = [0, 96], sizes = [2, 32], strides = [1, 1]} : vector<2x128xf32> to vector<2x32xf32>
    %465 = math.tanh %464 : vector<2x32xf32>
    %466 = vector.extract_strided_slice %463 {offsets = [0, 32], sizes = [2, 32], strides = [1, 1]} : vector<2x96xf32> to vector<2x32xf32>
    %467 = arith.mulf %466, %445 : vector<2x32xf32>
    %468 = vector.extract_strided_slice %463 {offsets = [0, 0], sizes = [2, 32], strides = [1, 1]} : vector<2x96xf32> to vector<2x32xf32>
    %469 = arith.mulf %468, %465 : vector<2x32xf32>
    %470 = arith.addf %467, %469 : vector<2x32xf32>
    %471 = vector.extract_strided_slice %463 {offsets = [0, 64], sizes = [2, 32], strides = [1, 1]} : vector<2x96xf32> to vector<2x32xf32>
    %472 = math.tanh %470 : vector<2x32xf32>
    %473 = arith.mulf %471, %472 : vector<2x32xf32>
    %c34 = arith.constant 34 : index
    %c0_144 = arith.constant 0 : index
    %474 = vector.load %arg12[%c34, %c0_144] : memref<64x32xf32, #tpu.memory_space<vmem>>, vector<2x32xf32>
    tpu.vector_store %arg12[%c34, %c0_144], %473 {strides = array<i32>} : memref<64x32xf32, #tpu.memory_space<vmem>>, vector<2x32xf32>,
    %475 = vector.extract_strided_slice %16 {offsets = [18, 0], sizes = [1, 128], strides = [1, 1]} : vector<32x128xf32> to vector<1x128xf32>
    %476 = vector.extract_strided_slice %22 {offsets = [18, 0], sizes = [1, 128], strides = [1, 1]} : vector<32x128xf32> to vector<1x128xf32>
    %477 = tpu.concatenate %475, %476 in 0 : vector<1x128xf32>, vector<1x128xf32> -> vector<2x128xf32>
    %c0_145 = arith.constant 0 : index
    %c0_146 = arith.constant 0 : index
    %478 = vector.load %arg4[%c0_145, %c0_146] : memref<32x128xf32, #tpu.memory_space<vmem>>, vector<32x128xf32>
    %cst_147 = arith.constant dense<0.000000e+00> : vector<2x128xf32>
    %479 = tpu.matmul %473, %478, %cst_147 {dimension_numbers = #tpu.dot_dimension_numbers<[1], [0], [0], [1], [0, 0, 1, 1], [], []>} : vector<2x32xf32>, vector<32x128xf32>, vector<2x128xf32> -> vector<2x128xf32>
    %480 = arith.addf %477, %479 : vector<2x128xf32>
    %481 = vector.extract_strided_slice %480 {offsets = [0, 0], sizes = [2, 96], strides = [1, 1]} : vector<2x128xf32> to vector<2x96xf32>
    %cst_148 = arith.constant 5.000000e-01 : f32
    %482 = vector.broadcast %cst_148 : f32 to vector<2x96xf32>
    %483 = arith.mulf %482, %481 : vector<2x96xf32>
    %484 = math.tanh %483 : vector<2x96xf32>
    %cst_149 = arith.constant 5.000000e-01 : f32
    %485 = vector.broadcast %cst_149 : f32 to vector<2x96xf32>
    %486 = arith.mulf %485, %484 : vector<2x96xf32>
    %cst_150 = arith.constant 5.000000e-01 : f32
    %487 = vector.broadcast %cst_150 : f32 to vector<2x96xf32>
    %488 = arith.addf %486, %487 : vector<2x96xf32>
    %489 = vector.extract_strided_slice %480 {offsets = [0, 96], sizes = [2, 32], strides = [1, 1]} : vector<2x128xf32> to vector<2x32xf32>
    %490 = math.tanh %489 : vector<2x32xf32>
    %491 = vector.extract_strided_slice %488 {offsets = [0, 32], sizes = [2, 32], strides = [1, 1]} : vector<2x96xf32> to vector<2x32xf32>
    %492 = arith.mulf %491, %470 : vector<2x32xf32>
    %493 = vector.extract_strided_slice %488 {offsets = [0, 0], sizes = [2, 32], strides = [1, 1]} : vector<2x96xf32> to vector<2x32xf32>
    %494 = arith.mulf %493, %490 : vector<2x32xf32>
    %495 = arith.addf %492, %494 : vector<2x32xf32>
    %496 = vector.extract_strided_slice %488 {offsets = [0, 64], sizes = [2, 32], strides = [1, 1]} : vector<2x96xf32> to vector<2x32xf32>
    %497 = math.tanh %495 : vector<2x32xf32>
    %498 = arith.mulf %496, %497 : vector<2x32xf32>
    %c36 = arith.constant 36 : index
    %c0_151 = arith.constant 0 : index
    %499 = vector.load %arg12[%c36, %c0_151] : memref<64x32xf32, #tpu.memory_space<vmem>>, vector<2x32xf32>
    tpu.vector_store %arg12[%c36, %c0_151], %498 {strides = array<i32>} : memref<64x32xf32, #tpu.memory_space<vmem>>, vector<2x32xf32>,
    %500 = vector.extract_strided_slice %16 {offsets = [19, 0], sizes = [1, 128], strides = [1, 1]} : vector<32x128xf32> to vector<1x128xf32>
    %501 = vector.extract_strided_slice %22 {offsets = [19, 0], sizes = [1, 128], strides = [1, 1]} : vector<32x128xf32> to vector<1x128xf32>
    %502 = tpu.concatenate %500, %501 in 0 : vector<1x128xf32>, vector<1x128xf32> -> vector<2x128xf32>
    %c0_152 = arith.constant 0 : index
    %c0_153 = arith.constant 0 : index
    %503 = vector.load %arg4[%c0_152, %c0_153] : memref<32x128xf32, #tpu.memory_space<vmem>>, vector<32x128xf32>
    %cst_154 = arith.constant dense<0.000000e+00> : vector<2x128xf32>
    %504 = tpu.matmul %498, %503, %cst_154 {dimension_numbers = #tpu.dot_dimension_numbers<[1], [0], [0], [1], [0, 0, 1, 1], [], []>} : vector<2x32xf32>, vector<32x128xf32>, vector<2x128xf32> -> vector<2x128xf32>
    %505 = arith.addf %502, %504 : vector<2x128xf32>
    %506 = vector.extract_strided_slice %505 {offsets = [0, 0], sizes = [2, 96], strides = [1, 1]} : vector<2x128xf32> to vector<2x96xf32>
    %cst_155 = arith.constant 5.000000e-01 : f32
    %507 = vector.broadcast %cst_155 : f32 to vector<2x96xf32>
    %508 = arith.mulf %507, %506 : vector<2x96xf32>
    %509 = math.tanh %508 : vector<2x96xf32>
    %cst_156 = arith.constant 5.000000e-01 : f32
    %510 = vector.broadcast %cst_156 : f32 to vector<2x96xf32>
    %511 = arith.mulf %510, %509 : vector<2x96xf32>
    %cst_157 = arith.constant 5.000000e-01 : f32
    %512 = vector.broadcast %cst_157 : f32 to vector<2x96xf32>
    %513 = arith.addf %511, %512 : vector<2x96xf32>
    %514 = vector.extract_strided_slice %505 {offsets = [0, 96], sizes = [2, 32], strides = [1, 1]} : vector<2x128xf32> to vector<2x32xf32>
    %515 = math.tanh %514 : vector<2x32xf32>
    %516 = vector.extract_strided_slice %513 {offsets = [0, 32], sizes = [2, 32], strides = [1, 1]} : vector<2x96xf32> to vector<2x32xf32>
    %517 = arith.mulf %516, %495 : vector<2x32xf32>
    %518 = vector.extract_strided_slice %513 {offsets = [0, 0], sizes = [2, 32], strides = [1, 1]} : vector<2x96xf32> to vector<2x32xf32>
    %519 = arith.mulf %518, %515 : vector<2x32xf32>
    %520 = arith.addf %517, %519 : vector<2x32xf32>
    %521 = vector.extract_strided_slice %513 {offsets = [0, 64], sizes = [2, 32], strides = [1, 1]} : vector<2x96xf32> to vector<2x32xf32>
    %522 = math.tanh %520 : vector<2x32xf32>
    %523 = arith.mulf %521, %522 : vector<2x32xf32>
    %c38 = arith.constant 38 : index
    %c0_158 = arith.constant 0 : index
    %524 = vector.load %arg12[%c38, %c0_158] : memref<64x32xf32, #tpu.memory_space<vmem>>, vector<2x32xf32>
    tpu.vector_store %arg12[%c38, %c0_158], %523 {strides = array<i32>} : memref<64x32xf32, #tpu.memory_space<vmem>>, vector<2x32xf32>,
    %525 = vector.extract_strided_slice %16 {offsets = [20, 0], sizes = [1, 128], strides = [1, 1]} : vector<32x128xf32> to vector<1x128xf32>
    %526 = vector.extract_strided_slice %22 {offsets = [20, 0], sizes = [1, 128], strides = [1, 1]} : vector<32x128xf32> to vector<1x128xf32>
    %527 = tpu.concatenate %525, %526 in 0 : vector<1x128xf32>, vector<1x128xf32> -> vector<2x128xf32>
    %c0_159 = arith.constant 0 : index
    %c0_160 = arith.constant 0 : index
    %528 = vector.load %arg4[%c0_159, %c0_160] : memref<32x128xf32, #tpu.memory_space<vmem>>, vector<32x128xf32>
    %cst_161 = arith.constant dense<0.000000e+00> : vector<2x128xf32>
    %529 = tpu.matmul %523, %528, %cst_161 {dimension_numbers = #tpu.dot_dimension_numbers<[1], [0], [0], [1], [0, 0, 1, 1], [], []>} : vector<2x32xf32>, vector<32x128xf32>, vector<2x128xf32> -> vector<2x128xf32>
    %530 = arith.addf %527, %529 : vector<2x128xf32>
    %531 = vector.extract_strided_slice %530 {offsets = [0, 0], sizes = [2, 96], strides = [1, 1]} : vector<2x128xf32> to vector<2x96xf32>
    %cst_162 = arith.constant 5.000000e-01 : f32
    %532 = vector.broadcast %cst_162 : f32 to vector<2x96xf32>
    %533 = arith.mulf %532, %531 : vector<2x96xf32>
    %534 = math.tanh %533 : vector<2x96xf32>
    %cst_163 = arith.constant 5.000000e-01 : f32
    %535 = vector.broadcast %cst_163 : f32 to vector<2x96xf32>
    %536 = arith.mulf %535, %534 : vector<2x96xf32>
    %cst_164 = arith.constant 5.000000e-01 : f32
    %537 = vector.broadcast %cst_164 : f32 to vector<2x96xf32>
    %538 = arith.addf %536, %537 : vector<2x96xf32>
    %539 = vector.extract_strided_slice %530 {offsets = [0, 96], sizes = [2, 32], strides = [1, 1]} : vector<2x128xf32> to vector<2x32xf32>
    %540 = math.tanh %539 : vector<2x32xf32>
    %541 = vector.extract_strided_slice %538 {offsets = [0, 32], sizes = [2, 32], strides = [1, 1]} : vector<2x96xf32> to vector<2x32xf32>
    %542 = arith.mulf %541, %520 : vector<2x32xf32>
    %543 = vector.extract_strided_slice %538 {offsets = [0, 0], sizes = [2, 32], strides = [1, 1]} : vector<2x96xf32> to vector<2x32xf32>
    %544 = arith.mulf %543, %540 : vector<2x32xf32>
    %545 = arith.addf %542, %544 : vector<2x32xf32>
    %546 = vector.extract_strided_slice %538 {offsets = [0, 64], sizes = [2, 32], strides = [1, 1]} : vector<2x96xf32> to vector<2x32xf32>
    %547 = math.tanh %545 : vector<2x32xf32>
    %548 = arith.mulf %546, %547 : vector<2x32xf32>
    %c40 = arith.constant 40 : index
    %c0_165 = arith.constant 0 : index
    %549 = vector.load %arg12[%c40, %c0_165] : memref<64x32xf32, #tpu.memory_space<vmem>>, vector<2x32xf32>
    tpu.vector_store %arg12[%c40, %c0_165], %548 {strides = array<i32>} : memref<64x32xf32, #tpu.memory_space<vmem>>, vector<2x32xf32>,
    %550 = vector.extract_strided_slice %16 {offsets = [21, 0], sizes = [1, 128], strides = [1, 1]} : vector<32x128xf32> to vector<1x128xf32>
    %551 = vector.extract_strided_slice %22 {offsets = [21, 0], sizes = [1, 128], strides = [1, 1]} : vector<32x128xf32> to vector<1x128xf32>
    %552 = tpu.concatenate %550, %551 in 0 : vector<1x128xf32>, vector<1x128xf32> -> vector<2x128xf32>
    %c0_166 = arith.constant 0 : index
    %c0_167 = arith.constant 0 : index
    %553 = vector.load %arg4[%c0_166, %c0_167] : memref<32x128xf32, #tpu.memory_space<vmem>>, vector<32x128xf32>
    %cst_168 = arith.constant dense<0.000000e+00> : vector<2x128xf32>
    %554 = tpu.matmul %548, %553, %cst_168 {dimension_numbers = #tpu.dot_dimension_numbers<[1], [0], [0], [1], [0, 0, 1, 1], [], []>} : vector<2x32xf32>, vector<32x128xf32>, vector<2x128xf32> -> vector<2x128xf32>
    %555 = arith.addf %552, %554 : vector<2x128xf32>
    %556 = vector.extract_strided_slice %555 {offsets = [0, 0], sizes = [2, 96], strides = [1, 1]} : vector<2x128xf32> to vector<2x96xf32>
    %cst_169 = arith.constant 5.000000e-01 : f32
    %557 = vector.broadcast %cst_169 : f32 to vector<2x96xf32>
    %558 = arith.mulf %557, %556 : vector<2x96xf32>
    %559 = math.tanh %558 : vector<2x96xf32>
    %cst_170 = arith.constant 5.000000e-01 : f32
    %560 = vector.broadcast %cst_170 : f32 to vector<2x96xf32>
    %561 = arith.mulf %560, %559 : vector<2x96xf32>
    %cst_171 = arith.constant 5.000000e-01 : f32
    %562 = vector.broadcast %cst_171 : f32 to vector<2x96xf32>
    %563 = arith.addf %561, %562 : vector<2x96xf32>
    %564 = vector.extract_strided_slice %555 {offsets = [0, 96], sizes = [2, 32], strides = [1, 1]} : vector<2x128xf32> to vector<2x32xf32>
    %565 = math.tanh %564 : vector<2x32xf32>
    %566 = vector.extract_strided_slice %563 {offsets = [0, 32], sizes = [2, 32], strides = [1, 1]} : vector<2x96xf32> to vector<2x32xf32>
    %567 = arith.mulf %566, %545 : vector<2x32xf32>
    %568 = vector.extract_strided_slice %563 {offsets = [0, 0], sizes = [2, 32], strides = [1, 1]} : vector<2x96xf32> to vector<2x32xf32>
    %569 = arith.mulf %568, %565 : vector<2x32xf32>
    %570 = arith.addf %567, %569 : vector<2x32xf32>
    %571 = vector.extract_strided_slice %563 {offsets = [0, 64], sizes = [2, 32], strides = [1, 1]} : vector<2x96xf32> to vector<2x32xf32>
    %572 = math.tanh %570 : vector<2x32xf32>
    %573 = arith.mulf %571, %572 : vector<2x32xf32>
    %c42 = arith.constant 42 : index
    %c0_172 = arith.constant 0 : index
    %574 = vector.load %arg12[%c42, %c0_172] : memref<64x32xf32, #tpu.memory_space<vmem>>, vector<2x32xf32>
    tpu.vector_store %arg12[%c42, %c0_172], %573 {strides = array<i32>} : memref<64x32xf32, #tpu.memory_space<vmem>>, vector<2x32xf32>,
    %575 = vector.extract_strided_slice %16 {offsets = [22, 0], sizes = [1, 128], strides = [1, 1]} : vector<32x128xf32> to vector<1x128xf32>
    %576 = vector.extract_strided_slice %22 {offsets = [22, 0], sizes = [1, 128], strides = [1, 1]} : vector<32x128xf32> to vector<1x128xf32>
    %577 = tpu.concatenate %575, %576 in 0 : vector<1x128xf32>, vector<1x128xf32> -> vector<2x128xf32>
    %c0_173 = arith.constant 0 : index
    %c0_174 = arith.constant 0 : index
    %578 = vector.load %arg4[%c0_173, %c0_174] : memref<32x128xf32, #tpu.memory_space<vmem>>, vector<32x128xf32>
    %cst_175 = arith.constant dense<0.000000e+00> : vector<2x128xf32>
    %579 = tpu.matmul %573, %578, %cst_175 {dimension_numbers = #tpu.dot_dimension_numbers<[1], [0], [0], [1], [0, 0, 1, 1], [], []>} : vector<2x32xf32>, vector<32x128xf32>, vector<2x128xf32> -> vector<2x128xf32>
    %580 = arith.addf %577, %579 : vector<2x128xf32>
    %581 = vector.extract_strided_slice %580 {offsets = [0, 0], sizes = [2, 96], strides = [1, 1]} : vector<2x128xf32> to vector<2x96xf32>
    %cst_176 = arith.constant 5.000000e-01 : f32
    %582 = vector.broadcast %cst_176 : f32 to vector<2x96xf32>
    %583 = arith.mulf %582, %581 : vector<2x96xf32>
    %584 = math.tanh %583 : vector<2x96xf32>
    %cst_177 = arith.constant 5.000000e-01 : f32
    %585 = vector.broadcast %cst_177 : f32 to vector<2x96xf32>
    %586 = arith.mulf %585, %584 : vector<2x96xf32>
    %cst_178 = arith.constant 5.000000e-01 : f32
    %587 = vector.broadcast %cst_178 : f32 to vector<2x96xf32>
    %588 = arith.addf %586, %587 : vector<2x96xf32>
    %589 = vector.extract_strided_slice %580 {offsets = [0, 96], sizes = [2, 32], strides = [1, 1]} : vector<2x128xf32> to vector<2x32xf32>
    %590 = math.tanh %589 : vector<2x32xf32>
    %591 = vector.extract_strided_slice %588 {offsets = [0, 32], sizes = [2, 32], strides = [1, 1]} : vector<2x96xf32> to vector<2x32xf32>
    %592 = arith.mulf %591, %570 : vector<2x32xf32>
    %593 = vector.extract_strided_slice %588 {offsets = [0, 0], sizes = [2, 32], strides = [1, 1]} : vector<2x96xf32> to vector<2x32xf32>
    %594 = arith.mulf %593, %590 : vector<2x32xf32>
    %595 = arith.addf %592, %594 : vector<2x32xf32>
    %596 = vector.extract_strided_slice %588 {offsets = [0, 64], sizes = [2, 32], strides = [1, 1]} : vector<2x96xf32> to vector<2x32xf32>
    %597 = math.tanh %595 : vector<2x32xf32>
    %598 = arith.mulf %596, %597 : vector<2x32xf32>
    %c44 = arith.constant 44 : index
    %c0_179 = arith.constant 0 : index
    %599 = vector.load %arg12[%c44, %c0_179] : memref<64x32xf32, #tpu.memory_space<vmem>>, vector<2x32xf32>
    tpu.vector_store %arg12[%c44, %c0_179], %598 {strides = array<i32>} : memref<64x32xf32, #tpu.memory_space<vmem>>, vector<2x32xf32>,
    %600 = vector.extract_strided_slice %16 {offsets = [23, 0], sizes = [1, 128], strides = [1, 1]} : vector<32x128xf32> to vector<1x128xf32>
    %601 = vector.extract_strided_slice %22 {offsets = [23, 0], sizes = [1, 128], strides = [1, 1]} : vector<32x128xf32> to vector<1x128xf32>
    %602 = tpu.concatenate %600, %601 in 0 : vector<1x128xf32>, vector<1x128xf32> -> vector<2x128xf32>
    %c0_180 = arith.constant 0 : index
    %c0_181 = arith.constant 0 : index
    %603 = vector.load %arg4[%c0_180, %c0_181] : memref<32x128xf32, #tpu.memory_space<vmem>>, vector<32x128xf32>
    %cst_182 = arith.constant dense<0.000000e+00> : vector<2x128xf32>
    %604 = tpu.matmul %598, %603, %cst_182 {dimension_numbers = #tpu.dot_dimension_numbers<[1], [0], [0], [1], [0, 0, 1, 1], [], []>} : vector<2x32xf32>, vector<32x128xf32>, vector<2x128xf32> -> vector<2x128xf32>
    %605 = arith.addf %602, %604 : vector<2x128xf32>
    %606 = vector.extract_strided_slice %605 {offsets = [0, 0], sizes = [2, 96], strides = [1, 1]} : vector<2x128xf32> to vector<2x96xf32>
    %cst_183 = arith.constant 5.000000e-01 : f32
    %607 = vector.broadcast %cst_183 : f32 to vector<2x96xf32>
    %608 = arith.mulf %607, %606 : vector<2x96xf32>
    %609 = math.tanh %608 : vector<2x96xf32>
    %cst_184 = arith.constant 5.000000e-01 : f32
    %610 = vector.broadcast %cst_184 : f32 to vector<2x96xf32>
    %611 = arith.mulf %610, %609 : vector<2x96xf32>
    %cst_185 = arith.constant 5.000000e-01 : f32
    %612 = vector.broadcast %cst_185 : f32 to vector<2x96xf32>
    %613 = arith.addf %611, %612 : vector<2x96xf32>
    %614 = vector.extract_strided_slice %605 {offsets = [0, 96], sizes = [2, 32], strides = [1, 1]} : vector<2x128xf32> to vector<2x32xf32>
    %615 = math.tanh %614 : vector<2x32xf32>
    %616 = vector.extract_strided_slice %613 {offsets = [0, 32], sizes = [2, 32], strides = [1, 1]} : vector<2x96xf32> to vector<2x32xf32>
    %617 = arith.mulf %616, %595 : vector<2x32xf32>
    %618 = vector.extract_strided_slice %613 {offsets = [0, 0], sizes = [2, 32], strides = [1, 1]} : vector<2x96xf32> to vector<2x32xf32>
    %619 = arith.mulf %618, %615 : vector<2x32xf32>
    %620 = arith.addf %617, %619 : vector<2x32xf32>
    %621 = vector.extract_strided_slice %613 {offsets = [0, 64], sizes = [2, 32], strides = [1, 1]} : vector<2x96xf32> to vector<2x32xf32>
    %622 = math.tanh %620 : vector<2x32xf32>
    %623 = arith.mulf %621, %622 : vector<2x32xf32>
    %c46 = arith.constant 46 : index
    %c0_186 = arith.constant 0 : index
    %624 = vector.load %arg12[%c46, %c0_186] : memref<64x32xf32, #tpu.memory_space<vmem>>, vector<2x32xf32>
    tpu.vector_store %arg12[%c46, %c0_186], %623 {strides = array<i32>} : memref<64x32xf32, #tpu.memory_space<vmem>>, vector<2x32xf32>,
    %625 = vector.extract_strided_slice %16 {offsets = [24, 0], sizes = [1, 128], strides = [1, 1]} : vector<32x128xf32> to vector<1x128xf32>
    %626 = vector.extract_strided_slice %22 {offsets = [24, 0], sizes = [1, 128], strides = [1, 1]} : vector<32x128xf32> to vector<1x128xf32>
    %627 = tpu.concatenate %625, %626 in 0 : vector<1x128xf32>, vector<1x128xf32> -> vector<2x128xf32>
    %c0_187 = arith.constant 0 : index
    %c0_188 = arith.constant 0 : index
    %628 = vector.load %arg4[%c0_187, %c0_188] : memref<32x128xf32, #tpu.memory_space<vmem>>, vector<32x128xf32>
    %cst_189 = arith.constant dense<0.000000e+00> : vector<2x128xf32>
    %629 = tpu.matmul %623, %628, %cst_189 {dimension_numbers = #tpu.dot_dimension_numbers<[1], [0], [0], [1], [0, 0, 1, 1], [], []>} : vector<2x32xf32>, vector<32x128xf32>, vector<2x128xf32> -> vector<2x128xf32>
    %630 = arith.addf %627, %629 : vector<2x128xf32>
    %631 = vector.extract_strided_slice %630 {offsets = [0, 0], sizes = [2, 96], strides = [1, 1]} : vector<2x128xf32> to vector<2x96xf32>
    %cst_190 = arith.constant 5.000000e-01 : f32
    %632 = vector.broadcast %cst_190 : f32 to vector<2x96xf32>
    %633 = arith.mulf %632, %631 : vector<2x96xf32>
    %634 = math.tanh %633 : vector<2x96xf32>
    %cst_191 = arith.constant 5.000000e-01 : f32
    %635 = vector.broadcast %cst_191 : f32 to vector<2x96xf32>
    %636 = arith.mulf %635, %634 : vector<2x96xf32>
    %cst_192 = arith.constant 5.000000e-01 : f32
    %637 = vector.broadcast %cst_192 : f32 to vector<2x96xf32>
    %638 = arith.addf %636, %637 : vector<2x96xf32>
    %639 = vector.extract_strided_slice %630 {offsets = [0, 96], sizes = [2, 32], strides = [1, 1]} : vector<2x128xf32> to vector<2x32xf32>
    %640 = math.tanh %639 : vector<2x32xf32>
    %641 = vector.extract_strided_slice %638 {offsets = [0, 32], sizes = [2, 32], strides = [1, 1]} : vector<2x96xf32> to vector<2x32xf32>
    %642 = arith.mulf %641, %620 : vector<2x32xf32>
    %643 = vector.extract_strided_slice %638 {offsets = [0, 0], sizes = [2, 32], strides = [1, 1]} : vector<2x96xf32> to vector<2x32xf32>
    %644 = arith.mulf %643, %640 : vector<2x32xf32>
    %645 = arith.addf %642, %644 : vector<2x32xf32>
    %646 = vector.extract_strided_slice %638 {offsets = [0, 64], sizes = [2, 32], strides = [1, 1]} : vector<2x96xf32> to vector<2x32xf32>
    %647 = math.tanh %645 : vector<2x32xf32>
    %648 = arith.mulf %646, %647 : vector<2x32xf32>
    %c48 = arith.constant 48 : index
    %c0_193 = arith.constant 0 : index
    %649 = vector.load %arg12[%c48, %c0_193] : memref<64x32xf32, #tpu.memory_space<vmem>>, vector<2x32xf32>
    tpu.vector_store %arg12[%c48, %c0_193], %648 {strides = array<i32>} : memref<64x32xf32, #tpu.memory_space<vmem>>, vector<2x32xf32>,
    %650 = vector.extract_strided_slice %16 {offsets = [25, 0], sizes = [1, 128], strides = [1, 1]} : vector<32x128xf32> to vector<1x128xf32>
    %651 = vector.extract_strided_slice %22 {offsets = [25, 0], sizes = [1, 128], strides = [1, 1]} : vector<32x128xf32> to vector<1x128xf32>
    %652 = tpu.concatenate %650, %651 in 0 : vector<1x128xf32>, vector<1x128xf32> -> vector<2x128xf32>
    %c0_194 = arith.constant 0 : index
    %c0_195 = arith.constant 0 : index
    %653 = vector.load %arg4[%c0_194, %c0_195] : memref<32x128xf32, #tpu.memory_space<vmem>>, vector<32x128xf32>
    %cst_196 = arith.constant dense<0.000000e+00> : vector<2x128xf32>
    %654 = tpu.matmul %648, %653, %cst_196 {dimension_numbers = #tpu.dot_dimension_numbers<[1], [0], [0], [1], [0, 0, 1, 1], [], []>} : vector<2x32xf32>, vector<32x128xf32>, vector<2x128xf32> -> vector<2x128xf32>
    %655 = arith.addf %652, %654 : vector<2x128xf32>
    %656 = vector.extract_strided_slice %655 {offsets = [0, 0], sizes = [2, 96], strides = [1, 1]} : vector<2x128xf32> to vector<2x96xf32>
    %cst_197 = arith.constant 5.000000e-01 : f32
    %657 = vector.broadcast %cst_197 : f32 to vector<2x96xf32>
    %658 = arith.mulf %657, %656 : vector<2x96xf32>
    %659 = math.tanh %658 : vector<2x96xf32>
    %cst_198 = arith.constant 5.000000e-01 : f32
    %660 = vector.broadcast %cst_198 : f32 to vector<2x96xf32>
    %661 = arith.mulf %660, %659 : vector<2x96xf32>
    %cst_199 = arith.constant 5.000000e-01 : f32
    %662 = vector.broadcast %cst_199 : f32 to vector<2x96xf32>
    %663 = arith.addf %661, %662 : vector<2x96xf32>
    %664 = vector.extract_strided_slice %655 {offsets = [0, 96], sizes = [2, 32], strides = [1, 1]} : vector<2x128xf32> to vector<2x32xf32>
    %665 = math.tanh %664 : vector<2x32xf32>
    %666 = vector.extract_strided_slice %663 {offsets = [0, 32], sizes = [2, 32], strides = [1, 1]} : vector<2x96xf32> to vector<2x32xf32>
    %667 = arith.mulf %666, %645 : vector<2x32xf32>
    %668 = vector.extract_strided_slice %663 {offsets = [0, 0], sizes = [2, 32], strides = [1, 1]} : vector<2x96xf32> to vector<2x32xf32>
    %669 = arith.mulf %668, %665 : vector<2x32xf32>
    %670 = arith.addf %667, %669 : vector<2x32xf32>
    %671 = vector.extract_strided_slice %663 {offsets = [0, 64], sizes = [2, 32], strides = [1, 1]} : vector<2x96xf32> to vector<2x32xf32>
    %672 = math.tanh %670 : vector<2x32xf32>
    %673 = arith.mulf %671, %672 : vector<2x32xf32>
    %c50 = arith.constant 50 : index
    %c0_200 = arith.constant 0 : index
    %674 = vector.load %arg12[%c50, %c0_200] : memref<64x32xf32, #tpu.memory_space<vmem>>, vector<2x32xf32>
    tpu.vector_store %arg12[%c50, %c0_200], %673 {strides = array<i32>} : memref<64x32xf32, #tpu.memory_space<vmem>>, vector<2x32xf32>,
    %675 = vector.extract_strided_slice %16 {offsets = [26, 0], sizes = [1, 128], strides = [1, 1]} : vector<32x128xf32> to vector<1x128xf32>
    %676 = vector.extract_strided_slice %22 {offsets = [26, 0], sizes = [1, 128], strides = [1, 1]} : vector<32x128xf32> to vector<1x128xf32>
    %677 = tpu.concatenate %675, %676 in 0 : vector<1x128xf32>, vector<1x128xf32> -> vector<2x128xf32>
    %c0_201 = arith.constant 0 : index
    %c0_202 = arith.constant 0 : index
    %678 = vector.load %arg4[%c0_201, %c0_202] : memref<32x128xf32, #tpu.memory_space<vmem>>, vector<32x128xf32>
    %cst_203 = arith.constant dense<0.000000e+00> : vector<2x128xf32>
    %679 = tpu.matmul %673, %678, %cst_203 {dimension_numbers = #tpu.dot_dimension_numbers<[1], [0], [0], [1], [0, 0, 1, 1], [], []>} : vector<2x32xf32>, vector<32x128xf32>, vector<2x128xf32> -> vector<2x128xf32>
    %680 = arith.addf %677, %679 : vector<2x128xf32>
    %681 = vector.extract_strided_slice %680 {offsets = [0, 0], sizes = [2, 96], strides = [1, 1]} : vector<2x128xf32> to vector<2x96xf32>
    %cst_204 = arith.constant 5.000000e-01 : f32
    %682 = vector.broadcast %cst_204 : f32 to vector<2x96xf32>
    %683 = arith.mulf %682, %681 : vector<2x96xf32>
    %684 = math.tanh %683 : vector<2x96xf32>
    %cst_205 = arith.constant 5.000000e-01 : f32
    %685 = vector.broadcast %cst_205 : f32 to vector<2x96xf32>
    %686 = arith.mulf %685, %684 : vector<2x96xf32>
    %cst_206 = arith.constant 5.000000e-01 : f32
    %687 = vector.broadcast %cst_206 : f32 to vector<2x96xf32>
    %688 = arith.addf %686, %687 : vector<2x96xf32>
    %689 = vector.extract_strided_slice %680 {offsets = [0, 96], sizes = [2, 32], strides = [1, 1]} : vector<2x128xf32> to vector<2x32xf32>
    %690 = math.tanh %689 : vector<2x32xf32>
    %691 = vector.extract_strided_slice %688 {offsets = [0, 32], sizes = [2, 32], strides = [1, 1]} : vector<2x96xf32> to vector<2x32xf32>
    %692 = arith.mulf %691, %670 : vector<2x32xf32>
    %693 = vector.extract_strided_slice %688 {offsets = [0, 0], sizes = [2, 32], strides = [1, 1]} : vector<2x96xf32> to vector<2x32xf32>
    %694 = arith.mulf %693, %690 : vector<2x32xf32>
    %695 = arith.addf %692, %694 : vector<2x32xf32>
    %696 = vector.extract_strided_slice %688 {offsets = [0, 64], sizes = [2, 32], strides = [1, 1]} : vector<2x96xf32> to vector<2x32xf32>
    %697 = math.tanh %695 : vector<2x32xf32>
    %698 = arith.mulf %696, %697 : vector<2x32xf32>
    %c52 = arith.constant 52 : index
    %c0_207 = arith.constant 0 : index
    %699 = vector.load %arg12[%c52, %c0_207] : memref<64x32xf32, #tpu.memory_space<vmem>>, vector<2x32xf32>
    tpu.vector_store %arg12[%c52, %c0_207], %698 {strides = array<i32>} : memref<64x32xf32, #tpu.memory_space<vmem>>, vector<2x32xf32>,
    %700 = vector.extract_strided_slice %16 {offsets = [27, 0], sizes = [1, 128], strides = [1, 1]} : vector<32x128xf32> to vector<1x128xf32>
    %701 = vector.extract_strided_slice %22 {offsets = [27, 0], sizes = [1, 128], strides = [1, 1]} : vector<32x128xf32> to vector<1x128xf32>
    %702 = tpu.concatenate %700, %701 in 0 : vector<1x128xf32>, vector<1x128xf32> -> vector<2x128xf32>
    %c0_208 = arith.constant 0 : index
    %c0_209 = arith.constant 0 : index
    %703 = vector.load %arg4[%c0_208, %c0_209] : memref<32x128xf32, #tpu.memory_space<vmem>>, vector<32x128xf32>
    %cst_210 = arith.constant dense<0.000000e+00> : vector<2x128xf32>
    %704 = tpu.matmul %698, %703, %cst_210 {dimension_numbers = #tpu.dot_dimension_numbers<[1], [0], [0], [1], [0, 0, 1, 1], [], []>} : vector<2x32xf32>, vector<32x128xf32>, vector<2x128xf32> -> vector<2x128xf32>
    %705 = arith.addf %702, %704 : vector<2x128xf32>
    %706 = vector.extract_strided_slice %705 {offsets = [0, 0], sizes = [2, 96], strides = [1, 1]} : vector<2x128xf32> to vector<2x96xf32>
    %cst_211 = arith.constant 5.000000e-01 : f32
    %707 = vector.broadcast %cst_211 : f32 to vector<2x96xf32>
    %708 = arith.mulf %707, %706 : vector<2x96xf32>
    %709 = math.tanh %708 : vector<2x96xf32>
    %cst_212 = arith.constant 5.000000e-01 : f32
    %710 = vector.broadcast %cst_212 : f32 to vector<2x96xf32>
    %711 = arith.mulf %710, %709 : vector<2x96xf32>
    %cst_213 = arith.constant 5.000000e-01 : f32
    %712 = vector.broadcast %cst_213 : f32 to vector<2x96xf32>
    %713 = arith.addf %711, %712 : vector<2x96xf32>
    %714 = vector.extract_strided_slice %705 {offsets = [0, 96], sizes = [2, 32], strides = [1, 1]} : vector<2x128xf32> to vector<2x32xf32>
    %715 = math.tanh %714 : vector<2x32xf32>
    %716 = vector.extract_strided_slice %713 {offsets = [0, 32], sizes = [2, 32], strides = [1, 1]} : vector<2x96xf32> to vector<2x32xf32>
    %717 = arith.mulf %716, %695 : vector<2x32xf32>
    %718 = vector.extract_strided_slice %713 {offsets = [0, 0], sizes = [2, 32], strides = [1, 1]} : vector<2x96xf32> to vector<2x32xf32>
    %719 = arith.mulf %718, %715 : vector<2x32xf32>
    %720 = arith.addf %717, %719 : vector<2x32xf32>
    %721 = vector.extract_strided_slice %713 {offsets = [0, 64], sizes = [2, 32], strides = [1, 1]} : vector<2x96xf32> to vector<2x32xf32>
    %722 = math.tanh %720 : vector<2x32xf32>
    %723 = arith.mulf %721, %722 : vector<2x32xf32>
    %c54 = arith.constant 54 : index
    %c0_214 = arith.constant 0 : index
    %724 = vector.load %arg12[%c54, %c0_214] : memref<64x32xf32, #tpu.memory_space<vmem>>, vector<2x32xf32>
    tpu.vector_store %arg12[%c54, %c0_214], %723 {strides = array<i32>} : memref<64x32xf32, #tpu.memory_space<vmem>>, vector<2x32xf32>,
    %725 = vector.extract_strided_slice %16 {offsets = [28, 0], sizes = [1, 128], strides = [1, 1]} : vector<32x128xf32> to vector<1x128xf32>
    %726 = vector.extract_strided_slice %22 {offsets = [28, 0], sizes = [1, 128], strides = [1, 1]} : vector<32x128xf32> to vector<1x128xf32>
    %727 = tpu.concatenate %725, %726 in 0 : vector<1x128xf32>, vector<1x128xf32> -> vector<2x128xf32>
    %c0_215 = arith.constant 0 : index
    %c0_216 = arith.constant 0 : index
    %728 = vector.load %arg4[%c0_215, %c0_216] : memref<32x128xf32, #tpu.memory_space<vmem>>, vector<32x128xf32>
    %cst_217 = arith.constant dense<0.000000e+00> : vector<2x128xf32>
    %729 = tpu.matmul %723, %728, %cst_217 {dimension_numbers = #tpu.dot_dimension_numbers<[1], [0], [0], [1], [0, 0, 1, 1], [], []>} : vector<2x32xf32>, vector<32x128xf32>, vector<2x128xf32> -> vector<2x128xf32>
    %730 = arith.addf %727, %729 : vector<2x128xf32>
    %731 = vector.extract_strided_slice %730 {offsets = [0, 0], sizes = [2, 96], strides = [1, 1]} : vector<2x128xf32> to vector<2x96xf32>
    %cst_218 = arith.constant 5.000000e-01 : f32
    %732 = vector.broadcast %cst_218 : f32 to vector<2x96xf32>
    %733 = arith.mulf %732, %731 : vector<2x96xf32>
    %734 = math.tanh %733 : vector<2x96xf32>
    %cst_219 = arith.constant 5.000000e-01 : f32
    %735 = vector.broadcast %cst_219 : f32 to vector<2x96xf32>
    %736 = arith.mulf %735, %734 : vector<2x96xf32>
    %cst_220 = arith.constant 5.000000e-01 : f32
    %737 = vector.broadcast %cst_220 : f32 to vector<2x96xf32>
    %738 = arith.addf %736, %737 : vector<2x96xf32>
    %739 = vector.extract_strided_slice %730 {offsets = [0, 96], sizes = [2, 32], strides = [1, 1]} : vector<2x128xf32> to vector<2x32xf32>
    %740 = math.tanh %739 : vector<2x32xf32>
    %741 = vector.extract_strided_slice %738 {offsets = [0, 32], sizes = [2, 32], strides = [1, 1]} : vector<2x96xf32> to vector<2x32xf32>
    %742 = arith.mulf %741, %720 : vector<2x32xf32>
    %743 = vector.extract_strided_slice %738 {offsets = [0, 0], sizes = [2, 32], strides = [1, 1]} : vector<2x96xf32> to vector<2x32xf32>
    %744 = arith.mulf %743, %740 : vector<2x32xf32>
    %745 = arith.addf %742, %744 : vector<2x32xf32>
    %746 = vector.extract_strided_slice %738 {offsets = [0, 64], sizes = [2, 32], strides = [1, 1]} : vector<2x96xf32> to vector<2x32xf32>
    %747 = math.tanh %745 : vector<2x32xf32>
    %748 = arith.mulf %746, %747 : vector<2x32xf32>
    %c56 = arith.constant 56 : index
    %c0_221 = arith.constant 0 : index
    %749 = vector.load %arg12[%c56, %c0_221] : memref<64x32xf32, #tpu.memory_space<vmem>>, vector<2x32xf32>
    tpu.vector_store %arg12[%c56, %c0_221], %748 {strides = array<i32>} : memref<64x32xf32, #tpu.memory_space<vmem>>, vector<2x32xf32>,
    %750 = vector.extract_strided_slice %16 {offsets = [29, 0], sizes = [1, 128], strides = [1, 1]} : vector<32x128xf32> to vector<1x128xf32>
    %751 = vector.extract_strided_slice %22 {offsets = [29, 0], sizes = [1, 128], strides = [1, 1]} : vector<32x128xf32> to vector<1x128xf32>
    %752 = tpu.concatenate %750, %751 in 0 : vector<1x128xf32>, vector<1x128xf32> -> vector<2x128xf32>
    %c0_222 = arith.constant 0 : index
    %c0_223 = arith.constant 0 : index
    %753 = vector.load %arg4[%c0_222, %c0_223] : memref<32x128xf32, #tpu.memory_space<vmem>>, vector<32x128xf32>
    %cst_224 = arith.constant dense<0.000000e+00> : vector<2x128xf32>
    %754 = tpu.matmul %748, %753, %cst_224 {dimension_numbers = #tpu.dot_dimension_numbers<[1], [0], [0], [1], [0, 0, 1, 1], [], []>} : vector<2x32xf32>, vector<32x128xf32>, vector<2x128xf32> -> vector<2x128xf32>
    %755 = arith.addf %752, %754 : vector<2x128xf32>
    %756 = vector.extract_strided_slice %755 {offsets = [0, 0], sizes = [2, 96], strides = [1, 1]} : vector<2x128xf32> to vector<2x96xf32>
    %cst_225 = arith.constant 5.000000e-01 : f32
    %757 = vector.broadcast %cst_225 : f32 to vector<2x96xf32>
    %758 = arith.mulf %757, %756 : vector<2x96xf32>
    %759 = math.tanh %758 : vector<2x96xf32>
    %cst_226 = arith.constant 5.000000e-01 : f32
    %760 = vector.broadcast %cst_226 : f32 to vector<2x96xf32>
    %761 = arith.mulf %760, %759 : vector<2x96xf32>
    %cst_227 = arith.constant 5.000000e-01 : f32
    %762 = vector.broadcast %cst_227 : f32 to vector<2x96xf32>
    %763 = arith.addf %761, %762 : vector<2x96xf32>
    %764 = vector.extract_strided_slice %755 {offsets = [0, 96], sizes = [2, 32], strides = [1, 1]} : vector<2x128xf32> to vector<2x32xf32>
    %765 = math.tanh %764 : vector<2x32xf32>
    %766 = vector.extract_strided_slice %763 {offsets = [0, 32], sizes = [2, 32], strides = [1, 1]} : vector<2x96xf32> to vector<2x32xf32>
    %767 = arith.mulf %766, %745 : vector<2x32xf32>
    %768 = vector.extract_strided_slice %763 {offsets = [0, 0], sizes = [2, 32], strides = [1, 1]} : vector<2x96xf32> to vector<2x32xf32>
    %769 = arith.mulf %768, %765 : vector<2x32xf32>
    %770 = arith.addf %767, %769 : vector<2x32xf32>
    %771 = vector.extract_strided_slice %763 {offsets = [0, 64], sizes = [2, 32], strides = [1, 1]} : vector<2x96xf32> to vector<2x32xf32>
    %772 = math.tanh %770 : vector<2x32xf32>
    %773 = arith.mulf %771, %772 : vector<2x32xf32>
    %c58 = arith.constant 58 : index
    %c0_228 = arith.constant 0 : index
    %774 = vector.load %arg12[%c58, %c0_228] : memref<64x32xf32, #tpu.memory_space<vmem>>, vector<2x32xf32>
    tpu.vector_store %arg12[%c58, %c0_228], %773 {strides = array<i32>} : memref<64x32xf32, #tpu.memory_space<vmem>>, vector<2x32xf32>,
    %775 = vector.extract_strided_slice %16 {offsets = [30, 0], sizes = [1, 128], strides = [1, 1]} : vector<32x128xf32> to vector<1x128xf32>
    %776 = vector.extract_strided_slice %22 {offsets = [30, 0], sizes = [1, 128], strides = [1, 1]} : vector<32x128xf32> to vector<1x128xf32>
    %777 = tpu.concatenate %775, %776 in 0 : vector<1x128xf32>, vector<1x128xf32> -> vector<2x128xf32>
    %c0_229 = arith.constant 0 : index
    %c0_230 = arith.constant 0 : index
    %778 = vector.load %arg4[%c0_229, %c0_230] : memref<32x128xf32, #tpu.memory_space<vmem>>, vector<32x128xf32>
    %cst_231 = arith.constant dense<0.000000e+00> : vector<2x128xf32>
    %779 = tpu.matmul %773, %778, %cst_231 {dimension_numbers = #tpu.dot_dimension_numbers<[1], [0], [0], [1], [0, 0, 1, 1], [], []>} : vector<2x32xf32>, vector<32x128xf32>, vector<2x128xf32> -> vector<2x128xf32>
    %780 = arith.addf %777, %779 : vector<2x128xf32>
    %781 = vector.extract_strided_slice %780 {offsets = [0, 0], sizes = [2, 96], strides = [1, 1]} : vector<2x128xf32> to vector<2x96xf32>
    %cst_232 = arith.constant 5.000000e-01 : f32
    %782 = vector.broadcast %cst_232 : f32 to vector<2x96xf32>
    %783 = arith.mulf %782, %781 : vector<2x96xf32>
    %784 = math.tanh %783 : vector<2x96xf32>
    %cst_233 = arith.constant 5.000000e-01 : f32
    %785 = vector.broadcast %cst_233 : f32 to vector<2x96xf32>
    %786 = arith.mulf %785, %784 : vector<2x96xf32>
    %cst_234 = arith.constant 5.000000e-01 : f32
    %787 = vector.broadcast %cst_234 : f32 to vector<2x96xf32>
    %788 = arith.addf %786, %787 : vector<2x96xf32>
    %789 = vector.extract_strided_slice %780 {offsets = [0, 96], sizes = [2, 32], strides = [1, 1]} : vector<2x128xf32> to vector<2x32xf32>
    %790 = math.tanh %789 : vector<2x32xf32>
    %791 = vector.extract_strided_slice %788 {offsets = [0, 32], sizes = [2, 32], strides = [1, 1]} : vector<2x96xf32> to vector<2x32xf32>
    %792 = arith.mulf %791, %770 : vector<2x32xf32>
    %793 = vector.extract_strided_slice %788 {offsets = [0, 0], sizes = [2, 32], strides = [1, 1]} : vector<2x96xf32> to vector<2x32xf32>
    %794 = arith.mulf %793, %790 : vector<2x32xf32>
    %795 = arith.addf %792, %794 : vector<2x32xf32>
    %796 = vector.extract_strided_slice %788 {offsets = [0, 64], sizes = [2, 32], strides = [1, 1]} : vector<2x96xf32> to vector<2x32xf32>
    %797 = math.tanh %795 : vector<2x32xf32>
    %798 = arith.mulf %796, %797 : vector<2x32xf32>
    %c60 = arith.constant 60 : index
    %c0_235 = arith.constant 0 : index
    %799 = vector.load %arg12[%c60, %c0_235] : memref<64x32xf32, #tpu.memory_space<vmem>>, vector<2x32xf32>
    tpu.vector_store %arg12[%c60, %c0_235], %798 {strides = array<i32>} : memref<64x32xf32, #tpu.memory_space<vmem>>, vector<2x32xf32>,
    %800 = vector.extract_strided_slice %16 {offsets = [31, 0], sizes = [1, 128], strides = [1, 1]} : vector<32x128xf32> to vector<1x128xf32>
    %801 = vector.extract_strided_slice %22 {offsets = [31, 0], sizes = [1, 128], strides = [1, 1]} : vector<32x128xf32> to vector<1x128xf32>
    %802 = tpu.concatenate %800, %801 in 0 : vector<1x128xf32>, vector<1x128xf32> -> vector<2x128xf32>
    %c0_236 = arith.constant 0 : index
    %c0_237 = arith.constant 0 : index
    %803 = vector.load %arg4[%c0_236, %c0_237] : memref<32x128xf32, #tpu.memory_space<vmem>>, vector<32x128xf32>
    %cst_238 = arith.constant dense<0.000000e+00> : vector<2x128xf32>
    %804 = tpu.matmul %798, %803, %cst_238 {dimension_numbers = #tpu.dot_dimension_numbers<[1], [0], [0], [1], [0, 0, 1, 1], [], []>} : vector<2x32xf32>, vector<32x128xf32>, vector<2x128xf32> -> vector<2x128xf32>
    %805 = arith.addf %802, %804 : vector<2x128xf32>
    %806 = vector.extract_strided_slice %805 {offsets = [0, 0], sizes = [2, 96], strides = [1, 1]} : vector<2x128xf32> to vector<2x96xf32>
    %cst_239 = arith.constant 5.000000e-01 : f32
    %807 = vector.broadcast %cst_239 : f32 to vector<2x96xf32>
    %808 = arith.mulf %807, %806 : vector<2x96xf32>
    %809 = math.tanh %808 : vector<2x96xf32>
    %cst_240 = arith.constant 5.000000e-01 : f32
    %810 = vector.broadcast %cst_240 : f32 to vector<2x96xf32>
    %811 = arith.mulf %810, %809 : vector<2x96xf32>
    %cst_241 = arith.constant 5.000000e-01 : f32
    %812 = vector.broadcast %cst_241 : f32 to vector<2x96xf32>
    %813 = arith.addf %811, %812 : vector<2x96xf32>
    %814 = vector.extract_strided_slice %805 {offsets = [0, 96], sizes = [2, 32], strides = [1, 1]} : vector<2x128xf32> to vector<2x32xf32>
    %815 = math.tanh %814 : vector<2x32xf32>
    %816 = vector.extract_strided_slice %813 {offsets = [0, 32], sizes = [2, 32], strides = [1, 1]} : vector<2x96xf32> to vector<2x32xf32>
    %817 = arith.mulf %816, %795 : vector<2x32xf32>
    %818 = vector.extract_strided_slice %813 {offsets = [0, 0], sizes = [2, 32], strides = [1, 1]} : vector<2x96xf32> to vector<2x32xf32>
    %819 = arith.mulf %818, %815 : vector<2x32xf32>
    %820 = arith.addf %817, %819 : vector<2x32xf32>
    %821 = vector.extract_strided_slice %813 {offsets = [0, 64], sizes = [2, 32], strides = [1, 1]} : vector<2x96xf32> to vector<2x32xf32>
    %822 = math.tanh %820 : vector<2x32xf32>
    %823 = arith.mulf %821, %822 : vector<2x32xf32>
    %c62 = arith.constant 62 : index
    %c0_242 = arith.constant 0 : index
    %824 = vector.load %arg12[%c62, %c0_242] : memref<64x32xf32, #tpu.memory_space<vmem>>, vector<2x32xf32>
    tpu.vector_store %arg12[%c62, %c0_242], %823 {strides = array<i32>} : memref<64x32xf32, #tpu.memory_space<vmem>>, vector<2x32xf32>,
    %c0_243 = arith.constant 0 : index
    %c0_244 = arith.constant 0 : index
    %825 = vector.load %arg12[%c0_243, %c0_244] : memref<64x32xf32, #tpu.memory_space<vmem>>, vector<64x32xf32>
    %c0_245 = arith.constant 0 : index
    %c0_246 = arith.constant 0 : index
    %826 = vector.load %arg6[%c0_245, %c0_246] : memref<32x128xf32, #tpu.memory_space<vmem>>, vector<32x128xf32>
    %cst_247 = arith.constant dense<0.000000e+00> : vector<64x128xf32>
    %827 = tpu.matmul %825, %826, %cst_247 {dimension_numbers = #tpu.dot_dimension_numbers<[1], [0], [0], [1], [0, 0, 1, 1], [], []>} : vector<64x32xf32>, vector<32x128xf32>, vector<64x128xf32> -> vector<64x128xf32>
    %c0_248 = arith.constant 0 : index
    %c0_249 = arith.constant 0 : index
    %828 = vector.load %arg8[%c0_248, %c0_249] : memref<1x128xf32, #tpu.memory_space<vmem>>, vector<1x128xf32>
    %829 = vector.broadcast %828 : vector<1x128xf32> to vector<64x128xf32>
    %830 = arith.addf %827, %829 : vector<64x128xf32>
    %cst_250 = arith.constant 0.000000e+00 : f32
    %831 = vector.broadcast %cst_250 : f32 to vector<2x32xf32>
    %cst_251 = arith.constant 0.000000e+00 : f32
    %832 = vector.broadcast %cst_251 : f32 to vector<2x32xf32>
    %833 = vector.extract_strided_slice %830 {offsets = [0, 0], sizes = [2, 128], strides = [1, 1]} : vector<64x128xf32> to vector<2x128xf32>
    %c0_252 = arith.constant 0 : index
    %c0_253 = arith.constant 0 : index
    %834 = vector.load %arg7[%c0_252, %c0_253] : memref<32x128xf32, #tpu.memory_space<vmem>>, vector<32x128xf32>
    %cst_254 = arith.constant dense<0.000000e+00> : vector<2x128xf32>
    %835 = tpu.matmul %831, %834, %cst_254 {dimension_numbers = #tpu.dot_dimension_numbers<[1], [0], [0], [1], [0, 0, 1, 1], [], []>} : vector<2x32xf32>, vector<32x128xf32>, vector<2x128xf32> -> vector<2x128xf32>
    %836 = arith.addf %833, %835 : vector<2x128xf32>
    %837 = vector.extract_strided_slice %836 {offsets = [0, 0], sizes = [2, 96], strides = [1, 1]} : vector<2x128xf32> to vector<2x96xf32>
    %cst_255 = arith.constant 5.000000e-01 : f32
    %838 = vector.broadcast %cst_255 : f32 to vector<2x96xf32>
    %839 = arith.mulf %838, %837 : vector<2x96xf32>
    %840 = math.tanh %839 : vector<2x96xf32>
    %cst_256 = arith.constant 5.000000e-01 : f32
    %841 = vector.broadcast %cst_256 : f32 to vector<2x96xf32>
    %842 = arith.mulf %841, %840 : vector<2x96xf32>
    %cst_257 = arith.constant 5.000000e-01 : f32
    %843 = vector.broadcast %cst_257 : f32 to vector<2x96xf32>
    %844 = arith.addf %842, %843 : vector<2x96xf32>
    %845 = vector.extract_strided_slice %836 {offsets = [0, 96], sizes = [2, 32], strides = [1, 1]} : vector<2x128xf32> to vector<2x32xf32>
    %846 = math.tanh %845 : vector<2x32xf32>
    %847 = vector.extract_strided_slice %844 {offsets = [0, 32], sizes = [2, 32], strides = [1, 1]} : vector<2x96xf32> to vector<2x32xf32>
    %848 = arith.mulf %847, %832 : vector<2x32xf32>
    %849 = vector.extract_strided_slice %844 {offsets = [0, 0], sizes = [2, 32], strides = [1, 1]} : vector<2x96xf32> to vector<2x32xf32>
    %850 = arith.mulf %849, %846 : vector<2x32xf32>
    %851 = arith.addf %848, %850 : vector<2x32xf32>
    %852 = vector.extract_strided_slice %844 {offsets = [0, 64], sizes = [2, 32], strides = [1, 1]} : vector<2x96xf32> to vector<2x32xf32>
    %853 = math.tanh %851 : vector<2x32xf32>
    %854 = arith.mulf %852, %853 : vector<2x32xf32>
    %855 = vector.extract_strided_slice %830 {offsets = [2, 0], sizes = [2, 128], strides = [1, 1]} : vector<64x128xf32> to vector<2x128xf32>
    %c0_258 = arith.constant 0 : index
    %c0_259 = arith.constant 0 : index
    %856 = vector.load %arg7[%c0_258, %c0_259] : memref<32x128xf32, #tpu.memory_space<vmem>>, vector<32x128xf32>
    %cst_260 = arith.constant dense<0.000000e+00> : vector<2x128xf32>
    %857 = tpu.matmul %854, %856, %cst_260 {dimension_numbers = #tpu.dot_dimension_numbers<[1], [0], [0], [1], [0, 0, 1, 1], [], []>} : vector<2x32xf32>, vector<32x128xf32>, vector<2x128xf32> -> vector<2x128xf32>
    %858 = arith.addf %855, %857 : vector<2x128xf32>
    %859 = vector.extract_strided_slice %858 {offsets = [0, 0], sizes = [2, 96], strides = [1, 1]} : vector<2x128xf32> to vector<2x96xf32>
    %cst_261 = arith.constant 5.000000e-01 : f32
    %860 = vector.broadcast %cst_261 : f32 to vector<2x96xf32>
    %861 = arith.mulf %860, %859 : vector<2x96xf32>
    %862 = math.tanh %861 : vector<2x96xf32>
    %cst_262 = arith.constant 5.000000e-01 : f32
    %863 = vector.broadcast %cst_262 : f32 to vector<2x96xf32>
    %864 = arith.mulf %863, %862 : vector<2x96xf32>
    %cst_263 = arith.constant 5.000000e-01 : f32
    %865 = vector.broadcast %cst_263 : f32 to vector<2x96xf32>
    %866 = arith.addf %864, %865 : vector<2x96xf32>
    %867 = vector.extract_strided_slice %858 {offsets = [0, 96], sizes = [2, 32], strides = [1, 1]} : vector<2x128xf32> to vector<2x32xf32>
    %868 = math.tanh %867 : vector<2x32xf32>
    %869 = vector.extract_strided_slice %866 {offsets = [0, 32], sizes = [2, 32], strides = [1, 1]} : vector<2x96xf32> to vector<2x32xf32>
    %870 = arith.mulf %869, %851 : vector<2x32xf32>
    %871 = vector.extract_strided_slice %866 {offsets = [0, 0], sizes = [2, 32], strides = [1, 1]} : vector<2x96xf32> to vector<2x32xf32>
    %872 = arith.mulf %871, %868 : vector<2x32xf32>
    %873 = arith.addf %870, %872 : vector<2x32xf32>
    %874 = vector.extract_strided_slice %866 {offsets = [0, 64], sizes = [2, 32], strides = [1, 1]} : vector<2x96xf32> to vector<2x32xf32>
    %875 = math.tanh %873 : vector<2x32xf32>
    %876 = arith.mulf %874, %875 : vector<2x32xf32>
    %877 = vector.extract_strided_slice %830 {offsets = [4, 0], sizes = [2, 128], strides = [1, 1]} : vector<64x128xf32> to vector<2x128xf32>
    %c0_264 = arith.constant 0 : index
    %c0_265 = arith.constant 0 : index
    %878 = vector.load %arg7[%c0_264, %c0_265] : memref<32x128xf32, #tpu.memory_space<vmem>>, vector<32x128xf32>
    %cst_266 = arith.constant dense<0.000000e+00> : vector<2x128xf32>
    %879 = tpu.matmul %876, %878, %cst_266 {dimension_numbers = #tpu.dot_dimension_numbers<[1], [0], [0], [1], [0, 0, 1, 1], [], []>} : vector<2x32xf32>, vector<32x128xf32>, vector<2x128xf32> -> vector<2x128xf32>
    %880 = arith.addf %877, %879 : vector<2x128xf32>
    %881 = vector.extract_strided_slice %880 {offsets = [0, 0], sizes = [2, 96], strides = [1, 1]} : vector<2x128xf32> to vector<2x96xf32>
    %cst_267 = arith.constant 5.000000e-01 : f32
    %882 = vector.broadcast %cst_267 : f32 to vector<2x96xf32>
    %883 = arith.mulf %882, %881 : vector<2x96xf32>
    %884 = math.tanh %883 : vector<2x96xf32>
    %cst_268 = arith.constant 5.000000e-01 : f32
    %885 = vector.broadcast %cst_268 : f32 to vector<2x96xf32>
    %886 = arith.mulf %885, %884 : vector<2x96xf32>
    %cst_269 = arith.constant 5.000000e-01 : f32
    %887 = vector.broadcast %cst_269 : f32 to vector<2x96xf32>
    %888 = arith.addf %886, %887 : vector<2x96xf32>
    %889 = vector.extract_strided_slice %880 {offsets = [0, 96], sizes = [2, 32], strides = [1, 1]} : vector<2x128xf32> to vector<2x32xf32>
    %890 = math.tanh %889 : vector<2x32xf32>
    %891 = vector.extract_strided_slice %888 {offsets = [0, 32], sizes = [2, 32], strides = [1, 1]} : vector<2x96xf32> to vector<2x32xf32>
    %892 = arith.mulf %891, %873 : vector<2x32xf32>
    %893 = vector.extract_strided_slice %888 {offsets = [0, 0], sizes = [2, 32], strides = [1, 1]} : vector<2x96xf32> to vector<2x32xf32>
    %894 = arith.mulf %893, %890 : vector<2x32xf32>
    %895 = arith.addf %892, %894 : vector<2x32xf32>
    %896 = vector.extract_strided_slice %888 {offsets = [0, 64], sizes = [2, 32], strides = [1, 1]} : vector<2x96xf32> to vector<2x32xf32>
    %897 = math.tanh %895 : vector<2x32xf32>
    %898 = arith.mulf %896, %897 : vector<2x32xf32>
    %899 = vector.extract_strided_slice %830 {offsets = [6, 0], sizes = [2, 128], strides = [1, 1]} : vector<64x128xf32> to vector<2x128xf32>
    %c0_270 = arith.constant 0 : index
    %c0_271 = arith.constant 0 : index
    %900 = vector.load %arg7[%c0_270, %c0_271] : memref<32x128xf32, #tpu.memory_space<vmem>>, vector<32x128xf32>
    %cst_272 = arith.constant dense<0.000000e+00> : vector<2x128xf32>
    %901 = tpu.matmul %898, %900, %cst_272 {dimension_numbers = #tpu.dot_dimension_numbers<[1], [0], [0], [1], [0, 0, 1, 1], [], []>} : vector<2x32xf32>, vector<32x128xf32>, vector<2x128xf32> -> vector<2x128xf32>
    %902 = arith.addf %899, %901 : vector<2x128xf32>
    %903 = vector.extract_strided_slice %902 {offsets = [0, 0], sizes = [2, 96], strides = [1, 1]} : vector<2x128xf32> to vector<2x96xf32>
    %cst_273 = arith.constant 5.000000e-01 : f32
    %904 = vector.broadcast %cst_273 : f32 to vector<2x96xf32>
    %905 = arith.mulf %904, %903 : vector<2x96xf32>
    %906 = math.tanh %905 : vector<2x96xf32>
    %cst_274 = arith.constant 5.000000e-01 : f32
    %907 = vector.broadcast %cst_274 : f32 to vector<2x96xf32>
    %908 = arith.mulf %907, %906 : vector<2x96xf32>
    %cst_275 = arith.constant 5.000000e-01 : f32
    %909 = vector.broadcast %cst_275 : f32 to vector<2x96xf32>
    %910 = arith.addf %908, %909 : vector<2x96xf32>
    %911 = vector.extract_strided_slice %902 {offsets = [0, 96], sizes = [2, 32], strides = [1, 1]} : vector<2x128xf32> to vector<2x32xf32>
    %912 = math.tanh %911 : vector<2x32xf32>
    %913 = vector.extract_strided_slice %910 {offsets = [0, 32], sizes = [2, 32], strides = [1, 1]} : vector<2x96xf32> to vector<2x32xf32>
    %914 = arith.mulf %913, %895 : vector<2x32xf32>
    %915 = vector.extract_strided_slice %910 {offsets = [0, 0], sizes = [2, 32], strides = [1, 1]} : vector<2x96xf32> to vector<2x32xf32>
    %916 = arith.mulf %915, %912 : vector<2x32xf32>
    %917 = arith.addf %914, %916 : vector<2x32xf32>
    %918 = vector.extract_strided_slice %910 {offsets = [0, 64], sizes = [2, 32], strides = [1, 1]} : vector<2x96xf32> to vector<2x32xf32>
    %919 = math.tanh %917 : vector<2x32xf32>
    %920 = arith.mulf %918, %919 : vector<2x32xf32>
    %921 = vector.extract_strided_slice %830 {offsets = [8, 0], sizes = [2, 128], strides = [1, 1]} : vector<64x128xf32> to vector<2x128xf32>
    %c0_276 = arith.constant 0 : index
    %c0_277 = arith.constant 0 : index
    %922 = vector.load %arg7[%c0_276, %c0_277] : memref<32x128xf32, #tpu.memory_space<vmem>>, vector<32x128xf32>
    %cst_278 = arith.constant dense<0.000000e+00> : vector<2x128xf32>
    %923 = tpu.matmul %920, %922, %cst_278 {dimension_numbers = #tpu.dot_dimension_numbers<[1], [0], [0], [1], [0, 0, 1, 1], [], []>} : vector<2x32xf32>, vector<32x128xf32>, vector<2x128xf32> -> vector<2x128xf32>
    %924 = arith.addf %921, %923 : vector<2x128xf32>
    %925 = vector.extract_strided_slice %924 {offsets = [0, 0], sizes = [2, 96], strides = [1, 1]} : vector<2x128xf32> to vector<2x96xf32>
    %cst_279 = arith.constant 5.000000e-01 : f32
    %926 = vector.broadcast %cst_279 : f32 to vector<2x96xf32>
    %927 = arith.mulf %926, %925 : vector<2x96xf32>
    %928 = math.tanh %927 : vector<2x96xf32>
    %cst_280 = arith.constant 5.000000e-01 : f32
    %929 = vector.broadcast %cst_280 : f32 to vector<2x96xf32>
    %930 = arith.mulf %929, %928 : vector<2x96xf32>
    %cst_281 = arith.constant 5.000000e-01 : f32
    %931 = vector.broadcast %cst_281 : f32 to vector<2x96xf32>
    %932 = arith.addf %930, %931 : vector<2x96xf32>
    %933 = vector.extract_strided_slice %924 {offsets = [0, 96], sizes = [2, 32], strides = [1, 1]} : vector<2x128xf32> to vector<2x32xf32>
    %934 = math.tanh %933 : vector<2x32xf32>
    %935 = vector.extract_strided_slice %932 {offsets = [0, 32], sizes = [2, 32], strides = [1, 1]} : vector<2x96xf32> to vector<2x32xf32>
    %936 = arith.mulf %935, %917 : vector<2x32xf32>
    %937 = vector.extract_strided_slice %932 {offsets = [0, 0], sizes = [2, 32], strides = [1, 1]} : vector<2x96xf32> to vector<2x32xf32>
    %938 = arith.mulf %937, %934 : vector<2x32xf32>
    %939 = arith.addf %936, %938 : vector<2x32xf32>
    %940 = vector.extract_strided_slice %932 {offsets = [0, 64], sizes = [2, 32], strides = [1, 1]} : vector<2x96xf32> to vector<2x32xf32>
    %941 = math.tanh %939 : vector<2x32xf32>
    %942 = arith.mulf %940, %941 : vector<2x32xf32>
    %943 = vector.extract_strided_slice %830 {offsets = [10, 0], sizes = [2, 128], strides = [1, 1]} : vector<64x128xf32> to vector<2x128xf32>
    %c0_282 = arith.constant 0 : index
    %c0_283 = arith.constant 0 : index
    %944 = vector.load %arg7[%c0_282, %c0_283] : memref<32x128xf32, #tpu.memory_space<vmem>>, vector<32x128xf32>
    %cst_284 = arith.constant dense<0.000000e+00> : vector<2x128xf32>
    %945 = tpu.matmul %942, %944, %cst_284 {dimension_numbers = #tpu.dot_dimension_numbers<[1], [0], [0], [1], [0, 0, 1, 1], [], []>} : vector<2x32xf32>, vector<32x128xf32>, vector<2x128xf32> -> vector<2x128xf32>
    %946 = arith.addf %943, %945 : vector<2x128xf32>
    %947 = vector.extract_strided_slice %946 {offsets = [0, 0], sizes = [2, 96], strides = [1, 1]} : vector<2x128xf32> to vector<2x96xf32>
    %cst_285 = arith.constant 5.000000e-01 : f32
    %948 = vector.broadcast %cst_285 : f32 to vector<2x96xf32>
    %949 = arith.mulf %948, %947 : vector<2x96xf32>
    %950 = math.tanh %949 : vector<2x96xf32>
    %cst_286 = arith.constant 5.000000e-01 : f32
    %951 = vector.broadcast %cst_286 : f32 to vector<2x96xf32>
    %952 = arith.mulf %951, %950 : vector<2x96xf32>
    %cst_287 = arith.constant 5.000000e-01 : f32
    %953 = vector.broadcast %cst_287 : f32 to vector<2x96xf32>
    %954 = arith.addf %952, %953 : vector<2x96xf32>
    %955 = vector.extract_strided_slice %946 {offsets = [0, 96], sizes = [2, 32], strides = [1, 1]} : vector<2x128xf32> to vector<2x32xf32>
    %956 = math.tanh %955 : vector<2x32xf32>
    %957 = vector.extract_strided_slice %954 {offsets = [0, 32], sizes = [2, 32], strides = [1, 1]} : vector<2x96xf32> to vector<2x32xf32>
    %958 = arith.mulf %957, %939 : vector<2x32xf32>
    %959 = vector.extract_strided_slice %954 {offsets = [0, 0], sizes = [2, 32], strides = [1, 1]} : vector<2x96xf32> to vector<2x32xf32>
    %960 = arith.mulf %959, %956 : vector<2x32xf32>
    %961 = arith.addf %958, %960 : vector<2x32xf32>
    %962 = vector.extract_strided_slice %954 {offsets = [0, 64], sizes = [2, 32], strides = [1, 1]} : vector<2x96xf32> to vector<2x32xf32>
    %963 = math.tanh %961 : vector<2x32xf32>
    %964 = arith.mulf %962, %963 : vector<2x32xf32>
    %965 = vector.extract_strided_slice %830 {offsets = [12, 0], sizes = [2, 128], strides = [1, 1]} : vector<64x128xf32> to vector<2x128xf32>
    %c0_288 = arith.constant 0 : index
    %c0_289 = arith.constant 0 : index
    %966 = vector.load %arg7[%c0_288, %c0_289] : memref<32x128xf32, #tpu.memory_space<vmem>>, vector<32x128xf32>
    %cst_290 = arith.constant dense<0.000000e+00> : vector<2x128xf32>
    %967 = tpu.matmul %964, %966, %cst_290 {dimension_numbers = #tpu.dot_dimension_numbers<[1], [0], [0], [1], [0, 0, 1, 1], [], []>} : vector<2x32xf32>, vector<32x128xf32>, vector<2x128xf32> -> vector<2x128xf32>
    %968 = arith.addf %965, %967 : vector<2x128xf32>
    %969 = vector.extract_strided_slice %968 {offsets = [0, 0], sizes = [2, 96], strides = [1, 1]} : vector<2x128xf32> to vector<2x96xf32>
    %cst_291 = arith.constant 5.000000e-01 : f32
    %970 = vector.broadcast %cst_291 : f32 to vector<2x96xf32>
    %971 = arith.mulf %970, %969 : vector<2x96xf32>
    %972 = math.tanh %971 : vector<2x96xf32>
    %cst_292 = arith.constant 5.000000e-01 : f32
    %973 = vector.broadcast %cst_292 : f32 to vector<2x96xf32>
    %974 = arith.mulf %973, %972 : vector<2x96xf32>
    %cst_293 = arith.constant 5.000000e-01 : f32
    %975 = vector.broadcast %cst_293 : f32 to vector<2x96xf32>
    %976 = arith.addf %974, %975 : vector<2x96xf32>
    %977 = vector.extract_strided_slice %968 {offsets = [0, 96], sizes = [2, 32], strides = [1, 1]} : vector<2x128xf32> to vector<2x32xf32>
    %978 = math.tanh %977 : vector<2x32xf32>
    %979 = vector.extract_strided_slice %976 {offsets = [0, 32], sizes = [2, 32], strides = [1, 1]} : vector<2x96xf32> to vector<2x32xf32>
    %980 = arith.mulf %979, %961 : vector<2x32xf32>
    %981 = vector.extract_strided_slice %976 {offsets = [0, 0], sizes = [2, 32], strides = [1, 1]} : vector<2x96xf32> to vector<2x32xf32>
    %982 = arith.mulf %981, %978 : vector<2x32xf32>
    %983 = arith.addf %980, %982 : vector<2x32xf32>
    %984 = vector.extract_strided_slice %976 {offsets = [0, 64], sizes = [2, 32], strides = [1, 1]} : vector<2x96xf32> to vector<2x32xf32>
    %985 = math.tanh %983 : vector<2x32xf32>
    %986 = arith.mulf %984, %985 : vector<2x32xf32>
    %987 = vector.extract_strided_slice %830 {offsets = [14, 0], sizes = [2, 128], strides = [1, 1]} : vector<64x128xf32> to vector<2x128xf32>
    %c0_294 = arith.constant 0 : index
    %c0_295 = arith.constant 0 : index
    %988 = vector.load %arg7[%c0_294, %c0_295] : memref<32x128xf32, #tpu.memory_space<vmem>>, vector<32x128xf32>
    %cst_296 = arith.constant dense<0.000000e+00> : vector<2x128xf32>
    %989 = tpu.matmul %986, %988, %cst_296 {dimension_numbers = #tpu.dot_dimension_numbers<[1], [0], [0], [1], [0, 0, 1, 1], [], []>} : vector<2x32xf32>, vector<32x128xf32>, vector<2x128xf32> -> vector<2x128xf32>
    %990 = arith.addf %987, %989 : vector<2x128xf32>
    %991 = vector.extract_strided_slice %990 {offsets = [0, 0], sizes = [2, 96], strides = [1, 1]} : vector<2x128xf32> to vector<2x96xf32>
    %cst_297 = arith.constant 5.000000e-01 : f32
    %992 = vector.broadcast %cst_297 : f32 to vector<2x96xf32>
    %993 = arith.mulf %992, %991 : vector<2x96xf32>
    %994 = math.tanh %993 : vector<2x96xf32>
    %cst_298 = arith.constant 5.000000e-01 : f32
    %995 = vector.broadcast %cst_298 : f32 to vector<2x96xf32>
    %996 = arith.mulf %995, %994 : vector<2x96xf32>
    %cst_299 = arith.constant 5.000000e-01 : f32
    %997 = vector.broadcast %cst_299 : f32 to vector<2x96xf32>
    %998 = arith.addf %996, %997 : vector<2x96xf32>
    %999 = vector.extract_strided_slice %990 {offsets = [0, 96], sizes = [2, 32], strides = [1, 1]} : vector<2x128xf32> to vector<2x32xf32>
    %1000 = math.tanh %999 : vector<2x32xf32>
    %1001 = vector.extract_strided_slice %998 {offsets = [0, 32], sizes = [2, 32], strides = [1, 1]} : vector<2x96xf32> to vector<2x32xf32>
    %1002 = arith.mulf %1001, %983 : vector<2x32xf32>
    %1003 = vector.extract_strided_slice %998 {offsets = [0, 0], sizes = [2, 32], strides = [1, 1]} : vector<2x96xf32> to vector<2x32xf32>
    %1004 = arith.mulf %1003, %1000 : vector<2x32xf32>
    %1005 = arith.addf %1002, %1004 : vector<2x32xf32>
    %1006 = vector.extract_strided_slice %998 {offsets = [0, 64], sizes = [2, 32], strides = [1, 1]} : vector<2x96xf32> to vector<2x32xf32>
    %1007 = math.tanh %1005 : vector<2x32xf32>
    %1008 = arith.mulf %1006, %1007 : vector<2x32xf32>
    %1009 = vector.extract_strided_slice %830 {offsets = [16, 0], sizes = [2, 128], strides = [1, 1]} : vector<64x128xf32> to vector<2x128xf32>
    %c0_300 = arith.constant 0 : index
    %c0_301 = arith.constant 0 : index
    %1010 = vector.load %arg7[%c0_300, %c0_301] : memref<32x128xf32, #tpu.memory_space<vmem>>, vector<32x128xf32>
    %cst_302 = arith.constant dense<0.000000e+00> : vector<2x128xf32>
    %1011 = tpu.matmul %1008, %1010, %cst_302 {dimension_numbers = #tpu.dot_dimension_numbers<[1], [0], [0], [1], [0, 0, 1, 1], [], []>} : vector<2x32xf32>, vector<32x128xf32>, vector<2x128xf32> -> vector<2x128xf32>
    %1012 = arith.addf %1009, %1011 : vector<2x128xf32>
    %1013 = vector.extract_strided_slice %1012 {offsets = [0, 0], sizes = [2, 96], strides = [1, 1]} : vector<2x128xf32> to vector<2x96xf32>
    %cst_303 = arith.constant 5.000000e-01 : f32
    %1014 = vector.broadcast %cst_303 : f32 to vector<2x96xf32>
    %1015 = arith.mulf %1014, %1013 : vector<2x96xf32>
    %1016 = math.tanh %1015 : vector<2x96xf32>
    %cst_304 = arith.constant 5.000000e-01 : f32
    %1017 = vector.broadcast %cst_304 : f32 to vector<2x96xf32>
    %1018 = arith.mulf %1017, %1016 : vector<2x96xf32>
    %cst_305 = arith.constant 5.000000e-01 : f32
    %1019 = vector.broadcast %cst_305 : f32 to vector<2x96xf32>
    %1020 = arith.addf %1018, %1019 : vector<2x96xf32>
    %1021 = vector.extract_strided_slice %1012 {offsets = [0, 96], sizes = [2, 32], strides = [1, 1]} : vector<2x128xf32> to vector<2x32xf32>
    %1022 = math.tanh %1021 : vector<2x32xf32>
    %1023 = vector.extract_strided_slice %1020 {offsets = [0, 32], sizes = [2, 32], strides = [1, 1]} : vector<2x96xf32> to vector<2x32xf32>
    %1024 = arith.mulf %1023, %1005 : vector<2x32xf32>
    %1025 = vector.extract_strided_slice %1020 {offsets = [0, 0], sizes = [2, 32], strides = [1, 1]} : vector<2x96xf32> to vector<2x32xf32>
    %1026 = arith.mulf %1025, %1022 : vector<2x32xf32>
    %1027 = arith.addf %1024, %1026 : vector<2x32xf32>
    %1028 = vector.extract_strided_slice %1020 {offsets = [0, 64], sizes = [2, 32], strides = [1, 1]} : vector<2x96xf32> to vector<2x32xf32>
    %1029 = math.tanh %1027 : vector<2x32xf32>
    %1030 = arith.mulf %1028, %1029 : vector<2x32xf32>
    %1031 = vector.extract_strided_slice %830 {offsets = [18, 0], sizes = [2, 128], strides = [1, 1]} : vector<64x128xf32> to vector<2x128xf32>
    %c0_306 = arith.constant 0 : index
    %c0_307 = arith.constant 0 : index
    %1032 = vector.load %arg7[%c0_306, %c0_307] : memref<32x128xf32, #tpu.memory_space<vmem>>, vector<32x128xf32>
    %cst_308 = arith.constant dense<0.000000e+00> : vector<2x128xf32>
    %1033 = tpu.matmul %1030, %1032, %cst_308 {dimension_numbers = #tpu.dot_dimension_numbers<[1], [0], [0], [1], [0, 0, 1, 1], [], []>} : vector<2x32xf32>, vector<32x128xf32>, vector<2x128xf32> -> vector<2x128xf32>
    %1034 = arith.addf %1031, %1033 : vector<2x128xf32>
    %1035 = vector.extract_strided_slice %1034 {offsets = [0, 0], sizes = [2, 96], strides = [1, 1]} : vector<2x128xf32> to vector<2x96xf32>
    %cst_309 = arith.constant 5.000000e-01 : f32
    %1036 = vector.broadcast %cst_309 : f32 to vector<2x96xf32>
    %1037 = arith.mulf %1036, %1035 : vector<2x96xf32>
    %1038 = math.tanh %1037 : vector<2x96xf32>
    %cst_310 = arith.constant 5.000000e-01 : f32
    %1039 = vector.broadcast %cst_310 : f32 to vector<2x96xf32>
    %1040 = arith.mulf %1039, %1038 : vector<2x96xf32>
    %cst_311 = arith.constant 5.000000e-01 : f32
    %1041 = vector.broadcast %cst_311 : f32 to vector<2x96xf32>
    %1042 = arith.addf %1040, %1041 : vector<2x96xf32>
    %1043 = vector.extract_strided_slice %1034 {offsets = [0, 96], sizes = [2, 32], strides = [1, 1]} : vector<2x128xf32> to vector<2x32xf32>
    %1044 = math.tanh %1043 : vector<2x32xf32>
    %1045 = vector.extract_strided_slice %1042 {offsets = [0, 32], sizes = [2, 32], strides = [1, 1]} : vector<2x96xf32> to vector<2x32xf32>
    %1046 = arith.mulf %1045, %1027 : vector<2x32xf32>
    %1047 = vector.extract_strided_slice %1042 {offsets = [0, 0], sizes = [2, 32], strides = [1, 1]} : vector<2x96xf32> to vector<2x32xf32>
    %1048 = arith.mulf %1047, %1044 : vector<2x32xf32>
    %1049 = arith.addf %1046, %1048 : vector<2x32xf32>
    %1050 = vector.extract_strided_slice %1042 {offsets = [0, 64], sizes = [2, 32], strides = [1, 1]} : vector<2x96xf32> to vector<2x32xf32>
    %1051 = math.tanh %1049 : vector<2x32xf32>
    %1052 = arith.mulf %1050, %1051 : vector<2x32xf32>
    %1053 = vector.extract_strided_slice %830 {offsets = [20, 0], sizes = [2, 128], strides = [1, 1]} : vector<64x128xf32> to vector<2x128xf32>
    %c0_312 = arith.constant 0 : index
    %c0_313 = arith.constant 0 : index
    %1054 = vector.load %arg7[%c0_312, %c0_313] : memref<32x128xf32, #tpu.memory_space<vmem>>, vector<32x128xf32>
    %cst_314 = arith.constant dense<0.000000e+00> : vector<2x128xf32>
    %1055 = tpu.matmul %1052, %1054, %cst_314 {dimension_numbers = #tpu.dot_dimension_numbers<[1], [0], [0], [1], [0, 0, 1, 1], [], []>} : vector<2x32xf32>, vector<32x128xf32>, vector<2x128xf32> -> vector<2x128xf32>
    %1056 = arith.addf %1053, %1055 : vector<2x128xf32>
    %1057 = vector.extract_strided_slice %1056 {offsets = [0, 0], sizes = [2, 96], strides = [1, 1]} : vector<2x128xf32> to vector<2x96xf32>
    %cst_315 = arith.constant 5.000000e-01 : f32
    %1058 = vector.broadcast %cst_315 : f32 to vector<2x96xf32>
    %1059 = arith.mulf %1058, %1057 : vector<2x96xf32>
    %1060 = math.tanh %1059 : vector<2x96xf32>
    %cst_316 = arith.constant 5.000000e-01 : f32
    %1061 = vector.broadcast %cst_316 : f32 to vector<2x96xf32>
    %1062 = arith.mulf %1061, %1060 : vector<2x96xf32>
    %cst_317 = arith.constant 5.000000e-01 : f32
    %1063 = vector.broadcast %cst_317 : f32 to vector<2x96xf32>
    %1064 = arith.addf %1062, %1063 : vector<2x96xf32>
    %1065 = vector.extract_strided_slice %1056 {offsets = [0, 96], sizes = [2, 32], strides = [1, 1]} : vector<2x128xf32> to vector<2x32xf32>
    %1066 = math.tanh %1065 : vector<2x32xf32>
    %1067 = vector.extract_strided_slice %1064 {offsets = [0, 32], sizes = [2, 32], strides = [1, 1]} : vector<2x96xf32> to vector<2x32xf32>
    %1068 = arith.mulf %1067, %1049 : vector<2x32xf32>
    %1069 = vector.extract_strided_slice %1064 {offsets = [0, 0], sizes = [2, 32], strides = [1, 1]} : vector<2x96xf32> to vector<2x32xf32>
    %1070 = arith.mulf %1069, %1066 : vector<2x32xf32>
    %1071 = arith.addf %1068, %1070 : vector<2x32xf32>
    %1072 = vector.extract_strided_slice %1064 {offsets = [0, 64], sizes = [2, 32], strides = [1, 1]} : vector<2x96xf32> to vector<2x32xf32>
    %1073 = math.tanh %1071 : vector<2x32xf32>
    %1074 = arith.mulf %1072, %1073 : vector<2x32xf32>
    %1075 = vector.extract_strided_slice %830 {offsets = [22, 0], sizes = [2, 128], strides = [1, 1]} : vector<64x128xf32> to vector<2x128xf32>
    %c0_318 = arith.constant 0 : index
    %c0_319 = arith.constant 0 : index
    %1076 = vector.load %arg7[%c0_318, %c0_319] : memref<32x128xf32, #tpu.memory_space<vmem>>, vector<32x128xf32>
    %cst_320 = arith.constant dense<0.000000e+00> : vector<2x128xf32>
    %1077 = tpu.matmul %1074, %1076, %cst_320 {dimension_numbers = #tpu.dot_dimension_numbers<[1], [0], [0], [1], [0, 0, 1, 1], [], []>} : vector<2x32xf32>, vector<32x128xf32>, vector<2x128xf32> -> vector<2x128xf32>
    %1078 = arith.addf %1075, %1077 : vector<2x128xf32>
    %1079 = vector.extract_strided_slice %1078 {offsets = [0, 0], sizes = [2, 96], strides = [1, 1]} : vector<2x128xf32> to vector<2x96xf32>
    %cst_321 = arith.constant 5.000000e-01 : f32
    %1080 = vector.broadcast %cst_321 : f32 to vector<2x96xf32>
    %1081 = arith.mulf %1080, %1079 : vector<2x96xf32>
    %1082 = math.tanh %1081 : vector<2x96xf32>
    %cst_322 = arith.constant 5.000000e-01 : f32
    %1083 = vector.broadcast %cst_322 : f32 to vector<2x96xf32>
    %1084 = arith.mulf %1083, %1082 : vector<2x96xf32>
    %cst_323 = arith.constant 5.000000e-01 : f32
    %1085 = vector.broadcast %cst_323 : f32 to vector<2x96xf32>
    %1086 = arith.addf %1084, %1085 : vector<2x96xf32>
    %1087 = vector.extract_strided_slice %1078 {offsets = [0, 96], sizes = [2, 32], strides = [1, 1]} : vector<2x128xf32> to vector<2x32xf32>
    %1088 = math.tanh %1087 : vector<2x32xf32>
    %1089 = vector.extract_strided_slice %1086 {offsets = [0, 32], sizes = [2, 32], strides = [1, 1]} : vector<2x96xf32> to vector<2x32xf32>
    %1090 = arith.mulf %1089, %1071 : vector<2x32xf32>
    %1091 = vector.extract_strided_slice %1086 {offsets = [0, 0], sizes = [2, 32], strides = [1, 1]} : vector<2x96xf32> to vector<2x32xf32>
    %1092 = arith.mulf %1091, %1088 : vector<2x32xf32>
    %1093 = arith.addf %1090, %1092 : vector<2x32xf32>
    %1094 = vector.extract_strided_slice %1086 {offsets = [0, 64], sizes = [2, 32], strides = [1, 1]} : vector<2x96xf32> to vector<2x32xf32>
    %1095 = math.tanh %1093 : vector<2x32xf32>
    %1096 = arith.mulf %1094, %1095 : vector<2x32xf32>
    %1097 = vector.extract_strided_slice %830 {offsets = [24, 0], sizes = [2, 128], strides = [1, 1]} : vector<64x128xf32> to vector<2x128xf32>
    %c0_324 = arith.constant 0 : index
    %c0_325 = arith.constant 0 : index
    %1098 = vector.load %arg7[%c0_324, %c0_325] : memref<32x128xf32, #tpu.memory_space<vmem>>, vector<32x128xf32>
    %cst_326 = arith.constant dense<0.000000e+00> : vector<2x128xf32>
    %1099 = tpu.matmul %1096, %1098, %cst_326 {dimension_numbers = #tpu.dot_dimension_numbers<[1], [0], [0], [1], [0, 0, 1, 1], [], []>} : vector<2x32xf32>, vector<32x128xf32>, vector<2x128xf32> -> vector<2x128xf32>
    %1100 = arith.addf %1097, %1099 : vector<2x128xf32>
    %1101 = vector.extract_strided_slice %1100 {offsets = [0, 0], sizes = [2, 96], strides = [1, 1]} : vector<2x128xf32> to vector<2x96xf32>
    %cst_327 = arith.constant 5.000000e-01 : f32
    %1102 = vector.broadcast %cst_327 : f32 to vector<2x96xf32>
    %1103 = arith.mulf %1102, %1101 : vector<2x96xf32>
    %1104 = math.tanh %1103 : vector<2x96xf32>
    %cst_328 = arith.constant 5.000000e-01 : f32
    %1105 = vector.broadcast %cst_328 : f32 to vector<2x96xf32>
    %1106 = arith.mulf %1105, %1104 : vector<2x96xf32>
    %cst_329 = arith.constant 5.000000e-01 : f32
    %1107 = vector.broadcast %cst_329 : f32 to vector<2x96xf32>
    %1108 = arith.addf %1106, %1107 : vector<2x96xf32>
    %1109 = vector.extract_strided_slice %1100 {offsets = [0, 96], sizes = [2, 32], strides = [1, 1]} : vector<2x128xf32> to vector<2x32xf32>
    %1110 = math.tanh %1109 : vector<2x32xf32>
    %1111 = vector.extract_strided_slice %1108 {offsets = [0, 32], sizes = [2, 32], strides = [1, 1]} : vector<2x96xf32> to vector<2x32xf32>
    %1112 = arith.mulf %1111, %1093 : vector<2x32xf32>
    %1113 = vector.extract_strided_slice %1108 {offsets = [0, 0], sizes = [2, 32], strides = [1, 1]} : vector<2x96xf32> to vector<2x32xf32>
    %1114 = arith.mulf %1113, %1110 : vector<2x32xf32>
    %1115 = arith.addf %1112, %1114 : vector<2x32xf32>
    %1116 = vector.extract_strided_slice %1108 {offsets = [0, 64], sizes = [2, 32], strides = [1, 1]} : vector<2x96xf32> to vector<2x32xf32>
    %1117 = math.tanh %1115 : vector<2x32xf32>
    %1118 = arith.mulf %1116, %1117 : vector<2x32xf32>
    %1119 = vector.extract_strided_slice %830 {offsets = [26, 0], sizes = [2, 128], strides = [1, 1]} : vector<64x128xf32> to vector<2x128xf32>
    %c0_330 = arith.constant 0 : index
    %c0_331 = arith.constant 0 : index
    %1120 = vector.load %arg7[%c0_330, %c0_331] : memref<32x128xf32, #tpu.memory_space<vmem>>, vector<32x128xf32>
    %cst_332 = arith.constant dense<0.000000e+00> : vector<2x128xf32>
    %1121 = tpu.matmul %1118, %1120, %cst_332 {dimension_numbers = #tpu.dot_dimension_numbers<[1], [0], [0], [1], [0, 0, 1, 1], [], []>} : vector<2x32xf32>, vector<32x128xf32>, vector<2x128xf32> -> vector<2x128xf32>
    %1122 = arith.addf %1119, %1121 : vector<2x128xf32>
    %1123 = vector.extract_strided_slice %1122 {offsets = [0, 0], sizes = [2, 96], strides = [1, 1]} : vector<2x128xf32> to vector<2x96xf32>
    %cst_333 = arith.constant 5.000000e-01 : f32
    %1124 = vector.broadcast %cst_333 : f32 to vector<2x96xf32>
    %1125 = arith.mulf %1124, %1123 : vector<2x96xf32>
    %1126 = math.tanh %1125 : vector<2x96xf32>
    %cst_334 = arith.constant 5.000000e-01 : f32
    %1127 = vector.broadcast %cst_334 : f32 to vector<2x96xf32>
    %1128 = arith.mulf %1127, %1126 : vector<2x96xf32>
    %cst_335 = arith.constant 5.000000e-01 : f32
    %1129 = vector.broadcast %cst_335 : f32 to vector<2x96xf32>
    %1130 = arith.addf %1128, %1129 : vector<2x96xf32>
    %1131 = vector.extract_strided_slice %1122 {offsets = [0, 96], sizes = [2, 32], strides = [1, 1]} : vector<2x128xf32> to vector<2x32xf32>
    %1132 = math.tanh %1131 : vector<2x32xf32>
    %1133 = vector.extract_strided_slice %1130 {offsets = [0, 32], sizes = [2, 32], strides = [1, 1]} : vector<2x96xf32> to vector<2x32xf32>
    %1134 = arith.mulf %1133, %1115 : vector<2x32xf32>
    %1135 = vector.extract_strided_slice %1130 {offsets = [0, 0], sizes = [2, 32], strides = [1, 1]} : vector<2x96xf32> to vector<2x32xf32>
    %1136 = arith.mulf %1135, %1132 : vector<2x32xf32>
    %1137 = arith.addf %1134, %1136 : vector<2x32xf32>
    %1138 = vector.extract_strided_slice %1130 {offsets = [0, 64], sizes = [2, 32], strides = [1, 1]} : vector<2x96xf32> to vector<2x32xf32>
    %1139 = math.tanh %1137 : vector<2x32xf32>
    %1140 = arith.mulf %1138, %1139 : vector<2x32xf32>
    %1141 = vector.extract_strided_slice %830 {offsets = [28, 0], sizes = [2, 128], strides = [1, 1]} : vector<64x128xf32> to vector<2x128xf32>
    %c0_336 = arith.constant 0 : index
    %c0_337 = arith.constant 0 : index
    %1142 = vector.load %arg7[%c0_336, %c0_337] : memref<32x128xf32, #tpu.memory_space<vmem>>, vector<32x128xf32>
    %cst_338 = arith.constant dense<0.000000e+00> : vector<2x128xf32>
    %1143 = tpu.matmul %1140, %1142, %cst_338 {dimension_numbers = #tpu.dot_dimension_numbers<[1], [0], [0], [1], [0, 0, 1, 1], [], []>} : vector<2x32xf32>, vector<32x128xf32>, vector<2x128xf32> -> vector<2x128xf32>
    %1144 = arith.addf %1141, %1143 : vector<2x128xf32>
    %1145 = vector.extract_strided_slice %1144 {offsets = [0, 0], sizes = [2, 96], strides = [1, 1]} : vector<2x128xf32> to vector<2x96xf32>
    %cst_339 = arith.constant 5.000000e-01 : f32
    %1146 = vector.broadcast %cst_339 : f32 to vector<2x96xf32>
    %1147 = arith.mulf %1146, %1145 : vector<2x96xf32>
    %1148 = math.tanh %1147 : vector<2x96xf32>
    %cst_340 = arith.constant 5.000000e-01 : f32
    %1149 = vector.broadcast %cst_340 : f32 to vector<2x96xf32>
    %1150 = arith.mulf %1149, %1148 : vector<2x96xf32>
    %cst_341 = arith.constant 5.000000e-01 : f32
    %1151 = vector.broadcast %cst_341 : f32 to vector<2x96xf32>
    %1152 = arith.addf %1150, %1151 : vector<2x96xf32>
    %1153 = vector.extract_strided_slice %1144 {offsets = [0, 96], sizes = [2, 32], strides = [1, 1]} : vector<2x128xf32> to vector<2x32xf32>
    %1154 = math.tanh %1153 : vector<2x32xf32>
    %1155 = vector.extract_strided_slice %1152 {offsets = [0, 32], sizes = [2, 32], strides = [1, 1]} : vector<2x96xf32> to vector<2x32xf32>
    %1156 = arith.mulf %1155, %1137 : vector<2x32xf32>
    %1157 = vector.extract_strided_slice %1152 {offsets = [0, 0], sizes = [2, 32], strides = [1, 1]} : vector<2x96xf32> to vector<2x32xf32>
    %1158 = arith.mulf %1157, %1154 : vector<2x32xf32>
    %1159 = arith.addf %1156, %1158 : vector<2x32xf32>
    %1160 = vector.extract_strided_slice %1152 {offsets = [0, 64], sizes = [2, 32], strides = [1, 1]} : vector<2x96xf32> to vector<2x32xf32>
    %1161 = math.tanh %1159 : vector<2x32xf32>
    %1162 = arith.mulf %1160, %1161 : vector<2x32xf32>
    %1163 = vector.extract_strided_slice %830 {offsets = [30, 0], sizes = [2, 128], strides = [1, 1]} : vector<64x128xf32> to vector<2x128xf32>
    %c0_342 = arith.constant 0 : index
    %c0_343 = arith.constant 0 : index
    %1164 = vector.load %arg7[%c0_342, %c0_343] : memref<32x128xf32, #tpu.memory_space<vmem>>, vector<32x128xf32>
    %cst_344 = arith.constant dense<0.000000e+00> : vector<2x128xf32>
    %1165 = tpu.matmul %1162, %1164, %cst_344 {dimension_numbers = #tpu.dot_dimension_numbers<[1], [0], [0], [1], [0, 0, 1, 1], [], []>} : vector<2x32xf32>, vector<32x128xf32>, vector<2x128xf32> -> vector<2x128xf32>
    %1166 = arith.addf %1163, %1165 : vector<2x128xf32>
    %1167 = vector.extract_strided_slice %1166 {offsets = [0, 0], sizes = [2, 96], strides = [1, 1]} : vector<2x128xf32> to vector<2x96xf32>
    %cst_345 = arith.constant 5.000000e-01 : f32
    %1168 = vector.broadcast %cst_345 : f32 to vector<2x96xf32>
    %1169 = arith.mulf %1168, %1167 : vector<2x96xf32>
    %1170 = math.tanh %1169 : vector<2x96xf32>
    %cst_346 = arith.constant 5.000000e-01 : f32
    %1171 = vector.broadcast %cst_346 : f32 to vector<2x96xf32>
    %1172 = arith.mulf %1171, %1170 : vector<2x96xf32>
    %cst_347 = arith.constant 5.000000e-01 : f32
    %1173 = vector.broadcast %cst_347 : f32 to vector<2x96xf32>
    %1174 = arith.addf %1172, %1173 : vector<2x96xf32>
    %1175 = vector.extract_strided_slice %1166 {offsets = [0, 96], sizes = [2, 32], strides = [1, 1]} : vector<2x128xf32> to vector<2x32xf32>
    %1176 = math.tanh %1175 : vector<2x32xf32>
    %1177 = vector.extract_strided_slice %1174 {offsets = [0, 32], sizes = [2, 32], strides = [1, 1]} : vector<2x96xf32> to vector<2x32xf32>
    %1178 = arith.mulf %1177, %1159 : vector<2x32xf32>
    %1179 = vector.extract_strided_slice %1174 {offsets = [0, 0], sizes = [2, 32], strides = [1, 1]} : vector<2x96xf32> to vector<2x32xf32>
    %1180 = arith.mulf %1179, %1176 : vector<2x32xf32>
    %1181 = arith.addf %1178, %1180 : vector<2x32xf32>
    %1182 = vector.extract_strided_slice %1174 {offsets = [0, 64], sizes = [2, 32], strides = [1, 1]} : vector<2x96xf32> to vector<2x32xf32>
    %1183 = math.tanh %1181 : vector<2x32xf32>
    %1184 = arith.mulf %1182, %1183 : vector<2x32xf32>
    %1185 = vector.extract_strided_slice %830 {offsets = [32, 0], sizes = [2, 128], strides = [1, 1]} : vector<64x128xf32> to vector<2x128xf32>
    %c0_348 = arith.constant 0 : index
    %c0_349 = arith.constant 0 : index
    %1186 = vector.load %arg7[%c0_348, %c0_349] : memref<32x128xf32, #tpu.memory_space<vmem>>, vector<32x128xf32>
    %cst_350 = arith.constant dense<0.000000e+00> : vector<2x128xf32>
    %1187 = tpu.matmul %1184, %1186, %cst_350 {dimension_numbers = #tpu.dot_dimension_numbers<[1], [0], [0], [1], [0, 0, 1, 1], [], []>} : vector<2x32xf32>, vector<32x128xf32>, vector<2x128xf32> -> vector<2x128xf32>
    %1188 = arith.addf %1185, %1187 : vector<2x128xf32>
    %1189 = vector.extract_strided_slice %1188 {offsets = [0, 0], sizes = [2, 96], strides = [1, 1]} : vector<2x128xf32> to vector<2x96xf32>
    %cst_351 = arith.constant 5.000000e-01 : f32
    %1190 = vector.broadcast %cst_351 : f32 to vector<2x96xf32>
    %1191 = arith.mulf %1190, %1189 : vector<2x96xf32>
    %1192 = math.tanh %1191 : vector<2x96xf32>
    %cst_352 = arith.constant 5.000000e-01 : f32
    %1193 = vector.broadcast %cst_352 : f32 to vector<2x96xf32>
    %1194 = arith.mulf %1193, %1192 : vector<2x96xf32>
    %cst_353 = arith.constant 5.000000e-01 : f32
    %1195 = vector.broadcast %cst_353 : f32 to vector<2x96xf32>
    %1196 = arith.addf %1194, %1195 : vector<2x96xf32>
    %1197 = vector.extract_strided_slice %1188 {offsets = [0, 96], sizes = [2, 32], strides = [1, 1]} : vector<2x128xf32> to vector<2x32xf32>
    %1198 = math.tanh %1197 : vector<2x32xf32>
    %1199 = vector.extract_strided_slice %1196 {offsets = [0, 32], sizes = [2, 32], strides = [1, 1]} : vector<2x96xf32> to vector<2x32xf32>
    %1200 = arith.mulf %1199, %1181 : vector<2x32xf32>
    %1201 = vector.extract_strided_slice %1196 {offsets = [0, 0], sizes = [2, 32], strides = [1, 1]} : vector<2x96xf32> to vector<2x32xf32>
    %1202 = arith.mulf %1201, %1198 : vector<2x32xf32>
    %1203 = arith.addf %1200, %1202 : vector<2x32xf32>
    %1204 = vector.extract_strided_slice %1196 {offsets = [0, 64], sizes = [2, 32], strides = [1, 1]} : vector<2x96xf32> to vector<2x32xf32>
    %1205 = math.tanh %1203 : vector<2x32xf32>
    %1206 = arith.mulf %1204, %1205 : vector<2x32xf32>
    %1207 = vector.extract_strided_slice %830 {offsets = [34, 0], sizes = [2, 128], strides = [1, 1]} : vector<64x128xf32> to vector<2x128xf32>
    %c0_354 = arith.constant 0 : index
    %c0_355 = arith.constant 0 : index
    %1208 = vector.load %arg7[%c0_354, %c0_355] : memref<32x128xf32, #tpu.memory_space<vmem>>, vector<32x128xf32>
    %cst_356 = arith.constant dense<0.000000e+00> : vector<2x128xf32>
    %1209 = tpu.matmul %1206, %1208, %cst_356 {dimension_numbers = #tpu.dot_dimension_numbers<[1], [0], [0], [1], [0, 0, 1, 1], [], []>} : vector<2x32xf32>, vector<32x128xf32>, vector<2x128xf32> -> vector<2x128xf32>
    %1210 = arith.addf %1207, %1209 : vector<2x128xf32>
    %1211 = vector.extract_strided_slice %1210 {offsets = [0, 0], sizes = [2, 96], strides = [1, 1]} : vector<2x128xf32> to vector<2x96xf32>
    %cst_357 = arith.constant 5.000000e-01 : f32
    %1212 = vector.broadcast %cst_357 : f32 to vector<2x96xf32>
    %1213 = arith.mulf %1212, %1211 : vector<2x96xf32>
    %1214 = math.tanh %1213 : vector<2x96xf32>
    %cst_358 = arith.constant 5.000000e-01 : f32
    %1215 = vector.broadcast %cst_358 : f32 to vector<2x96xf32>
    %1216 = arith.mulf %1215, %1214 : vector<2x96xf32>
    %cst_359 = arith.constant 5.000000e-01 : f32
    %1217 = vector.broadcast %cst_359 : f32 to vector<2x96xf32>
    %1218 = arith.addf %1216, %1217 : vector<2x96xf32>
    %1219 = vector.extract_strided_slice %1210 {offsets = [0, 96], sizes = [2, 32], strides = [1, 1]} : vector<2x128xf32> to vector<2x32xf32>
    %1220 = math.tanh %1219 : vector<2x32xf32>
    %1221 = vector.extract_strided_slice %1218 {offsets = [0, 32], sizes = [2, 32], strides = [1, 1]} : vector<2x96xf32> to vector<2x32xf32>
    %1222 = arith.mulf %1221, %1203 : vector<2x32xf32>
    %1223 = vector.extract_strided_slice %1218 {offsets = [0, 0], sizes = [2, 32], strides = [1, 1]} : vector<2x96xf32> to vector<2x32xf32>
    %1224 = arith.mulf %1223, %1220 : vector<2x32xf32>
    %1225 = arith.addf %1222, %1224 : vector<2x32xf32>
    %1226 = vector.extract_strided_slice %1218 {offsets = [0, 64], sizes = [2, 32], strides = [1, 1]} : vector<2x96xf32> to vector<2x32xf32>
    %1227 = math.tanh %1225 : vector<2x32xf32>
    %1228 = arith.mulf %1226, %1227 : vector<2x32xf32>
    %1229 = vector.extract_strided_slice %830 {offsets = [36, 0], sizes = [2, 128], strides = [1, 1]} : vector<64x128xf32> to vector<2x128xf32>
    %c0_360 = arith.constant 0 : index
    %c0_361 = arith.constant 0 : index
    %1230 = vector.load %arg7[%c0_360, %c0_361] : memref<32x128xf32, #tpu.memory_space<vmem>>, vector<32x128xf32>
    %cst_362 = arith.constant dense<0.000000e+00> : vector<2x128xf32>
    %1231 = tpu.matmul %1228, %1230, %cst_362 {dimension_numbers = #tpu.dot_dimension_numbers<[1], [0], [0], [1], [0, 0, 1, 1], [], []>} : vector<2x32xf32>, vector<32x128xf32>, vector<2x128xf32> -> vector<2x128xf32>
    %1232 = arith.addf %1229, %1231 : vector<2x128xf32>
    %1233 = vector.extract_strided_slice %1232 {offsets = [0, 0], sizes = [2, 96], strides = [1, 1]} : vector<2x128xf32> to vector<2x96xf32>
    %cst_363 = arith.constant 5.000000e-01 : f32
    %1234 = vector.broadcast %cst_363 : f32 to vector<2x96xf32>
    %1235 = arith.mulf %1234, %1233 : vector<2x96xf32>
    %1236 = math.tanh %1235 : vector<2x96xf32>
    %cst_364 = arith.constant 5.000000e-01 : f32
    %1237 = vector.broadcast %cst_364 : f32 to vector<2x96xf32>
    %1238 = arith.mulf %1237, %1236 : vector<2x96xf32>
    %cst_365 = arith.constant 5.000000e-01 : f32
    %1239 = vector.broadcast %cst_365 : f32 to vector<2x96xf32>
    %1240 = arith.addf %1238, %1239 : vector<2x96xf32>
    %1241 = vector.extract_strided_slice %1232 {offsets = [0, 96], sizes = [2, 32], strides = [1, 1]} : vector<2x128xf32> to vector<2x32xf32>
    %1242 = math.tanh %1241 : vector<2x32xf32>
    %1243 = vector.extract_strided_slice %1240 {offsets = [0, 32], sizes = [2, 32], strides = [1, 1]} : vector<2x96xf32> to vector<2x32xf32>
    %1244 = arith.mulf %1243, %1225 : vector<2x32xf32>
    %1245 = vector.extract_strided_slice %1240 {offsets = [0, 0], sizes = [2, 32], strides = [1, 1]} : vector<2x96xf32> to vector<2x32xf32>
    %1246 = arith.mulf %1245, %1242 : vector<2x32xf32>
    %1247 = arith.addf %1244, %1246 : vector<2x32xf32>
    %1248 = vector.extract_strided_slice %1240 {offsets = [0, 64], sizes = [2, 32], strides = [1, 1]} : vector<2x96xf32> to vector<2x32xf32>
    %1249 = math.tanh %1247 : vector<2x32xf32>
    %1250 = arith.mulf %1248, %1249 : vector<2x32xf32>
    %1251 = vector.extract_strided_slice %830 {offsets = [38, 0], sizes = [2, 128], strides = [1, 1]} : vector<64x128xf32> to vector<2x128xf32>
    %c0_366 = arith.constant 0 : index
    %c0_367 = arith.constant 0 : index
    %1252 = vector.load %arg7[%c0_366, %c0_367] : memref<32x128xf32, #tpu.memory_space<vmem>>, vector<32x128xf32>
    %cst_368 = arith.constant dense<0.000000e+00> : vector<2x128xf32>
    %1253 = tpu.matmul %1250, %1252, %cst_368 {dimension_numbers = #tpu.dot_dimension_numbers<[1], [0], [0], [1], [0, 0, 1, 1], [], []>} : vector<2x32xf32>, vector<32x128xf32>, vector<2x128xf32> -> vector<2x128xf32>
    %1254 = arith.addf %1251, %1253 : vector<2x128xf32>
    %1255 = vector.extract_strided_slice %1254 {offsets = [0, 0], sizes = [2, 96], strides = [1, 1]} : vector<2x128xf32> to vector<2x96xf32>
    %cst_369 = arith.constant 5.000000e-01 : f32
    %1256 = vector.broadcast %cst_369 : f32 to vector<2x96xf32>
    %1257 = arith.mulf %1256, %1255 : vector<2x96xf32>
    %1258 = math.tanh %1257 : vector<2x96xf32>
    %cst_370 = arith.constant 5.000000e-01 : f32
    %1259 = vector.broadcast %cst_370 : f32 to vector<2x96xf32>
    %1260 = arith.mulf %1259, %1258 : vector<2x96xf32>
    %cst_371 = arith.constant 5.000000e-01 : f32
    %1261 = vector.broadcast %cst_371 : f32 to vector<2x96xf32>
    %1262 = arith.addf %1260, %1261 : vector<2x96xf32>
    %1263 = vector.extract_strided_slice %1254 {offsets = [0, 96], sizes = [2, 32], strides = [1, 1]} : vector<2x128xf32> to vector<2x32xf32>
    %1264 = math.tanh %1263 : vector<2x32xf32>
    %1265 = vector.extract_strided_slice %1262 {offsets = [0, 32], sizes = [2, 32], strides = [1, 1]} : vector<2x96xf32> to vector<2x32xf32>
    %1266 = arith.mulf %1265, %1247 : vector<2x32xf32>
    %1267 = vector.extract_strided_slice %1262 {offsets = [0, 0], sizes = [2, 32], strides = [1, 1]} : vector<2x96xf32> to vector<2x32xf32>
    %1268 = arith.mulf %1267, %1264 : vector<2x32xf32>
    %1269 = arith.addf %1266, %1268 : vector<2x32xf32>
    %1270 = vector.extract_strided_slice %1262 {offsets = [0, 64], sizes = [2, 32], strides = [1, 1]} : vector<2x96xf32> to vector<2x32xf32>
    %1271 = math.tanh %1269 : vector<2x32xf32>
    %1272 = arith.mulf %1270, %1271 : vector<2x32xf32>
    %1273 = vector.extract_strided_slice %830 {offsets = [40, 0], sizes = [2, 128], strides = [1, 1]} : vector<64x128xf32> to vector<2x128xf32>
    %c0_372 = arith.constant 0 : index
    %c0_373 = arith.constant 0 : index
    %1274 = vector.load %arg7[%c0_372, %c0_373] : memref<32x128xf32, #tpu.memory_space<vmem>>, vector<32x128xf32>
    %cst_374 = arith.constant dense<0.000000e+00> : vector<2x128xf32>
    %1275 = tpu.matmul %1272, %1274, %cst_374 {dimension_numbers = #tpu.dot_dimension_numbers<[1], [0], [0], [1], [0, 0, 1, 1], [], []>} : vector<2x32xf32>, vector<32x128xf32>, vector<2x128xf32> -> vector<2x128xf32>
    %1276 = arith.addf %1273, %1275 : vector<2x128xf32>
    %1277 = vector.extract_strided_slice %1276 {offsets = [0, 0], sizes = [2, 96], strides = [1, 1]} : vector<2x128xf32> to vector<2x96xf32>
    %cst_375 = arith.constant 5.000000e-01 : f32
    %1278 = vector.broadcast %cst_375 : f32 to vector<2x96xf32>
    %1279 = arith.mulf %1278, %1277 : vector<2x96xf32>
    %1280 = math.tanh %1279 : vector<2x96xf32>
    %cst_376 = arith.constant 5.000000e-01 : f32
    %1281 = vector.broadcast %cst_376 : f32 to vector<2x96xf32>
    %1282 = arith.mulf %1281, %1280 : vector<2x96xf32>
    %cst_377 = arith.constant 5.000000e-01 : f32
    %1283 = vector.broadcast %cst_377 : f32 to vector<2x96xf32>
    %1284 = arith.addf %1282, %1283 : vector<2x96xf32>
    %1285 = vector.extract_strided_slice %1276 {offsets = [0, 96], sizes = [2, 32], strides = [1, 1]} : vector<2x128xf32> to vector<2x32xf32>
    %1286 = math.tanh %1285 : vector<2x32xf32>
    %1287 = vector.extract_strided_slice %1284 {offsets = [0, 32], sizes = [2, 32], strides = [1, 1]} : vector<2x96xf32> to vector<2x32xf32>
    %1288 = arith.mulf %1287, %1269 : vector<2x32xf32>
    %1289 = vector.extract_strided_slice %1284 {offsets = [0, 0], sizes = [2, 32], strides = [1, 1]} : vector<2x96xf32> to vector<2x32xf32>
    %1290 = arith.mulf %1289, %1286 : vector<2x32xf32>
    %1291 = arith.addf %1288, %1290 : vector<2x32xf32>
    %1292 = vector.extract_strided_slice %1284 {offsets = [0, 64], sizes = [2, 32], strides = [1, 1]} : vector<2x96xf32> to vector<2x32xf32>
    %1293 = math.tanh %1291 : vector<2x32xf32>
    %1294 = arith.mulf %1292, %1293 : vector<2x32xf32>
    %1295 = vector.extract_strided_slice %830 {offsets = [42, 0], sizes = [2, 128], strides = [1, 1]} : vector<64x128xf32> to vector<2x128xf32>
    %c0_378 = arith.constant 0 : index
    %c0_379 = arith.constant 0 : index
    %1296 = vector.load %arg7[%c0_378, %c0_379] : memref<32x128xf32, #tpu.memory_space<vmem>>, vector<32x128xf32>
    %cst_380 = arith.constant dense<0.000000e+00> : vector<2x128xf32>
    %1297 = tpu.matmul %1294, %1296, %cst_380 {dimension_numbers = #tpu.dot_dimension_numbers<[1], [0], [0], [1], [0, 0, 1, 1], [], []>} : vector<2x32xf32>, vector<32x128xf32>, vector<2x128xf32> -> vector<2x128xf32>
    %1298 = arith.addf %1295, %1297 : vector<2x128xf32>
    %1299 = vector.extract_strided_slice %1298 {offsets = [0, 0], sizes = [2, 96], strides = [1, 1]} : vector<2x128xf32> to vector<2x96xf32>
    %cst_381 = arith.constant 5.000000e-01 : f32
    %1300 = vector.broadcast %cst_381 : f32 to vector<2x96xf32>
    %1301 = arith.mulf %1300, %1299 : vector<2x96xf32>
    %1302 = math.tanh %1301 : vector<2x96xf32>
    %cst_382 = arith.constant 5.000000e-01 : f32
    %1303 = vector.broadcast %cst_382 : f32 to vector<2x96xf32>
    %1304 = arith.mulf %1303, %1302 : vector<2x96xf32>
    %cst_383 = arith.constant 5.000000e-01 : f32
    %1305 = vector.broadcast %cst_383 : f32 to vector<2x96xf32>
    %1306 = arith.addf %1304, %1305 : vector<2x96xf32>
    %1307 = vector.extract_strided_slice %1298 {offsets = [0, 96], sizes = [2, 32], strides = [1, 1]} : vector<2x128xf32> to vector<2x32xf32>
    %1308 = math.tanh %1307 : vector<2x32xf32>
    %1309 = vector.extract_strided_slice %1306 {offsets = [0, 32], sizes = [2, 32], strides = [1, 1]} : vector<2x96xf32> to vector<2x32xf32>
    %1310 = arith.mulf %1309, %1291 : vector<2x32xf32>
    %1311 = vector.extract_strided_slice %1306 {offsets = [0, 0], sizes = [2, 32], strides = [1, 1]} : vector<2x96xf32> to vector<2x32xf32>
    %1312 = arith.mulf %1311, %1308 : vector<2x32xf32>
    %1313 = arith.addf %1310, %1312 : vector<2x32xf32>
    %1314 = vector.extract_strided_slice %1306 {offsets = [0, 64], sizes = [2, 32], strides = [1, 1]} : vector<2x96xf32> to vector<2x32xf32>
    %1315 = math.tanh %1313 : vector<2x32xf32>
    %1316 = arith.mulf %1314, %1315 : vector<2x32xf32>
    %1317 = vector.extract_strided_slice %830 {offsets = [44, 0], sizes = [2, 128], strides = [1, 1]} : vector<64x128xf32> to vector<2x128xf32>
    %c0_384 = arith.constant 0 : index
    %c0_385 = arith.constant 0 : index
    %1318 = vector.load %arg7[%c0_384, %c0_385] : memref<32x128xf32, #tpu.memory_space<vmem>>, vector<32x128xf32>
    %cst_386 = arith.constant dense<0.000000e+00> : vector<2x128xf32>
    %1319 = tpu.matmul %1316, %1318, %cst_386 {dimension_numbers = #tpu.dot_dimension_numbers<[1], [0], [0], [1], [0, 0, 1, 1], [], []>} : vector<2x32xf32>, vector<32x128xf32>, vector<2x128xf32> -> vector<2x128xf32>
    %1320 = arith.addf %1317, %1319 : vector<2x128xf32>
    %1321 = vector.extract_strided_slice %1320 {offsets = [0, 0], sizes = [2, 96], strides = [1, 1]} : vector<2x128xf32> to vector<2x96xf32>
    %cst_387 = arith.constant 5.000000e-01 : f32
    %1322 = vector.broadcast %cst_387 : f32 to vector<2x96xf32>
    %1323 = arith.mulf %1322, %1321 : vector<2x96xf32>
    %1324 = math.tanh %1323 : vector<2x96xf32>
    %cst_388 = arith.constant 5.000000e-01 : f32
    %1325 = vector.broadcast %cst_388 : f32 to vector<2x96xf32>
    %1326 = arith.mulf %1325, %1324 : vector<2x96xf32>
    %cst_389 = arith.constant 5.000000e-01 : f32
    %1327 = vector.broadcast %cst_389 : f32 to vector<2x96xf32>
    %1328 = arith.addf %1326, %1327 : vector<2x96xf32>
    %1329 = vector.extract_strided_slice %1320 {offsets = [0, 96], sizes = [2, 32], strides = [1, 1]} : vector<2x128xf32> to vector<2x32xf32>
    %1330 = math.tanh %1329 : vector<2x32xf32>
    %1331 = vector.extract_strided_slice %1328 {offsets = [0, 32], sizes = [2, 32], strides = [1, 1]} : vector<2x96xf32> to vector<2x32xf32>
    %1332 = arith.mulf %1331, %1313 : vector<2x32xf32>
    %1333 = vector.extract_strided_slice %1328 {offsets = [0, 0], sizes = [2, 32], strides = [1, 1]} : vector<2x96xf32> to vector<2x32xf32>
    %1334 = arith.mulf %1333, %1330 : vector<2x32xf32>
    %1335 = arith.addf %1332, %1334 : vector<2x32xf32>
    %1336 = vector.extract_strided_slice %1328 {offsets = [0, 64], sizes = [2, 32], strides = [1, 1]} : vector<2x96xf32> to vector<2x32xf32>
    %1337 = math.tanh %1335 : vector<2x32xf32>
    %1338 = arith.mulf %1336, %1337 : vector<2x32xf32>
    %1339 = vector.extract_strided_slice %830 {offsets = [46, 0], sizes = [2, 128], strides = [1, 1]} : vector<64x128xf32> to vector<2x128xf32>
    %c0_390 = arith.constant 0 : index
    %c0_391 = arith.constant 0 : index
    %1340 = vector.load %arg7[%c0_390, %c0_391] : memref<32x128xf32, #tpu.memory_space<vmem>>, vector<32x128xf32>
    %cst_392 = arith.constant dense<0.000000e+00> : vector<2x128xf32>
    %1341 = tpu.matmul %1338, %1340, %cst_392 {dimension_numbers = #tpu.dot_dimension_numbers<[1], [0], [0], [1], [0, 0, 1, 1], [], []>} : vector<2x32xf32>, vector<32x128xf32>, vector<2x128xf32> -> vector<2x128xf32>
    %1342 = arith.addf %1339, %1341 : vector<2x128xf32>
    %1343 = vector.extract_strided_slice %1342 {offsets = [0, 0], sizes = [2, 96], strides = [1, 1]} : vector<2x128xf32> to vector<2x96xf32>
    %cst_393 = arith.constant 5.000000e-01 : f32
    %1344 = vector.broadcast %cst_393 : f32 to vector<2x96xf32>
    %1345 = arith.mulf %1344, %1343 : vector<2x96xf32>
    %1346 = math.tanh %1345 : vector<2x96xf32>
    %cst_394 = arith.constant 5.000000e-01 : f32
    %1347 = vector.broadcast %cst_394 : f32 to vector<2x96xf32>
    %1348 = arith.mulf %1347, %1346 : vector<2x96xf32>
    %cst_395 = arith.constant 5.000000e-01 : f32
    %1349 = vector.broadcast %cst_395 : f32 to vector<2x96xf32>
    %1350 = arith.addf %1348, %1349 : vector<2x96xf32>
    %1351 = vector.extract_strided_slice %1342 {offsets = [0, 96], sizes = [2, 32], strides = [1, 1]} : vector<2x128xf32> to vector<2x32xf32>
    %1352 = math.tanh %1351 : vector<2x32xf32>
    %1353 = vector.extract_strided_slice %1350 {offsets = [0, 32], sizes = [2, 32], strides = [1, 1]} : vector<2x96xf32> to vector<2x32xf32>
    %1354 = arith.mulf %1353, %1335 : vector<2x32xf32>
    %1355 = vector.extract_strided_slice %1350 {offsets = [0, 0], sizes = [2, 32], strides = [1, 1]} : vector<2x96xf32> to vector<2x32xf32>
    %1356 = arith.mulf %1355, %1352 : vector<2x32xf32>
    %1357 = arith.addf %1354, %1356 : vector<2x32xf32>
    %1358 = vector.extract_strided_slice %1350 {offsets = [0, 64], sizes = [2, 32], strides = [1, 1]} : vector<2x96xf32> to vector<2x32xf32>
    %1359 = math.tanh %1357 : vector<2x32xf32>
    %1360 = arith.mulf %1358, %1359 : vector<2x32xf32>
    %1361 = vector.extract_strided_slice %830 {offsets = [48, 0], sizes = [2, 128], strides = [1, 1]} : vector<64x128xf32> to vector<2x128xf32>
    %c0_396 = arith.constant 0 : index
    %c0_397 = arith.constant 0 : index
    %1362 = vector.load %arg7[%c0_396, %c0_397] : memref<32x128xf32, #tpu.memory_space<vmem>>, vector<32x128xf32>
    %cst_398 = arith.constant dense<0.000000e+00> : vector<2x128xf32>
    %1363 = tpu.matmul %1360, %1362, %cst_398 {dimension_numbers = #tpu.dot_dimension_numbers<[1], [0], [0], [1], [0, 0, 1, 1], [], []>} : vector<2x32xf32>, vector<32x128xf32>, vector<2x128xf32> -> vector<2x128xf32>
    %1364 = arith.addf %1361, %1363 : vector<2x128xf32>
    %1365 = vector.extract_strided_slice %1364 {offsets = [0, 0], sizes = [2, 96], strides = [1, 1]} : vector<2x128xf32> to vector<2x96xf32>
    %cst_399 = arith.constant 5.000000e-01 : f32
    %1366 = vector.broadcast %cst_399 : f32 to vector<2x96xf32>
    %1367 = arith.mulf %1366, %1365 : vector<2x96xf32>
    %1368 = math.tanh %1367 : vector<2x96xf32>
    %cst_400 = arith.constant 5.000000e-01 : f32
    %1369 = vector.broadcast %cst_400 : f32 to vector<2x96xf32>
    %1370 = arith.mulf %1369, %1368 : vector<2x96xf32>
    %cst_401 = arith.constant 5.000000e-01 : f32
    %1371 = vector.broadcast %cst_401 : f32 to vector<2x96xf32>
    %1372 = arith.addf %1370, %1371 : vector<2x96xf32>
    %1373 = vector.extract_strided_slice %1364 {offsets = [0, 96], sizes = [2, 32], strides = [1, 1]} : vector<2x128xf32> to vector<2x32xf32>
    %1374 = math.tanh %1373 : vector<2x32xf32>
    %1375 = vector.extract_strided_slice %1372 {offsets = [0, 32], sizes = [2, 32], strides = [1, 1]} : vector<2x96xf32> to vector<2x32xf32>
    %1376 = arith.mulf %1375, %1357 : vector<2x32xf32>
    %1377 = vector.extract_strided_slice %1372 {offsets = [0, 0], sizes = [2, 32], strides = [1, 1]} : vector<2x96xf32> to vector<2x32xf32>
    %1378 = arith.mulf %1377, %1374 : vector<2x32xf32>
    %1379 = arith.addf %1376, %1378 : vector<2x32xf32>
    %1380 = vector.extract_strided_slice %1372 {offsets = [0, 64], sizes = [2, 32], strides = [1, 1]} : vector<2x96xf32> to vector<2x32xf32>
    %1381 = math.tanh %1379 : vector<2x32xf32>
    %1382 = arith.mulf %1380, %1381 : vector<2x32xf32>
    %1383 = vector.extract_strided_slice %830 {offsets = [50, 0], sizes = [2, 128], strides = [1, 1]} : vector<64x128xf32> to vector<2x128xf32>
    %c0_402 = arith.constant 0 : index
    %c0_403 = arith.constant 0 : index
    %1384 = vector.load %arg7[%c0_402, %c0_403] : memref<32x128xf32, #tpu.memory_space<vmem>>, vector<32x128xf32>
    %cst_404 = arith.constant dense<0.000000e+00> : vector<2x128xf32>
    %1385 = tpu.matmul %1382, %1384, %cst_404 {dimension_numbers = #tpu.dot_dimension_numbers<[1], [0], [0], [1], [0, 0, 1, 1], [], []>} : vector<2x32xf32>, vector<32x128xf32>, vector<2x128xf32> -> vector<2x128xf32>
    %1386 = arith.addf %1383, %1385 : vector<2x128xf32>
    %1387 = vector.extract_strided_slice %1386 {offsets = [0, 0], sizes = [2, 96], strides = [1, 1]} : vector<2x128xf32> to vector<2x96xf32>
    %cst_405 = arith.constant 5.000000e-01 : f32
    %1388 = vector.broadcast %cst_405 : f32 to vector<2x96xf32>
    %1389 = arith.mulf %1388, %1387 : vector<2x96xf32>
    %1390 = math.tanh %1389 : vector<2x96xf32>
    %cst_406 = arith.constant 5.000000e-01 : f32
    %1391 = vector.broadcast %cst_406 : f32 to vector<2x96xf32>
    %1392 = arith.mulf %1391, %1390 : vector<2x96xf32>
    %cst_407 = arith.constant 5.000000e-01 : f32
    %1393 = vector.broadcast %cst_407 : f32 to vector<2x96xf32>
    %1394 = arith.addf %1392, %1393 : vector<2x96xf32>
    %1395 = vector.extract_strided_slice %1386 {offsets = [0, 96], sizes = [2, 32], strides = [1, 1]} : vector<2x128xf32> to vector<2x32xf32>
    %1396 = math.tanh %1395 : vector<2x32xf32>
    %1397 = vector.extract_strided_slice %1394 {offsets = [0, 32], sizes = [2, 32], strides = [1, 1]} : vector<2x96xf32> to vector<2x32xf32>
    %1398 = arith.mulf %1397, %1379 : vector<2x32xf32>
    %1399 = vector.extract_strided_slice %1394 {offsets = [0, 0], sizes = [2, 32], strides = [1, 1]} : vector<2x96xf32> to vector<2x32xf32>
    %1400 = arith.mulf %1399, %1396 : vector<2x32xf32>
    %1401 = arith.addf %1398, %1400 : vector<2x32xf32>
    %1402 = vector.extract_strided_slice %1394 {offsets = [0, 64], sizes = [2, 32], strides = [1, 1]} : vector<2x96xf32> to vector<2x32xf32>
    %1403 = math.tanh %1401 : vector<2x32xf32>
    %1404 = arith.mulf %1402, %1403 : vector<2x32xf32>
    %1405 = vector.extract_strided_slice %830 {offsets = [52, 0], sizes = [2, 128], strides = [1, 1]} : vector<64x128xf32> to vector<2x128xf32>
    %c0_408 = arith.constant 0 : index
    %c0_409 = arith.constant 0 : index
    %1406 = vector.load %arg7[%c0_408, %c0_409] : memref<32x128xf32, #tpu.memory_space<vmem>>, vector<32x128xf32>
    %cst_410 = arith.constant dense<0.000000e+00> : vector<2x128xf32>
    %1407 = tpu.matmul %1404, %1406, %cst_410 {dimension_numbers = #tpu.dot_dimension_numbers<[1], [0], [0], [1], [0, 0, 1, 1], [], []>} : vector<2x32xf32>, vector<32x128xf32>, vector<2x128xf32> -> vector<2x128xf32>
    %1408 = arith.addf %1405, %1407 : vector<2x128xf32>
    %1409 = vector.extract_strided_slice %1408 {offsets = [0, 0], sizes = [2, 96], strides = [1, 1]} : vector<2x128xf32> to vector<2x96xf32>
    %cst_411 = arith.constant 5.000000e-01 : f32
    %1410 = vector.broadcast %cst_411 : f32 to vector<2x96xf32>
    %1411 = arith.mulf %1410, %1409 : vector<2x96xf32>
    %1412 = math.tanh %1411 : vector<2x96xf32>
    %cst_412 = arith.constant 5.000000e-01 : f32
    %1413 = vector.broadcast %cst_412 : f32 to vector<2x96xf32>
    %1414 = arith.mulf %1413, %1412 : vector<2x96xf32>
    %cst_413 = arith.constant 5.000000e-01 : f32
    %1415 = vector.broadcast %cst_413 : f32 to vector<2x96xf32>
    %1416 = arith.addf %1414, %1415 : vector<2x96xf32>
    %1417 = vector.extract_strided_slice %1408 {offsets = [0, 96], sizes = [2, 32], strides = [1, 1]} : vector<2x128xf32> to vector<2x32xf32>
    %1418 = math.tanh %1417 : vector<2x32xf32>
    %1419 = vector.extract_strided_slice %1416 {offsets = [0, 32], sizes = [2, 32], strides = [1, 1]} : vector<2x96xf32> to vector<2x32xf32>
    %1420 = arith.mulf %1419, %1401 : vector<2x32xf32>
    %1421 = vector.extract_strided_slice %1416 {offsets = [0, 0], sizes = [2, 32], strides = [1, 1]} : vector<2x96xf32> to vector<2x32xf32>
    %1422 = arith.mulf %1421, %1418 : vector<2x32xf32>
    %1423 = arith.addf %1420, %1422 : vector<2x32xf32>
    %1424 = vector.extract_strided_slice %1416 {offsets = [0, 64], sizes = [2, 32], strides = [1, 1]} : vector<2x96xf32> to vector<2x32xf32>
    %1425 = math.tanh %1423 : vector<2x32xf32>
    %1426 = arith.mulf %1424, %1425 : vector<2x32xf32>
    %1427 = vector.extract_strided_slice %830 {offsets = [54, 0], sizes = [2, 128], strides = [1, 1]} : vector<64x128xf32> to vector<2x128xf32>
    %c0_414 = arith.constant 0 : index
    %c0_415 = arith.constant 0 : index
    %1428 = vector.load %arg7[%c0_414, %c0_415] : memref<32x128xf32, #tpu.memory_space<vmem>>, vector<32x128xf32>
    %cst_416 = arith.constant dense<0.000000e+00> : vector<2x128xf32>
    %1429 = tpu.matmul %1426, %1428, %cst_416 {dimension_numbers = #tpu.dot_dimension_numbers<[1], [0], [0], [1], [0, 0, 1, 1], [], []>} : vector<2x32xf32>, vector<32x128xf32>, vector<2x128xf32> -> vector<2x128xf32>
    %1430 = arith.addf %1427, %1429 : vector<2x128xf32>
    %1431 = vector.extract_strided_slice %1430 {offsets = [0, 0], sizes = [2, 96], strides = [1, 1]} : vector<2x128xf32> to vector<2x96xf32>
    %cst_417 = arith.constant 5.000000e-01 : f32
    %1432 = vector.broadcast %cst_417 : f32 to vector<2x96xf32>
    %1433 = arith.mulf %1432, %1431 : vector<2x96xf32>
    %1434 = math.tanh %1433 : vector<2x96xf32>
    %cst_418 = arith.constant 5.000000e-01 : f32
    %1435 = vector.broadcast %cst_418 : f32 to vector<2x96xf32>
    %1436 = arith.mulf %1435, %1434 : vector<2x96xf32>
    %cst_419 = arith.constant 5.000000e-01 : f32
    %1437 = vector.broadcast %cst_419 : f32 to vector<2x96xf32>
    %1438 = arith.addf %1436, %1437 : vector<2x96xf32>
    %1439 = vector.extract_strided_slice %1430 {offsets = [0, 96], sizes = [2, 32], strides = [1, 1]} : vector<2x128xf32> to vector<2x32xf32>
    %1440 = math.tanh %1439 : vector<2x32xf32>
    %1441 = vector.extract_strided_slice %1438 {offsets = [0, 32], sizes = [2, 32], strides = [1, 1]} : vector<2x96xf32> to vector<2x32xf32>
    %1442 = arith.mulf %1441, %1423 : vector<2x32xf32>
    %1443 = vector.extract_strided_slice %1438 {offsets = [0, 0], sizes = [2, 32], strides = [1, 1]} : vector<2x96xf32> to vector<2x32xf32>
    %1444 = arith.mulf %1443, %1440 : vector<2x32xf32>
    %1445 = arith.addf %1442, %1444 : vector<2x32xf32>
    %1446 = vector.extract_strided_slice %1438 {offsets = [0, 64], sizes = [2, 32], strides = [1, 1]} : vector<2x96xf32> to vector<2x32xf32>
    %1447 = math.tanh %1445 : vector<2x32xf32>
    %1448 = arith.mulf %1446, %1447 : vector<2x32xf32>
    %1449 = vector.extract_strided_slice %830 {offsets = [56, 0], sizes = [2, 128], strides = [1, 1]} : vector<64x128xf32> to vector<2x128xf32>
    %c0_420 = arith.constant 0 : index
    %c0_421 = arith.constant 0 : index
    %1450 = vector.load %arg7[%c0_420, %c0_421] : memref<32x128xf32, #tpu.memory_space<vmem>>, vector<32x128xf32>
    %cst_422 = arith.constant dense<0.000000e+00> : vector<2x128xf32>
    %1451 = tpu.matmul %1448, %1450, %cst_422 {dimension_numbers = #tpu.dot_dimension_numbers<[1], [0], [0], [1], [0, 0, 1, 1], [], []>} : vector<2x32xf32>, vector<32x128xf32>, vector<2x128xf32> -> vector<2x128xf32>
    %1452 = arith.addf %1449, %1451 : vector<2x128xf32>
    %1453 = vector.extract_strided_slice %1452 {offsets = [0, 0], sizes = [2, 96], strides = [1, 1]} : vector<2x128xf32> to vector<2x96xf32>
    %cst_423 = arith.constant 5.000000e-01 : f32
    %1454 = vector.broadcast %cst_423 : f32 to vector<2x96xf32>
    %1455 = arith.mulf %1454, %1453 : vector<2x96xf32>
    %1456 = math.tanh %1455 : vector<2x96xf32>
    %cst_424 = arith.constant 5.000000e-01 : f32
    %1457 = vector.broadcast %cst_424 : f32 to vector<2x96xf32>
    %1458 = arith.mulf %1457, %1456 : vector<2x96xf32>
    %cst_425 = arith.constant 5.000000e-01 : f32
    %1459 = vector.broadcast %cst_425 : f32 to vector<2x96xf32>
    %1460 = arith.addf %1458, %1459 : vector<2x96xf32>
    %1461 = vector.extract_strided_slice %1452 {offsets = [0, 96], sizes = [2, 32], strides = [1, 1]} : vector<2x128xf32> to vector<2x32xf32>
    %1462 = math.tanh %1461 : vector<2x32xf32>
    %1463 = vector.extract_strided_slice %1460 {offsets = [0, 32], sizes = [2, 32], strides = [1, 1]} : vector<2x96xf32> to vector<2x32xf32>
    %1464 = arith.mulf %1463, %1445 : vector<2x32xf32>
    %1465 = vector.extract_strided_slice %1460 {offsets = [0, 0], sizes = [2, 32], strides = [1, 1]} : vector<2x96xf32> to vector<2x32xf32>
    %1466 = arith.mulf %1465, %1462 : vector<2x32xf32>
    %1467 = arith.addf %1464, %1466 : vector<2x32xf32>
    %1468 = vector.extract_strided_slice %1460 {offsets = [0, 64], sizes = [2, 32], strides = [1, 1]} : vector<2x96xf32> to vector<2x32xf32>
    %1469 = math.tanh %1467 : vector<2x32xf32>
    %1470 = arith.mulf %1468, %1469 : vector<2x32xf32>
    %c56_426 = arith.constant 56 : index
    %c0_427 = arith.constant 0 : index
    %1471 = vector.load %arg12[%c56_426, %c0_427] : memref<64x32xf32, #tpu.memory_space<vmem>>, vector<2x32xf32>
    tpu.vector_store %arg12[%c56_426, %c0_427], %1470 {strides = array<i32>} : memref<64x32xf32, #tpu.memory_space<vmem>>, vector<2x32xf32>,
    %1472 = vector.extract_strided_slice %830 {offsets = [58, 0], sizes = [2, 128], strides = [1, 1]} : vector<64x128xf32> to vector<2x128xf32>
    %c0_428 = arith.constant 0 : index
    %c0_429 = arith.constant 0 : index
    %1473 = vector.load %arg7[%c0_428, %c0_429] : memref<32x128xf32, #tpu.memory_space<vmem>>, vector<32x128xf32>
    %cst_430 = arith.constant dense<0.000000e+00> : vector<2x128xf32>
    %1474 = tpu.matmul %1470, %1473, %cst_430 {dimension_numbers = #tpu.dot_dimension_numbers<[1], [0], [0], [1], [0, 0, 1, 1], [], []>} : vector<2x32xf32>, vector<32x128xf32>, vector<2x128xf32> -> vector<2x128xf32>
    %1475 = arith.addf %1472, %1474 : vector<2x128xf32>
    %1476 = vector.extract_strided_slice %1475 {offsets = [0, 0], sizes = [2, 96], strides = [1, 1]} : vector<2x128xf32> to vector<2x96xf32>
    %cst_431 = arith.constant 5.000000e-01 : f32
    %1477 = vector.broadcast %cst_431 : f32 to vector<2x96xf32>
    %1478 = arith.mulf %1477, %1476 : vector<2x96xf32>
    %1479 = math.tanh %1478 : vector<2x96xf32>
    %cst_432 = arith.constant 5.000000e-01 : f32
    %1480 = vector.broadcast %cst_432 : f32 to vector<2x96xf32>
    %1481 = arith.mulf %1480, %1479 : vector<2x96xf32>
    %cst_433 = arith.constant 5.000000e-01 : f32
    %1482 = vector.broadcast %cst_433 : f32 to vector<2x96xf32>
    %1483 = arith.addf %1481, %1482 : vector<2x96xf32>
    %1484 = vector.extract_strided_slice %1475 {offsets = [0, 96], sizes = [2, 32], strides = [1, 1]} : vector<2x128xf32> to vector<2x32xf32>
    %1485 = math.tanh %1484 : vector<2x32xf32>
    %1486 = vector.extract_strided_slice %1483 {offsets = [0, 32], sizes = [2, 32], strides = [1, 1]} : vector<2x96xf32> to vector<2x32xf32>
    %1487 = arith.mulf %1486, %1467 : vector<2x32xf32>
    %1488 = vector.extract_strided_slice %1483 {offsets = [0, 0], sizes = [2, 32], strides = [1, 1]} : vector<2x96xf32> to vector<2x32xf32>
    %1489 = arith.mulf %1488, %1485 : vector<2x32xf32>
    %1490 = arith.addf %1487, %1489 : vector<2x32xf32>
    %1491 = vector.extract_strided_slice %1483 {offsets = [0, 64], sizes = [2, 32], strides = [1, 1]} : vector<2x96xf32> to vector<2x32xf32>
    %1492 = math.tanh %1490 : vector<2x32xf32>
    %1493 = arith.mulf %1491, %1492 : vector<2x32xf32>
    %c58_434 = arith.constant 58 : index
    %c0_435 = arith.constant 0 : index
    %1494 = vector.load %arg12[%c58_434, %c0_435] : memref<64x32xf32, #tpu.memory_space<vmem>>, vector<2x32xf32>
    tpu.vector_store %arg12[%c58_434, %c0_435], %1493 {strides = array<i32>} : memref<64x32xf32, #tpu.memory_space<vmem>>, vector<2x32xf32>,
    %1495 = vector.extract_strided_slice %830 {offsets = [60, 0], sizes = [2, 128], strides = [1, 1]} : vector<64x128xf32> to vector<2x128xf32>
    %c0_436 = arith.constant 0 : index
    %c0_437 = arith.constant 0 : index
    %1496 = vector.load %arg7[%c0_436, %c0_437] : memref<32x128xf32, #tpu.memory_space<vmem>>, vector<32x128xf32>
    %cst_438 = arith.constant dense<0.000000e+00> : vector<2x128xf32>
    %1497 = tpu.matmul %1493, %1496, %cst_438 {dimension_numbers = #tpu.dot_dimension_numbers<[1], [0], [0], [1], [0, 0, 1, 1], [], []>} : vector<2x32xf32>, vector<32x128xf32>, vector<2x128xf32> -> vector<2x128xf32>
    %1498 = arith.addf %1495, %1497 : vector<2x128xf32>
    %1499 = vector.extract_strided_slice %1498 {offsets = [0, 0], sizes = [2, 96], strides = [1, 1]} : vector<2x128xf32> to vector<2x96xf32>
    %cst_439 = arith.constant 5.000000e-01 : f32
    %1500 = vector.broadcast %cst_439 : f32 to vector<2x96xf32>
    %1501 = arith.mulf %1500, %1499 : vector<2x96xf32>
    %1502 = math.tanh %1501 : vector<2x96xf32>
    %cst_440 = arith.constant 5.000000e-01 : f32
    %1503 = vector.broadcast %cst_440 : f32 to vector<2x96xf32>
    %1504 = arith.mulf %1503, %1502 : vector<2x96xf32>
    %cst_441 = arith.constant 5.000000e-01 : f32
    %1505 = vector.broadcast %cst_441 : f32 to vector<2x96xf32>
    %1506 = arith.addf %1504, %1505 : vector<2x96xf32>
    %1507 = vector.extract_strided_slice %1498 {offsets = [0, 96], sizes = [2, 32], strides = [1, 1]} : vector<2x128xf32> to vector<2x32xf32>
    %1508 = math.tanh %1507 : vector<2x32xf32>
    %1509 = vector.extract_strided_slice %1506 {offsets = [0, 32], sizes = [2, 32], strides = [1, 1]} : vector<2x96xf32> to vector<2x32xf32>
    %1510 = arith.mulf %1509, %1490 : vector<2x32xf32>
    %1511 = vector.extract_strided_slice %1506 {offsets = [0, 0], sizes = [2, 32], strides = [1, 1]} : vector<2x96xf32> to vector<2x32xf32>
    %1512 = arith.mulf %1511, %1508 : vector<2x32xf32>
    %1513 = arith.addf %1510, %1512 : vector<2x32xf32>
    %1514 = vector.extract_strided_slice %1506 {offsets = [0, 64], sizes = [2, 32], strides = [1, 1]} : vector<2x96xf32> to vector<2x32xf32>
    %1515 = math.tanh %1513 : vector<2x32xf32>
    %1516 = arith.mulf %1514, %1515 : vector<2x32xf32>
    %c60_442 = arith.constant 60 : index
    %c0_443 = arith.constant 0 : index
    %1517 = vector.load %arg12[%c60_442, %c0_443] : memref<64x32xf32, #tpu.memory_space<vmem>>, vector<2x32xf32>
    tpu.vector_store %arg12[%c60_442, %c0_443], %1516 {strides = array<i32>} : memref<64x32xf32, #tpu.memory_space<vmem>>, vector<2x32xf32>,
    %1518 = vector.extract_strided_slice %830 {offsets = [62, 0], sizes = [2, 128], strides = [1, 1]} : vector<64x128xf32> to vector<2x128xf32>
    %c0_444 = arith.constant 0 : index
    %c0_445 = arith.constant 0 : index
    %1519 = vector.load %arg7[%c0_444, %c0_445] : memref<32x128xf32, #tpu.memory_space<vmem>>, vector<32x128xf32>
    %cst_446 = arith.constant dense<0.000000e+00> : vector<2x128xf32>
    %1520 = tpu.matmul %1516, %1519, %cst_446 {dimension_numbers = #tpu.dot_dimension_numbers<[1], [0], [0], [1], [0, 0, 1, 1], [], []>} : vector<2x32xf32>, vector<32x128xf32>, vector<2x128xf32> -> vector<2x128xf32>
    %1521 = arith.addf %1518, %1520 : vector<2x128xf32>
    %1522 = vector.extract_strided_slice %1521 {offsets = [0, 0], sizes = [2, 96], strides = [1, 1]} : vector<2x128xf32> to vector<2x96xf32>
    %cst_447 = arith.constant 5.000000e-01 : f32
    %1523 = vector.broadcast %cst_447 : f32 to vector<2x96xf32>
    %1524 = arith.mulf %1523, %1522 : vector<2x96xf32>
    %1525 = math.tanh %1524 : vector<2x96xf32>
    %cst_448 = arith.constant 5.000000e-01 : f32
    %1526 = vector.broadcast %cst_448 : f32 to vector<2x96xf32>
    %1527 = arith.mulf %1526, %1525 : vector<2x96xf32>
    %cst_449 = arith.constant 5.000000e-01 : f32
    %1528 = vector.broadcast %cst_449 : f32 to vector<2x96xf32>
    %1529 = arith.addf %1527, %1528 : vector<2x96xf32>
    %1530 = vector.extract_strided_slice %1521 {offsets = [0, 96], sizes = [2, 32], strides = [1, 1]} : vector<2x128xf32> to vector<2x32xf32>
    %1531 = math.tanh %1530 : vector<2x32xf32>
    %1532 = vector.extract_strided_slice %1529 {offsets = [0, 32], sizes = [2, 32], strides = [1, 1]} : vector<2x96xf32> to vector<2x32xf32>
    %1533 = arith.mulf %1532, %1513 : vector<2x32xf32>
    %1534 = vector.extract_strided_slice %1529 {offsets = [0, 0], sizes = [2, 32], strides = [1, 1]} : vector<2x96xf32> to vector<2x32xf32>
    %1535 = arith.mulf %1534, %1531 : vector<2x32xf32>
    %1536 = arith.addf %1533, %1535 : vector<2x32xf32>
    %1537 = vector.extract_strided_slice %1529 {offsets = [0, 64], sizes = [2, 32], strides = [1, 1]} : vector<2x96xf32> to vector<2x32xf32>
    %1538 = math.tanh %1536 : vector<2x32xf32>
    %1539 = arith.mulf %1537, %1538 : vector<2x32xf32>
    %c62_450 = arith.constant 62 : index
    %c0_451 = arith.constant 0 : index
    %1540 = vector.load %arg12[%c62_450, %c0_451] : memref<64x32xf32, #tpu.memory_space<vmem>>, vector<2x32xf32>
    tpu.vector_store %arg12[%c62_450, %c0_451], %1539 {strides = array<i32>} : memref<64x32xf32, #tpu.memory_space<vmem>>, vector<2x32xf32>,
    %c56_452 = arith.constant 56 : index
    %c0_453 = arith.constant 0 : index
    %1541 = vector.load %arg12[%c56_452, %c0_453] : memref<64x32xf32, #tpu.memory_space<vmem>>, vector<8x32xf32>
    %c0_454 = arith.constant 0 : index
    %c0_455 = arith.constant 0 : index
    %1542 = vector.load %arg9[%c0_454, %c0_455] : memref<32x4xf32, #tpu.memory_space<vmem>>, vector<32x4xf32>
    %cst_456 = arith.constant dense<0.000000e+00> : vector<8x4xf32>
    %1543 = tpu.matmul %1541, %1542, %cst_456 {dimension_numbers = #tpu.dot_dimension_numbers<[1], [0], [0], [1], [0, 0, 1, 1], [], []>} : vector<8x32xf32>, vector<32x4xf32>, vector<8x4xf32> -> vector<8x4xf32>
    %c0_457 = arith.constant 0 : index
    %c0_458 = arith.constant 0 : index
    %1544 = vector.load %arg10[%c0_457, %c0_458] : memref<1x4xf32, #tpu.memory_space<vmem>>, vector<1x4xf32>
    %1545 = vector.broadcast %1544 : vector<1x4xf32> to vector<8x4xf32>
    %1546 = arith.addf %1543, %1545 : vector<8x4xf32>
    %c0_459 = arith.constant 0 : index
    %c0_460 = arith.constant 0 : index
    %1547 = vector.load %arg11[%c0_459, %c0_460] : memref<8x4xf32, #tpu.memory_space<vmem>>, vector<8x4xf32>
    tpu.vector_store %arg11[%c0_459, %c0_460], %1546 {strides = array<i32>} : memref<8x4xf32, #tpu.memory_space<vmem>>, vector<8x4xf32>,
    return
  }
}

</mosaic_0001>

<bundles_post_ra>
// kernel: cnn_lstm_forward.1
= control target key start
LH: loop header
LB: loop body
LE: loop exit
PB: predicated region body
PF: predicated region fallthrough
CT: control target
= control target key end

     0   :  { %vm81_vm0 = vcmask 1043456   ;;  %vm68_vm1 = vcmask 97280   ;;  %v9081_v3 = vmov 0   ;;  %v9083_v28 = vmov 0.0   ;;  %s9085_s25 = smov 124   ;;  %s9086_s27 = smov 32   ;;  %s10589_s0 = inlined_call_operand.vmem [shape: f32[12,16], index: 0, kind: input, shape index: {}]   ;;  %s10590_s1 = inlined_call_operand.vmem [shape: f32[32,12], index: 1, kind: input, shape index: {}]   ;;  %s10591_s2 = inlined_call_operand.vmem [shape: f32[32,1], index: 2, kind: input, shape index: {}]   ;;  %s10592_s3 = inlined_call_operand.vmem [shape: f32[4,128], index: 3, kind: input, shape index: {}]   ;;  %s10593_s4 = inlined_call_operand.vmem [shape: f32[32,128], index: 4, kind: input, shape index: {}]   ;;  %s10594_s5 = inlined_call_operand.vmem [shape: f32[1,128], index: 5, kind: input, shape index: {}]   ;;  %s10595_s6 = inlined_call_operand.vmem [shape: f32[32,128], index: 6, kind: input, shape index: {}]   ;;  %s10596_s7 = inlined_call_operand.vmem [shape: f32[32,128], index: 7, kind: input, shape index: {}]   ;;  %s10597_s8 = inlined_call_operand.vmem [shape: f32[1,128], index: 8, kind: input, shape index: {}]   ;;  %s10598_s9 = inlined_call_operand.vmem [shape: f32[32,4], index: 9, kind: input, shape index: {}]   ;;  %s10599_s10 = inlined_call_operand.vmem [shape: f32[1,4], index: 10, kind: input, shape index: {}]   ;;  %s10600_s11 = inlined_call_operand.vmem [shape: f32[8,4], index: 11, kind: output, shape index: {}]  }
   0x1   :  { %v43_v0 = vld [vmem:[%s10589_s0 + $0x8] sm:$0xf]  ;;  %v42_v1 = vld [vmem:[%s10589_s0] sm:$0xff]  ;;  %8689 = vset.pattern.permute.xlu0 %v9081_v3  ;;  %8690 = vset.pattern.permute.xlu1 %v9081_v3  ;;  %v46_v6 = vld [vmem:[%s10591_s2 + $0x10] sm:$0xff]  ;;  %vm9084_vm2 = vmmov 0   ;;  %vm202_vm3 = vcmask 31744  }
   0x2   :  { %v38_v2 = vld [vmem:[%s10590_s1] sm:$0xff]  ;;  %7921 = vmatprep.subr.msk.mxu0 %vm81_vm0, %v43_v0  ;;  %v39_v4 = vld [vmem:[%s10590_s1 + $0x8] sm:$0xff]  ;;  %v40_v7 = vld [vmem:[%s10590_s1 + $0x10] sm:$0xff]  ;;  %60 = vperm.xlu1 %8690, %v46_v6   ;;  %vm407_vm4 = vcmask 1040384   ;;  %s9087_s28 = smov 64   ;;  %vm514_vm5 = vcmask 254976  }
   0x3   :  { %7925 = vmatprep.mubr.msk.f32.mxu0 %vm68_vm1, %v38_v2  ;;  %7922 = vmatpush3.msk.msra.mxu0 %vm81_vm0, %v43_v0  ;;  %v44_v5 = vld [vmem:[%s10591_s2] sm:$0xff]  ;;  %v45_v8 = vld [vmem:[%s10591_s2 + $0x8] sm:$0xff]  ;;  %v47_v9 = vld [vmem:[%s10591_s2 + $0x18] sm:$0xff]  ;;  %vm413_vm6 = vcmask 261120   ;;  %vm7159_vm7 = vcmask 257026   ;;  %vm7273_vm8 = vcmask 259076  }
   0x4   :  { %7923 = vmatprep.subr.mxu0 %v42_v1  ;;  %50 = vperm.xlu0 %8689, %v44_v5   ;;  %v41_v10 = vld [vmem:[%s10590_s1 + $0x18] sm:$0xff]  ;;  %v9187_v12 = vld [vmem:[%s10592_s3] sm:$0xf]  ;;  %s9082_s1 = smov 120   ;;  %v9206_v30 = vld [vmem:[%s10593_s4 + $0x10] sm:$0xff]  ;;  %vm7387_vm9 = vcmask 261126  }
   0x5   :  { %7924 = vmatpush3.msra.mxu0 %v42_v1  ;;  %7931 = vmatprep.subr.msk.mxu1 %vm81_vm0, %v9187_v12  ;;  %v9199_v29 = vld [vmem:[%s10593_s4 + $0x18] sm:$0xff]  ;;  %v9212_v31 = vld [vmem:[%s10593_s4 + $0x8] sm:$0xff]  ;;  %v9218_v32 = vld [vmem:[%s10593_s4] sm:$0xff] }
   0x6   :  { %7926 = vmatmul.mubr.msk.f32.vlgmr.msra.gmra.mxu0 %vm68_vm1, %v39_v4  ;;  %65 = vperm.xlu1 %8690, %v47_v9   ;;  %v9267_v50 = vld [vmem:[%s10594_s5] ss:$0 sm:$0xff] }
   0x7   :  { %7928 = vmatprep.mubr.msk.f32.mxu0 %vm68_vm1, %v40_v7  ;;  %7932 = vmatpush3.msk.msra.mxu1 %vm81_vm0, %v9187_v12 }
   0x8   :  { %55 = vperm.xlu0 %8689, %v45_v8   ;;  %7939 = vmatprep.subr.msk.mxu1 %vm81_vm0, %v9187_v12 }
   0x9   :  { %7947 = vmatprep.subr.mxu0 %v9083_v28 }
   0xa   :  { %7929 = vmatmul.mubr.msk.f32.gmra.mxu0 %vm68_vm1, %v41_v10 }
   0xb   :  { %7948 = vmatpush3.msra.mxu0 %v9199_v29  ;;  %7955 = vmatprep.mubr.msk.f32.mxu0 %vm9084_vm2, %v9083_v28 }
   0xc   :  { %7949 = vmatprep.subr.mxu0 %v9083_v28 }
   0xd   :  { %7950 = vmatpush3.msra.mxu0 %v9206_v30 }
   0xe   :  { %7951 = vmatprep.subr.mxu0 %v9083_v28 }
   0xf   :  { %7952 = vmatpush3.msra.mxu0 %v9212_v31 }
  0x10   :  { %7953 = vmatprep.subr.mxu0 %v9083_v28 }
  0x11   :  { %7954 = vmatpush3.msra.mxu0 %v9218_v32 }
  0x12   :  { %7956 = vmatmul.mubr.f32.vlgmr.msra.gmra.mxu0 %v9083_v28  ;;  %7969 = vmatprep.subr.mxu0 %v9083_v28 }
  0x13   :  { %7970 = vmatpush3.msra.mxu0 %v9199_v29  ;;  %7977 = vmatprep.mubr.msk.f32.mxu0 %vm9084_vm2, %v9083_v28 }
  0x14   :  { %7971 = vmatprep.subr.mxu0 %v9083_v28 }
  0x15   :  { %7972 = vmatpush3.msra.mxu0 %v9206_v30 }
  0x16   :  { %7973 = vmatprep.subr.mxu0 %v9083_v28 }
  0x17   :  { %7974 = vmatpush3.msra.mxu0 %v9212_v31 }
  0x18   :  { %7975 = vmatprep.subr.mxu0 %v9083_v28 }
  0x19   :  { %7976 = vmatpush3.msra.mxu0 %v9218_v32 }
  0x1a   :  { %7991 = vmatprep.subr.mxu0 %v9083_v28 }
  0x7d   :  { %v61_v13 = vpop.permute.xlu1 %60 }
  0x7f   :  { %v51_v11 = vpop.permute.xlu0 %50 }
  0x81   :  { %v66_v18 = vpop.permute.xlu1 %65 }
  0x83   :  { %v56_v14 = vpop.permute.xlu0 %55 }
  0xc6   :  { %v7927_v15 = vpop.f32.mrf.mxu0 }
  0xc7   :  { %v157_v16 = vadd.f32 %v7927_v15, %v56_v14 }
  0xc8   :  { %v151_v17 = vpop.f32.mrf.mxu0 }
  0xc9   :  { %v171_v19 = vmax.f32 %v157_v16, 0.0  ;;  %v152_v20 = vadd.f32 %v151_v17, %v51_v11 }
  0xca   :  { %v7930_v21 = vpop.f32.mrf.mxu0 }
  0xcb   :  { %v170_v22 = vmax.f32 %v152_v20, 0.0  ;;  %v167_v23 = vadd.f32 %v7930_v21, %v66_v18  ;;  %180 = vrot.lane.b32.xlu1 %v171_v19, %s9082_s1 }
  0xcc   :  { %v161_v24 = vpop.f32.mrf.mxu0 }
  0xcd   :  { %v173_v25 = vmax.f32 %v167_v23, 0.0  ;;  %v162_v26 = vadd.f32 %v161_v24, %v61_v13  ;;  %178 = vrot.lane.b32.xlu0 %v170_v22, %s9082_s1 }
  0xcf   :  { %v172_v27 = vmax.f32 %v162_v26, 0.0  ;;  %184 = vrot.lane.b32.xlu1 %v173_v25, %s9082_s1 }
  0xd1   :  { %182 = vrot.lane.b32.xlu0 %v172_v27, %s9082_s1 }
  0xd2   :  { %v483_v43 = vpop.f32.mrf.mxu0 }
  0xd4   :  { %v7957_v44 = vpop.f32.mrf.mxu0 }
 0x13d   :  { %v181_v33 = vpop.permute.xlu1 %180 }
 0x13e   :  { %v191_v34 = vmax.f32 %v171_v19, %v181_v33 }
 0x13f   :  { %v179_v35 = vpop.permute.xlu0 %178 }
 0x140   :  { %v190_v36 = vmax.f32 %v170_v22, %v179_v35  ;;  %305 = vrot.lane.b32.xlu1 %v191_v34, %s9085_s25 }
 0x141   :  { %v185_v37 = vpop.permute.xlu1 %184 }
 0x142   :  { %303 = vrot.lane.b32.xlu0 %v190_v36, %s9085_s25  ;;  %7933 = vmatprep.mubr.msk.f32.mxu1 %vm202_vm3, %v190_v36  ;;  %v193_v40 = vmax.f32 %v173_v25, %v185_v37 }
 0x143   :  { %7934 = vmatmul.mubr.msk.f32.vlgmr.msra.gmra.mxu1 %vm202_vm3, %v191_v34  ;;  %v183_v38 = vpop.permute.xlu0 %182 }
 0x144   :  { %v192_v39 = vmax.f32 %v172_v27, %v183_v38  ;;  %7940 = vmatpush3.msk.msra.mxu1 %vm81_vm0, %v9187_v12 }
 0x145   :  { %7958 = vmatprep.subr.mxu1 %v9083_v28 }
 0x146   :  { %7936 = vmatprep.mubr.msk.f32.mxu1 %vm202_vm3, %v192_v39 }
 0x147   :  { %7937 = vmatmul.mubr.msk.f32.gmra.mxu1 %vm202_vm3, %v193_v40 }
 0x1b2   :  { %v306_v42 = vpop.permute.xlu1 %305 }
 0x1b4   :  { %v304_v41 = vpop.permute.xlu0 %303 }
 0x1b5   :  { %7941 = vmatprep.mubr.msk.f32.mxu1 %vm202_vm3, %v304_v41 }
 0x1b6   :  { %7942 = vmatmul.mubr.msk.f32.vlgmr.msra.gmra.mxu1 %vm202_vm3, %v306_v42 }
 0x1b7   :  { %7959 = vmatpush3.msra.mxu1 %v9199_v29 }
 0x1b8   :  { %7960 = vmatprep.subr.mxu1 %v9083_v28 }
 0x1b9   :  { %7961 = vmatpush3.msra.mxu1 %v9206_v30 }
 0x1ba   :  { %7962 = vmatprep.subr.mxu1 %v9083_v28 }
 0x1bb   :  { %7963 = vmatpush3.msra.mxu1 %v9212_v31 }
 0x1bc   :  { %7964 = vmatprep.subr.mxu1 %v9083_v28 }
 0x1bd   :  { %7965 = vmatpush3.msra.mxu1 %v9218_v32 }
 0x1be   :  { %7980 = vmatprep.subr.mxu1 %v9083_v28 }
 0x203   :  { %v9256_v45 = vpop.f32.mrf.mxu1 }
 0x205   :  { %v284_v46 = vpop.f32.mrf.mxu1 }
 0x206   :  { %v9273_v53 = vadd.f32 %v9267_v50, %v284_v46 }
 0x207   :  { %v9258_v47 = vpop.f32.mrf.mxu1 }
 0x208   :  { %v517_v11 = vrot.slane %v9273_v53, 1  ;;  %v624_v36 = vrot.slane %v9273_v53, 2 }
 0x209   :  { %v9260_v48 = vpop.f32.mrf.mxu1 }
 0x276   :  { %v9262_v49 = vpop.f32.mrf.mxu1 }
 0x278   :  { %v385_v51 = vpop.f32.mrf.mxu1 }
 0x279   :  { %v9270_v52 = vadd.f32 %v9267_v50, %v385_v51 }
 0x27b   :  { %v405_v54 = vrot.slane %v9270_v52, 7  ;;  %v519_v12 = vsel %vm407_vm4, %v517_v11, %v9270_v52  ;;  %v626_v35 = vrot.slane %v9270_v52, 1 }
 0x27d   :  { %v408_v55 = vsel %vm407_vm4, %v9273_v53, %v405_v54  ;;  %v628_v37 = vsel %vm407_vm4, %v624_v36, %v626_v35 }
 0x27e   :  { %v487_v56 = vadd.f32 %v483_v43, %v408_v55 }
 0x280   :  { %8691 = vtanh.f32 %v487_v56  ;;  %v488_v58 = vmul.f32 0.5, %v487_v56 }
 0x282   :  { %8693 = vtanh.f32 %v488_v58 }
 0x28d   :  { %v8692_v57 = vpop.eup %8691 }
 0x28e   :  { %495 = vrot.lane.b32.xlu0 %v8692_v57, %s9086_s27 }
 0x28f   :  { %v8694_v59 = vpop.eup %8693 }
 0x290   :  { %v490_v60 = vmul.f32 0.5, %v8694_v59 }
 0x292   :  { %v491_v61 = vadd.f32 0.5, %v490_v60 }
 0x294   :  { %v493_v0 = vmul.f32 0.0, %v491_v61 }
 0x300   :  { %v496_v62 = vpop.permute.xlu0 %495 }
 0x301   :  { %v498_v63 = vmul.f32 %v496_v62, %v491_v61  ;;  %v735_v62 = vrot.slane %v9270_v52, 2 }
 0x303   :  { %500 = vrot.lane.b32.xlu1 %v498_v63, %s9086_s27  ;;  %v733_v63 = vrot.slane %v9273_v53, 3 }
 0x307   :  { %307 = vrot.lane.b32.xlu1 %v192_v39, %s9085_s25 }
 0x375   :  { %v501_v1 = vpop.permute.xlu1 %500 }
 0x376   :  { %v503_v2 = vadd.f32 %v501_v1, %v493_v0  ;;  %v737_v0 = vsel %vm407_vm4, %v733_v63, %v735_v62 }
 0x378   :  { %8695 = vtanh.f32 %v503_v2 }
 0x379   :  { %v308_v3 = vpop.permute.xlu1 %307 }
 0x37a   :  { %7944 = vmatprep.mubr.msk.f32.mxu1 %vm202_vm3, %v308_v3 }
 0x385   :  { %v8696_v4 = vpop.eup %8695 }
 0x386   :  { %506 = vrot.lane.b32.xlu0 %v8696_v4, %s9086_s27 }
 0x38a   :  { %309 = vrot.lane.b32.xlu0 %v193_v40, %s9085_s25 }
 0x3f8   :  { %v507_v5 = vpop.permute.xlu0 %506 }
 0x3f9   :  { %v509_v6 = vmul.f32 %v507_v5, %v491_v61 }
 0x3fb   :  { %511 = vrot.lane.b32.xlu1 %v509_v6, %s9087_s28 }
 0x3fc   :  { %v310_v7 = vpop.permute.xlu0 %309 }
 0x3fd   :  { %7945 = vmatmul.mubr.msk.f32.gmra.mxu1 %vm202_vm3, %v310_v7 }
 0x3fe   :  { %7966 = vmatprep.mubr.msk.f32.mxu1 %vm9084_vm2, %v9083_v28 }
 0x46d   :  { %v512_v8 = vpop.permute.xlu1 %511 }
 0x46e   :  { %515 = vst.msk [vmem:[#allocation2] sm:$0x3] %vm514_vm5, %v512_v8  ;;  %7967 = vmatmul.mubr.msk.f32.vlgmr.msra.gmra.mxu1 %vm413_vm6, %v512_v8 }
 0x46f   :  { %7981 = vmatpush3.msra.mxu1 %v9199_v29  ;;  %7988 = vmatprep.mubr.msk.f32.mxu1 %vm9084_vm2, %v9083_v28 }
 0x470   :  { %7982 = vmatprep.subr.mxu1 %v9083_v28 }
 0x471   :  { %7983 = vmatpush3.msra.mxu1 %v9206_v30 }
 0x472   :  { %7984 = vmatprep.subr.mxu1 %v9083_v28 }
 0x473   :  { %7985 = vmatpush3.msra.mxu1 %v9212_v31 }
 0x474   :  { %7986 = vmatprep.subr.mxu1 %v9083_v28 }
 0x475   :  { %7987 = vmatpush3.msra.mxu1 %v9218_v32 }
 0x476   :  { %8002 = vmatprep.subr.mxu1 %v9083_v28 }
 0x4bd   :  { %v9300_v9 = vpop.f32.mrf.mxu1 }
 0x4bf   :  { %v9302_v10 = vpop.f32.mrf.mxu1 }
 0x52e   :  { %v592_v13 = vpop.f32.mrf.mxu1 }
 0x52f   :  { %v596_v14 = vadd.f32 %v592_v13, %v519_v12 }
 0x530   :  { %v7968_v15 = vpop.f32.mrf.mxu1 }
 0x531   :  { %8697 = vtanh.f32 %v596_v14  ;;  %v597_v17 = vmul.f32 0.5, %v596_v14 }
 0x533   :  { %8699 = vtanh.f32 %v597_v17 }
 0x53e   :  { %v8698_v16 = vpop.eup %8697 }
 0x53f   :  { %604 = vrot.lane.b32.xlu0 %v8698_v16, %s9086_s27 }
 0x540   :  { %v8700_v18 = vpop.eup %8699 }
 0x541   :  { %v599_v19 = vmul.f32 0.5, %v8700_v18 }
 0x543   :  { %v600_v20 = vadd.f32 0.5, %v599_v19 }
 0x545   :  { %v602_v23 = vmul.f32 %v600_v20, %v503_v2 }
 0x5b1   :  { %v605_v21 = vpop.permute.xlu0 %604 }
 0x5b2   :  { %v607_v22 = vmul.f32 %v605_v21, %v600_v20  ;;  %v842_v21 = vrot.slane %v9273_v53, 4 }
 0x5b4   :  { %609 = vrot.lane.b32.xlu1 %v607_v22, %s9086_s27 }
 0x626   :  { %v610_v24 = vpop.permute.xlu1 %609 }
 0x627   :  { %v612_v25 = vadd.f32 %v610_v24, %v602_v23 }
 0x629   :  { %8701 = vtanh.f32 %v612_v25 }
 0x636   :  { %v8702_v26 = vpop.eup %8701 }
 0x637   :  { %615 = vrot.lane.b32.xlu0 %v8702_v26, %s9086_s27 }
 0x6a9   :  { %v616_v27 = vpop.permute.xlu0 %615 }
 0x6aa   :  { %v618_v33 = vmul.f32 %v616_v27, %v600_v20  ;;  %v844_v20 = vrot.slane %v9270_v52, 3 }
 0x6ac   :  { %620 = vrot.lane.b32.xlu1 %v618_v33, %s9087_s28  ;;  %v846_v22 = vsel %vm407_vm4, %v842_v21, %v844_v20 }
 0x71e   :  { %v621_v34 = vpop.permute.xlu1 %620 }
 0x71f   :  { %623 = vst.msk [vmem:[#allocation2 + $0x2] sm:$0x3] %vm514_vm5, %v621_v34  ;;  %7978 = vmatmul.mubr.msk.f32.vlgmr.msra.gmra.mxu0 %vm413_vm6, %v621_v34 }
 0x720   :  { %7992 = vmatpush3.msra.mxu0 %v9199_v29  ;;  %7999 = vmatprep.mubr.msk.f32.mxu0 %vm9084_vm2, %v9083_v28 }
 0x721   :  { %7993 = vmatprep.subr.mxu0 %v9083_v28 }
 0x722   :  { %7994 = vmatpush3.msra.mxu0 %v9206_v30 }
 0x723   :  { %7995 = vmatprep.subr.mxu0 %v9083_v28 }
 0x724   :  { %7996 = vmatpush3.msra.mxu0 %v9212_v31 }
 0x725   :  { %7997 = vmatprep.subr.mxu0 %v9083_v28 }
 0x726   :  { %7998 = vmatpush3.msra.mxu0 %v9218_v32 }
 0x727   :  { %8013 = vmatprep.subr.mxu0 %v9083_v28 }
 0x7df   :  { %v701_v38 = vpop.f32.mrf.mxu0 }
 0x7e0   :  { %v705_v39 = vadd.f32 %v701_v38, %v628_v37 }
 0x7e1   :  { %v7979_v40 = vpop.f32.mrf.mxu0 }
 0x7e2   :  { %8703 = vtanh.f32 %v705_v39  ;;  %v706_v42 = vmul.f32 0.5, %v705_v39 }
 0x7e4   :  { %8705 = vtanh.f32 %v706_v42 }
 0x7ef   :  { %v8704_v41 = vpop.eup %8703 }
 0x7f0   :  { %713 = vrot.lane.b32.xlu0 %v8704_v41, %s9086_s27 }
 0x7f1   :  { %v8706_v43 = vpop.eup %8705 }
 0x7f2   :  { %v708_v44 = vmul.f32 0.5, %v8706_v43 }
 0x7f4   :  { %v709_v46 = vadd.f32 0.5, %v708_v44 }
 0x7f6   :  { %v711_v55 = vmul.f32 %v709_v46, %v612_v25 }
 0x862   :  { %v714_v51 = vpop.permute.xlu0 %713 }
 0x863   :  { %v716_v54 = vmul.f32 %v714_v51, %v709_v46  ;;  %v951_v51 = vrot.slane %v9273_v53, 5 }
 0x865   :  { %718 = vrot.lane.b32.xlu1 %v716_v54, %s9086_s27 }
 0x8d7   :  { %v719_v56 = vpop.permute.xlu1 %718 }
 0x8d8   :  { %v721_v57 = vadd.f32 %v719_v56, %v711_v55 }
 0x8da   :  { %8707 = vtanh.f32 %v721_v57 }
 0x8e7   :  { %v8708_v58 = vpop.eup %8707 }
 0x8e8   :  { %724 = vrot.lane.b32.xlu0 %v8708_v58, %s9086_s27 }
 0x95a   :  { %v725_v59 = vpop.permute.xlu0 %724 }
 0x95b   :  { %v727_v60 = vmul.f32 %v725_v59, %v709_v46  ;;  %v953_v46 = vrot.slane %v9270_v52, 4 }
 0x95d   :  { %729 = vrot.lane.b32.xlu1 %v727_v60, %s9087_s28  ;;  %v955_v54 = vsel %vm407_vm4, %v951_v51, %v953_v46 }
 0x9cf   :  { %v730_v61 = vpop.permute.xlu1 %729 }
 0x9d0   :  { %732 = vst.msk [vmem:[#allocation2 + $0x4] sm:$0x3] %vm514_vm5, %v730_v61  ;;  %7989 = vmatmul.mubr.msk.f32.vlgmr.msra.gmra.mxu1 %vm413_vm6, %v730_v61 }
 0x9d1   :  { %8003 = vmatpush3.msra.mxu1 %v9199_v29  ;;  %8010 = vmatprep.mubr.msk.f32.mxu1 %vm9084_vm2, %v9083_v28 }
 0x9d2   :  { %8004 = vmatprep.subr.mxu1 %v9083_v28 }
 0x9d3   :  { %8005 = vmatpush3.msra.mxu1 %v9206_v30 }
 0x9d4   :  { %8006 = vmatprep.subr.mxu1 %v9083_v28 }
 0x9d5   :  { %8007 = vmatpush3.msra.mxu1 %v9212_v31 }
 0x9d6   :  { %8008 = vmatprep.subr.mxu1 %v9083_v28 }
 0x9d7   :  { %8009 = vmatpush3.msra.mxu1 %v9218_v32 }
 0x9d8   :  { %8024 = vmatprep.subr.mxu1 %v9083_v28 }
 0xa90   :  { %v810_v1 = vpop.f32.mrf.mxu1 }
 0xa91   :  { %v814_v2 = vadd.f32 %v810_v1, %v737_v0 }
 0xa92   :  { %v7990_v3 = vpop.f32.mrf.mxu1 }
 0xa93   :  { %8709 = vtanh.f32 %v814_v2  ;;  %v815_v5 = vmul.f32 0.5, %v814_v2 }
 0xa95   :  { %8711 = vtanh.f32 %v815_v5 }
 0xaa0   :  { %v8710_v4 = vpop.eup %8709 }
 0xaa1   :  { %822 = vrot.lane.b32.xlu0 %v8710_v4, %s9086_s27 }
 0xaa2   :  { %v8712_v6 = vpop.eup %8711 }
 0xaa3   :  { %v817_v7 = vmul.f32 0.5, %v8712_v6 }
 0xaa5   :  { %v818_v8 = vadd.f32 0.5, %v817_v7 }
 0xaa7   :  { %v820_v13 = vmul.f32 %v818_v8, %v721_v57 }
 0xb13   :  { %v823_v11 = vpop.permute.xlu0 %822 }
 0xb14   :  { %v825_v12 = vmul.f32 %v823_v11, %v818_v8  ;;  %v1060_v11 = vrot.slane %v9273_v53, 6 }
 0xb16   :  { %827 = vrot.lane.b32.xlu1 %v825_v12, %s9086_s27 }
 0xb88   :  { %v828_v14 = vpop.permute.xlu1 %827 }
 0xb89   :  { %v830_v15 = vadd.f32 %v828_v14, %v820_v13 }
 0xb8b   :  { %8713 = vtanh.f32 %v830_v15 }
 0xb98   :  { %v8714_v16 = vpop.eup %8713 }
 0xb99   :  { %833 = vrot.lane.b32.xlu0 %v8714_v16, %s9086_s27 }
 0xc0b   :  { %v834_v17 = vpop.permute.xlu0 %833 }
 0xc0c   :  { %v836_v18 = vmul.f32 %v834_v17, %v818_v8  ;;  %v1062_v8 = vrot.slane %v9270_v52, 5 }
 0xc0e   :  { %838 = vrot.lane.b32.xlu1 %v836_v18, %s9087_s28  ;;  %v1064_v12 = vsel %vm407_vm4, %v1060_v11, %v1062_v8 }
 0xc80   :  { %v839_v19 = vpop.permute.xlu1 %838 }
 0xc81   :  { %841 = vst.msk [vmem:[#allocation2 + $0x6] sm:$0x3] %vm514_vm5, %v839_v19  ;;  %8000 = vmatmul.mubr.msk.f32.vlgmr.msra.gmra.mxu0 %vm413_vm6, %v839_v19 }
 0xc82   :  { %8014 = vmatpush3.msra.mxu0 %v9199_v29  ;;  %8021 = vmatprep.mubr.msk.f32.mxu0 %vm9084_vm2, %v9083_v28 }
 0xc83   :  { %8015 = vmatprep.subr.mxu0 %v9083_v28 }
 0xc84   :  { %8016 = vmatpush3.msra.mxu0 %v9206_v30 }
 0xc85   :  { %8017 = vmatprep.subr.mxu0 %v9083_v28 }
 0xc86   :  { %8018 = vmatpush3.msra.mxu0 %v9212_v31 }
 0xc87   :  { %8019 = vmatprep.subr.mxu0 %v9083_v28 }
 0xc88   :  { %8020 = vmatpush3.msra.mxu0 %v9218_v32 }
 0xc89   :  { %8035 = vmatprep.subr.mxu0 %v9083_v28 }
 0xd41   :  { %v919_v23 = vpop.f32.mrf.mxu0 }
 0xd42   :  { %v923_v24 = vadd.f32 %v919_v23, %v846_v22 }
 0xd43   :  { %v8001_v25 = vpop.f32.mrf.mxu0 }
 0xd44   :  { %8715 = vtanh.f32 %v923_v24  ;;  %v924_v27 = vmul.f32 0.5, %v923_v24 }
 0xd46   :  { %8717 = vtanh.f32 %v924_v27 }
 0xd51   :  { %v8716_v26 = vpop.eup %8715 }
 0xd52   :  { %931 = vrot.lane.b32.xlu0 %v8716_v26, %s9086_s27 }
 0xd53   :  { %v8718_v33 = vpop.eup %8717 }
 0xd54   :  { %v926_v34 = vmul.f32 0.5, %v8718_v33 }
 0xd56   :  { %v927_v35 = vadd.f32 0.5, %v926_v34 }
 0xd58   :  { %v929_v38 = vmul.f32 %v927_v35, %v830_v15 }
 0xdc4   :  { %v932_v36 = vpop.permute.xlu0 %931 }
 0xdc5   :  { %v934_v37 = vmul.f32 %v932_v36, %v927_v35  ;;  %v1169_v36 = vrot.slane %v9273_v53, 7 }
 0xdc7   :  { %936 = vrot.lane.b32.xlu1 %v934_v37, %s9086_s27 }
 0xe39   :  { %v937_v39 = vpop.permute.xlu1 %936 }
 0xe3a   :  { %v939_v40 = vadd.f32 %v937_v39, %v929_v38 }
 0xe3c   :  { %8719 = vtanh.f32 %v939_v40 }
 0xe49   :  { %v8720_v41 = vpop.eup %8719 }
 0xe4a   :  { %942 = vrot.lane.b32.xlu0 %v8720_v41, %s9086_s27 }
 0xebc   :  { %v943_v42 = vpop.permute.xlu0 %942 }
 0xebd   :  { %v945_v43 = vmul.f32 %v943_v42, %v927_v35  ;;  %v1171_v35 = vrot.slane %v9270_v52, 6 }
 0xebf   :  { %947 = vrot.lane.b32.xlu1 %v945_v43, %s9087_s28  ;;  %v1173_v37 = vsel %vm407_vm4, %v1169_v36, %v1171_v35 }
 0xf31   :  { %v948_v44 = vpop.permute.xlu1 %947 }
 0xf32   :  { %950 = vst.msk [vmem:[#allocation2 + $0x8] sm:$0x3] %vm514_vm5, %v948_v44  ;;  %8011 = vmatmul.mubr.msk.f32.vlgmr.msra.gmra.mxu1 %vm413_vm6, %v948_v44 }
 0xf33   :  { %8025 = vmatpush3.msra.mxu1 %v9199_v29  ;;  %8032 = vmatprep.mubr.msk.f32.mxu1 %vm9084_vm2, %v9083_v28 }
 0xf34   :  { %8026 = vmatprep.subr.mxu1 %v9083_v28 }
 0xf35   :  { %8027 = vmatpush3.msra.mxu1 %v9206_v30 }
 0xf36   :  { %8028 = vmatprep.subr.mxu1 %v9083_v28 }
 0xf37   :  { %8029 = vmatpush3.msra.mxu1 %v9212_v31 }
 0xf38   :  { %8030 = vmatprep.subr.mxu1 %v9083_v28 }
 0xf39   :  { %8031 = vmatpush3.msra.mxu1 %v9218_v32 }
 0xf3a   :  { %8046 = vmatprep.subr.mxu1 %v9083_v28 }
 0xff2   :  { %v1028_v55 = vpop.f32.mrf.mxu1 }
 0xff3   :  { %v1032_v56 = vadd.f32 %v1028_v55, %v955_v54 }
 0xff4   :  { %v8012_v57 = vpop.f32.mrf.mxu1 }
 0xff5   :  { %8721 = vtanh.f32 %v1032_v56  ;;  %v1033_v59 = vmul.f32 0.5, %v1032_v56 }
 0xff7   :  { %8723 = vtanh.f32 %v1033_v59 }
0x1002   :  { %v8722_v58 = vpop.eup %8721 }
0x1003   :  { %1040 = vrot.lane.b32.xlu0 %v8722_v58, %s9086_s27 }
0x1004   :  { %v8724_v60 = vpop.eup %8723 }
0x1005   :  { %v1035_v61 = vmul.f32 0.5, %v8724_v60  ;;  %v9439_v60 = vadd.f32 %v9262_v49, %v9267_v50 }
0x1007   :  { %v1036_v62 = vadd.f32 0.5, %v1035_v61  ;;  %v1279_v61 = vrot.slane %v9439_v60, 7 }
0x1009   :  { %v1038_v1 = vmul.f32 %v1036_v62, %v939_v40 }
0x1075   :  { %v1041_v63 = vpop.permute.xlu0 %1040 }
0x1076   :  { %v1043_v0 = vmul.f32 %v1041_v63, %v1036_v62 }
0x1078   :  { %1045 = vrot.lane.b32.xlu1 %v1043_v0, %s9086_s27 }
0x10ea   :  { %v1046_v2 = vpop.permute.xlu1 %1045 }
0x10eb   :  { %v1048_v3 = vadd.f32 %v1046_v2, %v1038_v1 }
0x10ed   :  { %8725 = vtanh.f32 %v1048_v3 }
0x10fa   :  { %v8726_v4 = vpop.eup %8725 }
0x10fb   :  { %1051 = vrot.lane.b32.xlu0 %v8726_v4, %s9086_s27 }
0x116d   :  { %v1052_v5 = vpop.permute.xlu0 %1051 }
0x116e   :  { %v1054_v6 = vmul.f32 %v1052_v5, %v1036_v62  ;;  %v9444_v62 = vadd.f32 %v9256_v45, %v9267_v50 }
0x1170   :  { %1056 = vrot.lane.b32.xlu1 %v1054_v6, %s9087_s28  ;;  %v1281_v63 = vsel %vm407_vm4, %v9444_v62, %v1279_v61 }
0x11e2   :  { %v1057_v7 = vpop.permute.xlu1 %1056 }
0x11e3   :  { %1059 = vst.msk [vmem:[#allocation2 + $0xa] sm:$0x3] %vm514_vm5, %v1057_v7  ;;  %8022 = vmatmul.mubr.msk.f32.vlgmr.msra.gmra.mxu0 %vm413_vm6, %v1057_v7 }
0x11e4   :  { %8036 = vmatpush3.msra.mxu0 %v9199_v29  ;;  %8043 = vmatprep.mubr.msk.f32.mxu0 %vm9084_vm2, %v9083_v28 }
0x11e5   :  { %8037 = vmatprep.subr.mxu0 %v9083_v28 }
0x11e6   :  { %8038 = vmatpush3.msra.mxu0 %v9206_v30 }
0x11e7   :  { %8039 = vmatprep.subr.mxu0 %v9083_v28 }
0x11e8   :  { %8040 = vmatpush3.msra.mxu0 %v9212_v31 }
0x11e9   :  { %8041 = vmatprep.subr.mxu0 %v9083_v28 }
0x11ea   :  { %8042 = vmatpush3.msra.mxu0 %v9218_v32 }
0x11eb   :  { %8057 = vmatprep.subr.mxu0 %v9083_v28 }
0x12a3   :  { %v1137_v13 = vpop.f32.mrf.mxu0 }
0x12a4   :  { %v1141_v14 = vadd.f32 %v1137_v13, %v1064_v12 }
0x12a5   :  { %v8023_v15 = vpop.f32.mrf.mxu0 }
0x12a6   :  { %8727 = vtanh.f32 %v1141_v14  ;;  %v1142_v17 = vmul.f32 0.5, %v1141_v14 }
0x12a8   :  { %8729 = vtanh.f32 %v1142_v17 }
0x12b3   :  { %v8728_v16 = vpop.eup %8727 }
0x12b4   :  { %1149 = vrot.lane.b32.xlu0 %v8728_v16, %s9086_s27  ;;  %v1387_v16 = vrot.slane %v9444_v62, 1 }
0x12b5   :  { %v8730_v18 = vpop.eup %8729 }
0x12b6   :  { %v1144_v19 = vmul.f32 0.5, %v8730_v18  ;;  %v1389_v17 = vsel %vm407_vm4, %v1387_v16, %v9439_v60 }
0x12b8   :  { %v1145_v20 = vadd.f32 0.5, %v1144_v19 }
0x12ba   :  { %v1147_v23 = vmul.f32 %v1145_v20, %v1048_v3 }
0x1326   :  { %v1150_v21 = vpop.permute.xlu0 %1149 }
0x1327   :  { %v1152_v22 = vmul.f32 %v1150_v21, %v1145_v20 }
0x1329   :  { %1154 = vrot.lane.b32.xlu1 %v1152_v22, %s9086_s27 }
0x139b   :  { %v1155_v24 = vpop.permute.xlu1 %1154 }
0x139c   :  { %v1157_v25 = vadd.f32 %v1155_v24, %v1147_v23 }
0x139e   :  { %8731 = vtanh.f32 %v1157_v25 }
0x13ab   :  { %v8732_v26 = vpop.eup %8731 }
0x13ac   :  { %1160 = vrot.lane.b32.xlu0 %v8732_v26, %s9086_s27 }
0x141e   :  { %v1161_v27 = vpop.permute.xlu0 %1160 }
0x141f   :  { %v1163_v33 = vmul.f32 %v1161_v27, %v1145_v20 }
0x1421   :  { %1165 = vrot.lane.b32.xlu1 %v1163_v33, %s9087_s28 }
0x1493   :  { %v1166_v34 = vpop.permute.xlu1 %1165 }
0x1494   :  { %1168 = vst.msk [vmem:[#allocation2 + $0xc] sm:$0x3] %vm514_vm5, %v1166_v34  ;;  %8033 = vmatmul.mubr.msk.f32.vlgmr.msra.gmra.mxu1 %vm413_vm6, %v1166_v34 }
0x1495   :  { %8047 = vmatpush3.msra.mxu1 %v9199_v29  ;;  %8054 = vmatprep.mubr.msk.f32.mxu1 %vm9084_vm2, %v9083_v28 }
0x1496   :  { %8048 = vmatprep.subr.mxu1 %v9083_v28 }
0x1497   :  { %8049 = vmatpush3.msra.mxu1 %v9206_v30 }
0x1498   :  { %8050 = vmatprep.subr.mxu1 %v9083_v28 }
0x1499   :  { %8051 = vmatpush3.msra.mxu1 %v9212_v31 }
0x149a   :  { %8052 = vmatprep.subr.mxu1 %v9083_v28 }
0x149b   :  { %8053 = vmatpush3.msra.mxu1 %v9218_v32 }
0x149c   :  { %8068 = vmatprep.subr.mxu1 %v9083_v28 }
0x1554   :  { %v1246_v38 = vpop.f32.mrf.mxu1 }
0x1555   :  { %v1250_v39 = vadd.f32 %v1246_v38, %v1173_v37 }
0x1556   :  { %v8034_v40 = vpop.f32.mrf.mxu1 }
0x1557   :  { %8733 = vtanh.f32 %v1250_v39  ;;  %v1251_v42 = vmul.f32 0.5, %v1250_v39  ;;  %v1496_v40 = vrot.slane %v9439_v60, 1 }
0x1559   :  { %8735 = vtanh.f32 %v1251_v42 }
0x1564   :  { %v8734_v41 = vpop.eup %8733 }
0x1565   :  { %1258 = vrot.lane.b32.xlu0 %v8734_v41, %s9086_s27 }
0x1566   :  { %v8736_v43 = vpop.eup %8735 }
0x1567   :  { %v1253_v44 = vmul.f32 0.5, %v8736_v43 }
0x1569   :  { %v1254_v46 = vadd.f32 0.5, %v1253_v44 }
0x156b   :  { %v1256_v52 = vmul.f32 %v1254_v46, %v1157_v25 }
0x15d7   :  { %v1259_v51 = vpop.permute.xlu0 %1258 }
0x15d8   :  { %v1261_v54 = vmul.f32 %v1259_v51, %v1254_v46 }
0x15da   :  { %1263 = vrot.lane.b32.xlu1 %v1261_v54, %s9086_s27 }
0x164c   :  { %v1264_v53 = vpop.permute.xlu1 %1263 }
0x164d   :  { %v1266_v55 = vadd.f32 %v1264_v53, %v1256_v52 }
0x164f   :  { %8737 = vtanh.f32 %v1266_v55 }
0x165c   :  { %v8738_v56 = vpop.eup %8737 }
0x165d   :  { %1269 = vrot.lane.b32.xlu0 %v8738_v56, %s9086_s27 }
0x16cf   :  { %v1270_v57 = vpop.permute.xlu0 %1269 }
0x16d0   :  { %v1272_v58 = vmul.f32 %v1270_v57, %v1254_v46 }
0x16d2   :  { %1274 = vrot.lane.b32.xlu1 %v1272_v58, %s9087_s28 }
0x1744   :  { %v1275_v59 = vpop.permute.xlu1 %1274 }
0x1745   :  { %1277 = vst.msk [vmem:[#allocation2 + $0xe] sm:$0x3] %vm514_vm5, %v1275_v59  ;;  %8044 = vmatmul.mubr.msk.f32.vlgmr.msra.gmra.mxu0 %vm413_vm6, %v1275_v59 }
0x1746   :  { %8058 = vmatpush3.msra.mxu0 %v9199_v29  ;;  %8065 = vmatprep.mubr.msk.f32.mxu0 %vm9084_vm2, %v9083_v28 }
0x1747   :  { %8059 = vmatprep.subr.mxu0 %v9083_v28 }
0x1748   :  { %8060 = vmatpush3.msra.mxu0 %v9206_v30 }
0x1749   :  { %8061 = vmatprep.subr.mxu0 %v9083_v28 }
0x174a   :  { %8062 = vmatpush3.msra.mxu0 %v9212_v31 }
0x174b   :  { %8063 = vmatprep.subr.mxu0 %v9083_v28 }
0x174c   :  { %8064 = vmatpush3.msra.mxu0 %v9218_v32 }
0x174d   :  { %8079 = vmatprep.subr.mxu0 %v9083_v28 }
0x1805   :  { %v1354_v0 = vpop.f32.mrf.mxu0 }
0x1806   :  { %v1358_v1 = vadd.f32 %v1354_v0, %v1281_v63  ;;  %v1605_v63 = vrot.slane %v9439_v60, 2  ;;  %v1603_v0 = vrot.slane %v9444_v62, 3 }
0x1807   :  { %v8045_v2 = vpop.f32.mrf.mxu0 }
0x1808   :  { %8739 = vtanh.f32 %v1358_v1  ;;  %v1359_v4 = vmul.f32 0.5, %v1358_v1  ;;  %v1607_v1 = vsel %vm407_vm4, %v1603_v0, %v1605_v63 }
0x180a   :  { %8741 = vtanh.f32 %v1359_v4 }
0x1815   :  { %v8740_v3 = vpop.eup %8739 }
0x1816   :  { %1366 = vrot.lane.b32.xlu0 %v8740_v3, %s9086_s27 }
0x1817   :  { %v8742_v49 = vpop.eup %8741 }
0x1818   :  { %v1361_v5 = vmul.f32 0.5, %v8742_v49 }
0x181a   :  { %v1362_v6 = vadd.f32 0.5, %v1361_v5 }
0x181c   :  { %v1364_v45 = vmul.f32 %v1362_v6, %v1266_v55 }
0x1888   :  { %v1367_v7 = vpop.permute.xlu0 %1366 }
0x1889   :  { %v1369_v8 = vmul.f32 %v1367_v7, %v1362_v6 }
0x188b   :  { %1371 = vrot.lane.b32.xlu1 %v1369_v8, %s9086_s27 }
0x18fd   :  { %v1372_v50 = vpop.permute.xlu1 %1371 }
0x18fe   :  { %v1374_v11 = vadd.f32 %v1372_v50, %v1364_v45 }
0x1900   :  { %8743 = vtanh.f32 %v1374_v11 }
0x190d   :  { %v8744_v12 = vpop.eup %8743 }
0x190e   :  { %1377 = vrot.lane.b32.xlu0 %v8744_v12, %s9086_s27 }
0x1980   :  { %v1378_v13 = vpop.permute.xlu0 %1377 }
0x1981   :  { %v1380_v14 = vmul.f32 %v1378_v13, %v1362_v6 }
0x1983   :  { %1382 = vrot.lane.b32.xlu1 %v1380_v14, %s9087_s28 }
0x19f5   :  { %v1383_v15 = vpop.permute.xlu1 %1382 }
0x19f6   :  { %1385 = vst.msk [vmem:[#allocation2 + $0x10] sm:$0x3] %vm514_vm5, %v1383_v15  ;;  %8055 = vmatmul.mubr.msk.f32.vlgmr.msra.gmra.mxu1 %vm413_vm6, %v1383_v15 }
0x19f7   :  { %8069 = vmatpush3.msra.mxu1 %v9199_v29  ;;  %8076 = vmatprep.mubr.msk.f32.mxu1 %vm9084_vm2, %v9083_v28 }
0x19f8   :  { %8070 = vmatprep.subr.mxu1 %v9083_v28 }
0x19f9   :  { %8071 = vmatpush3.msra.mxu1 %v9206_v30 }
0x19fa   :  { %8072 = vmatprep.subr.mxu1 %v9083_v28 }
0x19fb   :  { %8073 = vmatpush3.msra.mxu1 %v9212_v31 }
0x19fc   :  { %8074 = vmatprep.subr.mxu1 %v9083_v28 }
0x19fd   :  { %8075 = vmatpush3.msra.mxu1 %v9218_v32 }
0x19fe   :  { %8090 = vmatprep.subr.mxu1 %v9083_v28 }
0x1ab6   :  { %v1462_v18 = vpop.f32.mrf.mxu1 }
0x1ab7   :  { %v1466_v19 = vadd.f32 %v1462_v18, %v1389_v17  ;;  %v1714_v18 = vrot.slane %v9439_v60, 3 }
0x1ab8   :  { %v8056_v20 = vpop.f32.mrf.mxu1 }
0x1ab9   :  { %8745 = vtanh.f32 %v1466_v19  ;;  %v1467_v22 = vmul.f32 0.5, %v1466_v19  ;;  %v1712_v19 = vrot.slane %v9444_v62, 4 }
0x1abb   :  { %8747 = vtanh.f32 %v1467_v22  ;;  %v1716_v20 = vsel %vm407_vm4, %v1712_v19, %v1714_v18 }
0x1ac6   :  { %v8746_v21 = vpop.eup %8745 }
0x1ac7   :  { %1474 = vrot.lane.b32.xlu0 %v8746_v21, %s9086_s27 }
0x1ac8   :  { %v8748_v23 = vpop.eup %8747 }
0x1ac9   :  { %v1469_v24 = vmul.f32 0.5, %v8748_v23 }
0x1acb   :  { %v1470_v25 = vadd.f32 0.5, %v1469_v24 }
0x1acd   :  { %v1472_v33 = vmul.f32 %v1470_v25, %v1374_v11 }
0x1b39   :  { %v1475_v26 = vpop.permute.xlu0 %1474 }
0x1b3a   :  { %v1477_v27 = vmul.f32 %v1475_v26, %v1470_v25 }
0x1b3c   :  { %1479 = vrot.lane.b32.xlu1 %v1477_v27, %s9086_s27 }
0x1bae   :  { %v1480_v34 = vpop.permute.xlu1 %1479 }
0x1baf   :  { %v1482_v35 = vadd.f32 %v1480_v34, %v1472_v33 }
0x1bb1   :  { %8749 = vtanh.f32 %v1482_v35 }
0x1bbe   :  { %v8750_v36 = vpop.eup %8749 }
0x1bbf   :  { %1485 = vrot.lane.b32.xlu0 %v8750_v36, %s9086_s27 }
0x1c31   :  { %v1486_v37 = vpop.permute.xlu0 %1485 }
0x1c32   :  { %v1488_v38 = vmul.f32 %v1486_v37, %v1470_v25 }
0x1c34   :  { %1490 = vrot.lane.b32.xlu1 %v1488_v38, %s9087_s28 }
0x1ca6   :  { %v1491_v39 = vpop.permute.xlu1 %1490 }
0x1ca7   :  { %1493 = vst.msk [vmem:[#allocation2 + $0x12] sm:$0x3] %vm514_vm5, %v1491_v39  ;;  %8066 = vmatmul.mubr.msk.f32.vlgmr.msra.gmra.mxu0 %vm413_vm6, %v1491_v39  ;;  %v9513_v39 = vld [vmem:[%s10593_s4 + $0x18] sm:$0xff] }
0x1ca8   :  { %8080 = vmatpush3.msra.mxu0 %v9199_v29  ;;  %8087 = vmatprep.mubr.msk.f32.mxu0 %vm9084_vm2, %v9083_v28  ;;  %v1494_v29 = vrot.slane %v9444_v62, 2 }
0x1ca9   :  { %8081 = vmatprep.subr.mxu0 %v9083_v28 }
0x1caa   :  { %8082 = vmatpush3.msra.mxu0 %v9206_v30  ;;  %v1498_v41 = vsel %vm407_vm4, %v1494_v29, %v1496_v40  ;;  %v9518_v40 = vld [vmem:[%s10593_s4 + $0x10] sm:$0xff]  ;;  %v9526_v29 = vld [vmem:[%s10593_s4 + $0x8] sm:$0xff] }
0x1cab   :  { %8083 = vmatprep.subr.mxu0 %v9083_v28 }
0x1cac   :  { %8084 = vmatpush3.msra.mxu0 %v9212_v31 }
0x1cad   :  { %8085 = vmatprep.subr.mxu0 %v9083_v28 }
0x1cae   :  { %8086 = vmatpush3.msra.mxu0 %v9218_v32 }
0x1caf   :  { %8101 = vmatprep.subr.mxu0 %v9083_v28 }
0x1d67   :  { %v1571_v42 = vpop.f32.mrf.mxu0 }
0x1d68   :  { %v1575_v43 = vadd.f32 %v1571_v42, %v1498_v41  ;;  %v9535_v41 = vld [vmem:[%s10593_s4] sm:$0xff] }
0x1d69   :  { %v8067_v44 = vpop.f32.mrf.mxu0 }
0x1d6a   :  { %8751 = vtanh.f32 %v1575_v43  ;;  %v1576_v31 = vmul.f32 0.5, %v1575_v43 }
0x1d6c   :  { %8753 = vtanh.f32 %v1576_v31  ;;  %v1823_v31 = vrot.slane %v9439_v60, 4 }
0x1d77   :  { %v8752_v30 = vpop.eup %8751 }
0x1d78   :  { %1583 = vrot.lane.b32.xlu0 %v8752_v30, %s9086_s27 }
0x1d79   :  { %v8754_v46 = vpop.eup %8753 }
0x1d7a   :  { %v1578_v51 = vmul.f32 0.5, %v8754_v46  ;;  %v1821_v46 = vrot.slane %v9444_v62, 5 }
0x1d7c   :  { %v1579_v32 = vadd.f32 0.5, %v1578_v51  ;;  %v1825_v51 = vsel %vm407_vm4, %v1821_v46, %v1823_v31 }
0x1d7e   :  { %v1581_v53 = vmul.f32 %v1579_v32, %v1482_v35 }
0x1dea   :  { %v1584_v54 = vpop.permute.xlu0 %1583 }
0x1deb   :  { %v1586_v52 = vmul.f32 %v1584_v54, %v1579_v32 }
0x1ded   :  { %1588 = vrot.lane.b32.xlu1 %v1586_v52, %s9086_s27 }
0x1e5f   :  { %v1589_v55 = vpop.permute.xlu1 %1588 }
0x1e60   :  { %v1591_v56 = vadd.f32 %v1589_v55, %v1581_v53 }
0x1e62   :  { %8755 = vtanh.f32 %v1591_v56 }
0x1e6f   :  { %v8756_v57 = vpop.eup %8755 }
0x1e70   :  { %1594 = vrot.lane.b32.xlu0 %v8756_v57, %s9086_s27 }
0x1ee2   :  { %v1595_v58 = vpop.permute.xlu0 %1594 }
0x1ee3   :  { %v1597_v59 = vmul.f32 %v1595_v58, %v1579_v32 }
0x1ee5   :  { %1599 = vrot.lane.b32.xlu1 %v1597_v59, %s9087_s28 }
0x1f57   :  { %v1600_v61 = vpop.permute.xlu1 %1599 }
0x1f58   :  { %1602 = vst.msk [vmem:[#allocation2 + $0x14] sm:$0x3] %vm514_vm5, %v1600_v61  ;;  %8077 = vmatmul.mubr.msk.f32.vlgmr.msra.gmra.mxu1 %vm413_vm6, %v1600_v61 }
0x1f59   :  { %8098 = vmatprep.mubr.msk.f32.mxu1 %vm9084_vm2, %v9083_v28  ;;  %8091 = vmatpush3.msra.mxu1 %v9513_v39 }
0x1f5a   :  { %8092 = vmatprep.subr.mxu1 %v9083_v28 }
0x1f5b   :  { %8093 = vmatpush3.msra.mxu1 %v9518_v40 }
0x1f5c   :  { %8094 = vmatprep.subr.mxu1 %v9083_v28 }
0x1f5d   :  { %8095 = vmatpush3.msra.mxu1 %v9526_v29 }
0x1f5e   :  { %8096 = vmatprep.subr.mxu1 %v9083_v28 }
0x1f5f   :  { %8097 = vmatpush3.msra.mxu1 %v9535_v41 }
0x1f60   :  { %8112 = vmatprep.subr.mxu1 %v9083_v28 }
0x2018   :  { %v1680_v2 = vpop.f32.mrf.mxu1 }
0x2019   :  { %v1684_v3 = vadd.f32 %v1680_v2, %v1607_v1 }
0x201a   :  { %v8078_v4 = vpop.f32.mrf.mxu1 }
0x201b   :  { %8757 = vtanh.f32 %v1684_v3  ;;  %v1685_v5 = vmul.f32 0.5, %v1684_v3 }
0x201d   :  { %8759 = vtanh.f32 %v1685_v5  ;;  %v1932_v5 = vrot.slane %v9439_v60, 5 }
0x2028   :  { %v8758_v49 = vpop.eup %8757 }
0x2029   :  { %1692 = vrot.lane.b32.xlu0 %v8758_v49, %s9086_s27 }
0x202a   :  { %v8760_v6 = vpop.eup %8759 }
0x202b   :  { %v1687_v7 = vmul.f32 0.5, %v8760_v6  ;;  %v1930_v6 = vrot.slane %v9444_v62, 6 }
0x202d   :  { %v1688_v8 = vadd.f32 0.5, %v1687_v7  ;;  %v1934_v7 = vsel %vm407_vm4, %v1930_v6, %v1932_v5 }
0x202f   :  { %v1690_v11 = vmul.f32 %v1688_v8, %v1591_v56 }
0x209b   :  { %v1693_v45 = vpop.permute.xlu0 %1692 }
0x209c   :  { %v1695_v50 = vmul.f32 %v1693_v45, %v1688_v8 }
0x209e   :  { %1697 = vrot.lane.b32.xlu1 %v1695_v50, %s9086_s27 }
0x2110   :  { %v1698_v12 = vpop.permute.xlu1 %1697 }
0x2111   :  { %v1700_v13 = vadd.f32 %v1698_v12, %v1690_v11 }
0x2113   :  { %8761 = vtanh.f32 %v1700_v13 }
0x2120   :  { %v8762_v14 = vpop.eup %8761 }
0x2121   :  { %1703 = vrot.lane.b32.xlu0 %v8762_v14, %s9086_s27 }
0x2193   :  { %v1704_v15 = vpop.permute.xlu0 %1703 }
0x2194   :  { %v1706_v16 = vmul.f32 %v1704_v15, %v1688_v8 }
0x2196   :  { %1708 = vrot.lane.b32.xlu1 %v1706_v16, %s9087_s28 }
0x2208   :  { %v1709_v17 = vpop.permute.xlu1 %1708 }
0x2209   :  { %1711 = vst.msk [vmem:[#allocation2 + $0x16] sm:$0x3] %vm514_vm5, %v1709_v17  ;;  %8088 = vmatmul.mubr.msk.f32.vlgmr.msra.gmra.mxu0 %vm413_vm6, %v1709_v17 }
0x220a   :  { %8109 = vmatprep.mubr.msk.f32.mxu0 %vm9084_vm2, %v9083_v28  ;;  %8102 = vmatpush3.msra.mxu0 %v9513_v39 }
0x220b   :  { %8103 = vmatprep.subr.mxu0 %v9083_v28 }
0x220c   :  { %8104 = vmatpush3.msra.mxu0 %v9518_v40 }
0x220d   :  { %8105 = vmatprep.subr.mxu0 %v9083_v28 }
0x220e   :  { %8106 = vmatpush3.msra.mxu0 %v9526_v29 }
0x220f   :  { %8107 = vmatprep.subr.mxu0 %v9083_v28 }
0x2210   :  { %8108 = vmatpush3.msra.mxu0 %v9535_v41 }
0x2211   :  { %8123 = vmatprep.subr.mxu0 %v9083_v28 }
0x22c9   :  { %v1789_v21 = vpop.f32.mrf.mxu0 }
0x22ca   :  { %v1793_v22 = vadd.f32 %v1789_v21, %v1716_v20 }
0x22cb   :  { %v8089_v23 = vpop.f32.mrf.mxu0 }
0x22cc   :  { %8763 = vtanh.f32 %v1793_v22  ;;  %v1794_v25 = vmul.f32 0.5, %v1793_v22 }
0x22ce   :  { %8765 = vtanh.f32 %v1794_v25  ;;  %v2041_v25 = vrot.slane %v9439_v60, 6 }
0x22d9   :  { %v8764_v24 = vpop.eup %8763 }
0x22da   :  { %1801 = vrot.lane.b32.xlu0 %v8764_v24, %s9086_s27 }
0x22db   :  { %v8766_v26 = vpop.eup %8765 }
0x22dc   :  { %v1796_v27 = vmul.f32 0.5, %v8766_v26  ;;  %v2039_v26 = vrot.slane %v9444_v62, 7 }
0x22de   :  { %v1797_v33 = vadd.f32 0.5, %v1796_v27  ;;  %v2043_v27 = vsel %vm407_vm4, %v2039_v26, %v2041_v25 }
0x22e0   :  { %v1799_v36 = vmul.f32 %v1797_v33, %v1700_v13 }
0x234c   :  { %v1802_v34 = vpop.permute.xlu0 %1801 }
0x234d   :  { %v1804_v35 = vmul.f32 %v1802_v34, %v1797_v33 }
0x234f   :  { %1806 = vrot.lane.b32.xlu1 %v1804_v35, %s9086_s27 }
0x23c1   :  { %v1807_v37 = vpop.permute.xlu1 %1806 }
0x23c2   :  { %v1809_v38 = vadd.f32 %v1807_v37, %v1799_v36 }
0x23c4   :  { %8767 = vtanh.f32 %v1809_v38 }
0x23d1   :  { %v8768_v42 = vpop.eup %8767 }
0x23d2   :  { %1812 = vrot.lane.b32.xlu0 %v8768_v42, %s9086_s27 }
0x2444   :  { %v1813_v43 = vpop.permute.xlu0 %1812 }
0x2445   :  { %v1815_v44 = vmul.f32 %v1813_v43, %v1797_v33 }
0x2447   :  { %1817 = vrot.lane.b32.xlu1 %v1815_v44, %s9087_s28 }
0x24b9   :  { %v1818_v30 = vpop.permute.xlu1 %1817 }
0x24ba   :  { %1820 = vst.msk [vmem:[#allocation2 + $0x18] sm:$0x3] %vm514_vm5, %v1818_v30  ;;  %8099 = vmatmul.mubr.msk.f32.vlgmr.msra.gmra.mxu1 %vm413_vm6, %v1818_v30 }
0x24bb   :  { %8113 = vmatpush3.msra.mxu1 %v9513_v39  ;;  %8120 = vmatprep.mubr.msk.f32.mxu1 %vm9084_vm2, %v9083_v28 }
0x24bc   :  { %8114 = vmatprep.subr.mxu1 %v9083_v28 }
0x24bd   :  { %8115 = vmatpush3.msra.mxu1 %v9518_v40 }
0x24be   :  { %8116 = vmatprep.subr.mxu1 %v9083_v28 }
0x24bf   :  { %8117 = vmatpush3.msra.mxu1 %v9526_v29 }
0x24c0   :  { %8118 = vmatprep.subr.mxu1 %v9083_v28 }
0x24c1   :  { %8119 = vmatpush3.msra.mxu1 %v9535_v41 }
0x24c2   :  { %8134 = vmatprep.subr.mxu1 %v9083_v28 }
0x257a   :  { %v1898_v32 = vpop.f32.mrf.mxu1 }
0x257b   :  { %v1902_v54 = vadd.f32 %v1898_v32, %v1825_v51 }
0x257c   :  { %v8100_v52 = vpop.f32.mrf.mxu1 }
0x257d   :  { %8769 = vtanh.f32 %v1902_v54  ;;  %v1903_v55 = vmul.f32 0.5, %v1902_v54  ;;  %v9620_v52 = vld [vmem:[%s10594_s5] ss:$0 sm:$0xff] }
0x257f   :  { %8771 = vtanh.f32 %v1903_v55 }
0x258a   :  { %v8770_v53 = vpop.eup %8769 }
0x258b   :  { %1910 = vrot.lane.b32.xlu0 %v8770_v53, %s9086_s27  ;;  %v9624_v53 = vadd.f32 %v9620_v52, %v9302_v10 }
0x258c   :  { %v8772_v56 = vpop.eup %8771 }
0x258d   :  { %v1905_v57 = vmul.f32 0.5, %v8772_v56  ;;  %v2149_v55 = vrot.slane %v9624_v53, 7  ;;  %v9629_v56 = vadd.f32 %v9620_v52, %v9260_v48 }
0x258f   :  { %v1906_v58 = vadd.f32 0.5, %v1905_v57  ;;  %v2151_v57 = vsel %vm407_vm4, %v9629_v56, %v2149_v55 }
0x2591   :  { %v1908_v63 = vmul.f32 %v1906_v58, %v1809_v38 }
0x25fd   :  { %v1911_v59 = vpop.permute.xlu0 %1910 }
0x25fe   :  { %v1913_v61 = vmul.f32 %v1911_v59, %v1906_v58 }
0x2600   :  { %1915 = vrot.lane.b32.xlu1 %v1913_v61, %s9086_s27 }
0x2672   :  { %v1916_v0 = vpop.permute.xlu1 %1915 }
0x2673   :  { %v1918_v1 = vadd.f32 %v1916_v0, %v1908_v63 }
0x2675   :  { %8773 = vtanh.f32 %v1918_v1 }
0x2682   :  { %v8774_v2 = vpop.eup %8773 }
0x2683   :  { %1921 = vrot.lane.b32.xlu0 %v8774_v2, %s9086_s27 }
0x26f5   :  { %v1922_v3 = vpop.permute.xlu0 %1921 }
0x26f6   :  { %v1924_v4 = vmul.f32 %v1922_v3, %v1906_v58 }
0x26f8   :  { %1926 = vrot.lane.b32.xlu1 %v1924_v4, %s9087_s28 }
0x276a   :  { %v1927_v49 = vpop.permute.xlu1 %1926 }
0x276b   :  { %1929 = vst.msk [vmem:[#allocation2 + $0x1a] sm:$0x3] %vm514_vm5, %v1927_v49  ;;  %8110 = vmatmul.mubr.msk.f32.vlgmr.msra.gmra.mxu0 %vm413_vm6, %v1927_v49 }
0x276c   :  { %8124 = vmatpush3.msra.mxu0 %v9513_v39  ;;  %8131 = vmatprep.mubr.msk.f32.mxu0 %vm9084_vm2, %v9083_v28 }
0x276d   :  { %8125 = vmatprep.subr.mxu0 %v9083_v28 }
0x276e   :  { %8126 = vmatpush3.msra.mxu0 %v9518_v40 }
0x276f   :  { %8127 = vmatprep.subr.mxu0 %v9083_v28 }
0x2770   :  { %8128 = vmatpush3.msra.mxu0 %v9526_v29 }
0x2771   :  { %8129 = vmatprep.subr.mxu0 %v9083_v28 }
0x2772   :  { %8130 = vmatpush3.msra.mxu0 %v9535_v41 }
0x2773   :  { %8145 = vmatprep.subr.mxu0 %v9083_v28 }
0x282b   :  { %v2007_v8 = vpop.f32.mrf.mxu0 }
0x282c   :  { %v2011_v45 = vadd.f32 %v2007_v8, %v1934_v7 }
0x282d   :  { %v8111_v50 = vpop.f32.mrf.mxu0 }
0x282e   :  { %8775 = vtanh.f32 %v2011_v45  ;;  %v2012_v12 = vmul.f32 0.5, %v2011_v45  ;;  %v2257_v50 = vrot.slane %v9629_v56, 1 }
0x2830   :  { %8777 = vtanh.f32 %v2012_v12 }
0x283b   :  { %v8776_v11 = vpop.eup %8775 }
0x283c   :  { %2019 = vrot.lane.b32.xlu0 %v8776_v11, %s9086_s27  ;;  %v2259_v11 = vsel %vm407_vm4, %v2257_v50, %v9624_v53 }
0x283d   :  { %v8778_v13 = vpop.eup %8777 }
0x283e   :  { %v2014_v14 = vmul.f32 0.5, %v8778_v13 }
0x2840   :  { %v2015_v15 = vadd.f32 0.5, %v2014_v14 }
0x2842   :  { %v2017_v18 = vmul.f32 %v2015_v15, %v1918_v1 }
0x28ae   :  { %v2020_v16 = vpop.permute.xlu0 %2019 }
0x28af   :  { %v2022_v17 = vmul.f32 %v2020_v16, %v2015_v15 }
0x28b1   :  { %2024 = vrot.lane.b32.xlu1 %v2022_v17, %s9086_s27 }
0x2923   :  { %v2025_v19 = vpop.permute.xlu1 %2024 }
0x2924   :  { %v2027_v20 = vadd.f32 %v2025_v19, %v2017_v18 }
0x2926   :  { %8779 = vtanh.f32 %v2027_v20 }
0x2933   :  { %v8780_v21 = vpop.eup %8779 }
0x2934   :  { %2030 = vrot.lane.b32.xlu0 %v8780_v21, %s9086_s27 }
0x29a6   :  { %v2031_v22 = vpop.permute.xlu0 %2030 }
0x29a7   :  { %v2033_v23 = vmul.f32 %v2031_v22, %v2015_v15 }
0x29a9   :  { %2035 = vrot.lane.b32.xlu1 %v2033_v23, %s9087_s28 }
0x2a1b   :  { %v2036_v24 = vpop.permute.xlu1 %2035 }
0x2a1c   :  { %2038 = vst.msk [vmem:[#allocation2 + $0x1c] sm:$0x3] %vm514_vm5, %v2036_v24  ;;  %8121 = vmatmul.mubr.msk.f32.vlgmr.msra.gmra.mxu1 %vm413_vm6, %v2036_v24 }
0x2a1d   :  { %8135 = vmatpush3.msra.mxu1 %v9513_v39  ;;  %8142 = vmatprep.mubr.msk.f32.mxu1 %vm9084_vm2, %v9083_v28 }
0x2a1e   :  { %8136 = vmatprep.subr.mxu1 %v9083_v28 }
0x2a1f   :  { %8137 = vmatpush3.msra.mxu1 %v9518_v40 }
0x2a20   :  { %8138 = vmatprep.subr.mxu1 %v9083_v28 }
0x2a21   :  { %8139 = vmatpush3.msra.mxu1 %v9526_v29 }
0x2a22   :  { %8140 = vmatprep.subr.mxu1 %v9083_v28 }
0x2a23   :  { %8141 = vmatpush3.msra.mxu1 %v9535_v41 }
0x2a24   :  { %8156 = vmatprep.subr.mxu1 %v9083_v28 }
0x2adc   :  { %v2116_v33 = vpop.f32.mrf.mxu1 }
0x2add   :  { %v2120_v34 = vadd.f32 %v2116_v33, %v2043_v27 }
0x2ade   :  { %v8122_v35 = vpop.f32.mrf.mxu1 }
0x2adf   :  { %8781 = vtanh.f32 %v2120_v34  ;;  %v2121_v37 = vmul.f32 0.5, %v2120_v34  ;;  %v2366_v34 = vrot.slane %v9624_v53, 1  ;;  %v2364_v35 = vrot.slane %v9629_v56, 2 }
0x2ae1   :  { %8783 = vtanh.f32 %v2121_v37 }
0x2aec   :  { %v8782_v36 = vpop.eup %8781 }
0x2aed   :  { %2128 = vrot.lane.b32.xlu0 %v8782_v36, %s9086_s27  ;;  %v2368_v36 = vsel %vm407_vm4, %v2364_v35, %v2366_v34 }
0x2aee   :  { %v8784_v38 = vpop.eup %8783 }
0x2aef   :  { %v2123_v42 = vmul.f32 0.5, %v8784_v38 }
0x2af1   :  { %v2124_v43 = vadd.f32 0.5, %v2123_v42 }
0x2af3   :  { %v2126_v60 = vmul.f32 %v2124_v43, %v2027_v20 }
0x2b5f   :  { %v2129_v44 = vpop.permute.xlu0 %2128 }
0x2b60   :  { %v2131_v30 = vmul.f32 %v2129_v44, %v2124_v43 }
0x2b62   :  { %2133 = vrot.lane.b32.xlu1 %v2131_v30, %s9086_s27 }
0x2bd4   :  { %v2134_v62 = vpop.permute.xlu1 %2133 }
0x2bd5   :  { %v2136_v31 = vadd.f32 %v2134_v62, %v2126_v60 }
0x2bd7   :  { %8785 = vtanh.f32 %v2136_v31 }
0x2be4   :  { %v8786_v46 = vpop.eup %8785 }
0x2be5   :  { %2139 = vrot.lane.b32.xlu0 %v8786_v46, %s9086_s27 }
0x2c57   :  { %v2140_v51 = vpop.permute.xlu0 %2139 }
0x2c58   :  { %v2142_v32 = vmul.f32 %v2140_v51, %v2124_v43 }
0x2c5a   :  { %2144 = vrot.lane.b32.xlu1 %v2142_v32, %s9087_s28 }
0x2ccc   :  { %v2145_v54 = vpop.permute.xlu1 %2144 }
0x2ccd   :  { %2147 = vst.msk [vmem:[#allocation2 + $0x1e] sm:$0x3] %vm514_vm5, %v2145_v54  ;;  %8132 = vmatmul.mubr.msk.f32.vlgmr.msra.gmra.mxu0 %vm413_vm6, %v2145_v54 }
0x2cce   :  { %8146 = vmatpush3.msra.mxu0 %v9513_v39  ;;  %8153 = vmatprep.mubr.msk.f32.mxu0 %vm9084_vm2, %v9083_v28 }
0x2ccf   :  { %8147 = vmatprep.subr.mxu0 %v9083_v28 }
0x2cd0   :  { %8148 = vmatpush3.msra.mxu0 %v9518_v40 }
0x2cd1   :  { %8149 = vmatprep.subr.mxu0 %v9083_v28 }
0x2cd2   :  { %8150 = vmatpush3.msra.mxu0 %v9526_v29 }
0x2cd3   :  { %8151 = vmatprep.subr.mxu0 %v9083_v28 }
0x2cd4   :  { %8152 = vmatpush3.msra.mxu0 %v9535_v41 }
0x2cd5   :  { %8167 = vmatprep.subr.mxu0 %v9083_v28 }
0x2d8d   :  { %v2224_v58 = vpop.f32.mrf.mxu0 }
0x2d8e   :  { %v2228_v59 = vadd.f32 %v2224_v58, %v2151_v57 }
0x2d8f   :  { %v8133_v61 = vpop.f32.mrf.mxu0 }
0x2d90   :  { %8787 = vtanh.f32 %v2228_v59  ;;  %v2229_v0 = vmul.f32 0.5, %v2228_v59  ;;  %v2475_v61 = vrot.slane %v9624_v53, 2 }
0x2d92   :  { %8789 = vtanh.f32 %v2229_v0 }
0x2d9d   :  { %v8788_v63 = vpop.eup %8787 }
0x2d9e   :  { %2236 = vrot.lane.b32.xlu0 %v8788_v63, %s9086_s27  ;;  %v2473_v63 = vrot.slane %v9629_v56, 3 }
0x2d9f   :  { %v8790_v10 = vpop.eup %8789 }
0x2da0   :  { %v2231_v1 = vmul.f32 0.5, %v8790_v10  ;;  %v2477_v0 = vsel %vm407_vm4, %v2473_v63, %v2475_v61 }
0x2da2   :  { %v2232_v2 = vadd.f32 0.5, %v2231_v1 }
0x2da4   :  { %v2234_v48 = vmul.f32 %v2232_v2, %v2136_v31 }
0x2e10   :  { %v2237_v3 = vpop.permute.xlu0 %2236 }
0x2e11   :  { %v2239_v4 = vmul.f32 %v2237_v3, %v2232_v2 }
0x2e13   :  { %2241 = vrot.lane.b32.xlu1 %v2239_v4, %s9086_s27 }
0x2e85   :  { %v2242_v49 = vpop.permute.xlu1 %2241 }
0x2e86   :  { %v2244_v5 = vadd.f32 %v2242_v49, %v2234_v48 }
0x2e88   :  { %8791 = vtanh.f32 %v2244_v5 }
0x2e95   :  { %v8792_v6 = vpop.eup %8791 }
0x2e96   :  { %2247 = vrot.lane.b32.xlu0 %v8792_v6, %s9086_s27 }
0x2f08   :  { %v2248_v7 = vpop.permute.xlu0 %2247 }
0x2f09   :  { %v2250_v8 = vmul.f32 %v2248_v7, %v2232_v2 }
0x2f0b   :  { %2252 = vrot.lane.b32.xlu1 %v2250_v8, %s9087_s28 }
0x2f7d   :  { %v2253_v45 = vpop.permute.xlu1 %2252 }
0x2f7e   :  { %2255 = vst.msk [vmem:[#allocation2 + $0x20] sm:$0x3] %vm514_vm5, %v2253_v45  ;;  %8143 = vmatmul.mubr.msk.f32.vlgmr.msra.gmra.mxu1 %vm413_vm6, %v2253_v45 }
0x2f7f   :  { %8157 = vmatpush3.msra.mxu1 %v9513_v39  ;;  %8164 = vmatprep.mubr.msk.f32.mxu1 %vm9084_vm2, %v9083_v28 }
0x2f80   :  { %8158 = vmatprep.subr.mxu1 %v9083_v28 }
0x2f81   :  { %8159 = vmatpush3.msra.mxu1 %v9518_v40 }
0x2f82   :  { %8160 = vmatprep.subr.mxu1 %v9083_v28 }
0x2f83   :  { %8161 = vmatpush3.msra.mxu1 %v9526_v29 }
0x2f84   :  { %8162 = vmatprep.subr.mxu1 %v9083_v28 }
0x2f85   :  { %8163 = vmatpush3.msra.mxu1 %v9535_v41 }
0x2f86   :  { %8178 = vmatprep.subr.mxu1 %v9083_v28 }
0x303e   :  { %v2332_v12 = vpop.f32.mrf.mxu1 }
0x303f   :  { %v2336_v13 = vadd.f32 %v2332_v12, %v2259_v11 }
0x3040   :  { %v8144_v14 = vpop.f32.mrf.mxu1 }
0x3041   :  { %8793 = vtanh.f32 %v2336_v13  ;;  %v2337_v16 = vmul.f32 0.5, %v2336_v13 }
0x3043   :  { %8795 = vtanh.f32 %v2337_v16  ;;  %v2582_v16 = vrot.slane %v9629_v56, 4 }
0x304e   :  { %v8794_v15 = vpop.eup %8793 }
0x304f   :  { %2344 = vrot.lane.b32.xlu0 %v8794_v15, %s9086_s27  ;;  %v2584_v15 = vrot.slane %v9624_v53, 3 }
0x3050   :  { %v8796_v17 = vpop.eup %8795 }
0x3051   :  { %v2339_v18 = vmul.f32 0.5, %v8796_v17  ;;  %v2586_v17 = vsel %vm407_vm4, %v2582_v16, %v2584_v15 }
0x3053   :  { %v2340_v19 = vadd.f32 0.5, %v2339_v18 }
0x3055   :  { %v2342_v22 = vmul.f32 %v2340_v19, %v2244_v5 }
0x30c1   :  { %v2345_v20 = vpop.permute.xlu0 %2344 }
0x30c2   :  { %v2347_v21 = vmul.f32 %v2345_v20, %v2340_v19 }
0x30c4   :  { %2349 = vrot.lane.b32.xlu1 %v2347_v21, %s9086_s27 }
0x3136   :  { %v2350_v23 = vpop.permute.xlu1 %2349 }
0x3137   :  { %v2352_v24 = vadd.f32 %v2350_v23, %v2342_v22 }
0x3139   :  { %8797 = vtanh.f32 %v2352_v24 }
0x3146   :  { %v8798_v25 = vpop.eup %8797 }
0x3147   :  { %2355 = vrot.lane.b32.xlu0 %v8798_v25, %s9086_s27 }
0x31b9   :  { %v2356_v26 = vpop.permute.xlu0 %2355 }
0x31ba   :  { %v2358_v27 = vmul.f32 %v2356_v26, %v2340_v19 }
0x31bc   :  { %2360 = vrot.lane.b32.xlu1 %v2358_v27, %s9087_s28 }
0x322e   :  { %v2361_v33 = vpop.permute.xlu1 %2360 }
0x322f   :  { %2363 = vst.msk [vmem:[#allocation2 + $0x22] sm:$0x3] %vm514_vm5, %v2361_v33  ;;  %8154 = vmatmul.mubr.msk.f32.vlgmr.msra.gmra.mxu0 %vm413_vm6, %v2361_v33 }
0x3230   :  { %8168 = vmatpush3.msra.mxu0 %v9513_v39  ;;  %8175 = vmatprep.mubr.msk.f32.mxu0 %vm9084_vm2, %v9083_v28 }
0x3231   :  { %8169 = vmatprep.subr.mxu0 %v9083_v28 }
0x3232   :  { %8170 = vmatpush3.msra.mxu0 %v9518_v40 }
0x3233   :  { %8171 = vmatprep.subr.mxu0 %v9083_v28 }
0x3234   :  { %8172 = vmatpush3.msra.mxu0 %v9526_v29 }
0x3235   :  { %8173 = vmatprep.subr.mxu0 %v9083_v28 }
0x3236   :  { %8174 = vmatpush3.msra.mxu0 %v9535_v41 }
0x3237   :  { %8189 = vmatprep.subr.mxu0 %v9083_v28 }
0x32ef   :  { %v2441_v37 = vpop.f32.mrf.mxu0 }
0x32f0   :  { %v2445_v38 = vadd.f32 %v2441_v37, %v2368_v36 }
0x32f1   :  { %v8155_v42 = vpop.f32.mrf.mxu0 }
0x32f2   :  { %8799 = vtanh.f32 %v2445_v38  ;;  %v2446_v44 = vmul.f32 0.5, %v2445_v38 }
0x32f4   :  { %8801 = vtanh.f32 %v2446_v44  ;;  %v2691_v44 = vrot.slane %v9629_v56, 5 }
0x32ff   :  { %v8800_v43 = vpop.eup %8799 }
0x3300   :  { %2453 = vrot.lane.b32.xlu0 %v8800_v43, %s9086_s27  ;;  %v2693_v43 = vrot.slane %v9624_v53, 4 }
0x3301   :  { %v8802_v30 = vpop.eup %8801 }
0x3302   :  { %v2448_v60 = vmul.f32 0.5, %v8802_v30  ;;  %v2695_v30 = vsel %vm407_vm4, %v2691_v44, %v2693_v43 }
0x3304   :  { %v2449_v62 = vadd.f32 0.5, %v2448_v60 }
0x3306   :  { %v2451_v51 = vmul.f32 %v2449_v62, %v2352_v24 }
0x3372   :  { %v2454_v31 = vpop.permute.xlu0 %2453 }
0x3373   :  { %v2456_v46 = vmul.f32 %v2454_v31, %v2449_v62 }
0x3375   :  { %2458 = vrot.lane.b32.xlu1 %v2456_v46, %s9086_s27 }
0x33e7   :  { %v2459_v32 = vpop.permute.xlu1 %2458 }
0x33e8   :  { %v2461_v54 = vadd.f32 %v2459_v32, %v2451_v51 }
0x33ea   :  { %8803 = vtanh.f32 %v2461_v54 }
0x33f7   :  { %v8804_v55 = vpop.eup %8803 }
0x33f8   :  { %2464 = vrot.lane.b32.xlu0 %v8804_v55, %s9086_s27 }
0x346a   :  { %v2465_v57 = vpop.permute.xlu0 %2464 }
0x346b   :  { %v2467_v58 = vmul.f32 %v2465_v57, %v2449_v62 }
0x346d   :  { %2469 = vrot.lane.b32.xlu1 %v2467_v58, %s9087_s28 }
0x34df   :  { %v2470_v59 = vpop.permute.xlu1 %2469 }
0x34e0   :  { %2472 = vst.msk [vmem:[#allocation2 + $0x24] sm:$0x3] %vm514_vm5, %v2470_v59  ;;  %8165 = vmatmul.mubr.msk.f32.vlgmr.msra.gmra.mxu1 %vm413_vm6, %v2470_v59 }
0x34e1   :  { %8179 = vmatpush3.msra.mxu1 %v9513_v39  ;;  %8186 = vmatprep.mubr.msk.f32.mxu1 %vm9084_vm2, %v9083_v28 }
0x34e2   :  { %8180 = vmatprep.subr.mxu1 %v9083_v28 }
0x34e3   :  { %8181 = vmatpush3.msra.mxu1 %v9518_v40 }
0x34e4   :  { %8182 = vmatprep.subr.mxu1 %v9083_v28 }
0x34e5   :  { %8183 = vmatpush3.msra.mxu1 %v9526_v29 }
0x34e6   :  { %8184 = vmatprep.subr.mxu1 %v9083_v28 }
0x34e7   :  { %8185 = vmatpush3.msra.mxu1 %v9535_v41 }
0x34e8   :  { %8200 = vmatprep.subr.mxu1 %v9083_v28 }
0x35a0   :  { %v2550_v10 = vpop.f32.mrf.mxu1 }
0x35a1   :  { %v2554_v1 = vadd.f32 %v2550_v10, %v2477_v0 }
0x35a2   :  { %v8166_v2 = vpop.f32.mrf.mxu1 }
0x35a3   :  { %8805 = vtanh.f32 %v2554_v1  ;;  %v2555_v4 = vmul.f32 0.5, %v2554_v1 }
0x35a5   :  { %8807 = vtanh.f32 %v2555_v4  ;;  %v2800_v4 = vrot.slane %v9629_v56, 6 }
0x35b0   :  { %v8806_v3 = vpop.eup %8805 }
0x35b1   :  { %2562 = vrot.lane.b32.xlu0 %v8806_v3, %s9086_s27  ;;  %v2802_v3 = vrot.slane %v9624_v53, 5 }
0x35b2   :  { %v8808_v48 = vpop.eup %8807 }
0x35b3   :  { %v2557_v49 = vmul.f32 0.5, %v8808_v48  ;;  %v2804_v48 = vsel %vm407_vm4, %v2800_v4, %v2802_v3 }
0x35b5   :  { %v2558_v5 = vadd.f32 0.5, %v2557_v49 }
0x35b7   :  { %v2560_v8 = vmul.f32 %v2558_v5, %v2461_v54 }
0x3623   :  { %v2563_v6 = vpop.permute.xlu0 %2562 }
0x3624   :  { %v2565_v7 = vmul.f32 %v2563_v6, %v2558_v5 }
0x3626   :  { %2567 = vrot.lane.b32.xlu1 %v2565_v7, %s9086_s27 }
0x3698   :  { %v2568_v45 = vpop.permute.xlu1 %2567 }
0x3699   :  { %v2570_v50 = vadd.f32 %v2568_v45, %v2560_v8 }
0x369b   :  { %8809 = vtanh.f32 %v2570_v50 }
0x36a8   :  { %v8810_v11 = vpop.eup %8809 }
0x36a9   :  { %2573 = vrot.lane.b32.xlu0 %v8810_v11, %s9086_s27 }
0x371b   :  { %v2574_v12 = vpop.permute.xlu0 %2573 }
0x371c   :  { %v2576_v13 = vmul.f32 %v2574_v12, %v2558_v5 }
0x371e   :  { %2578 = vrot.lane.b32.xlu1 %v2576_v13, %s9087_s28 }
0x3790   :  { %v2579_v14 = vpop.permute.xlu1 %2578 }
0x3791   :  { %2581 = vst.msk [vmem:[#allocation2 + $0x26] sm:$0x3] %vm514_vm5, %v2579_v14  ;;  %8176 = vmatmul.mubr.msk.f32.vlgmr.msra.gmra.mxu0 %vm413_vm6, %v2579_v14 }
0x3792   :  { %8190 = vmatpush3.msra.mxu0 %v9513_v39  ;;  %8197 = vmatprep.mubr.msk.f32.mxu0 %vm9084_vm2, %v9083_v28 }
0x3793   :  { %8191 = vmatprep.subr.mxu0 %v9083_v28 }
0x3794   :  { %8192 = vmatpush3.msra.mxu0 %v9518_v40 }
0x3795   :  { %8193 = vmatprep.subr.mxu0 %v9083_v28 }
0x3796   :  { %8194 = vmatpush3.msra.mxu0 %v9526_v29 }
0x3797   :  { %8195 = vmatprep.subr.mxu0 %v9083_v28 }
0x3798   :  { %8196 = vmatpush3.msra.mxu0 %v9535_v41 }
0x3799   :  { %8211 = vmatprep.subr.mxu0 %v9083_v28 }
0x3851   :  { %v2659_v18 = vpop.f32.mrf.mxu0 }
0x3852   :  { %v2663_v19 = vadd.f32 %v2659_v18, %v2586_v17 }
0x3853   :  { %v8177_v20 = vpop.f32.mrf.mxu0 }
0x3854   :  { %8811 = vtanh.f32 %v2663_v19  ;;  %v2664_v22 = vmul.f32 0.5, %v2663_v19 }
0x3856   :  { %8813 = vtanh.f32 %v2664_v22  ;;  %v2909_v22 = vrot.slane %v9629_v56, 7 }
0x3861   :  { %v8812_v21 = vpop.eup %8811 }
0x3862   :  { %2671 = vrot.lane.b32.xlu0 %v8812_v21, %s9086_s27  ;;  %v2911_v21 = vrot.slane %v9624_v53, 6 }
0x3863   :  { %v8814_v23 = vpop.eup %8813 }
0x3864   :  { %v2666_v24 = vmul.f32 0.5, %v8814_v23  ;;  %v2913_v23 = vsel %vm407_vm4, %v2909_v22, %v2911_v21 }
0x3866   :  { %v2667_v25 = vadd.f32 0.5, %v2666_v24 }
0x3868   :  { %v2669_v33 = vmul.f32 %v2667_v25, %v2570_v50 }
0x38d4   :  { %v2672_v26 = vpop.permute.xlu0 %2671 }
0x38d5   :  { %v2674_v27 = vmul.f32 %v2672_v26, %v2667_v25 }
0x38d7   :  { %2676 = vrot.lane.b32.xlu1 %v2674_v27, %s9086_s27 }
0x3949   :  { %v2677_v34 = vpop.permute.xlu1 %2676 }
0x394a   :  { %v2679_v35 = vadd.f32 %v2677_v34, %v2669_v33 }
0x394c   :  { %8815 = vtanh.f32 %v2679_v35 }
0x3959   :  { %v8816_v36 = vpop.eup %8815 }
0x395a   :  { %2682 = vrot.lane.b32.xlu0 %v8816_v36, %s9086_s27 }
0x39cc   :  { %v2683_v37 = vpop.permute.xlu0 %2682 }
0x39cd   :  { %v2685_v38 = vmul.f32 %v2683_v37, %v2667_v25 }
0x39cf   :  { %2687 = vrot.lane.b32.xlu1 %v2685_v38, %s9087_s28 }
0x3a41   :  { %v2688_v42 = vpop.permute.xlu1 %2687 }
0x3a42   :  { %2690 = vst.msk [vmem:[#allocation2 + $0x28] sm:$0x3] %vm514_vm5, %v2688_v42  ;;  %8187 = vmatmul.mubr.msk.f32.vlgmr.msra.gmra.mxu1 %vm413_vm6, %v2688_v42 }
0x3a43   :  { %8201 = vmatpush3.msra.mxu1 %v9513_v39  ;;  %8208 = vmatprep.mubr.msk.f32.mxu1 %vm9084_vm2, %v9083_v28 }
0x3a44   :  { %8202 = vmatprep.subr.mxu1 %v9083_v28 }
0x3a45   :  { %8203 = vmatpush3.msra.mxu1 %v9518_v40 }
0x3a46   :  { %8204 = vmatprep.subr.mxu1 %v9083_v28 }
0x3a47   :  { %8205 = vmatpush3.msra.mxu1 %v9526_v29 }
0x3a48   :  { %8206 = vmatprep.subr.mxu1 %v9083_v28 }
0x3a49   :  { %8207 = vmatpush3.msra.mxu1 %v9535_v41 }
0x3a4a   :  { %8222 = vmatprep.subr.mxu1 %v9083_v28 }
0x3b02   :  { %v2768_v60 = vpop.f32.mrf.mxu1 }
0x3b03   :  { %v2772_v62 = vadd.f32 %v2768_v60, %v2695_v30 }
0x3b04   :  { %v8188_v31 = vpop.f32.mrf.mxu1 }
0x3b05   :  { %8817 = vtanh.f32 %v2772_v62  ;;  %v2773_v51 = vmul.f32 0.5, %v2772_v62  ;;  %v9789_v31 = vadd.f32 %v9620_v52, %v9258_v47 }
0x3b07   :  { %8819 = vtanh.f32 %v2773_v51 }
0x3b12   :  { %v8818_v46 = vpop.eup %8817 }
0x3b13   :  { %2780 = vrot.lane.b32.xlu0 %v8818_v46, %s9086_s27 }
0x3b14   :  { %v8820_v32 = vpop.eup %8819 }
0x3b15   :  { %v2775_v54 = vmul.f32 0.5, %v8820_v32 }
0x3b17   :  { %v2776_v55 = vadd.f32 0.5, %v2775_v54 }
0x3b19   :  { %v2778_v59 = vmul.f32 %v2776_v55, %v2679_v35 }
0x3b85   :  { %v2781_v57 = vpop.permute.xlu0 %2780 }
0x3b86   :  { %v2783_v58 = vmul.f32 %v2781_v57, %v2776_v55 }
0x3b88   :  { %2785 = vrot.lane.b32.xlu1 %v2783_v58, %s9086_s27 }
0x3bfa   :  { %v2786_v61 = vpop.permute.xlu1 %2785 }
0x3bfb   :  { %v2788_v63 = vadd.f32 %v2786_v61, %v2778_v59 }
0x3bfd   :  { %8821 = vtanh.f32 %v2788_v63 }
0x3c0a   :  { %v8822_v0 = vpop.eup %8821 }
0x3c0b   :  { %2791 = vrot.lane.b32.xlu0 %v8822_v0, %s9086_s27 }
0x3c7d   :  { %v2792_v10 = vpop.permute.xlu0 %2791 }
0x3c7e   :  { %v2794_v1 = vmul.f32 %v2792_v10, %v2776_v55 }
0x3c80   :  { %2796 = vrot.lane.b32.xlu1 %v2794_v1, %s9087_s28  ;;  %v3127_v1 = vrot.slane %v9789_v31, 1 }
0x3cf2   :  { %v2797_v2 = vpop.permute.xlu1 %2796 }
0x3cf3   :  { %2799 = vst.msk [vmem:[#allocation2 + $0x2a] sm:$0x3] %vm514_vm5, %v2797_v2  ;;  %8198 = vmatmul.mubr.msk.f32.vlgmr.msra.gmra.mxu0 %vm413_vm6, %v2797_v2 }
0x3cf4   :  { %8212 = vmatpush3.msra.mxu0 %v9513_v39  ;;  %8219 = vmatprep.mubr.msk.f32.mxu0 %vm9084_vm2, %v9083_v28 }
0x3cf5   :  { %8213 = vmatprep.subr.mxu0 %v9083_v28 }
0x3cf6   :  { %8214 = vmatpush3.msra.mxu0 %v9518_v40 }
0x3cf7   :  { %8215 = vmatprep.subr.mxu0 %v9083_v28 }
0x3cf8   :  { %8216 = vmatpush3.msra.mxu0 %v9526_v29 }
0x3cf9   :  { %8217 = vmatprep.subr.mxu0 %v9083_v28 }
0x3cfa   :  { %8218 = vmatpush3.msra.mxu0 %v9535_v41 }
0x3cfb   :  { %8233 = vmatprep.subr.mxu0 %v9083_v28 }
0x3db3   :  { %v2877_v49 = vpop.f32.mrf.mxu0 }
0x3db4   :  { %v2881_v5 = vadd.f32 %v2877_v49, %v2804_v48 }
0x3db5   :  { %v8199_v6 = vpop.f32.mrf.mxu0 }
0x3db6   :  { %8823 = vtanh.f32 %v2881_v5  ;;  %v2882_v8 = vmul.f32 0.5, %v2881_v5 }
0x3db8   :  { %8825 = vtanh.f32 %v2882_v8 }
0x3dc3   :  { %v8824_v7 = vpop.eup %8823 }
0x3dc4   :  { %2889 = vrot.lane.b32.xlu0 %v8824_v7, %s9086_s27 }
0x3dc5   :  { %v8826_v45 = vpop.eup %8825 }
0x3dc6   :  { %v2884_v50 = vmul.f32 0.5, %v8826_v45 }
0x3dc8   :  { %v2885_v11 = vadd.f32 0.5, %v2884_v50 }
0x3dca   :  { %v2887_v14 = vmul.f32 %v2885_v11, %v2788_v63 }
0x3e36   :  { %v2890_v12 = vpop.permute.xlu0 %2889 }
0x3e37   :  { %v2892_v13 = vmul.f32 %v2890_v12, %v2885_v11 }
0x3e39   :  { %2894 = vrot.lane.b32.xlu1 %v2892_v13, %s9086_s27 }
0x3eab   :  { %v2895_v15 = vpop.permute.xlu1 %2894 }
0x3eac   :  { %v2897_v16 = vadd.f32 %v2895_v15, %v2887_v14 }
0x3eae   :  { %8827 = vtanh.f32 %v2897_v16 }
0x3ebb   :  { %v8828_v17 = vpop.eup %8827 }
0x3ebc   :  { %2900 = vrot.lane.b32.xlu0 %v8828_v17, %s9086_s27 }
0x3f2e   :  { %v2901_v18 = vpop.permute.xlu0 %2900 }
0x3f2f   :  { %v2903_v19 = vmul.f32 %v2901_v18, %v2885_v11 }
0x3f31   :  { %2905 = vrot.lane.b32.xlu1 %v2903_v19, %s9087_s28  ;;  %v3234_v19 = vrot.slane %v9789_v31, 2 }
0x3fa3   :  { %v2906_v20 = vpop.permute.xlu1 %2905 }
0x3fa4   :  { %2908 = vst.msk [vmem:[#allocation2 + $0x2c] sm:$0x3] %vm514_vm5, %v2906_v20  ;;  %8209 = vmatmul.mubr.msk.f32.vlgmr.msra.gmra.mxu1 %vm413_vm6, %v2906_v20 }
0x3fa5   :  { %8223 = vmatpush3.msra.mxu1 %v9513_v39  ;;  %8230 = vmatprep.mubr.msk.f32.mxu1 %vm9084_vm2, %v9083_v28 }
0x3fa6   :  { %8224 = vmatprep.subr.mxu1 %v9083_v28 }
0x3fa7   :  { %8225 = vmatpush3.msra.mxu1 %v9518_v40 }
0x3fa8   :  { %8226 = vmatprep.subr.mxu1 %v9083_v28 }
0x3fa9   :  { %8227 = vmatpush3.msra.mxu1 %v9526_v29 }
0x3faa   :  { %8228 = vmatprep.subr.mxu1 %v9083_v28 }
0x3fab   :  { %8229 = vmatpush3.msra.mxu1 %v9535_v41 }
0x3fac   :  { %8244 = vmatprep.subr.mxu1 %v9083_v28 }
0x4064   :  { %v2986_v24 = vpop.f32.mrf.mxu1 }
0x4065   :  { %v2990_v25 = vadd.f32 %v2986_v24, %v2913_v23 }
0x4066   :  { %v8210_v26 = vpop.f32.mrf.mxu1 }
0x4067   :  { %8829 = vtanh.f32 %v2990_v25  ;;  %v2991_v33 = vmul.f32 0.5, %v2990_v25 }
0x4069   :  { %8831 = vtanh.f32 %v2991_v33 }
0x4074   :  { %v8830_v27 = vpop.eup %8829 }
0x4075   :  { %2998 = vrot.lane.b32.xlu0 %v8830_v27, %s9086_s27 }
0x4076   :  { %v8832_v34 = vpop.eup %8831 }
0x4077   :  { %v2993_v35 = vmul.f32 0.5, %v8832_v34 }
0x4079   :  { %v2994_v36 = vadd.f32 0.5, %v2993_v35 }
0x407b   :  { %v2996_v53 = vmul.f32 %v2994_v36, %v2897_v16 }
0x40e7   :  { %v2999_v37 = vpop.permute.xlu0 %2998 }
0x40e8   :  { %v3001_v38 = vmul.f32 %v2999_v37, %v2994_v36 }
0x40ea   :  { %3003 = vrot.lane.b32.xlu1 %v3001_v38, %s9086_s27 }
0x415c   :  { %v3004_v56 = vpop.permute.xlu1 %3003 }
0x415d   :  { %v3006_v42 = vadd.f32 %v3004_v56, %v2996_v53  ;;  %v9820_v53 = vld [vmem:[%s10593_s4 + $0x18] sm:$0xff]  ;;  %v9825_v56 = vld [vmem:[%s10593_s4 + $0x10] sm:$0xff] }
0x415f   :  { %8833 = vtanh.f32 %v3006_v42 }
0x416c   :  { %v8834_v43 = vpop.eup %8833 }
0x416d   :  { %3009 = vrot.lane.b32.xlu0 %v8834_v43, %s9086_s27  ;;  %v9842_v43 = vld [vmem:[%s10593_s4] sm:$0xff] }
0x41df   :  { %v3010_v44 = vpop.permute.xlu0 %3009 }
0x41e0   :  { %v3012_v30 = vmul.f32 %v3010_v44, %v2994_v36 }
0x41e2   :  { %3014 = vrot.lane.b32.xlu1 %v3012_v30, %s9087_s28 }
0x4254   :  { %v3015_v60 = vpop.permute.xlu1 %3014 }
0x4255   :  { %3017 = vst.msk [vmem:[#allocation2 + $0x2e] sm:$0x3] %vm514_vm5, %v3015_v60  ;;  %8220 = vmatmul.mubr.msk.f32.vlgmr.msra.gmra.mxu0 %vm413_vm6, %v3015_v60 }
0x4256   :  { %8234 = vmatpush3.msra.mxu0 %v9513_v39  ;;  %8241 = vmatprep.mubr.msk.f32.mxu0 %vm9084_vm2, %v9083_v28  ;;  %v9784_v39 = vadd.f32 %v9620_v52, %v9300_v9 }
0x4257   :  { %8235 = vmatprep.subr.mxu0 %v9083_v28 }
0x4258   :  { %8236 = vmatpush3.msra.mxu0 %v9518_v40  ;;  %v3019_v62 = vrot.slane %v9784_v39, 7  ;;  %v3129_v2 = vsel %vm407_vm4, %v3127_v1, %v9784_v39  ;;  %v3236_v18 = vrot.slane %v9784_v39, 1 }
0x4259   :  { %8237 = vmatprep.subr.mxu0 %v9083_v28 }
0x425a   :  { %8238 = vmatpush3.msra.mxu0 %v9526_v29  ;;  %v3021_v40 = vsel %vm407_vm4, %v9789_v31, %v3019_v62  ;;  %v3238_v20 = vsel %vm407_vm4, %v3234_v19, %v3236_v18 }
0x425b   :  { %8239 = vmatprep.subr.mxu0 %v9083_v28 }
0x425c   :  { %8240 = vmatpush3.msra.mxu0 %v9535_v41 }
0x425d   :  { %8255 = vmatprep.subr.mxu0 %v9083_v28 }
0x4315   :  { %v3094_v29 = vpop.f32.mrf.mxu0 }
0x4316   :  { %v3098_v46 = vadd.f32 %v3094_v29, %v3021_v40  ;;  %v3345_v40 = vrot.slane %v9784_v39, 2  ;;  %v3343_v29 = vrot.slane %v9789_v31, 3 }
0x4317   :  { %v8221_v51 = vpop.f32.mrf.mxu0 }
0x4318   :  { %8835 = vtanh.f32 %v3098_v46  ;;  %v3099_v32 = vmul.f32 0.5, %v3098_v46  ;;  %v3347_v46 = vsel %vm407_vm4, %v3343_v29, %v3345_v40  ;;  %v3898_v40 = vld [vmem:[%s10595_s6 + $0x10] sm:$0xff]  ;;  %v3888_v29 = vld [vmem:[#allocation2] sm:$0xff] }
0x431a   :  { %8837 = vtanh.f32 %v3099_v32 }
0x4325   :  { %v8836_v41 = vpop.eup %8835 }
0x4326   :  { %3106 = vrot.lane.b32.xlu0 %v8836_v41, %s9086_s27 }
0x4327   :  { %v8838_v9 = vpop.eup %8837 }
0x4328   :  { %v3101_v54 = vmul.f32 0.5, %v8838_v9 }
0x432a   :  { %v3102_v55 = vadd.f32 0.5, %v3101_v54 }
0x432c   :  { %v3104_v47 = vmul.f32 %v3102_v55, %v3006_v42  ;;  %v9833_v42 = vld [vmem:[%s10593_s4 + $0x8] sm:$0xff] }
0x4398   :  { %v3107_v57 = vpop.permute.xlu0 %3106 }
0x4399   :  { %v3109_v58 = vmul.f32 %v3107_v57, %v3102_v55 }
0x439b   :  { %3111 = vrot.lane.b32.xlu1 %v3109_v58, %s9086_s27 }
0x440d   :  { %v3112_v52 = vpop.permute.xlu1 %3111 }
0x440e   :  { %v3114_v59 = vadd.f32 %v3112_v52, %v3104_v47 }
0x4410   :  { %8839 = vtanh.f32 %v3114_v59 }
0x441d   :  { %v8840_v61 = vpop.eup %8839 }
0x441e   :  { %3117 = vrot.lane.b32.xlu0 %v8840_v61, %s9086_s27 }
0x4490   :  { %v3118_v63 = vpop.permute.xlu0 %3117 }
0x4491   :  { %v3120_v0 = vmul.f32 %v3118_v63, %v3102_v55 }
0x4493   :  { %3122 = vrot.lane.b32.xlu1 %v3120_v0, %s9087_s28 }
0x4505   :  { %v3123_v10 = vpop.permute.xlu1 %3122 }
0x4506   :  { %3125 = vst.msk [vmem:[#allocation2 + $0x30] sm:$0x3] %vm514_vm5, %v3123_v10  ;;  %8231 = vmatmul.mubr.msk.f32.vlgmr.msra.gmra.mxu1 %vm413_vm6, %v3123_v10 }
0x4507   :  { %8252 = vmatprep.mubr.msk.f32.mxu1 %vm9084_vm2, %v9083_v28  ;;  %8245 = vmatpush3.msra.mxu1 %v9820_v53 }
0x4508   :  { %8246 = vmatprep.subr.mxu1 %v9083_v28 }
0x4509   :  { %8247 = vmatpush3.msra.mxu1 %v9825_v56 }
0x450a   :  { %8248 = vmatprep.subr.mxu1 %v9083_v28 }
0x450b   :  { %8249 = vmatpush3.msra.mxu1 %v9833_v42 }
0x450c   :  { %8250 = vmatprep.subr.mxu1 %v9083_v28 }
0x450d   :  { %8251 = vmatpush3.msra.mxu1 %v9842_v43 }
0x450e   :  { %8266 = vmatprep.subr.mxu1 %v9083_v28 }
0x45c6   :  { %v3202_v3 = vpop.f32.mrf.mxu1 }
0x45c7   :  { %v3206_v4 = vadd.f32 %v3202_v3, %v3129_v2  ;;  %v3454_v3 = vrot.slane %v9784_v39, 3 }
0x45c8   :  { %v8232_v48 = vpop.f32.mrf.mxu1 }
0x45c9   :  { %8841 = vtanh.f32 %v3206_v4  ;;  %v3207_v5 = vmul.f32 0.5, %v3206_v4  ;;  %v3452_v4 = vrot.slane %v9789_v31, 4 }
0x45cb   :  { %8843 = vtanh.f32 %v3207_v5  ;;  %v3456_v48 = vsel %vm407_vm4, %v3452_v4, %v3454_v3 }
0x45d6   :  { %v8842_v49 = vpop.eup %8841 }
0x45d7   :  { %3214 = vrot.lane.b32.xlu0 %v8842_v49, %s9086_s27 }
0x45d8   :  { %v8844_v6 = vpop.eup %8843 }
0x45d9   :  { %v3209_v7 = vmul.f32 0.5, %v8844_v6 }
0x45db   :  { %v3210_v8 = vadd.f32 0.5, %v3209_v7 }
0x45dd   :  { %v3212_v11 = vmul.f32 %v3210_v8, %v3114_v59 }
0x4649   :  { %v3215_v45 = vpop.permute.xlu0 %3214 }
0x464a   :  { %v3217_v50 = vmul.f32 %v3215_v45, %v3210_v8 }
0x464c   :  { %3219 = vrot.lane.b32.xlu1 %v3217_v50, %s9086_s27 }
0x46be   :  { %v3220_v12 = vpop.permute.xlu1 %3219 }
0x46bf   :  { %v3222_v13 = vadd.f32 %v3220_v12, %v3212_v11 }
0x46c1   :  { %8845 = vtanh.f32 %v3222_v13 }
0x46ce   :  { %v8846_v14 = vpop.eup %8845 }
0x46cf   :  { %3225 = vrot.lane.b32.xlu0 %v8846_v14, %s9086_s27 }
0x4741   :  { %v3226_v15 = vpop.permute.xlu0 %3225 }
0x4742   :  { %v3228_v16 = vmul.f32 %v3226_v15, %v3210_v8 }
0x4744   :  { %3230 = vrot.lane.b32.xlu1 %v3228_v16, %s9087_s28 }
0x47b6   :  { %v3231_v17 = vpop.permute.xlu1 %3230 }
0x47b7   :  { %3233 = vst.msk [vmem:[#allocation2 + $0x32] sm:$0x3] %vm514_vm5, %v3231_v17  ;;  %8242 = vmatmul.mubr.msk.f32.vlgmr.msra.gmra.mxu0 %vm413_vm6, %v3231_v17 }
0x47b8   :  { %8263 = vmatprep.mubr.msk.f32.mxu0 %vm9084_vm2, %v9083_v28  ;;  %8256 = vmatpush3.msra.mxu0 %v9820_v53 }
0x47b9   :  { %8257 = vmatprep.subr.mxu0 %v9083_v28 }
0x47ba   :  { %8258 = vmatpush3.msra.mxu0 %v9825_v56 }
0x47bb   :  { %8259 = vmatprep.subr.mxu0 %v9083_v28 }
0x47bc   :  { %8260 = vmatpush3.msra.mxu0 %v9833_v42 }
0x47bd   :  { %8261 = vmatprep.subr.mxu0 %v9083_v28 }
0x47be   :  { %8262 = vmatpush3.msra.mxu0 %v9842_v43 }
0x47bf   :  { %8277 = vmatprep.subr.mxu0 %v9083_v28 }
0x4877   :  { %v3311_v21 = vpop.f32.mrf.mxu0 }
0x4878   :  { %v3315_v22 = vadd.f32 %v3311_v21, %v3238_v20  ;;  %v3563_v21 = vrot.slane %v9784_v39, 4 }
0x4879   :  { %v8243_v23 = vpop.f32.mrf.mxu0 }
0x487a   :  { %8847 = vtanh.f32 %v3315_v22  ;;  %v3316_v25 = vmul.f32 0.5, %v3315_v22  ;;  %v3561_v22 = vrot.slane %v9789_v31, 5 }
0x487c   :  { %8849 = vtanh.f32 %v3316_v25  ;;  %v3565_v23 = vsel %vm407_vm4, %v3561_v22, %v3563_v21 }
0x4887   :  { %v8848_v24 = vpop.eup %8847 }
0x4888   :  { %3323 = vrot.lane.b32.xlu0 %v8848_v24, %s9086_s27 }
0x4889   :  { %v8850_v26 = vpop.eup %8849 }
0x488a   :  { %v3318_v27 = vmul.f32 0.5, %v8850_v26 }
0x488c   :  { %v3319_v33 = vadd.f32 0.5, %v3318_v27 }
0x488e   :  { %v3321_v36 = vmul.f32 %v3319_v33, %v3222_v13 }
0x48fa   :  { %v3324_v34 = vpop.permute.xlu0 %3323 }
0x48fb   :  { %v3326_v35 = vmul.f32 %v3324_v34, %v3319_v33 }
0x48fd   :  { %3328 = vrot.lane.b32.xlu1 %v3326_v35, %s9086_s27 }
0x496f   :  { %v3329_v37 = vpop.permute.xlu1 %3328 }
0x4970   :  { %v3331_v38 = vadd.f32 %v3329_v37, %v3321_v36 }
0x4972   :  { %8851 = vtanh.f32 %v3331_v38 }
0x497f   :  { %v8852_v44 = vpop.eup %8851 }
0x4980   :  { %3334 = vrot.lane.b32.xlu0 %v8852_v44, %s9086_s27 }
0x49f2   :  { %v3335_v30 = vpop.permute.xlu0 %3334 }
0x49f3   :  { %v3337_v60 = vmul.f32 %v3335_v30, %v3319_v33 }
0x49f5   :  { %3339 = vrot.lane.b32.xlu1 %v3337_v60, %s9087_s28 }
0x4a67   :  { %v3340_v62 = vpop.permute.xlu1 %3339 }
0x4a68   :  { %3342 = vst.msk [vmem:[#allocation2 + $0x34] sm:$0x3] %vm514_vm5, %v3340_v62  ;;  %8253 = vmatmul.mubr.msk.f32.vlgmr.msra.gmra.mxu1 %vm413_vm6, %v3340_v62 }
0x4a69   :  { %8267 = vmatpush3.msra.mxu1 %v9820_v53  ;;  %8274 = vmatprep.mubr.msk.f32.mxu1 %vm9084_vm2, %v9083_v28 }
0x4a6a   :  { %8268 = vmatprep.subr.mxu1 %v9083_v28 }
0x4a6b   :  { %8269 = vmatpush3.msra.mxu1 %v9825_v56 }
0x4a6c   :  { %8270 = vmatprep.subr.mxu1 %v9083_v28 }
0x4a6d   :  { %8271 = vmatpush3.msra.mxu1 %v9833_v42 }
0x4a6e   :  { %8272 = vmatprep.subr.mxu1 %v9083_v28 }
0x4a6f   :  { %8273 = vmatpush3.msra.mxu1 %v9842_v43 }
0x4a70   :  { %8288 = vmatprep.subr.mxu1 %v9083_v28 }
0x4b28   :  { %v3420_v51 = vpop.f32.mrf.mxu1 }
0x4b29   :  { %v3424_v41 = vadd.f32 %v3420_v51, %v3347_v46  ;;  %v3897_v46 = vld [vmem:[%s10595_s6 + $0x8] sm:$0xff]  ;;  %v3896_v51 = vld [vmem:[%s10595_s6] sm:$0xff] }
0x4b2a   :  { %v8254_v32 = vpop.f32.mrf.mxu1 }
0x4b2b   :  { %8853 = vtanh.f32 %v3424_v41  ;;  %v3425_v54 = vmul.f32 0.5, %v3424_v41  ;;  %v3889_v41 = vld [vmem:[#allocation2 + $0x8] sm:$0xff]  ;;  %v3890_v32 = vld [vmem:[#allocation2 + $0x10] sm:$0xff] }
0x4b2d   :  { %8855 = vtanh.f32 %v3425_v54  ;;  %v3892_v54 = vld [vmem:[#allocation2 + $0x20] sm:$0xff] }
0x4b38   :  { %v8854_v9 = vpop.eup %8853 }
0x4b39   :  { %3432 = vrot.lane.b32.xlu0 %v8854_v9, %s9086_s27  ;;  %v3891_v9 = vld [vmem:[#allocation2 + $0x18] sm:$0xff] }
0x4b3a   :  { %v8856_v55 = vpop.eup %8855 }
0x4b3b   :  { %v3427_v57 = vmul.f32 0.5, %v8856_v55  ;;  %v3893_v55 = vld [vmem:[#allocation2 + $0x28] sm:$0xff] }
0x4b3d   :  { %v3428_v58 = vadd.f32 0.5, %v3427_v57 }
0x4b3f   :  { %v3430_v59 = vmul.f32 %v3428_v58, %v3331_v38 }
0x4bab   :  { %v3433_v47 = vpop.permute.xlu0 %3432 }
0x4bac   :  { %v3435_v52 = vmul.f32 %v3433_v47, %v3428_v58  ;;  %v3670_v47 = vrot.slane %v9789_v31, 6 }
0x4bae   :  { %3437 = vrot.lane.b32.xlu1 %v3435_v52, %s9086_s27 }
0x4c20   :  { %v3438_v61 = vpop.permute.xlu1 %3437 }
0x4c21   :  { %v3440_v63 = vadd.f32 %v3438_v61, %v3430_v59 }
0x4c23   :  { %8857 = vtanh.f32 %v3440_v63 }
0x4c30   :  { %v8858_v0 = vpop.eup %8857 }
0x4c31   :  { %3443 = vrot.lane.b32.xlu0 %v8858_v0, %s9086_s27 }
0x4ca3   :  { %v3444_v10 = vpop.permute.xlu0 %3443 }
0x4ca4   :  { %v3446_v1 = vmul.f32 %v3444_v10, %v3428_v58  ;;  %v3672_v58 = vrot.slane %v9784_v39, 5 }
0x4ca6   :  { %3448 = vrot.lane.b32.xlu1 %v3446_v1, %s9087_s28  ;;  %v3674_v52 = vsel %vm407_vm4, %v3670_v47, %v3672_v58 }
0x4d18   :  { %v3449_v2 = vpop.permute.xlu1 %3448 }
0x4d19   :  { %3451 = vst.msk [vmem:[#allocation2 + $0x36] sm:$0x3] %vm514_vm5, %v3449_v2  ;;  %8264 = vmatmul.mubr.msk.f32.vlgmr.msra.gmra.mxu0 %vm413_vm6, %v3449_v2 }
0x4d1a   :  { %8278 = vmatpush3.msra.mxu0 %v9820_v53  ;;  %8285 = vmatprep.mubr.msk.f32.mxu0 %vm9084_vm2, %v9083_v28 }
0x4d1b   :  { %8279 = vmatprep.subr.mxu0 %v9083_v28 }
0x4d1c   :  { %8280 = vmatpush3.msra.mxu0 %v9825_v56 }
0x4d1d   :  { %8281 = vmatprep.subr.mxu0 %v9083_v28 }
0x4d1e   :  { %8282 = vmatpush3.msra.mxu0 %v9833_v42 }
0x4d1f   :  { %8283 = vmatprep.subr.mxu0 %v9083_v28 }
0x4d20   :  { %8284 = vmatpush3.msra.mxu0 %v9842_v43  ;;  %v3894_v57 = vld [vmem:[#allocation2 + $0x30] sm:$0xff] }
0x4dd9   :  { %v3529_v49 = vpop.f32.mrf.mxu0 }
0x4dda   :  { %v3533_v5 = vadd.f32 %v3529_v49, %v3456_v48 }
0x4ddb   :  { %v8265_v6 = vpop.f32.mrf.mxu0 }
0x4ddc   :  { %8859 = vtanh.f32 %v3533_v5  ;;  %v3534_v8 = vmul.f32 0.5, %v3533_v5 }
0x4dde   :  { %8861 = vtanh.f32 %v3534_v8  ;;  %v9945_v8 = vld [vmem:[%s10596_s7 + $0x18] sm:$0xff] }
0x4de9   :  { %v8860_v7 = vpop.eup %8859 }
0x4dea   :  { %3541 = vrot.lane.b32.xlu0 %v8860_v7, %s9086_s27 }
0x4deb   :  { %v8862_v45 = vpop.eup %8861 }
0x4dec   :  { %v3536_v50 = vmul.f32 0.5, %v8862_v45  ;;  %v9951_v45 = vld [vmem:[%s10596_s7 + $0x10] sm:$0xff] }
0x4dee   :  { %v3537_v11 = vadd.f32 0.5, %v3536_v50  ;;  %v9958_v50 = vld [vmem:[%s10596_s7 + $0x8] sm:$0xff] }
0x4df0   :  { %v3539_v14 = vmul.f32 %v3537_v11, %v3440_v63 }
0x4e5c   :  { %v3542_v12 = vpop.permute.xlu0 %3541 }
0x4e5d   :  { %v3544_v13 = vmul.f32 %v3542_v12, %v3537_v11 }
0x4e5f   :  { %3546 = vrot.lane.b32.xlu1 %v3544_v13, %s9086_s27 }
0x4ed1   :  { %v3547_v15 = vpop.permute.xlu1 %3546 }
0x4ed2   :  { %v3549_v16 = vadd.f32 %v3547_v15, %v3539_v14  ;;  %v3781_v15 = vrot.slane %v9784_v39, 6 }
0x4ed4   :  { %8863 = vtanh.f32 %v3549_v16 }
0x4ee1   :  { %v8864_v17 = vpop.eup %8863 }
0x4ee2   :  { %3552 = vrot.lane.b32.xlu0 %v8864_v17, %s9086_s27 }
0x4f54   :  { %v3553_v18 = vpop.permute.xlu0 %3552 }
0x4f55   :  { %v3555_v19 = vmul.f32 %v3553_v18, %v3537_v11  ;;  %v9965_v11 = vld [vmem:[%s10596_s7] sm:$0xff] }
0x4f57   :  { %3557 = vrot.lane.b32.xlu1 %v3555_v19, %s9087_s28 }
0x4fc9   :  { %v3558_v20 = vpop.permute.xlu1 %3557 }
0x4fca   :  { %3560 = vst.msk [vmem:[#allocation2 + $0x38] sm:$0x3] %vm514_vm5, %v3558_v20  ;;  %8275 = vmatmul.mubr.msk.f32.vlgmr.msra.gmra.mxu1 %vm413_vm6, %v3558_v20 }
0x4fcb   :  { %8289 = vmatpush3.msra.mxu1 %v9820_v53  ;;  %8296 = vmatprep.mubr.msk.f32.mxu1 %vm9084_vm2, %v9083_v28 }
0x4fcc   :  { %8290 = vmatprep.subr.mxu1 %v9083_v28 }
0x4fcd   :  { %8291 = vmatpush3.msra.mxu1 %v9825_v56 }
0x4fce   :  { %8292 = vmatprep.subr.mxu1 %v9083_v28 }
0x4fcf   :  { %8293 = vmatpush3.msra.mxu1 %v9833_v42 }
0x4fd0   :  { %8294 = vmatprep.subr.mxu1 %v9083_v28 }
0x4fd1   :  { %8295 = vmatpush3.msra.mxu1 %v9842_v43  ;;  %v3899_v43 = vld [vmem:[%s10595_s6 + $0x18] sm:$0xff] }
0x4fd2   :  { %8319 = vmatprep.subr.mxu1 %v9083_v28  ;;  %8299 = vmatprep.subr.mxu0 %v3899_v43 }
0x508a   :  { %v3638_v24 = vpop.f32.mrf.mxu1 }
0x508b   :  { %v3642_v25 = vadd.f32 %v3638_v24, %v3565_v23  ;;  %v10002_v23 = vld [vmem:[%s10597_s8] ss:$0 sm:$0xff] }
0x508c   :  { %v8276_v26 = vpop.f32.mrf.mxu1 }
0x508d   :  { %8865 = vtanh.f32 %v3642_v25  ;;  %v3643_v33 = vmul.f32 0.5, %v3642_v25 }
0x508f   :  { %8867 = vtanh.f32 %v3643_v33 }
0x509a   :  { %v8866_v27 = vpop.eup %8865 }
0x509b   :  { %3650 = vrot.lane.b32.xlu0 %v8866_v27, %s9086_s27 }
0x509c   :  { %v8868_v34 = vpop.eup %8867 }
0x509d   :  { %v3645_v35 = vmul.f32 0.5, %v8868_v34 }
0x509f   :  { %v3646_v36 = vadd.f32 0.5, %v3645_v35 }
0x50a1   :  { %v3648_v53 = vmul.f32 %v3646_v36, %v3549_v16  ;;  %v3779_v16 = vrot.slane %v9789_v31, 7 }
0x50a3   :  { %v3783_v18 = vsel %vm407_vm4, %v3779_v16, %v3781_v15 }
0x510d   :  { %v3651_v37 = vpop.permute.xlu0 %3650 }
0x510e   :  { %v3653_v38 = vmul.f32 %v3651_v37, %v3646_v36 }
0x5110   :  { %3655 = vrot.lane.b32.xlu1 %v3653_v38, %s9086_s27 }
0x5182   :  { %v3656_v56 = vpop.permute.xlu1 %3655 }
0x5183   :  { %v3658_v42 = vadd.f32 %v3656_v56, %v3648_v53 }
0x5185   :  { %8869 = vtanh.f32 %v3658_v42 }
0x5192   :  { %v8870_v44 = vpop.eup %8869 }
0x5193   :  { %3661 = vrot.lane.b32.xlu0 %v8870_v44, %s9086_s27 }
0x5205   :  { %v3662_v30 = vpop.permute.xlu0 %3661 }
0x5206   :  { %v3664_v60 = vmul.f32 %v3662_v30, %v3646_v36 }
0x5208   :  { %3666 = vrot.lane.b32.xlu1 %v3664_v60, %s9087_s28 }
0x527a   :  { %v3667_v62 = vpop.permute.xlu1 %3666 }
0x527b   :  { %3669 = vst.msk [vmem:[#allocation2 + $0x3a] sm:$0x3] %vm514_vm5, %v3667_v62  ;;  %8286 = vmatmul.mubr.msk.f32.vlgmr.msra.gmra.mxu0 %vm413_vm6, %v3667_v62 }
0x527c   :  { %8300 = vmatpush3.msra.mxu0 %v3899_v43  ;;  %8307 = vmatprep.mubr.msk.f32.mxu0 %vm413_vm6, %v3888_v29 }
0x527d   :  { %8301 = vmatprep.subr.mxu0 %v3898_v40 }
0x527e   :  { %8302 = vmatpush3.msra.mxu0 %v3898_v40 }
0x527f   :  { %8303 = vmatprep.subr.mxu0 %v3897_v46 }
0x5280   :  { %8304 = vmatpush3.msra.mxu0 %v3897_v46 }
0x5281   :  { %8305 = vmatprep.subr.mxu0 %v3896_v51 }
0x5282   :  { %8306 = vmatpush3.msra.mxu0 %v3896_v51 }
0x5283   :  { %8308 = vmatmul.mubr.msk.f32.vlgmr.msra.gmra.mxu0 %vm413_vm6, %v3889_v41  ;;  %8341 = vmatprep.subr.mxu0 %v9083_v28 }
0x5284   :  { %8310 = vmatprep.mubr.msk.f32.mxu0 %vm413_vm6, %v3890_v32  ;;  %8342 = vmatpush3.msra.mxu0 %v9945_v8 }
0x5285   :  { %8343 = vmatprep.subr.mxu0 %v9083_v28 }
0x5286   :  { %8344 = vmatpush3.msra.mxu0 %v9951_v45 }
0x5287   :  { %8311 = vmatmul.mubr.msk.f32.gmra.mxu0 %vm413_vm6, %v3891_v9  ;;  %8345 = vmatprep.subr.mxu0 %v9083_v28 }
0x5288   :  { %8313 = vmatprep.mubr.msk.f32.mxu0 %vm413_vm6, %v3892_v54  ;;  %8346 = vmatpush3.msra.mxu0 %v9958_v50 }
0x5289   :  { %8347 = vmatprep.subr.mxu0 %v9083_v28 }
0x528a   :  { %8348 = vmatpush3.msra.mxu0 %v9965_v11 }
0x528b   :  { %8314 = vmatmul.mubr.msk.f32.gmra.mxu0 %vm413_vm6, %v3893_v55  ;;  %8363 = vmatprep.subr.mxu0 %v9083_v28 }
0x528c   :  { %8316 = vmatprep.mubr.msk.f32.mxu0 %vm413_vm6, %v3894_v57 }
0x533b   :  { %v3747_v59 = vpop.f32.mrf.mxu0 }
0x533c   :  { %v3751_v61 = vadd.f32 %v3747_v59, %v3674_v52 }
0x533d   :  { %v8287_v63 = vpop.f32.mrf.mxu0 }
0x533e   :  { %8871 = vtanh.f32 %v3751_v61  ;;  %v3752_v10 = vmul.f32 0.5, %v3751_v61 }
0x5340   :  { %8873 = vtanh.f32 %v3752_v10 }
0x5343   :  { %v9996_v17 = vpop.f32.mrf.mxu0 }
0x5345   :  { %v3997_v22 = vpop.f32.mrf.mxu0 }
0x5346   :  { %v10005_v24 = vadd.f32 %v10002_v23, %v3997_v22 }
0x534b   :  { %v8872_v0 = vpop.eup %8871 }
0x534c   :  { %3759 = vrot.lane.b32.xlu0 %v8872_v0, %s9086_s27 }
0x534d   :  { %v8874_v1 = vpop.eup %8873 }
0x534e   :  { %v3754_v2 = vmul.f32 0.5, %v8874_v1 }
0x5350   :  { %v3755_v3 = vadd.f32 0.5, %v3754_v2 }
0x5352   :  { %v3757_v49 = vmul.f32 %v3755_v3, %v3658_v42 }
0x53be   :  { %v3760_v4 = vpop.permute.xlu0 %3759 }
0x53bf   :  { %v3762_v48 = vmul.f32 %v3760_v4, %v3755_v3 }
0x53c1   :  { %3764 = vrot.lane.b32.xlu1 %v3762_v48, %s9086_s27 }
0x5433   :  { %v3765_v5 = vpop.permute.xlu1 %3764 }
0x5434   :  { %v9938_v6 = vadd.f32 %v3765_v5, %v3757_v49 }
0x5436   :  { %8875 = vtanh.f32 %v9938_v6 }
0x5443   :  { %v8876_v7 = vpop.eup %8875 }
0x5444   :  { %3770 = vrot.lane.b32.xlu0 %v8876_v7, %s9086_s27 }
0x54b6   :  { %v3771_v12 = vpop.permute.xlu0 %3770 }
0x54b7   :  { %v3773_v13 = vmul.f32 %v3771_v12, %v3755_v3 }
0x54b9   :  { %3775 = vrot.lane.b32.xlu1 %v3773_v13, %s9087_s28 }
0x552b   :  { %v3776_v14 = vpop.permute.xlu1 %3775 }
0x552c   :  { %3778 = vst.msk [vmem:[#allocation2 + $0x3c] sm:$0x3] %vm514_vm5, %v3776_v14  ;;  %8297 = vmatmul.mubr.msk.f32.vlgmr.msra.gmra.mxu1 %vm413_vm6, %v3776_v14 }
0x552d   :  { %8320 = vmatpush3.msra.mxu1 %v9945_v8  ;;  %8327 = vmatprep.mubr.msk.f32.mxu1 %vm9084_vm2, %v9083_v28 }
0x552e   :  { %8321 = vmatprep.subr.mxu1 %v9083_v28 }
0x552f   :  { %8322 = vmatpush3.msra.mxu1 %v9951_v45 }
0x5530   :  { %8323 = vmatprep.subr.mxu1 %v9083_v28 }
0x5531   :  { %8324 = vmatpush3.msra.mxu1 %v9958_v50 }
0x5532   :  { %8325 = vmatprep.subr.mxu1 %v9083_v28 }
0x5533   :  { %8326 = vmatpush3.msra.mxu1 %v9965_v11 }
0x5534   :  { %8328 = vmatmul.mubr.f32.vlgmr.msra.gmra.mxu1 %v9083_v28  ;;  %8330 = vmatprep.subr.mxu1 %v9083_v28 }
0x5535   :  { %8331 = vmatpush3.msra.mxu1 %v9945_v8  ;;  %8338 = vmatprep.mubr.msk.f32.mxu1 %vm9084_vm2, %v9083_v28 }
0x5536   :  { %8332 = vmatprep.subr.mxu1 %v9083_v28 }
0x5537   :  { %8333 = vmatpush3.msra.mxu1 %v9951_v45 }
0x5538   :  { %8334 = vmatprep.subr.mxu1 %v9083_v28 }
0x5539   :  { %8335 = vmatpush3.msra.mxu1 %v9958_v50 }
0x553a   :  { %8336 = vmatprep.subr.mxu1 %v9083_v28 }
0x553b   :  { %8337 = vmatpush3.msra.mxu1 %v9965_v11 }
0x553c   :  { %8352 = vmatprep.subr.mxu1 %v9083_v28 }
0x55ec   :  { %v3856_v19 = vpop.f32.mrf.mxu1 }
0x55ed   :  { %v3860_v20 = vadd.f32 %v3856_v19, %v3783_v18  ;;  %v10048_v19 = vpop.f32.mrf.mxu0 }
0x55ee   :  { %v8298_v21 = vpop.f32.mrf.mxu1 }
0x55ef   :  { %v3861_v44 = vmul.f32 0.5, %v3860_v20 }
0x55f4   :  { %v4106_v25 = vpop.f32.mrf.mxu1 }
0x55f5   :  { %v4110_v39 = vadd.f32 %v4106_v25, %v10005_v24 }
0x55f6   :  { %v8329_v31 = vpop.f32.mrf.mxu1 }
0x55f7   :  { %8877 = vtanh.f32 %v4110_v39  ;;  %v4111_v27 = vmul.f32 0.5, %v4110_v39 }
0x55f9   :  { %8879 = vtanh.f32 %v4111_v27 }
0x5604   :  { %v8878_v26 = vpop.eup %8877 }
0x5605   :  { %4118 = vrot.lane.b32.xlu0 %v8878_v26, %s9086_s27 }
0x5606   :  { %v8880_v33 = vpop.eup %8879 }
0x5607   :  { %v4113_v34 = vmul.f32 0.5, %v8880_v33 }
0x5609   :  { %v4114_v35 = vadd.f32 0.5, %v4113_v34 }
0x560b   :  { %v4116_v38 = vmul.f32 0.0, %v4114_v35 }
0x5677   :  { %v4119_v36 = vpop.permute.xlu0 %4118 }
0x5678   :  { %v4121_v37 = vmul.f32 %v4119_v36, %v4114_v35 }
0x567a   :  { %4123 = vrot.lane.b32.xlu1 %v4121_v37, %s9086_s27 }
0x56ec   :  { %v4124_v53 = vpop.permute.xlu1 %4123 }
0x56ed   :  { %v4126_v56 = vadd.f32 %v4124_v53, %v4116_v38 }
0x56ef   :  { %8881 = vtanh.f32 %v4126_v56  ;;  %v4218_v5 = vrot.slane %v4126_v56, 6 }
0x56f0   :  { %8883 = vtanh.f32 %v3860_v20  ;;  %v10050_v20 = vpop.f32.mrf.mxu0 }
0x56f1   :  { %8885 = vtanh.f32 %v3861_v44 }
0x56f2   :  { %v10052_v21 = vpop.f32.mrf.mxu0 }
0x56f4   :  { %v10054_v22 = vpop.f32.mrf.mxu0 }
0x56fc   :  { %v8882_v42 = vpop.eup %8881 }
0x56fd   :  { %4129 = vrot.lane.b32.xlu0 %v8882_v42, %s9086_s27  ;;  %v8884_v43 = vpop.eup %8883 }
0x56fe   :  { %v8886_v30 = vpop.eup %8885 }
0x56ff   :  { %v3863_v60 = vmul.f32 0.5, %v8886_v30 }
0x5701   :  { %3868 = vrot.lane.b32.xlu0 %v8884_v43, %s9086_s27  ;;  %v3864_v29 = vadd.f32 0.5, %v3863_v60 }
0x5703   :  { %v3866_v32 = vmul.f32 %v3864_v29, %v9938_v6 }
0x576f   :  { %v4130_v62 = vpop.permute.xlu0 %4129 }
0x5770   :  { %v4132_v40 = vmul.f32 %v4130_v62, %v4114_v35 }
0x5772   :  { %4134 = vrot.lane.b32.xlu1 %v4132_v40, %s9087_s28 }
0x5773   :  { %v3869_v46 = vpop.permute.xlu0 %3868 }
0x5774   :  { %v3871_v51 = vmul.f32 %v3869_v46, %v3864_v29 }
0x5776   :  { %3873 = vrot.lane.b32.xlu0 %v3871_v51, %s9086_s27 }
0x57e4   :  { %v4135_v41 = vpop.permute.xlu1 %4134 }
0x57e5   :  { %8339 = vmatmul.mubr.msk.f32.vlgmr.msra.gmra.mxu1 %vm413_vm6, %v4135_v41 }
0x57e6   :  { %8353 = vmatpush3.msra.mxu1 %v9945_v8  ;;  %8360 = vmatprep.mubr.msk.f32.mxu1 %vm9084_vm2, %v9083_v28 }
0x57e7   :  { %8354 = vmatprep.subr.mxu1 %v9083_v28 }
0x57e8   :  { %v3874_v9 = vpop.permute.xlu0 %3873  ;;  %8355 = vmatpush3.msra.mxu1 %v9951_v45 }
0x57e9   :  { %v3876_v54 = vadd.f32 %v3874_v9, %v3866_v32  ;;  %8356 = vmatprep.subr.mxu1 %v9083_v28 }
0x57ea   :  { %8357 = vmatpush3.msra.mxu1 %v9958_v50 }
0x57eb   :  { %8887 = vtanh.f32 %v3876_v54  ;;  %8358 = vmatprep.subr.mxu1 %v9083_v28 }
0x57ec   :  { %8359 = vmatpush3.msra.mxu1 %v9965_v11 }
0x57ed   :  { %8374 = vmatprep.subr.mxu1 %v9083_v28 }
0x57f8   :  { %v8888_v55 = vpop.eup %8887 }
0x57f9   :  { %3879 = vrot.lane.b32.xlu0 %v8888_v55, %s9086_s27 }
0x586b   :  { %v3880_v57 = vpop.permute.xlu0 %3879 }
0x586c   :  { %v3882_v58 = vmul.f32 %v3880_v57, %v3864_v29 }
0x586e   :  { %3884 = vrot.lane.b32.xlu0 %v3882_v58, %s9087_s28 }
0x58a5   :  { %v4204_v47 = vpop.f32.mrf.mxu1 }
0x58a6   :  { %v4209_v52 = vrot.slane %v4204_v47, 6 }
0x58a7   :  { %v8340_v59 = vpop.f32.mrf.mxu1 }
0x58a8   :  { %v4211_v61 = vadd.f32 %v4209_v52, %v10005_v24 }
0x58aa   :  { %8889 = vtanh.f32 %v4211_v61  ;;  %v4212_v1 = vmul.f32 0.5, %v4211_v61 }
0x58ac   :  { %8891 = vtanh.f32 %v4212_v1 }
0x58b7   :  { %v8890_v63 = vpop.eup %8889 }
0x58b8   :  { %4222 = vrot.lane.b32.xlu1 %v8890_v63, %s9086_s27 }
0x58b9   :  { %v8892_v2 = vpop.eup %8891 }
0x58ba   :  { %v4214_v3 = vmul.f32 0.5, %v8892_v2 }
0x58bc   :  { %v4215_v4 = vadd.f32 0.5, %v4214_v3 }
0x58be   :  { %v4220_v6 = vmul.f32 %v4218_v5, %v4215_v4 }
0x58e0   :  { %v3885_v0 = vpop.permute.xlu0 %3884 }
0x58e1   :  { %3887 = vst.msk [vmem:[#allocation2 + $0x3e] sm:$0x3] %vm514_vm5, %v3885_v0 }
0x58e8   :  { %v3895_v10 = vld [vmem:[#allocation2 + $0x38] sm:$0xff] }
0x58e9   :  { %8317 = vmatmul.mubr.msk.f32.gmra.mxu0 %vm413_vm6, %v3895_v10 }
0x58ea   :  { %8349 = vmatprep.mubr.msk.f32.mxu0 %vm9084_vm2, %v9083_v28 }
0x592a   :  { %v4223_v48 = vpop.permute.xlu1 %4222 }
0x592b   :  { %v4225_v49 = vmul.f32 %v4223_v48, %v4215_v4  ;;  %v10094_v48 = vadd.f32 %v9996_v17, %v10002_v23 }
0x592d   :  { %4227 = vrot.lane.b32.xlu1 %v4225_v49, %s9086_s27 }
0x599f   :  { %v4228_v7 = vpop.permute.xlu1 %4227 }
0x59a0   :  { %v4230_v12 = vadd.f32 %v4228_v7, %v4220_v6 }
0x59a2   :  { %8893 = vtanh.f32 %v4230_v12  ;;  %v4323_v42 = vrot.slane %v4230_v12, 6 }
0x59a9   :  { %v10056_v25 = vpop.f32.mrf.mxu0 }
0x59ab   :  { %v10058_v39 = vpop.f32.mrf.mxu0 }
0x59af   :  { %v8894_v13 = vpop.eup %8893 }
0x59b0   :  { %4233 = vrot.lane.b32.xlu1 %v8894_v13, %s9086_s27 }
0x5a22   :  { %v4234_v14 = vpop.permute.xlu1 %4233 }
0x5a23   :  { %v4236_v15 = vmul.f32 %v4234_v14, %v4215_v4 }
0x5a25   :  { %v4238_v16 = vrot.slane %v4236_v15, 2 }
0x5a27   :  { %4239 = vrot.lane.b32.xlu1 %v4238_v16, %s9087_s28 }
0x5a99   :  { %v4240_v18 = vpop.permute.xlu1 %4239 }
0x5a9a   :  { %8350 = vmatmul.mubr.msk.f32.vlgmr.msra.gmra.mxu0 %vm413_vm6, %v4240_v18 }
0x5a9b   :  { %8364 = vmatpush3.msra.mxu0 %v9945_v8  ;;  %8371 = vmatprep.mubr.msk.f32.mxu0 %vm9084_vm2, %v9083_v28 }
0x5a9c   :  { %8365 = vmatprep.subr.mxu0 %v9083_v28 }
0x5a9d   :  { %8366 = vmatpush3.msra.mxu0 %v9951_v45 }
0x5a9e   :  { %8367 = vmatprep.subr.mxu0 %v9083_v28 }
0x5a9f   :  { %8368 = vmatpush3.msra.mxu0 %v9958_v50 }
0x5aa0   :  { %8369 = vmatprep.subr.mxu0 %v9083_v28 }
0x5aa1   :  { %8370 = vmatpush3.msra.mxu0 %v9965_v11 }
0x5aa2   :  { %8385 = vmatprep.subr.mxu0 %v9083_v28 }
0x5b5a   :  { %v4309_v31 = vpop.f32.mrf.mxu0 }
0x5b5b   :  { %v4314_v26 = vrot.slane %v4309_v31, 4 }
0x5b5c   :  { %v8351_v27 = vpop.f32.mrf.mxu0 }
0x5b5d   :  { %v4316_v33 = vadd.f32 %v4314_v26, %v10005_v24 }
0x5b5f   :  { %8895 = vtanh.f32 %v4316_v33  ;;  %v4317_v35 = vmul.f32 0.5, %v4316_v33 }
0x5b61   :  { %8897 = vtanh.f32 %v4317_v35 }
0x5b6c   :  { %v8896_v34 = vpop.eup %8895 }
0x5b6d   :  { %4327 = vrot.lane.b32.xlu0 %v8896_v34, %s9086_s27 }
0x5b6e   :  { %v8898_v36 = vpop.eup %8897 }
0x5b6f   :  { %v4319_v37 = vmul.f32 0.5, %v8898_v36 }
0x5b71   :  { %v4320_v38 = vadd.f32 0.5, %v4319_v37 }
0x5b73   :  { %v4325_v43 = vmul.f32 %v4323_v42, %v4320_v38 }
0x5bdf   :  { %v4328_v53 = vpop.permute.xlu0 %4327 }
0x5be0   :  { %v4330_v56 = vmul.f32 %v4328_v53, %v4320_v38 }
0x5be2   :  { %4332 = vrot.lane.b32.xlu1 %v4330_v56, %s9086_s27 }
0x5c54   :  { %v4333_v44 = vpop.permute.xlu1 %4332 }
0x5c55   :  { %v4335_v30 = vadd.f32 %v4333_v44, %v4325_v43 }
0x5c57   :  { %8899 = vtanh.f32 %v4335_v30  ;;  %v4428_v61 = vrot.slane %v4335_v30, 6 }
0x5c64   :  { %v8900_v60 = vpop.eup %8899 }
0x5c65   :  { %4338 = vrot.lane.b32.xlu0 %v8900_v60, %s9086_s27 }
0x5cd7   :  { %v4339_v62 = vpop.permute.xlu0 %4338 }
0x5cd8   :  { %v4341_v40 = vmul.f32 %v4339_v62, %v4320_v38 }
0x5cda   :  { %v4343_v29 = vrot.slane %v4341_v40, 4 }
0x5cdc   :  { %4344 = vrot.lane.b32.xlu1 %v4343_v29, %s9087_s28 }
0x5d4e   :  { %v4345_v46 = vpop.permute.xlu1 %4344 }
0x5d4f   :  { %8361 = vmatmul.mubr.msk.f32.vlgmr.msra.gmra.mxu1 %vm413_vm6, %v4345_v46 }
0x5d50   :  { %8375 = vmatpush3.msra.mxu1 %v9945_v8  ;;  %8382 = vmatprep.mubr.msk.f32.mxu1 %vm9084_vm2, %v9083_v28 }
0x5d51   :  { %8376 = vmatprep.subr.mxu1 %v9083_v28 }
0x5d52   :  { %8377 = vmatpush3.msra.mxu1 %v9951_v45 }
0x5d53   :  { %8378 = vmatprep.subr.mxu1 %v9083_v28 }
0x5d54   :  { %8379 = vmatpush3.msra.mxu1 %v9958_v50 }
0x5d55   :  { %8380 = vmatprep.subr.mxu1 %v9083_v28 }
0x5d56   :  { %8381 = vmatpush3.msra.mxu1 %v9965_v11 }
0x5d57   :  { %8396 = vmatprep.subr.mxu1 %v9083_v28 }
0x5e0f   :  { %v4414_v51 = vpop.f32.mrf.mxu1 }
0x5e10   :  { %v4419_v41 = vrot.slane %v4414_v51, 2 }
0x5e11   :  { %v8362_v32 = vpop.f32.mrf.mxu1 }
0x5e12   :  { %v4421_v9 = vadd.f32 %v4419_v41, %v10005_v24 }
0x5e14   :  { %8901 = vtanh.f32 %v4421_v9  ;;  %v4422_v55 = vmul.f32 0.5, %v4421_v9 }
0x5e16   :  { %8903 = vtanh.f32 %v4422_v55 }
0x5e21   :  { %v8902_v54 = vpop.eup %8901 }
0x5e22   :  { %4432 = vrot.lane.b32.xlu0 %v8902_v54, %s9086_s27 }
0x5e23   :  { %v8904_v57 = vpop.eup %8903 }
0x5e24   :  { %v4424_v58 = vmul.f32 0.5, %v8904_v57 }
0x5e26   :  { %v4425_v47 = vadd.f32 0.5, %v4424_v58 }
0x5e28   :  { %v4430_v63 = vmul.f32 %v4428_v61, %v4425_v47 }
0x5e94   :  { %v4433_v52 = vpop.permute.xlu0 %4432 }
0x5e95   :  { %v4435_v59 = vmul.f32 %v4433_v52, %v4425_v47 }
0x5e97   :  { %4437 = vrot.lane.b32.xlu1 %v4435_v59, %s9086_s27 }
0x5f09   :  { %v4438_v0 = vpop.permute.xlu1 %4437 }
0x5f0a   :  { %v4440_v10 = vadd.f32 %v4438_v0, %v4430_v63 }
0x5f0c   :  { %8905 = vtanh.f32 %v4440_v10  ;;  %v4530_v31 = vrot.slane %v4440_v10, 6 }
0x5f19   :  { %v8906_v1 = vpop.eup %8905 }
0x5f1a   :  { %4443 = vrot.lane.b32.xlu0 %v8906_v1, %s9086_s27 }
0x5f8c   :  { %v4444_v24 = vpop.permute.xlu0 %4443 }
0x5f8d   :  { %v4446_v2 = vmul.f32 %v4444_v24, %v4425_v47 }
0x5f8f   :  { %v4448_v3 = vrot.slane %v4446_v2, 6 }
0x5f91   :  { %4449 = vrot.lane.b32.xlu1 %v4448_v3, %s9087_s28 }
0x6003   :  { %v4450_v4 = vpop.permute.xlu1 %4449 }
0x6004   :  { %8372 = vmatmul.mubr.msk.f32.vlgmr.msra.gmra.mxu0 %vm413_vm6, %v4450_v4 }
0x6005   :  { %8386 = vmatpush3.msra.mxu0 %v9945_v8  ;;  %8393 = vmatprep.mubr.msk.f32.mxu0 %vm9084_vm2, %v9083_v28 }
0x6006   :  { %8387 = vmatprep.subr.mxu0 %v9083_v28 }
0x6007   :  { %8388 = vmatpush3.msra.mxu0 %v9951_v45 }
0x6008   :  { %8389 = vmatprep.subr.mxu0 %v9083_v28 }
0x6009   :  { %8390 = vmatpush3.msra.mxu0 %v9958_v50 }
0x600a   :  { %8391 = vmatprep.subr.mxu0 %v9083_v28 }
0x600b   :  { %8392 = vmatpush3.msra.mxu0 %v9965_v11 }
0x600c   :  { %8407 = vmatprep.subr.mxu0 %v9083_v28 }
0x60c4   :  { %v4519_v49 = vpop.f32.mrf.mxu0 }
0x60c5   :  { %v4523_v5 = vadd.f32 %v4519_v49, %v10094_v48 }
0x60c6   :  { %v8373_v6 = vpop.f32.mrf.mxu0 }
0x60c7   :  { %8907 = vtanh.f32 %v4523_v5  ;;  %v4524_v12 = vmul.f32 0.5, %v4523_v5 }
0x60c9   :  { %8909 = vtanh.f32 %v4524_v12 }
0x60d4   :  { %v8908_v7 = vpop.eup %8907 }
0x60d5   :  { %4534 = vrot.lane.b32.xlu0 %v8908_v7, %s9086_s27 }
0x60d6   :  { %v8910_v13 = vpop.eup %8909 }
0x60d7   :  { %v4526_v14 = vmul.f32 0.5, %v8910_v13 }
0x60d9   :  { %v4527_v15 = vadd.f32 0.5, %v4526_v14 }
0x60db   :  { %v4532_v17 = vmul.f32 %v4530_v31, %v4527_v15 }
0x6147   :  { %v4535_v16 = vpop.permute.xlu0 %4534 }
0x6148   :  { %v4537_v18 = vmul.f32 %v4535_v16, %v4527_v15 }
0x614a   :  { %4539 = vrot.lane.b32.xlu1 %v4537_v18, %s9086_s27 }
0x61bc   :  { %v4540_v26 = vpop.permute.xlu1 %4539 }
0x61bd   :  { %v4542_v27 = vadd.f32 %v4540_v26, %v4532_v17 }
0x61bf   :  { %8911 = vtanh.f32 %v4542_v27  ;;  %v4634_v29 = vrot.slane %v4542_v27, 6 }
0x61cc   :  { %v8912_v33 = vpop.eup %8911 }
0x61cd   :  { %4545 = vrot.lane.b32.xlu0 %v8912_v33, %s9086_s27 }
0x623f   :  { %v4546_v34 = vpop.permute.xlu0 %4545 }
0x6240   :  { %v4548_v35 = vmul.f32 %v4546_v34, %v4527_v15 }
0x6242   :  { %4550 = vrot.lane.b32.xlu1 %v4548_v35, %s9087_s28 }
0x62b4   :  { %v4551_v36 = vpop.permute.xlu1 %4550 }
0x62b5   :  { %8383 = vmatmul.mubr.msk.f32.vlgmr.msra.gmra.mxu1 %vm413_vm6, %v4551_v36 }
0x62b6   :  { %8397 = vmatpush3.msra.mxu1 %v9945_v8  ;;  %8404 = vmatprep.mubr.msk.f32.mxu1 %vm9084_vm2, %v9083_v28 }
0x62b7   :  { %8398 = vmatprep.subr.mxu1 %v9083_v28 }
0x62b8   :  { %8399 = vmatpush3.msra.mxu1 %v9951_v45 }
0x62b9   :  { %8400 = vmatprep.subr.mxu1 %v9083_v28 }
0x62ba   :  { %8401 = vmatpush3.msra.mxu1 %v9958_v50 }
0x62bb   :  { %8402 = vmatprep.subr.mxu1 %v9083_v28 }
0x62bc   :  { %8403 = vmatpush3.msra.mxu1 %v9965_v11 }
0x62bd   :  { %8418 = vmatprep.subr.mxu1 %v9083_v28 }
0x6375   :  { %v4620_v37 = vpop.f32.mrf.mxu1 }
0x6376   :  { %v4625_v38 = vrot.slane %v4620_v37, 6 }
0x6377   :  { %v8384_v53 = vpop.f32.mrf.mxu1 }
0x6378   :  { %v4627_v56 = vadd.f32 %v4625_v38, %v10094_v48 }
0x637a   :  { %8913 = vtanh.f32 %v4627_v56  ;;  %v4628_v43 = vmul.f32 0.5, %v4627_v56 }
0x637c   :  { %8915 = vtanh.f32 %v4628_v43 }
0x6387   :  { %v8914_v42 = vpop.eup %8913 }
0x6388   :  { %4638 = vrot.lane.b32.xlu0 %v8914_v42, %s9086_s27 }
0x6389   :  { %v8916_v44 = vpop.eup %8915 }
0x638a   :  { %v4630_v30 = vmul.f32 0.5, %v8916_v44 }
0x638c   :  { %v4631_v60 = vadd.f32 0.5, %v4630_v30 }
0x638e   :  { %v4636_v46 = vmul.f32 %v4634_v29, %v4631_v60 }
0x63fa   :  { %v4639_v62 = vpop.permute.xlu0 %4638 }
0x63fb   :  { %v4641_v40 = vmul.f32 %v4639_v62, %v4631_v60 }
0x63fd   :  { %4643 = vrot.lane.b32.xlu1 %v4641_v40, %s9086_s27 }
0x646f   :  { %v4644_v51 = vpop.permute.xlu1 %4643 }
0x6470   :  { %v4646_v41 = vadd.f32 %v4644_v51, %v4636_v46 }
0x6472   :  { %8917 = vtanh.f32 %v4646_v41  ;;  %v4739_v3 = vrot.slane %v4646_v41, 6 }
0x647f   :  { %v8918_v32 = vpop.eup %8917 }
0x6480   :  { %4649 = vrot.lane.b32.xlu0 %v8918_v32, %s9086_s27 }
0x64f2   :  { %v4650_v9 = vpop.permute.xlu0 %4649 }
0x64f3   :  { %v4652_v54 = vmul.f32 %v4650_v9, %v4631_v60  ;;  %v10162_v60 = vadd.f32 %v10002_v23, %v10050_v20 }
0x64f5   :  { %v4654_v55 = vrot.slane %v4652_v54, 2 }
0x64f7   :  { %4655 = vrot.lane.b32.xlu1 %v4654_v55, %s9087_s28 }
0x6569   :  { %v4656_v57 = vpop.permute.xlu1 %4655 }
0x656a   :  { %8394 = vmatmul.mubr.msk.f32.vlgmr.msra.gmra.mxu0 %vm413_vm6, %v4656_v57 }
0x656b   :  { %8408 = vmatpush3.msra.mxu0 %v9945_v8  ;;  %8415 = vmatprep.mubr.msk.f32.mxu0 %vm9084_vm2, %v9083_v28 }
0x656c   :  { %8409 = vmatprep.subr.mxu0 %v9083_v28 }
0x656d   :  { %8410 = vmatpush3.msra.mxu0 %v9951_v45 }
0x656e   :  { %8411 = vmatprep.subr.mxu0 %v9083_v28 }
0x656f   :  { %8412 = vmatpush3.msra.mxu0 %v9958_v50 }
0x6570   :  { %8413 = vmatprep.subr.mxu0 %v9083_v28 }
0x6571   :  { %8414 = vmatpush3.msra.mxu0 %v9965_v11 }
0x6572   :  { %8429 = vmatprep.subr.mxu0 %v9083_v28 }
0x662a   :  { %v4725_v58 = vpop.f32.mrf.mxu0 }
0x662b   :  { %v4730_v47 = vrot.slane %v4725_v58, 4 }
0x662c   :  { %v8395_v52 = vpop.f32.mrf.mxu0 }
0x662d   :  { %v4732_v59 = vadd.f32 %v4730_v47, %v10094_v48 }
0x662f   :  { %8919 = vtanh.f32 %v4732_v59  ;;  %v4733_v63 = vmul.f32 0.5, %v4732_v59 }
0x6631   :  { %8921 = vtanh.f32 %v4733_v63 }
0x663c   :  { %v8920_v61 = vpop.eup %8919 }
0x663d   :  { %4743 = vrot.lane.b32.xlu0 %v8920_v61, %s9086_s27 }
0x663e   :  { %v8922_v0 = vpop.eup %8921 }
0x663f   :  { %v4735_v10 = vmul.f32 0.5, %v8922_v0 }
0x6641   :  { %v4736_v1 = vadd.f32 0.5, %v4735_v10 }
0x6643   :  { %v4741_v4 = vmul.f32 %v4739_v3, %v4736_v1 }
0x66af   :  { %v4744_v24 = vpop.permute.xlu0 %4743 }
0x66b0   :  { %v4746_v2 = vmul.f32 %v4744_v24, %v4736_v1 }
0x66b2   :  { %4748 = vrot.lane.b32.xlu1 %v4746_v2, %s9086_s27 }
0x6724   :  { %v4749_v49 = vpop.permute.xlu1 %4748 }
0x6725   :  { %v4751_v5 = vadd.f32 %v4749_v49, %v4741_v4 }
0x6727   :  { %8923 = vtanh.f32 %v4751_v5  ;;  %v4844_v37 = vrot.slane %v4751_v5, 6 }
0x6734   :  { %v8924_v6 = vpop.eup %8923 }
0x6735   :  { %4754 = vrot.lane.b32.xlu0 %v8924_v6, %s9086_s27 }
0x67a7   :  { %v4755_v7 = vpop.permute.xlu0 %4754 }
0x67a8   :  { %v4757_v12 = vmul.f32 %v4755_v7, %v4736_v1 }
0x67aa   :  { %v4759_v13 = vrot.slane %v4757_v12, 4 }
0x67ac   :  { %4760 = vrot.lane.b32.xlu1 %v4759_v13, %s9087_s28 }
0x681e   :  { %v4761_v14 = vpop.permute.xlu1 %4760 }
0x681f   :  { %8405 = vmatmul.mubr.msk.f32.vlgmr.msra.gmra.mxu1 %vm413_vm6, %v4761_v14 }
0x6820   :  { %8419 = vmatpush3.msra.mxu1 %v9945_v8  ;;  %8426 = vmatprep.mubr.msk.f32.mxu1 %vm9084_vm2, %v9083_v28 }
0x6821   :  { %8420 = vmatprep.subr.mxu1 %v9083_v28 }
0x6822   :  { %8421 = vmatpush3.msra.mxu1 %v9951_v45 }
0x6823   :  { %8422 = vmatprep.subr.mxu1 %v9083_v28 }
0x6824   :  { %8423 = vmatpush3.msra.mxu1 %v9958_v50 }
0x6825   :  { %8424 = vmatprep.subr.mxu1 %v9083_v28 }
0x6826   :  { %8425 = vmatpush3.msra.mxu1 %v9965_v11 }
0x6827   :  { %8440 = vmatprep.subr.mxu1 %v9083_v28 }
0x68df   :  { %v4830_v15 = vpop.f32.mrf.mxu1 }
0x68e0   :  { %v4835_v16 = vrot.slane %v4830_v15, 2 }
0x68e1   :  { %v8406_v18 = vpop.f32.mrf.mxu1 }
0x68e2   :  { %v4837_v31 = vadd.f32 %v4835_v16, %v10094_v48 }
0x68e4   :  { %8925 = vtanh.f32 %v4837_v31  ;;  %v4838_v26 = vmul.f32 0.5, %v4837_v31 }
0x68e6   :  { %8927 = vtanh.f32 %v4838_v26 }
0x68f1   :  { %v8926_v17 = vpop.eup %8925 }
0x68f2   :  { %4848 = vrot.lane.b32.xlu0 %v8926_v17, %s9086_s27 }
0x68f3   :  { %v8928_v27 = vpop.eup %8927 }
0x68f4   :  { %v4840_v33 = vmul.f32 0.5, %v8928_v27 }
0x68f6   :  { %v4841_v34 = vadd.f32 0.5, %v4840_v33 }
0x68f8   :  { %v4846_v38 = vmul.f32 %v4844_v37, %v4841_v34 }
0x6964   :  { %v4849_v35 = vpop.permute.xlu0 %4848 }
0x6965   :  { %v4851_v36 = vmul.f32 %v4849_v35, %v4841_v34 }
0x6967   :  { %4853 = vrot.lane.b32.xlu1 %v4851_v36, %s9086_s27 }
0x69d9   :  { %v4854_v53 = vpop.permute.xlu1 %4853 }
0x69da   :  { %v4856_v56 = vadd.f32 %v4854_v53, %v4846_v38 }
0x69dc   :  { %8929 = vtanh.f32 %v4856_v56  ;;  %v4946_v57 = vrot.slane %v4856_v56, 6 }
0x69e9   :  { %v8930_v42 = vpop.eup %8929 }
0x69ea   :  { %4859 = vrot.lane.b32.xlu0 %v8930_v42, %s9086_s27 }
0x6a5c   :  { %v4860_v48 = vpop.permute.xlu0 %4859 }
0x6a5d   :  { %v4862_v43 = vmul.f32 %v4860_v48, %v4841_v34 }
0x6a5f   :  { %v4864_v44 = vrot.slane %v4862_v43, 6 }
0x6a61   :  { %4865 = vrot.lane.b32.xlu1 %v4864_v44, %s9087_s28 }
0x6ad3   :  { %v4866_v30 = vpop.permute.xlu1 %4865 }
0x6ad4   :  { %8416 = vmatmul.mubr.msk.f32.vlgmr.msra.gmra.mxu0 %vm413_vm6, %v4866_v30 }
0x6ad5   :  { %8430 = vmatpush3.msra.mxu0 %v9945_v8  ;;  %8437 = vmatprep.mubr.msk.f32.mxu0 %vm9084_vm2, %v9083_v28 }
0x6ad6   :  { %8431 = vmatprep.subr.mxu0 %v9083_v28 }
0x6ad7   :  { %8432 = vmatpush3.msra.mxu0 %v9951_v45 }
0x6ad8   :  { %8433 = vmatprep.subr.mxu0 %v9083_v28 }
0x6ad9   :  { %8434 = vmatpush3.msra.mxu0 %v9958_v50 }
0x6ada   :  { %8435 = vmatprep.subr.mxu0 %v9083_v28 }
0x6adb   :  { %8436 = vmatpush3.msra.mxu0 %v9965_v11 }
0x6adc   :  { %8451 = vmatprep.subr.mxu0 %v9083_v28 }
0x6b94   :  { %v4935_v62 = vpop.f32.mrf.mxu0 }
0x6b95   :  { %v4939_v40 = vadd.f32 %v4935_v62, %v10162_v60 }
0x6b96   :  { %v8417_v29 = vpop.f32.mrf.mxu0 }
0x6b97   :  { %8931 = vtanh.f32 %v4939_v40  ;;  %v4940_v51 = vmul.f32 0.5, %v4939_v40 }
0x6b99   :  { %8933 = vtanh.f32 %v4940_v51 }
0x6ba4   :  { %v8932_v46 = vpop.eup %8931 }
0x6ba5   :  { %4950 = vrot.lane.b32.xlu0 %v8932_v46, %s9086_s27 }
0x6ba6   :  { %v8934_v41 = vpop.eup %8933 }
0x6ba7   :  { %v4942_v32 = vmul.f32 0.5, %v8934_v41 }
0x6ba9   :  { %v4943_v9 = vadd.f32 0.5, %v4942_v32 }
0x6bab   :  { %v4948_v20 = vmul.f32 %v4946_v57, %v4943_v9 }
0x6c17   :  { %v4951_v54 = vpop.permute.xlu0 %4950 }
0x6c18   :  { %v4953_v55 = vmul.f32 %v4951_v54, %v4943_v9 }
0x6c1a   :  { %4955 = vrot.lane.b32.xlu1 %v4953_v55, %s9086_s27 }
0x6c8c   :  { %v4956_v58 = vpop.permute.xlu1 %4955 }
0x6c8d   :  { %v4958_v47 = vadd.f32 %v4956_v58, %v4948_v20 }
0x6c8f   :  { %8935 = vtanh.f32 %v4958_v47  ;;  %v5050_v12 = vrot.slane %v4958_v47, 6 }
0x6c9c   :  { %v8936_v52 = vpop.eup %8935 }
0x6c9d   :  { %4961 = vrot.lane.b32.xlu0 %v8936_v52, %s9086_s27 }
0x6d0f   :  { %v4962_v59 = vpop.permute.xlu0 %4961 }
0x6d10   :  { %v4964_v61 = vmul.f32 %v4962_v59, %v4943_v9 }
0x6d12   :  { %4966 = vrot.lane.b32.xlu1 %v4964_v61, %s9087_s28 }
0x6d84   :  { %v4967_v63 = vpop.permute.xlu1 %4966 }
0x6d85   :  { %8427 = vmatmul.mubr.msk.f32.vlgmr.msra.gmra.mxu1 %vm413_vm6, %v4967_v63 }
0x6d86   :  { %8441 = vmatpush3.msra.mxu1 %v9945_v8  ;;  %8448 = vmatprep.mubr.msk.f32.mxu1 %vm9084_vm2, %v9083_v28 }
0x6d87   :  { %8442 = vmatprep.subr.mxu1 %v9083_v28 }
0x6d88   :  { %8443 = vmatpush3.msra.mxu1 %v9951_v45 }
0x6d89   :  { %8444 = vmatprep.subr.mxu1 %v9083_v28 }
0x6d8a   :  { %8445 = vmatpush3.msra.mxu1 %v9958_v50 }
0x6d8b   :  { %8446 = vmatprep.subr.mxu1 %v9083_v28 }
0x6d8c   :  { %8447 = vmatpush3.msra.mxu1 %v9965_v11 }
0x6d8d   :  { %8462 = vmatprep.subr.mxu1 %v9083_v28 }
0x6e45   :  { %v5036_v0 = vpop.f32.mrf.mxu1 }
0x6e46   :  { %v5041_v10 = vrot.slane %v5036_v0, 6 }
0x6e47   :  { %v8428_v1 = vpop.f32.mrf.mxu1 }
0x6e48   :  { %v5043_v24 = vadd.f32 %v5041_v10, %v10162_v60 }
0x6e4a   :  { %8937 = vtanh.f32 %v5043_v24  ;;  %v5044_v3 = vmul.f32 0.5, %v5043_v24 }
0x6e4c   :  { %8939 = vtanh.f32 %v5044_v3 }
0x6e57   :  { %v8938_v2 = vpop.eup %8937 }
0x6e58   :  { %5054 = vrot.lane.b32.xlu0 %v8938_v2, %s9086_s27 }
0x6e59   :  { %v8940_v4 = vpop.eup %8939 }
0x6e5a   :  { %v5046_v49 = vmul.f32 0.5, %v8940_v4 }
0x6e5c   :  { %v5047_v5 = vadd.f32 0.5, %v5046_v49 }
0x6e5e   :  { %v5052_v13 = vmul.f32 %v5050_v12, %v5047_v5 }
0x6eca   :  { %v5055_v6 = vpop.permute.xlu0 %5054 }
0x6ecb   :  { %v5057_v7 = vmul.f32 %v5055_v6, %v5047_v5 }
0x6ecd   :  { %5059 = vrot.lane.b32.xlu1 %v5057_v7, %s9086_s27 }
0x6f3f   :  { %v5060_v14 = vpop.permute.xlu1 %5059 }
0x6f40   :  { %v5062_v15 = vadd.f32 %v5060_v14, %v5052_v13 }
0x6f42   :  { %8941 = vtanh.f32 %v5062_v15  ;;  %v5155_v43 = vrot.slane %v5062_v15, 6 }
0x6f4f   :  { %v8942_v16 = vpop.eup %8941 }
0x6f50   :  { %5065 = vrot.lane.b32.xlu0 %v8942_v16, %s9086_s27 }
0x6fc2   :  { %v5066_v18 = vpop.permute.xlu0 %5065 }
0x6fc3   :  { %v5068_v31 = vmul.f32 %v5066_v18, %v5047_v5 }
0x6fc5   :  { %v5070_v17 = vrot.slane %v5068_v31, 2 }
0x6fc7   :  { %5071 = vrot.lane.b32.xlu1 %v5070_v17, %s9087_s28 }
0x7039   :  { %v5072_v26 = vpop.permute.xlu1 %5071 }
0x703a   :  { %8438 = vmatmul.mubr.msk.f32.vlgmr.msra.gmra.mxu0 %vm413_vm6, %v5072_v26 }
0x703b   :  { %8452 = vmatpush3.msra.mxu0 %v9945_v8  ;;  %8459 = vmatprep.mubr.msk.f32.mxu0 %vm9084_vm2, %v9083_v28 }
0x703c   :  { %8453 = vmatprep.subr.mxu0 %v9083_v28 }
0x703d   :  { %8454 = vmatpush3.msra.mxu0 %v9951_v45 }
0x703e   :  { %8455 = vmatprep.subr.mxu0 %v9083_v28 }
0x703f   :  { %8456 = vmatpush3.msra.mxu0 %v9958_v50 }
0x7040   :  { %8457 = vmatprep.subr.mxu0 %v9083_v28 }
0x7041   :  { %8458 = vmatpush3.msra.mxu0 %v9965_v11 }
0x7042   :  { %8473 = vmatprep.subr.mxu0 %v9083_v28 }
0x70fa   :  { %v5141_v27 = vpop.f32.mrf.mxu0 }
0x70fb   :  { %v5146_v33 = vrot.slane %v5141_v27, 4  ;;  %v10241_v27 = vld [vmem:[%s10596_s7 + $0x18] sm:$0xff] }
0x70fc   :  { %v8439_v34 = vpop.f32.mrf.mxu0 }
0x70fd   :  { %v5148_v35 = vadd.f32 %v5146_v33, %v10162_v60  ;;  %v10250_v33 = vld [vmem:[%s10596_s7 + $0x10] sm:$0xff]  ;;  %v10257_v34 = vld [vmem:[%s10596_s7 + $0x8] sm:$0xff] }
0x70ff   :  { %8943 = vtanh.f32 %v5148_v35  ;;  %v5149_v37 = vmul.f32 0.5, %v5148_v35  ;;  %v10264_v35 = vld [vmem:[%s10596_s7] sm:$0xff] }
0x7101   :  { %8945 = vtanh.f32 %v5149_v37 }
0x710c   :  { %v8944_v36 = vpop.eup %8943 }
0x710d   :  { %5159 = vrot.lane.b32.xlu0 %v8944_v36, %s9086_s27 }
0x710e   :  { %v8946_v38 = vpop.eup %8945 }
0x710f   :  { %v5151_v53 = vmul.f32 0.5, %v8946_v38 }
0x7111   :  { %v5152_v56 = vadd.f32 0.5, %v5151_v53 }
0x7113   :  { %v5157_v44 = vmul.f32 %v5155_v43, %v5152_v56 }
0x717f   :  { %v5160_v42 = vpop.permute.xlu0 %5159 }
0x7180   :  { %v5162_v48 = vmul.f32 %v5160_v42, %v5152_v56 }
0x7182   :  { %5164 = vrot.lane.b32.xlu1 %v5162_v48, %s9086_s27 }
0x71f4   :  { %v5165_v30 = vpop.permute.xlu1 %5164 }
0x71f5   :  { %v5167_v62 = vadd.f32 %v5165_v30, %v5157_v44 }
0x71f7   :  { %8947 = vtanh.f32 %v5167_v62  ;;  %v5260_v63 = vrot.slane %v5167_v62, 6 }
0x7204   :  { %v8948_v40 = vpop.eup %8947 }
0x7205   :  { %5170 = vrot.lane.b32.xlu0 %v8948_v40, %s9086_s27 }
0x7277   :  { %v5171_v29 = vpop.permute.xlu0 %5170 }
0x7278   :  { %v5173_v46 = vmul.f32 %v5171_v29, %v5152_v56 }
0x727a   :  { %v5175_v51 = vrot.slane %v5173_v46, 4 }
0x727c   :  { %5176 = vrot.lane.b32.xlu1 %v5175_v51, %s9087_s28 }
0x72ee   :  { %v5177_v41 = vpop.permute.xlu1 %5176 }
0x72ef   :  { %8449 = vmatmul.mubr.msk.f32.vlgmr.msra.gmra.mxu1 %vm413_vm6, %v5177_v41 }
0x72f0   :  { %8463 = vmatpush3.msra.mxu1 %v9945_v8  ;;  %8470 = vmatprep.mubr.msk.f32.mxu1 %vm9084_vm2, %v9083_v28 }
0x72f1   :  { %8464 = vmatprep.subr.mxu1 %v9083_v28 }
0x72f2   :  { %8465 = vmatpush3.msra.mxu1 %v9951_v45 }
0x72f3   :  { %8466 = vmatprep.subr.mxu1 %v9083_v28 }
0x72f4   :  { %8467 = vmatpush3.msra.mxu1 %v9958_v50 }
0x72f5   :  { %8468 = vmatprep.subr.mxu1 %v9083_v28 }
0x72f6   :  { %8469 = vmatpush3.msra.mxu1 %v9965_v11 }
0x72f7   :  { %8484 = vmatprep.subr.mxu1 %v9083_v28 }
0x73af   :  { %v5246_v32 = vpop.f32.mrf.mxu1 }
0x73b0   :  { %v5251_v9 = vrot.slane %v5246_v32, 2 }
0x73b1   :  { %v8450_v54 = vpop.f32.mrf.mxu1 }
0x73b2   :  { %v5253_v55 = vadd.f32 %v5251_v9, %v10162_v60 }
0x73b4   :  { %8949 = vtanh.f32 %v5253_v55  ;;  %v5254_v20 = vmul.f32 0.5, %v5253_v55 }
0x73b6   :  { %8951 = vtanh.f32 %v5254_v20 }
0x73c1   :  { %v8950_v57 = vpop.eup %8949 }
0x73c2   :  { %5264 = vrot.lane.b32.xlu0 %v8950_v57, %s9086_s27 }
0x73c3   :  { %v8952_v58 = vpop.eup %8951 }
0x73c4   :  { %v5256_v47 = vmul.f32 0.5, %v8952_v58 }
0x73c6   :  { %v5257_v52 = vadd.f32 0.5, %v5256_v47 }
0x73c8   :  { %v5262_v0 = vmul.f32 %v5260_v63, %v5257_v52 }
0x7434   :  { %v5265_v59 = vpop.permute.xlu0 %5264 }
0x7435   :  { %v5267_v61 = vmul.f32 %v5265_v59, %v5257_v52 }
0x7437   :  { %5269 = vrot.lane.b32.xlu1 %v5267_v61, %s9086_s27 }
0x74a9   :  { %v5270_v10 = vpop.permute.xlu1 %5269 }
0x74aa   :  { %v5272_v1 = vadd.f32 %v5270_v10, %v5262_v0 }
0x74ac   :  { %8953 = vtanh.f32 %v5272_v1  ;;  %v5362_v15 = vrot.slane %v5272_v1, 6 }
0x74b9   :  { %v8954_v24 = vpop.eup %8953 }
0x74ba   :  { %5275 = vrot.lane.b32.xlu0 %v8954_v24, %s9086_s27 }
0x752c   :  { %v5276_v60 = vpop.permute.xlu0 %5275 }
0x752d   :  { %v5278_v2 = vmul.f32 %v5276_v60, %v5257_v52 }
0x752f   :  { %v5280_v3 = vrot.slane %v5278_v2, 6 }
0x7531   :  { %5281 = vrot.lane.b32.xlu1 %v5280_v3, %s9087_s28 }
0x75a3   :  { %v5282_v4 = vpop.permute.xlu1 %5281 }
0x75a4   :  { %8460 = vmatmul.mubr.msk.f32.vlgmr.msra.gmra.mxu0 %vm413_vm6, %v5282_v4 }
0x75a5   :  { %8474 = vmatpush3.msra.mxu0 %v9945_v8  ;;  %8481 = vmatprep.mubr.msk.f32.mxu0 %vm9084_vm2, %v9083_v28  ;;  %v10230_v8 = vadd.f32 %v10048_v19, %v10002_v23 }
0x75a6   :  { %8475 = vmatprep.subr.mxu0 %v9083_v28 }
0x75a7   :  { %8476 = vmatpush3.msra.mxu0 %v9951_v45 }
0x75a8   :  { %8477 = vmatprep.subr.mxu0 %v9083_v28 }
0x75a9   :  { %8478 = vmatpush3.msra.mxu0 %v9958_v50 }
0x75aa   :  { %8479 = vmatprep.subr.mxu0 %v9083_v28 }
0x75ab   :  { %8480 = vmatpush3.msra.mxu0 %v9965_v11 }
0x75ac   :  { %8495 = vmatprep.subr.mxu0 %v9083_v28 }
0x7664   :  { %v5351_v49 = vpop.f32.mrf.mxu0 }
0x7665   :  { %v5355_v5 = vadd.f32 %v5351_v49, %v10230_v8 }
0x7666   :  { %v8461_v6 = vpop.f32.mrf.mxu0 }
0x7667   :  { %8955 = vtanh.f32 %v5355_v5  ;;  %v5356_v7 = vmul.f32 0.5, %v5355_v5 }
0x7669   :  { %8957 = vtanh.f32 %v5356_v7 }
0x7674   :  { %v8956_v45 = vpop.eup %8955 }
0x7675   :  { %5366 = vrot.lane.b32.xlu0 %v8956_v45, %s9086_s27 }
0x7676   :  { %v8958_v50 = vpop.eup %8957 }
0x7677   :  { %v5358_v12 = vmul.f32 0.5, %v8958_v50 }
0x7679   :  { %v5359_v13 = vadd.f32 0.5, %v5358_v12 }
0x767b   :  { %v5364_v23 = vmul.f32 %v5362_v15, %v5359_v13 }
0x76e7   :  { %v5367_v11 = vpop.permute.xlu0 %5366 }
0x76e8   :  { %v5369_v14 = vmul.f32 %v5367_v11, %v5359_v13 }
0x76ea   :  { %5371 = vrot.lane.b32.xlu1 %v5369_v14, %s9086_s27 }
0x775c   :  { %v5372_v19 = vpop.permute.xlu1 %5371 }
0x775d   :  { %v5374_v16 = vadd.f32 %v5372_v19, %v5364_v23 }
0x775f   :  { %8959 = vtanh.f32 %v5374_v16  ;;  %v5466_v40 = vrot.slane %v5374_v16, 6 }
0x776c   :  { %v8960_v18 = vpop.eup %8959 }
0x776d   :  { %5377 = vrot.lane.b32.xlu0 %v8960_v18, %s9086_s27 }
0x77df   :  { %v5378_v31 = vpop.permute.xlu0 %5377 }
0x77e0   :  { %v5380_v17 = vmul.f32 %v5378_v31, %v5359_v13 }
0x77e2   :  { %5382 = vrot.lane.b32.xlu1 %v5380_v17, %s9087_s28 }
0x7854   :  { %v5383_v26 = vpop.permute.xlu1 %5382 }
0x7855   :  { %8471 = vmatmul.mubr.msk.f32.vlgmr.msra.gmra.mxu1 %vm413_vm6, %v5383_v26 }
0x7856   :  { %8485 = vmatpush3.msra.mxu1 %v10241_v27  ;;  %8492 = vmatprep.mubr.msk.f32.mxu1 %vm9084_vm2, %v9083_v28 }
0x7857   :  { %8486 = vmatprep.subr.mxu1 %v9083_v28 }
0x7858   :  { %8487 = vmatpush3.msra.mxu1 %v10250_v33 }
0x7859   :  { %8488 = vmatprep.subr.mxu1 %v9083_v28 }
0x785a   :  { %8489 = vmatpush3.msra.mxu1 %v10257_v34 }
0x785b   :  { %8490 = vmatprep.subr.mxu1 %v9083_v28 }
0x785c   :  { %8491 = vmatpush3.msra.mxu1 %v10264_v35 }
0x785d   :  { %8506 = vmatprep.subr.mxu1 %v9083_v28 }
0x7915   :  { %v5452_v36 = vpop.f32.mrf.mxu1 }
0x7916   :  { %v5457_v37 = vrot.slane %v5452_v36, 6 }
0x7917   :  { %v8472_v38 = vpop.f32.mrf.mxu1 }
0x7918   :  { %v5459_v53 = vadd.f32 %v5457_v37, %v10230_v8 }
0x791a   :  { %8961 = vtanh.f32 %v5459_v53  ;;  %v5460_v42 = vmul.f32 0.5, %v5459_v53 }
0x791c   :  { %8963 = vtanh.f32 %v5460_v42  ;;  %v10319_v42 = vld [vmem:[%s10597_s8] ss:$0 sm:$0xff] }
0x7927   :  { %v8962_v56 = vpop.eup %8961 }
0x7928   :  { %5470 = vrot.lane.b32.xlu0 %v8962_v56, %s9086_s27 }
0x7929   :  { %v8964_v48 = vpop.eup %8963 }
0x792a   :  { %v5462_v43 = vmul.f32 0.5, %v8964_v48  ;;  %v10323_v48 = vadd.f32 %v10319_v42, %v10054_v22 }
0x792c   :  { %v5463_v44 = vadd.f32 0.5, %v5462_v43 }
0x792e   :  { %v5468_v29 = vmul.f32 %v5466_v40, %v5463_v44 }
0x799a   :  { %v5471_v30 = vpop.permute.xlu0 %5470 }
0x799b   :  { %v5473_v62 = vmul.f32 %v5471_v30, %v5463_v44 }
0x799d   :  { %5475 = vrot.lane.b32.xlu1 %v5473_v62, %s9086_s27 }
0x7a0f   :  { %v5476_v46 = vpop.permute.xlu1 %5475 }
0x7a10   :  { %v5478_v51 = vadd.f32 %v5476_v46, %v5468_v29 }
0x7a12   :  { %8965 = vtanh.f32 %v5478_v51  ;;  %v5571_v24 = vrot.slane %v5478_v51, 6 }
0x7a1f   :  { %v8966_v41 = vpop.eup %8965 }
0x7a20   :  { %5481 = vrot.lane.b32.xlu0 %v8966_v41, %s9086_s27 }
0x7a92   :  { %v5482_v32 = vpop.permute.xlu0 %5481 }
0x7a93   :  { %v5484_v9 = vmul.f32 %v5482_v32, %v5463_v44 }
0x7a95   :  { %v5486_v54 = vrot.slane %v5484_v9, 2 }
0x7a97   :  { %5487 = vrot.lane.b32.xlu1 %v5486_v54, %s9087_s28 }
0x7b09   :  { %v5488_v55 = vpop.permute.xlu1 %5487 }
0x7b0a   :  { %8482 = vmatmul.mubr.msk.f32.vlgmr.msra.gmra.mxu0 %vm413_vm6, %v5488_v55 }
0x7b0b   :  { %8496 = vmatpush3.msra.mxu0 %v10241_v27  ;;  %8503 = vmatprep.mubr.msk.f32.mxu0 %vm9084_vm2, %v9083_v28 }
0x7b0c   :  { %8497 = vmatprep.subr.mxu0 %v9083_v28 }
0x7b0d   :  { %8498 = vmatpush3.msra.mxu0 %v10250_v33 }
0x7b0e   :  { %8499 = vmatprep.subr.mxu0 %v9083_v28 }
0x7b0f   :  { %8500 = vmatpush3.msra.mxu0 %v10257_v34 }
0x7b10   :  { %8501 = vmatprep.subr.mxu0 %v9083_v28 }
0x7b11   :  { %8502 = vmatpush3.msra.mxu0 %v10264_v35 }
0x7b12   :  { %8517 = vmatprep.subr.mxu0 %v9083_v28 }
0x7bca   :  { %v5557_v57 = vpop.f32.mrf.mxu0 }
0x7bcb   :  { %v5562_v20 = vrot.slane %v5557_v57, 4 }
0x7bcc   :  { %v8483_v58 = vpop.f32.mrf.mxu0 }
0x7bcd   :  { %v5564_v47 = vadd.f32 %v5562_v20, %v10230_v8 }
0x7bcf   :  { %8967 = vtanh.f32 %v5564_v47  ;;  %v5565_v59 = vmul.f32 0.5, %v5564_v47 }
0x7bd1   :  { %8969 = vtanh.f32 %v5565_v59 }
0x7bdc   :  { %v8968_v52 = vpop.eup %8967 }
0x7bdd   :  { %5575 = vrot.lane.b32.xlu0 %v8968_v52, %s9086_s27 }
0x7bde   :  { %v8970_v61 = vpop.eup %8969 }
0x7bdf   :  { %v5567_v63 = vmul.f32 0.5, %v8970_v61 }
0x7be1   :  { %v5568_v0 = vadd.f32 0.5, %v5567_v63 }
0x7be3   :  { %v5573_v60 = vmul.f32 %v5571_v24, %v5568_v0 }
0x7c4f   :  { %v5576_v10 = vpop.permute.xlu0 %5575 }
0x7c50   :  { %v5578_v1 = vmul.f32 %v5576_v10, %v5568_v0 }
0x7c52   :  { %5580 = vrot.lane.b32.xlu1 %v5578_v1, %s9086_s27 }
0x7cc4   :  { %v5581_v2 = vpop.permute.xlu1 %5580 }
0x7cc5   :  { %v5583_v3 = vadd.f32 %v5581_v2, %v5573_v60 }
0x7cc7   :  { %8971 = vtanh.f32 %v5583_v3  ;;  %v5676_v31 = vrot.slane %v5583_v3, 6 }
0x7cd4   :  { %v8972_v4 = vpop.eup %8971 }
0x7cd5   :  { %5586 = vrot.lane.b32.xlu0 %v8972_v4, %s9086_s27 }
0x7d47   :  { %v5587_v49 = vpop.permute.xlu0 %5586 }
0x7d48   :  { %v5589_v5 = vmul.f32 %v5587_v49, %v5568_v0 }
0x7d4a   :  { %v5591_v6 = vrot.slane %v5589_v5, 4 }
0x7d4c   :  { %5592 = vrot.lane.b32.xlu1 %v5591_v6, %s9087_s28 }
0x7dbe   :  { %v5593_v45 = vpop.permute.xlu1 %5592 }
0x7dbf   :  { %8493 = vmatmul.mubr.msk.f32.vlgmr.msra.gmra.mxu1 %vm413_vm6, %v5593_v45 }
0x7dc0   :  { %8507 = vmatpush3.msra.mxu1 %v10241_v27  ;;  %8514 = vmatprep.mubr.msk.f32.mxu1 %vm9084_vm2, %v9083_v28 }
0x7dc1   :  { %8508 = vmatprep.subr.mxu1 %v9083_v28 }
0x7dc2   :  { %8509 = vmatpush3.msra.mxu1 %v10250_v33 }
0x7dc3   :  { %8510 = vmatprep.subr.mxu1 %v9083_v28 }
0x7dc4   :  { %8511 = vmatpush3.msra.mxu1 %v10257_v34 }
0x7dc5   :  { %8512 = vmatprep.subr.mxu1 %v9083_v28 }
0x7dc6   :  { %8513 = vmatpush3.msra.mxu1 %v10264_v35 }
0x7dc7   :  { %8528 = vmatprep.subr.mxu1 %v9083_v28 }
0x7e7f   :  { %v5662_v7 = vpop.f32.mrf.mxu1 }
0x7e80   :  { %v5667_v50 = vrot.slane %v5662_v7, 2 }
0x7e81   :  { %v8494_v12 = vpop.f32.mrf.mxu1 }
0x7e82   :  { %v5669_v13 = vadd.f32 %v5667_v50, %v10230_v8 }
0x7e84   :  { %8973 = vtanh.f32 %v5669_v13  ;;  %v5670_v14 = vmul.f32 0.5, %v5669_v13 }
0x7e86   :  { %8975 = vtanh.f32 %v5670_v14 }
0x7e91   :  { %v8974_v11 = vpop.eup %8973 }
0x7e92   :  { %5680 = vrot.lane.b32.xlu0 %v8974_v11, %s9086_s27 }
0x7e93   :  { %v8976_v15 = vpop.eup %8975 }
0x7e94   :  { %v5672_v23 = vmul.f32 0.5, %v8976_v15 }
0x7e96   :  { %v5673_v19 = vadd.f32 0.5, %v5672_v23 }
0x7e98   :  { %v5678_v17 = vmul.f32 %v5676_v31, %v5673_v19 }
0x7f04   :  { %v5681_v16 = vpop.permute.xlu0 %5680 }
0x7f05   :  { %v5683_v18 = vmul.f32 %v5681_v16, %v5673_v19 }
0x7f07   :  { %5685 = vrot.lane.b32.xlu1 %v5683_v18, %s9086_s27 }
0x7f79   :  { %v5686_v26 = vpop.permute.xlu1 %5685 }
0x7f7a   :  { %v5688_v36 = vadd.f32 %v5686_v26, %v5678_v17 }
0x7f7c   :  { %8977 = vtanh.f32 %v5688_v36  ;;  %v5778_v9 = vrot.slane %v5688_v36, 6 }
0x7f89   :  { %v8978_v37 = vpop.eup %8977 }
0x7f8a   :  { %5691 = vrot.lane.b32.xlu0 %v8978_v37, %s9086_s27 }
0x7ffc   :  { %v5692_v8 = vpop.permute.xlu0 %5691 }
0x7ffd   :  { %v5694_v38 = vmul.f32 %v5692_v8, %v5673_v19 }
0x7fff   :  { %v5696_v53 = vrot.slane %v5694_v38, 6 }
0x8001   :  { %5697 = vrot.lane.b32.xlu1 %v5696_v53, %s9087_s28 }
0x8073   :  { %v5698_v56 = vpop.permute.xlu1 %5697 }
0x8074   :  { %8504 = vmatmul.mubr.msk.f32.vlgmr.msra.gmra.mxu0 %vm413_vm6, %v5698_v56 }
0x8075   :  { %8518 = vmatpush3.msra.mxu0 %v10241_v27  ;;  %8525 = vmatprep.mubr.msk.f32.mxu0 %vm9084_vm2, %v9083_v28 }
0x8076   :  { %8519 = vmatprep.subr.mxu0 %v9083_v28 }
0x8077   :  { %8520 = vmatpush3.msra.mxu0 %v10250_v33 }
0x8078   :  { %8521 = vmatprep.subr.mxu0 %v9083_v28 }
0x8079   :  { %8522 = vmatpush3.msra.mxu0 %v10257_v34 }
0x807a   :  { %8523 = vmatprep.subr.mxu0 %v9083_v28 }
0x807b   :  { %8524 = vmatpush3.msra.mxu0 %v10264_v35 }
0x807c   :  { %8539 = vmatprep.subr.mxu0 %v9083_v28 }
0x8134   :  { %v5767_v43 = vpop.f32.mrf.mxu0 }
0x8135   :  { %v5771_v44 = vadd.f32 %v5767_v43, %v10323_v48 }
0x8136   :  { %v8505_v30 = vpop.f32.mrf.mxu0 }
0x8137   :  { %8979 = vtanh.f32 %v5771_v44  ;;  %v5772_v40 = vmul.f32 0.5, %v5771_v44 }
0x8139   :  { %8981 = vtanh.f32 %v5772_v40 }
0x8144   :  { %v8980_v62 = vpop.eup %8979 }
0x8145   :  { %5782 = vrot.lane.b32.xlu0 %v8980_v62, %s9086_s27 }
0x8146   :  { %v8982_v29 = vpop.eup %8981 }
0x8147   :  { %v5774_v46 = vmul.f32 0.5, %v8982_v29 }
0x8149   :  { %v5775_v51 = vadd.f32 0.5, %v5774_v46 }
0x814b   :  { %v5780_v22 = vmul.f32 %v5778_v9, %v5775_v51 }
0x81b7   :  { %v5783_v41 = vpop.permute.xlu0 %5782 }
0x81b8   :  { %v5785_v32 = vmul.f32 %v5783_v41, %v5775_v51 }
0x81ba   :  { %5787 = vrot.lane.b32.xlu1 %v5785_v32, %s9086_s27 }
0x822c   :  { %v5788_v54 = vpop.permute.xlu1 %5787 }
0x822d   :  { %v5790_v55 = vadd.f32 %v5788_v54, %v5780_v22 }
0x822f   :  { %8983 = vtanh.f32 %v5790_v55  ;;  %v5882_v4 = vrot.slane %v5790_v55, 6 }
0x823c   :  { %v8984_v57 = vpop.eup %8983 }
0x823d   :  { %5793 = vrot.lane.b32.xlu0 %v8984_v57, %s9086_s27 }
0x82af   :  { %v5794_v20 = vpop.permute.xlu0 %5793 }
0x82b0   :  { %v5796_v58 = vmul.f32 %v5794_v20, %v5775_v51 }
0x82b2   :  { %5798 = vrot.lane.b32.xlu1 %v5796_v58, %s9087_s28 }
0x8324   :  { %v5799_v47 = vpop.permute.xlu1 %5798 }
0x8325   :  { %8515 = vmatmul.mubr.msk.f32.vlgmr.msra.gmra.mxu1 %vm413_vm6, %v5799_v47 }
0x8326   :  { %8529 = vmatpush3.msra.mxu1 %v10241_v27  ;;  %8536 = vmatprep.mubr.msk.f32.mxu1 %vm9084_vm2, %v9083_v28 }
0x8327   :  { %8530 = vmatprep.subr.mxu1 %v9083_v28 }
0x8328   :  { %8531 = vmatpush3.msra.mxu1 %v10250_v33 }
0x8329   :  { %8532 = vmatprep.subr.mxu1 %v9083_v28 }
0x832a   :  { %8533 = vmatpush3.msra.mxu1 %v10257_v34 }
0x832b   :  { %8534 = vmatprep.subr.mxu1 %v9083_v28 }
0x832c   :  { %8535 = vmatpush3.msra.mxu1 %v10264_v35 }
0x832d   :  { %8550 = vmatprep.subr.mxu1 %v9083_v28 }
0x83e5   :  { %v5868_v52 = vpop.f32.mrf.mxu1 }
0x83e6   :  { %v5873_v59 = vrot.slane %v5868_v52, 6 }
0x83e7   :  { %v8516_v61 = vpop.f32.mrf.mxu1 }
0x83e8   :  { %v5875_v63 = vadd.f32 %v5873_v59, %v10323_v48 }
0x83ea   :  { %8985 = vtanh.f32 %v5875_v63  ;;  %v5876_v10 = vmul.f32 0.5, %v5875_v63 }
0x83ec   :  { %8987 = vtanh.f32 %v5876_v10  ;;  %v10391_v10 = vadd.f32 %v10319_v42, %v10052_v21 }
0x83f7   :  { %v8986_v0 = vpop.eup %8985 }
0x83f8   :  { %5886 = vrot.lane.b32.xlu0 %v8986_v0, %s9086_s27 }
0x83f9   :  { %v8988_v1 = vpop.eup %8987 }
0x83fa   :  { %v5878_v24 = vmul.f32 0.5, %v8988_v1 }
0x83fc   :  { %v5879_v60 = vadd.f32 0.5, %v5878_v24 }
0x83fe   :  { %v5884_v49 = vmul.f32 %v5882_v4, %v5879_v60 }
0x846a   :  { %v5887_v2 = vpop.permute.xlu0 %5886 }
0x846b   :  { %v5889_v3 = vmul.f32 %v5887_v2, %v5879_v60 }
0x846d   :  { %5891 = vrot.lane.b32.xlu1 %v5889_v3, %s9086_s27 }
0x84df   :  { %v5892_v5 = vpop.permute.xlu1 %5891 }
0x84e0   :  { %v5894_v6 = vadd.f32 %v5892_v5, %v5884_v49 }
0x84e2   :  { %8989 = vtanh.f32 %v5894_v6  ;;  %v5987_v37 = vrot.slane %v5894_v6, 6 }
0x84ef   :  { %v8990_v45 = vpop.eup %8989 }
0x84f0   :  { %5897 = vrot.lane.b32.xlu0 %v8990_v45, %s9086_s27 }
0x8562   :  { %v5898_v7 = vpop.permute.xlu0 %5897 }
0x8563   :  { %v5900_v50 = vmul.f32 %v5898_v7, %v5879_v60 }
0x8565   :  { %v5902_v12 = vrot.slane %v5900_v50, 2 }
0x8567   :  { %5903 = vrot.lane.b32.xlu1 %v5902_v12, %s9087_s28 }
0x85d9   :  { %v5904_v13 = vpop.permute.xlu1 %5903 }
0x85da   :  { %8526 = vmatmul.mubr.msk.f32.vlgmr.msra.gmra.mxu0 %vm413_vm6, %v5904_v13 }
0x85db   :  { %8540 = vmatpush3.msra.mxu0 %v10241_v27  ;;  %8547 = vmatprep.mubr.msk.f32.mxu0 %vm9084_vm2, %v9083_v28 }
0x85dc   :  { %8541 = vmatprep.subr.mxu0 %v9083_v28 }
0x85dd   :  { %8542 = vmatpush3.msra.mxu0 %v10250_v33 }
0x85de   :  { %8543 = vmatprep.subr.mxu0 %v9083_v28 }
0x85df   :  { %8544 = vmatpush3.msra.mxu0 %v10257_v34 }
0x85e0   :  { %8545 = vmatprep.subr.mxu0 %v9083_v28 }
0x85e1   :  { %8546 = vmatpush3.msra.mxu0 %v10264_v35 }
0x85e2   :  { %8561 = vmatprep.subr.mxu0 %v9083_v28 }
0x869a   :  { %v5973_v11 = vpop.f32.mrf.mxu0 }
0x869b   :  { %v5978_v14 = vrot.slane %v5973_v11, 4 }
0x869c   :  { %v8527_v15 = vpop.f32.mrf.mxu0 }
0x869d   :  { %v5980_v23 = vadd.f32 %v5978_v14, %v10323_v48 }
0x869f   :  { %8991 = vtanh.f32 %v5980_v23  ;;  %v5981_v16 = vmul.f32 0.5, %v5980_v23 }
0x86a1   :  { %8993 = vtanh.f32 %v5981_v16 }
0x86ac   :  { %v8992_v19 = vpop.eup %8991 }
0x86ad   :  { %5991 = vrot.lane.b32.xlu0 %v8992_v19, %s9086_s27 }
0x86ae   :  { %v8994_v18 = vpop.eup %8993 }
0x86af   :  { %v5983_v31 = vmul.f32 0.5, %v8994_v18 }
0x86b1   :  { %v5984_v17 = vadd.f32 0.5, %v5983_v31 }
0x86b3   :  { %v5989_v8 = vmul.f32 %v5987_v37, %v5984_v17 }
0x871f   :  { %v5992_v26 = vpop.permute.xlu0 %5991 }
0x8720   :  { %v5994_v36 = vmul.f32 %v5992_v26, %v5984_v17 }
0x8722   :  { %5996 = vrot.lane.b32.xlu1 %v5994_v36, %s9086_s27 }
0x8794   :  { %v5997_v38 = vpop.permute.xlu1 %5996 }
0x8795   :  { %v5999_v53 = vadd.f32 %v5997_v38, %v5989_v8 }
0x8797   :  { %8995 = vtanh.f32 %v5999_v53  ;;  %v6092_v20 = vrot.slane %v5999_v53, 6 }
0x87a4   :  { %v8996_v56 = vpop.eup %8995 }
0x87a5   :  { %6002 = vrot.lane.b32.xlu0 %v8996_v56, %s9086_s27 }
0x8817   :  { %v6003_v43 = vpop.permute.xlu0 %6002 }
0x8818   :  { %v6005_v44 = vmul.f32 %v6003_v43, %v5984_v17 }
0x881a   :  { %v6007_v30 = vrot.slane %v6005_v44, 4 }
0x881c   :  { %6008 = vrot.lane.b32.xlu1 %v6007_v30, %s9087_s28 }
0x888e   :  { %v6009_v62 = vpop.permute.xlu1 %6008 }
0x888f   :  { %8537 = vmatmul.mubr.msk.f32.vlgmr.msra.gmra.mxu1 %vm413_vm6, %v6009_v62 }
0x8890   :  { %8551 = vmatpush3.msra.mxu1 %v10241_v27  ;;  %8558 = vmatprep.mubr.msk.f32.mxu1 %vm9084_vm2, %v9083_v28 }
0x8891   :  { %8552 = vmatprep.subr.mxu1 %v9083_v28 }
0x8892   :  { %8553 = vmatpush3.msra.mxu1 %v10250_v33 }
0x8893   :  { %8554 = vmatprep.subr.mxu1 %v9083_v28 }
0x8894   :  { %8555 = vmatpush3.msra.mxu1 %v10257_v34 }
0x8895   :  { %8556 = vmatprep.subr.mxu1 %v9083_v28 }
0x8896   :  { %8557 = vmatpush3.msra.mxu1 %v10264_v35 }
0x8897   :  { %8572 = vmatprep.subr.mxu1 %v9083_v28 }
0x894f   :  { %v6078_v40 = vpop.f32.mrf.mxu1 }
0x8950   :  { %v6083_v29 = vrot.slane %v6078_v40, 2 }
0x8951   :  { %v8538_v46 = vpop.f32.mrf.mxu1 }
0x8952   :  { %v6085_v51 = vadd.f32 %v6083_v29, %v10323_v48 }
0x8954   :  { %8997 = vtanh.f32 %v6085_v51  ;;  %v6086_v32 = vmul.f32 0.5, %v6085_v51 }
0x8956   :  { %8999 = vtanh.f32 %v6086_v32 }
0x8961   :  { %v8998_v41 = vpop.eup %8997 }
0x8962   :  { %6096 = vrot.lane.b32.xlu0 %v8998_v41, %s9086_s27 }
0x8963   :  { %v9000_v9 = vpop.eup %8999 }
0x8964   :  { %v6088_v22 = vmul.f32 0.5, %v9000_v9 }
0x8966   :  { %v6089_v54 = vadd.f32 0.5, %v6088_v22 }
0x8968   :  { %v6094_v58 = vmul.f32 %v6092_v20, %v6089_v54 }
0x89d4   :  { %v6097_v55 = vpop.permute.xlu0 %6096 }
0x89d5   :  { %v6099_v57 = vmul.f32 %v6097_v55, %v6089_v54 }
0x89d7   :  { %6101 = vrot.lane.b32.xlu1 %v6099_v57, %s9086_s27 }
0x8a49   :  { %v6102_v47 = vpop.permute.xlu1 %6101 }
0x8a4a   :  { %v6104_v52 = vadd.f32 %v6102_v47, %v6094_v58 }
0x8a4c   :  { %9001 = vtanh.f32 %v6104_v52  ;;  %v6194_v7 = vrot.slane %v6104_v52, 6 }
0x8a59   :  { %v9002_v59 = vpop.eup %9001 }
0x8a5a   :  { %6107 = vrot.lane.b32.xlu0 %v9002_v59, %s9086_s27 }
0x8acc   :  { %v6108_v48 = vpop.permute.xlu0 %6107 }
0x8acd   :  { %v6110_v61 = vmul.f32 %v6108_v48, %v6089_v54 }
0x8acf   :  { %v6112_v63 = vrot.slane %v6110_v61, 6 }
0x8ad1   :  { %6113 = vrot.lane.b32.xlu1 %v6112_v63, %s9087_s28 }
0x8b43   :  { %v6114_v0 = vpop.permute.xlu1 %6113 }
0x8b44   :  { %8548 = vmatmul.mubr.msk.f32.vlgmr.msra.gmra.mxu0 %vm413_vm6, %v6114_v0 }
0x8b45   :  { %8562 = vmatpush3.msra.mxu0 %v10241_v27  ;;  %8569 = vmatprep.mubr.msk.f32.mxu0 %vm9084_vm2, %v9083_v28 }
0x8b46   :  { %8563 = vmatprep.subr.mxu0 %v9083_v28 }
0x8b47   :  { %8564 = vmatpush3.msra.mxu0 %v10250_v33 }
0x8b48   :  { %8565 = vmatprep.subr.mxu0 %v9083_v28 }
0x8b49   :  { %8566 = vmatpush3.msra.mxu0 %v10257_v34 }
0x8b4a   :  { %8567 = vmatprep.subr.mxu0 %v9083_v28 }
0x8b4b   :  { %8568 = vmatpush3.msra.mxu0 %v10264_v35 }
0x8b4c   :  { %8583 = vmatprep.subr.mxu0 %v9083_v28 }
0x8c04   :  { %v6183_v1 = vpop.f32.mrf.mxu0 }
0x8c05   :  { %v6187_v24 = vadd.f32 %v6183_v1, %v10391_v10 }
0x8c06   :  { %v8549_v60 = vpop.f32.mrf.mxu0 }
0x8c07   :  { %9003 = vtanh.f32 %v6187_v24  ;;  %v6188_v3 = vmul.f32 0.5, %v6187_v24 }
0x8c09   :  { %9005 = vtanh.f32 %v6188_v3 }
0x8c14   :  { %v9004_v2 = vpop.eup %9003 }
0x8c15   :  { %6198 = vrot.lane.b32.xlu0 %v9004_v2, %s9086_s27 }
0x8c16   :  { %v9006_v4 = vpop.eup %9005 }
0x8c17   :  { %v6190_v49 = vmul.f32 0.5, %v9006_v4 }
0x8c19   :  { %v6191_v5 = vadd.f32 0.5, %v6190_v49 }
0x8c1b   :  { %v6196_v21 = vmul.f32 %v6194_v7, %v6191_v5 }
0x8c87   :  { %v6199_v6 = vpop.permute.xlu0 %6198 }
0x8c88   :  { %v6201_v45 = vmul.f32 %v6199_v6, %v6191_v5 }
0x8c8a   :  { %6203 = vrot.lane.b32.xlu1 %v6201_v45, %s9086_s27 }
0x8cfc   :  { %v6204_v50 = vpop.permute.xlu1 %6203 }
0x8cfd   :  { %v6206_v12 = vadd.f32 %v6204_v50, %v6196_v21 }
0x8cff   :  { %9007 = vtanh.f32 %v6206_v12  ;;  %v6298_v53 = vrot.slane %v6206_v12, 6 }
0x8d0c   :  { %v9008_v13 = vpop.eup %9007 }
0x8d0d   :  { %6209 = vrot.lane.b32.xlu0 %v9008_v13, %s9086_s27 }
0x8d7f   :  { %v6210_v11 = vpop.permute.xlu0 %6209 }
0x8d80   :  { %v6212_v14 = vmul.f32 %v6210_v11, %v6191_v5 }
0x8d82   :  { %6214 = vrot.lane.b32.xlu1 %v6212_v14, %s9087_s28 }
0x8df4   :  { %v6215_v15 = vpop.permute.xlu1 %6214 }
0x8df5   :  { %8559 = vmatmul.mubr.msk.f32.vlgmr.msra.gmra.mxu1 %vm413_vm6, %v6215_v15 }
0x8df6   :  { %8573 = vmatpush3.msra.mxu1 %v10241_v27  ;;  %8580 = vmatprep.mubr.msk.f32.mxu1 %vm9084_vm2, %v9083_v28 }
0x8df7   :  { %8574 = vmatprep.subr.mxu1 %v9083_v28 }
0x8df8   :  { %8575 = vmatpush3.msra.mxu1 %v10250_v33 }
0x8df9   :  { %8576 = vmatprep.subr.mxu1 %v9083_v28 }
0x8dfa   :  { %8577 = vmatpush3.msra.mxu1 %v10257_v34 }
0x8dfb   :  { %8578 = vmatprep.subr.mxu1 %v9083_v28 }
0x8dfc   :  { %8579 = vmatpush3.msra.mxu1 %v10264_v35 }
0x8dfd   :  { %8594 = vmatprep.subr.mxu1 %v9083_v28 }
0x8eb5   :  { %v6284_v23 = vpop.f32.mrf.mxu1 }
0x8eb6   :  { %v6289_v19 = vrot.slane %v6284_v23, 6 }
0x8eb7   :  { %v8560_v16 = vpop.f32.mrf.mxu1 }
0x8eb8   :  { %v6291_v18 = vadd.f32 %v6289_v19, %v10391_v10 }
0x8eba   :  { %9009 = vtanh.f32 %v6291_v18  ;;  %v6292_v17 = vmul.f32 0.5, %v6291_v18 }
0x8ebc   :  { %9011 = vtanh.f32 %v6292_v17 }
0x8ec7   :  { %v9010_v31 = vpop.eup %9009 }
0x8ec8   :  { %6302 = vrot.lane.b32.xlu0 %v9010_v31, %s9086_s27  ;;  %v10459_v31 = vadd.f32 %v10319_v42, %v10058_v39 }
0x8ec9   :  { %v9012_v26 = vpop.eup %9011 }
0x8eca   :  { %v6294_v36 = vmul.f32 0.5, %v9012_v26 }
0x8ecc   :  { %v6295_v37 = vadd.f32 0.5, %v6294_v36 }
0x8ece   :  { %v6300_v56 = vmul.f32 %v6298_v53, %v6295_v37 }
0x8f3a   :  { %v6303_v8 = vpop.permute.xlu0 %6302 }
0x8f3b   :  { %v6305_v38 = vmul.f32 %v6303_v8, %v6295_v37 }
0x8f3d   :  { %6307 = vrot.lane.b32.xlu1 %v6305_v38, %s9086_s27 }
0x8faf   :  { %v6308_v43 = vpop.permute.xlu1 %6307 }
0x8fb0   :  { %v6310_v44 = vadd.f32 %v6308_v43, %v6300_v56 }
0x8fb2   :  { %9013 = vtanh.f32 %v6310_v44  ;;  %v6403_v52 = vrot.slane %v6310_v44, 6 }
0x8fbf   :  { %v9014_v30 = vpop.eup %9013 }
0x8fc0   :  { %6313 = vrot.lane.b32.xlu0 %v9014_v30, %s9086_s27 }
0x9032   :  { %v6314_v62 = vpop.permute.xlu0 %6313 }
0x9033   :  { %v6316_v40 = vmul.f32 %v6314_v62, %v6295_v37 }
0x9035   :  { %v6318_v29 = vrot.slane %v6316_v40, 2 }
0x9037   :  { %6319 = vrot.lane.b32.xlu1 %v6318_v29, %s9087_s28 }
0x90a9   :  { %v6320_v46 = vpop.permute.xlu1 %6319 }
0x90aa   :  { %8570 = vmatmul.mubr.msk.f32.vlgmr.msra.gmra.mxu0 %vm413_vm6, %v6320_v46 }
0x90ab   :  { %8584 = vmatpush3.msra.mxu0 %v10241_v27  ;;  %8591 = vmatprep.mubr.msk.f32.mxu0 %vm9084_vm2, %v9083_v28 }
0x90ac   :  { %8585 = vmatprep.subr.mxu0 %v9083_v28 }
0x90ad   :  { %8586 = vmatpush3.msra.mxu0 %v10250_v33 }
0x90ae   :  { %8587 = vmatprep.subr.mxu0 %v9083_v28 }
0x90af   :  { %8588 = vmatpush3.msra.mxu0 %v10257_v34 }
0x90b0   :  { %8589 = vmatprep.subr.mxu0 %v9083_v28 }
0x90b1   :  { %8590 = vmatpush3.msra.mxu0 %v10264_v35 }
0x90b2   :  { %8605 = vmatprep.subr.mxu0 %v9083_v28 }
0x916a   :  { %v6389_v51 = vpop.f32.mrf.mxu0 }
0x916b   :  { %v6394_v41 = vrot.slane %v6389_v51, 4 }
0x916c   :  { %v8571_v32 = vpop.f32.mrf.mxu0 }
0x916d   :  { %v6396_v9 = vadd.f32 %v6394_v41, %v10391_v10 }
0x916f   :  { %9015 = vtanh.f32 %v6396_v9  ;;  %v6397_v54 = vmul.f32 0.5, %v6396_v9 }
0x9171   :  { %9017 = vtanh.f32 %v6397_v54 }
0x917c   :  { %v9016_v22 = vpop.eup %9015 }
0x917d   :  { %6407 = vrot.lane.b32.xlu0 %v9016_v22, %s9086_s27 }
0x917e   :  { %v9018_v55 = vpop.eup %9017 }
0x917f   :  { %v6399_v57 = vmul.f32 0.5, %v9018_v55 }
0x9181   :  { %v6400_v20 = vadd.f32 0.5, %v6399_v57 }
0x9183   :  { %v6405_v59 = vmul.f32 %v6403_v52, %v6400_v20 }
0x91ef   :  { %v6408_v58 = vpop.permute.xlu0 %6407 }
0x91f0   :  { %v6410_v47 = vmul.f32 %v6408_v58, %v6400_v20 }
0x91f2   :  { %6412 = vrot.lane.b32.xlu1 %v6410_v47, %s9086_s27 }
0x9264   :  { %v6413_v48 = vpop.permute.xlu1 %6412 }
0x9265   :  { %v6415_v61 = vadd.f32 %v6413_v48, %v6405_v59 }
0x9267   :  { %9019 = vtanh.f32 %v6415_v61  ;;  %v6508_v13 = vrot.slane %v6415_v61, 6 }
0x9274   :  { %v9020_v63 = vpop.eup %9019 }
0x9275   :  { %6418 = vrot.lane.b32.xlu0 %v9020_v63, %s9086_s27 }
0x92e7   :  { %v6419_v0 = vpop.permute.xlu0 %6418 }
0x92e8   :  { %v6421_v1 = vmul.f32 %v6419_v0, %v6400_v20 }
0x92ea   :  { %v6423_v24 = vrot.slane %v6421_v1, 4 }
0x92ec   :  { %6424 = vrot.lane.b32.xlu1 %v6423_v24, %s9087_s28 }
0x935e   :  { %v6425_v60 = vpop.permute.xlu1 %6424 }
0x935f   :  { %8581 = vmatmul.mubr.msk.f32.vlgmr.msra.gmra.mxu1 %vm413_vm6, %v6425_v60 }
0x9360   :  { %8595 = vmatpush3.msra.mxu1 %v10241_v27  ;;  %8602 = vmatprep.mubr.msk.f32.mxu1 %vm9084_vm2, %v9083_v28 }
0x9361   :  { %8596 = vmatprep.subr.mxu1 %v9083_v28 }
0x9362   :  { %8597 = vmatpush3.msra.mxu1 %v10250_v33 }
0x9363   :  { %8598 = vmatprep.subr.mxu1 %v9083_v28 }
0x9364   :  { %8599 = vmatpush3.msra.mxu1 %v10257_v34 }
0x9365   :  { %8600 = vmatprep.subr.mxu1 %v9083_v28 }
0x9366   :  { %8601 = vmatpush3.msra.mxu1 %v10264_v35 }
0x9367   :  { %8616 = vmatprep.subr.mxu1 %v9083_v28 }
0x941f   :  { %v6494_v2 = vpop.f32.mrf.mxu1 }
0x9420   :  { %v6499_v3 = vrot.slane %v6494_v2, 2 }
0x9421   :  { %v8582_v4 = vpop.f32.mrf.mxu1 }
0x9422   :  { %v6501_v49 = vadd.f32 %v6499_v3, %v10391_v10 }
0x9424   :  { %9021 = vtanh.f32 %v6501_v49  ;;  %v6502_v6 = vmul.f32 0.5, %v6501_v49 }
0x9426   :  { %9023 = vtanh.f32 %v6502_v6 }
0x9431   :  { %v9022_v5 = vpop.eup %9021 }
0x9432   :  { %6512 = vrot.lane.b32.xlu0 %v9022_v5, %s9086_s27 }
0x9433   :  { %v9024_v45 = vpop.eup %9023 }
0x9434   :  { %v6504_v7 = vmul.f32 0.5, %v9024_v45 }
0x9436   :  { %v6505_v21 = vadd.f32 0.5, %v6504_v7 }
0x9438   :  { %v6510_v11 = vmul.f32 %v6508_v13, %v6505_v21 }
0x94a4   :  { %v6513_v50 = vpop.permute.xlu0 %6512 }
0x94a5   :  { %v6515_v12 = vmul.f32 %v6513_v50, %v6505_v21 }
0x94a7   :  { %6517 = vrot.lane.b32.xlu1 %v6515_v12, %s9086_s27 }
0x9519   :  { %v6518_v14 = vpop.permute.xlu1 %6517 }
0x951a   :  { %v6520_v15 = vadd.f32 %v6518_v14, %v6510_v11 }
0x951c   :  { %9025 = vtanh.f32 %v6520_v15  ;;  %v6610_v30 = vrot.slane %v6520_v15, 6 }
0x9529   :  { %v9026_v23 = vpop.eup %9025 }
0x952a   :  { %6523 = vrot.lane.b32.xlu0 %v9026_v23, %s9086_s27 }
0x959c   :  { %v6524_v10 = vpop.permute.xlu0 %6523 }
0x959d   :  { %v6526_v19 = vmul.f32 %v6524_v10, %v6505_v21 }
0x959f   :  { %v6528_v16 = vrot.slane %v6526_v19, 6 }
0x95a1   :  { %6529 = vrot.lane.b32.xlu1 %v6528_v16, %s9087_s28 }
0x9613   :  { %v6530_v18 = vpop.permute.xlu1 %6529 }
0x9614   :  { %8592 = vmatmul.mubr.msk.f32.vlgmr.msra.gmra.mxu0 %vm413_vm6, %v6530_v18 }
0x9615   :  { %8606 = vmatpush3.msra.mxu0 %v10241_v27  ;;  %8613 = vmatprep.mubr.msk.f32.mxu0 %vm9084_vm2, %v9083_v28 }
0x9616   :  { %8607 = vmatprep.subr.mxu0 %v9083_v28 }
0x9617   :  { %8608 = vmatpush3.msra.mxu0 %v10250_v33 }
0x9618   :  { %8609 = vmatprep.subr.mxu0 %v9083_v28 }
0x9619   :  { %8610 = vmatpush3.msra.mxu0 %v10257_v34 }
0x961a   :  { %8611 = vmatprep.subr.mxu0 %v9083_v28 }
0x961b   :  { %8612 = vmatpush3.msra.mxu0 %v10264_v35 }
0x961c   :  { %8627 = vmatprep.subr.mxu0 %v9083_v28 }
0x96d4   :  { %v6599_v17 = vpop.f32.mrf.mxu0 }
0x96d5   :  { %v6603_v26 = vadd.f32 %v6599_v17, %v10459_v31 }
0x96d6   :  { %v8593_v36 = vpop.f32.mrf.mxu0 }
0x96d7   :  { %9027 = vtanh.f32 %v6603_v26  ;;  %v6604_v8 = vmul.f32 0.5, %v6603_v26 }
0x96d9   :  { %9029 = vtanh.f32 %v6604_v8 }
0x96e4   :  { %v9028_v37 = vpop.eup %9027 }
0x96e5   :  { %6614 = vrot.lane.b32.xlu0 %v9028_v37, %s9086_s27 }
0x96e6   :  { %v9030_v38 = vpop.eup %9029 }
0x96e7   :  { %v6606_v53 = vmul.f32 0.5, %v9030_v38 }
0x96e9   :  { %v6607_v56 = vadd.f32 0.5, %v6606_v53 }
0x96eb   :  { %v6612_v39 = vmul.f32 %v6610_v30, %v6607_v56 }
0x9757   :  { %v6615_v43 = vpop.permute.xlu0 %6614 }
0x9758   :  { %v6617_v44 = vmul.f32 %v6615_v43, %v6607_v56 }
0x975a   :  { %6619 = vrot.lane.b32.xlu1 %v6617_v44, %s9086_s27 }
0x97cc   :  { %v6620_v62 = vpop.permute.xlu1 %6619 }
0x97cd   :  { %v6622_v40 = vadd.f32 %v6620_v62, %v6612_v39 }
0x97cf   :  { %9031 = vtanh.f32 %v6622_v40  ;;  %v6714_v48 = vrot.slane %v6622_v40, 6 }
0x97dc   :  { %v9032_v29 = vpop.eup %9031 }
0x97dd   :  { %6625 = vrot.lane.b32.xlu0 %v9032_v29, %s9086_s27 }
0x984f   :  { %v6626_v46 = vpop.permute.xlu0 %6625 }
0x9850   :  { %v6628_v51 = vmul.f32 %v6626_v46, %v6607_v56 }
0x9852   :  { %6630 = vrot.lane.b32.xlu1 %v6628_v51, %s9087_s28 }
0x98c4   :  { %v6631_v41 = vpop.permute.xlu1 %6630 }
0x98c5   :  { %8603 = vmatmul.mubr.msk.f32.vlgmr.msra.gmra.mxu1 %vm413_vm6, %v6631_v41  ;;  %v10511_v41 = vadd.f32 %v10319_v42, %v10056_v25 }
0x98c6   :  { %8617 = vmatpush3.msra.mxu1 %v10241_v27  ;;  %8624 = vmatprep.mubr.msk.f32.mxu1 %vm9084_vm2, %v9083_v28 }
0x98c7   :  { %8618 = vmatprep.subr.mxu1 %v9083_v28 }
0x98c8   :  { %8619 = vmatpush3.msra.mxu1 %v10250_v33 }
0x98c9   :  { %8620 = vmatprep.subr.mxu1 %v9083_v28 }
0x98ca   :  { %8621 = vmatpush3.msra.mxu1 %v10257_v34 }
0x98cb   :  { %8622 = vmatprep.subr.mxu1 %v9083_v28 }
0x98cc   :  { %8623 = vmatpush3.msra.mxu1 %v10264_v35 }
0x98cd   :  { %8638 = vmatprep.subr.mxu1 %v9083_v28 }
0x9985   :  { %v6700_v32 = vpop.f32.mrf.mxu1 }
0x9986   :  { %v6705_v9 = vrot.slane %v6700_v32, 6 }
0x9987   :  { %v8604_v22 = vpop.f32.mrf.mxu1 }
0x9988   :  { %v6707_v54 = vadd.f32 %v6705_v9, %v10459_v31 }
0x998a   :  { %9033 = vtanh.f32 %v6707_v54  ;;  %v6708_v57 = vmul.f32 0.5, %v6707_v54 }
0x998c   :  { %9035 = vtanh.f32 %v6708_v57 }
0x9997   :  { %v9034_v55 = vpop.eup %9033 }
0x9998   :  { %6718 = vrot.lane.b32.xlu0 %v9034_v55, %s9086_s27 }
0x9999   :  { %v9036_v20 = vpop.eup %9035 }
0x999a   :  { %v6710_v58 = vmul.f32 0.5, %v9036_v20 }
0x999c   :  { %v6711_v47 = vadd.f32 0.5, %v6710_v58 }
0x999e   :  { %v6716_v61 = vmul.f32 %v6714_v48, %v6711_v47 }
0x9a0a   :  { %v6719_v52 = vpop.permute.xlu0 %6718 }
0x9a0b   :  { %v6721_v59 = vmul.f32 %v6719_v52, %v6711_v47 }
0x9a0d   :  { %6723 = vrot.lane.b32.xlu1 %v6721_v59, %s9086_s27 }
0x9a7f   :  { %v6724_v63 = vpop.permute.xlu1 %6723 }
0x9a80   :  { %v6726_v0 = vadd.f32 %v6724_v63, %v6716_v61  ;;  %v7053_v61 = vld [vmem:[%s10596_s7 + $0x18] sm:$0xff]  ;;  %v7052_v63 = vld [vmem:[%s10596_s7 + $0x10] sm:$0xff] }
0x9a82   :  { %9037 = vtanh.f32 %v6726_v0 }
0x9a8f   :  { %v9038_v1 = vpop.eup %9037 }
0x9a90   :  { %6729 = vrot.lane.b32.xlu0 %v9038_v1, %s9086_s27  ;;  %v7050_v1 = vld [vmem:[%s10596_s7] sm:$0xff] }
0x9b02   :  { %v6730_v24 = vpop.permute.xlu0 %6729 }
0x9b03   :  { %v6732_v60 = vmul.f32 %v6730_v24, %v6711_v47 }
0x9b05   :  { %v6734_v2 = vrot.slane %v6732_v60, 2 }
0x9b07   :  { %6735 = vrot.lane.b32.xlu1 %v6734_v2, %s9087_s28 }
0x9b79   :  { %v6736_v3 = vpop.permute.xlu1 %6735 }
0x9b7a   :  { %8614 = vmatmul.mubr.msk.f32.vlgmr.msra.gmra.mxu0 %vm413_vm6, %v6736_v3 }
0x9b7b   :  { %8628 = vmatpush3.msra.mxu0 %v10241_v27  ;;  %8635 = vmatprep.mubr.msk.f32.mxu0 %vm9084_vm2, %v9083_v28 }
0x9b7c   :  { %8629 = vmatprep.subr.mxu0 %v9083_v28 }
0x9b7d   :  { %8630 = vmatpush3.msra.mxu0 %v10250_v33 }
0x9b7e   :  { %8631 = vmatprep.subr.mxu0 %v9083_v28 }
0x9b7f   :  { %8632 = vmatpush3.msra.mxu0 %v10257_v34 }
0x9b80   :  { %8633 = vmatprep.subr.mxu0 %v9083_v28 }
0x9b81   :  { %8634 = vmatpush3.msra.mxu0 %v10264_v35  ;;  %v6819_v35 = vrot.slane %v6726_v0, 6  ;;  %v7051_v0 = vld [vmem:[%s10596_s7 + $0x8] sm:$0xff] }
0x9b82   :  { %8649 = vmatprep.subr.mxu0 %v9083_v28 }
0x9c3a   :  { %v6805_v4 = vpop.f32.mrf.mxu0 }
0x9c3b   :  { %v6810_v49 = vrot.slane %v6805_v4, 4 }
0x9c3c   :  { %v8615_v27 = vpop.f32.mrf.mxu0 }
0x9c3d   :  { %v6812_v5 = vadd.f32 %v6810_v49, %v10459_v31 }
0x9c3f   :  { %9039 = vtanh.f32 %v6812_v5  ;;  %v6813_v33 = vmul.f32 0.5, %v6812_v5 }
0x9c41   :  { %9041 = vtanh.f32 %v6813_v33 }
0x9c4c   :  { %v9040_v6 = vpop.eup %9039 }
0x9c4d   :  { %6823 = vrot.lane.b32.xlu0 %v9040_v6, %s9086_s27 }
0x9c4e   :  { %v9042_v45 = vpop.eup %9041 }
0x9c4f   :  { %v6815_v7 = vmul.f32 0.5, %v9042_v45 }
0x9c51   :  { %v6816_v34 = vadd.f32 0.5, %v6815_v7 }
0x9c53   :  { %v6821_v12 = vmul.f32 %v6819_v35, %v6816_v34 }
0x9cbf   :  { %v6824_v21 = vpop.permute.xlu0 %6823 }
0x9cc0   :  { %v6826_v50 = vmul.f32 %v6824_v21, %v6816_v34 }
0x9cc2   :  { %6828 = vrot.lane.b32.xlu1 %v6826_v50, %s9086_s27 }
0x9d34   :  { %v6829_v13 = vpop.permute.xlu1 %6828 }
0x9d35   :  { %v6831_v11 = vadd.f32 %v6829_v13, %v6821_v12 }
0x9d37   :  { %9043 = vtanh.f32 %v6831_v11  ;;  %v6924_v44 = vrot.slane %v6831_v11, 6 }
0x9d44   :  { %v9044_v14 = vpop.eup %9043 }
0x9d45   :  { %6834 = vrot.lane.b32.xlu0 %v9044_v14, %s9086_s27 }
0x9db7   :  { %v6835_v15 = vpop.permute.xlu0 %6834 }
0x9db8   :  { %v6837_v23 = vmul.f32 %v6835_v15, %v6816_v34 }
0x9dba   :  { %v6839_v10 = vrot.slane %v6837_v23, 4 }
0x9dbc   :  { %6840 = vrot.lane.b32.xlu1 %v6839_v10, %s9087_s28 }
0x9e2e   :  { %v6841_v19 = vpop.permute.xlu1 %6840 }
0x9e2f   :  { %8625 = vmatmul.mubr.msk.f32.vlgmr.msra.gmra.mxu1 %vm413_vm6, %v6841_v19 }
0x9e30   :  { %8646 = vmatprep.mubr.msk.f32.mxu1 %vm9084_vm2, %v9083_v28  ;;  %8639 = vmatpush3.msra.mxu1 %v7053_v61 }
0x9e31   :  { %8640 = vmatprep.subr.mxu1 %v9083_v28 }
0x9e32   :  { %8641 = vmatpush3.msra.mxu1 %v7052_v63 }
0x9e33   :  { %8642 = vmatprep.subr.mxu1 %v9083_v28 }
0x9e34   :  { %8643 = vmatpush3.msra.mxu1 %v7051_v0 }
0x9e35   :  { %8644 = vmatprep.subr.mxu1 %v9083_v28 }
0x9e36   :  { %8645 = vmatpush3.msra.mxu1 %v7050_v1 }
0x9e37   :  { %8660 = vmatprep.subr.mxu1 %v9083_v28 }
0x9eef   :  { %v6910_v16 = vpop.f32.mrf.mxu1 }
0x9ef0   :  { %v6915_v18 = vrot.slane %v6910_v16, 2 }
0x9ef1   :  { %v8626_v17 = vpop.f32.mrf.mxu1 }
0x9ef2   :  { %v6917_v26 = vadd.f32 %v6915_v18, %v10459_v31 }
0x9ef4   :  { %9045 = vtanh.f32 %v6917_v26  ;;  %v6918_v37 = vmul.f32 0.5, %v6917_v26 }
0x9ef6   :  { %9047 = vtanh.f32 %v6918_v37 }
0x9f01   :  { %v9046_v36 = vpop.eup %9045 }
0x9f02   :  { %6928 = vrot.lane.b32.xlu0 %v9046_v36, %s9086_s27 }
0x9f03   :  { %v9048_v8 = vpop.eup %9047 }
0x9f04   :  { %v6920_v38 = vmul.f32 0.5, %v9048_v8 }
0x9f06   :  { %v6921_v53 = vadd.f32 0.5, %v6920_v38 }
0x9f08   :  { %v6926_v30 = vmul.f32 %v6924_v44, %v6921_v53 }
0x9f74   :  { %v6929_v56 = vpop.permute.xlu0 %6928 }
0x9f75   :  { %v6931_v43 = vmul.f32 %v6929_v56, %v6921_v53 }
0x9f77   :  { %6933 = vrot.lane.b32.xlu1 %v6931_v43, %s9086_s27 }
0x9fe9   :  { %v6934_v39 = vpop.permute.xlu1 %6933 }
0x9fea   :  { %v6936_v62 = vadd.f32 %v6934_v39, %v6926_v30 }
0x9fec   :  { %9049 = vtanh.f32 %v6936_v62  ;;  %v7026_v59 = vrot.slane %v6936_v62, 6 }
0x9ff9   :  { %v9050_v40 = vpop.eup %9049 }
0x9ffa   :  { %6939 = vrot.lane.b32.xlu0 %v9050_v40, %s9086_s27 }
0xa06c   :  { %v6940_v31 = vpop.permute.xlu0 %6939 }
0xa06d   :  { %v6942_v29 = vmul.f32 %v6940_v31, %v6921_v53 }
0xa06f   :  { %v6944_v46 = vrot.slane %v6942_v29, 6 }
0xa071   :  { %6945 = vrot.lane.b32.xlu1 %v6944_v46, %s9087_s28 }
0xa0e3   :  { %v6946_v51 = vpop.permute.xlu1 %6945 }
0xa0e4   :  { %8636 = vmatmul.mubr.msk.f32.vlgmr.msra.gmra.mxu0 %vm413_vm6, %v6946_v51 }
0xa0e5   :  { %8657 = vmatprep.mubr.msk.f32.mxu0 %vm9084_vm2, %v9083_v28  ;;  %8650 = vmatpush3.msra.mxu0 %v7053_v61 }
0xa0e6   :  { %8651 = vmatprep.subr.mxu0 %v9083_v28 }
0xa0e7   :  { %8652 = vmatpush3.msra.mxu0 %v7052_v63 }
0xa0e8   :  { %8653 = vmatprep.subr.mxu0 %v9083_v28 }
0xa0e9   :  { %8654 = vmatpush3.msra.mxu0 %v7051_v0 }
0xa0ea   :  { %8655 = vmatprep.subr.mxu0 %v9083_v28 }
0xa0eb   :  { %8656 = vmatpush3.msra.mxu0 %v7050_v1 }
0xa0ec   :  { %8671 = vmatprep.subr.mxu0 %v9083_v28 }
0xa1a4   :  { %v7015_v32 = vpop.f32.mrf.mxu0 }
0xa1a5   :  { %v7019_v9 = vadd.f32 %v7015_v32, %v10511_v41 }
0xa1a6   :  { %v8637_v22 = vpop.f32.mrf.mxu0 }
0xa1a7   :  { %9051 = vtanh.f32 %v7019_v9  ;;  %v7020_v55 = vmul.f32 0.5, %v7019_v9 }
0xa1a9   :  { %9053 = vtanh.f32 %v7020_v55 }
0xa1b4   :  { %v9052_v54 = vpop.eup %9051 }
0xa1b5   :  { %7030 = vrot.lane.b32.xlu0 %v9052_v54, %s9086_s27 }
0xa1b6   :  { %v9054_v57 = vpop.eup %9053 }
0xa1b7   :  { %v7022_v20 = vmul.f32 0.5, %v9054_v57 }
0xa1b9   :  { %v7023_v58 = vadd.f32 0.5, %v7022_v20 }
0xa1bb   :  { %v7028_v25 = vmul.f32 %v7026_v59, %v7023_v58 }
0xa227   :  { %v7031_v47 = vpop.permute.xlu0 %7030 }
0xa228   :  { %v7033_v52 = vmul.f32 %v7031_v47, %v7023_v58 }
0xa22a   :  { %7035 = vrot.lane.b32.xlu1 %v7033_v52, %s9086_s27 }
0xa29c   :  { %v7036_v42 = vpop.permute.xlu1 %7035 }
0xa29d   :  { %v7038_v48 = vadd.f32 %v7036_v42, %v7028_v25 }
0xa29f   :  { %9055 = vtanh.f32 %v7038_v48  ;;  %v7136_v35 = vrot.slane %v7038_v48, 6 }
0xa2ac   :  { %v9056_v24 = vpop.eup %9055 }
0xa2ad   :  { %7041 = vrot.lane.b32.xlu0 %v9056_v24, %s9086_s27  ;;  %v7391_v24 = vld [vmem:[%s10598_s9 + $0x8] sm:$0xff] }
0xa31f   :  { %v7042_v60 = vpop.permute.xlu0 %7041 }
0xa320   :  { %v7044_v2 = vmul.f32 %v7042_v60, %v7023_v58  ;;  %v7390_v60 = vld [vmem:[%s10598_s9] sm:$0xff] }
0xa322   :  { %7046 = vrot.lane.b32.xlu1 %v7044_v2, %s9087_s28 }
0xa394   :  { %v7047_v3 = vpop.permute.xlu1 %7046 }
0xa395   :  { %7049 = vst.msk [vmem:[#allocation2 + $0x38] sm:$0x3] %vm514_vm5, %v7047_v3  ;;  %8647 = vmatmul.mubr.msk.f32.vlgmr.msra.gmra.mxu1 %vm413_vm6, %v7047_v3 }
0xa396   :  { %8661 = vmatpush3.msra.mxu1 %v7053_v61  ;;  %8668 = vmatprep.mubr.msk.f32.mxu1 %vm9084_vm2, %v9083_v28 }
0xa397   :  { %8662 = vmatprep.subr.mxu1 %v9083_v28 }
0xa398   :  { %8663 = vmatpush3.msra.mxu1 %v7052_v63 }
0xa399   :  { %8664 = vmatprep.subr.mxu1 %v9083_v28 }
0xa39a   :  { %8665 = vmatpush3.msra.mxu1 %v7051_v0  ;;  %v7393_v0 = vld [vmem:[%s10598_s9 + $0x18] sm:$0xff] }
0xa39b   :  { %8666 = vmatprep.subr.mxu1 %v9083_v28 }
0xa39c   :  { %8667 = vmatpush3.msra.mxu1 %v7050_v1  ;;  %v7392_v1 = vld [vmem:[%s10598_s9 + $0x10] sm:$0xff] }
0xa455   :  { %v7122_v4 = vpop.f32.mrf.mxu1 }
0xa456   :  { %v7127_v49 = vrot.slane %v7122_v4, 6 }
0xa457   :  { %v8648_v27 = vpop.f32.mrf.mxu1 }
0xa458   :  { %v7129_v5 = vadd.f32 %v7127_v49, %v10511_v41 }
0xa45a   :  { %9057 = vtanh.f32 %v7129_v5  ;;  %v7130_v33 = vmul.f32 0.5, %v7129_v5  ;;  %v7566_v5 = vld [vmem:[%s10599_s10] ss:$0 sm:$0xff] }
0xa45c   :  { %9059 = vtanh.f32 %v7130_v33 }
0xa467   :  { %v9058_v6 = vpop.eup %9057 }
0xa468   :  { %7140 = vrot.lane.b32.xlu0 %v9058_v6, %s9086_s27 }
0xa469   :  { %v9060_v45 = vpop.eup %9059 }
0xa46a   :  { %v7132_v7 = vmul.f32 0.5, %v9060_v45 }
0xa46c   :  { %v7133_v34 = vadd.f32 0.5, %v7132_v7 }
0xa46e   :  { %v7138_v12 = vmul.f32 %v7136_v35, %v7133_v34 }
0xa4da   :  { %v7141_v21 = vpop.permute.xlu0 %7140 }
0xa4db   :  { %v7143_v50 = vmul.f32 %v7141_v21, %v7133_v34 }
0xa4dd   :  { %7145 = vrot.lane.b32.xlu1 %v7143_v50, %s9086_s27 }
0xa54f   :  { %v7146_v13 = vpop.permute.xlu1 %7145 }
0xa550   :  { %v7148_v11 = vadd.f32 %v7146_v13, %v7138_v12 }
0xa552   :  { %9061 = vtanh.f32 %v7148_v11  ;;  %v7250_v44 = vrot.slane %v7148_v11, 6 }
0xa55f   :  { %v9062_v14 = vpop.eup %9061 }
0xa560   :  { %7151 = vrot.lane.b32.xlu0 %v9062_v14, %s9086_s27 }
0xa5d2   :  { %v7152_v15 = vpop.permute.xlu0 %7151 }
0xa5d3   :  { %v7154_v23 = vmul.f32 %v7152_v15, %v7133_v34 }
0xa5d5   :  { %v7165_v10 = vrot.slane %v7154_v23, 2 }
0xa5d7   :  { %7166 = vrot.lane.b32.xlu1 %v7165_v10, %s9087_s28 }
0xa649   :  { %v7167_v19 = vpop.permute.xlu1 %7166 }
0xa64a   :  { %8658 = vmatmul.mubr.msk.f32.vlgmr.msra.gmra.mxu0 %vm413_vm6, %v7167_v19 }
0xa64b   :  { %8679 = vmatprep.mubr.msk.f32.mxu0 %vm9084_vm2, %v9083_v28  ;;  %8672 = vmatpush3.msra.mxu0 %v7393_v0 }
0xa64c   :  { %8673 = vmatprep.subr.mxu0 %v9083_v28 }
0xa64d   :  { %8674 = vmatpush3.msra.mxu0 %v7392_v1 }
0xa64e   :  { %8675 = vmatprep.subr.mxu0 %v9083_v28 }
0xa64f   :  { %8676 = vmatpush3.msra.mxu0 %v7391_v24 }
0xa650   :  { %8677 = vmatprep.subr.mxu0 %v9083_v28 }
0xa651   :  { %8678 = vmatpush3.msra.mxu0 %v7390_v60 }
0xa70a   :  { %v7236_v16 = vpop.f32.mrf.mxu0 }
0xa70b   :  { %v7241_v18 = vrot.slane %v7236_v16, 4 }
0xa70c   :  { %v8659_v17 = vpop.f32.mrf.mxu0 }
0xa70d   :  { %v7243_v26 = vadd.f32 %v7241_v18, %v10511_v41 }
0xa70f   :  { %9063 = vtanh.f32 %v7243_v26  ;;  %v7244_v37 = vmul.f32 0.5, %v7243_v26 }
0xa711   :  { %9065 = vtanh.f32 %v7244_v37 }
0xa71c   :  { %v9064_v36 = vpop.eup %9063 }
0xa71d   :  { %7254 = vrot.lane.b32.xlu0 %v9064_v36, %s9086_s27 }
0xa71e   :  { %v9066_v8 = vpop.eup %9065 }
0xa71f   :  { %v7246_v38 = vmul.f32 0.5, %v9066_v8 }
0xa721   :  { %v7247_v53 = vadd.f32 0.5, %v7246_v38 }
0xa723   :  { %v7252_v30 = vmul.f32 %v7250_v44, %v7247_v53 }
0xa78f   :  { %v7255_v56 = vpop.permute.xlu0 %7254 }
0xa790   :  { %v7257_v43 = vmul.f32 %v7255_v56, %v7247_v53 }
0xa792   :  { %7259 = vrot.lane.b32.xlu1 %v7257_v43, %s9086_s27 }
0xa804   :  { %v7260_v39 = vpop.permute.xlu1 %7259 }
0xa805   :  { %v7262_v62 = vadd.f32 %v7260_v39, %v7252_v30 }
0xa807   :  { %9067 = vtanh.f32 %v7262_v62  ;;  %v7364_v25 = vrot.slane %v7262_v62, 6 }
0xa814   :  { %v9068_v40 = vpop.eup %9067 }
0xa815   :  { %7265 = vrot.lane.b32.xlu0 %v9068_v40, %s9086_s27 }
0xa887   :  { %v7266_v31 = vpop.permute.xlu0 %7265 }
0xa888   :  { %v7268_v29 = vmul.f32 %v7266_v31, %v7247_v53 }
0xa88a   :  { %v7279_v46 = vrot.slane %v7268_v29, 4 }
0xa88c   :  { %7280 = vrot.lane.b32.xlu1 %v7279_v46, %s9087_s28 }
0xa8fe   :  { %v7281_v51 = vpop.permute.xlu1 %7280 }
0xa8ff   :  { %8669 = vmatmul.mubr.msk.f32.vlgmr.msra.gmra.mxu1 %vm413_vm6, %v7281_v51 }
0xa9bf   :  { %v7350_v32 = vpop.f32.mrf.mxu1 }
0xa9c0   :  { %v7355_v9 = vrot.slane %v7350_v32, 2 }
0xa9c1   :  { %v8670_v22 = vpop.f32.mrf.mxu1 }
0xa9c2   :  { %v7357_v54 = vadd.f32 %v7355_v9, %v10511_v41 }
0xa9c4   :  { %9069 = vtanh.f32 %v7357_v54  ;;  %v7358_v57 = vmul.f32 0.5, %v7357_v54 }
0xa9c6   :  { %9071 = vtanh.f32 %v7358_v57 }
0xa9d1   :  { %v9070_v55 = vpop.eup %9069 }
0xa9d2   :  { %7368 = vrot.lane.b32.xlu0 %v9070_v55, %s9086_s27 }
0xa9d3   :  { %v9072_v20 = vpop.eup %9071 }
0xa9d4   :  { %v7360_v58 = vmul.f32 0.5, %v9072_v20 }
0xa9d6   :  { %v7361_v47 = vadd.f32 0.5, %v7360_v58 }
0xa9d8   :  { %v7366_v42 = vmul.f32 %v7364_v25, %v7361_v47 }
0xaa44   :  { %v7369_v52 = vpop.permute.xlu0 %7368 }
0xaa45   :  { %v7371_v59 = vmul.f32 %v7369_v52, %v7361_v47 }
0xaa47   :  { %7373 = vrot.lane.b32.xlu1 %v7371_v59, %s9086_s27 }
0xaa4b   :  { %7156 = vrot.lane.b32.xlu1 %v7154_v23, %s9087_s28 }
0xaab9   :  { %v7374_v48 = vpop.permute.xlu1 %7373 }
0xaaba   :  { %v7376_v61 = vadd.f32 %v7374_v48, %v7366_v42 }
0xaabc   :  { %9073 = vtanh.f32 %v7376_v61 }
0xaabd   :  { %v7157_v41 = vpop.permute.xlu1 %7156 }
0xaabe   :  { %7160 = vst.msk [vmem:[#allocation2 + $0x38] sm:$0xc] %vm7159_vm7, %v7157_v41 }
0xaac9   :  { %v9074_v63 = vpop.eup %9073 }
0xaaca   :  { %7379 = vrot.lane.b32.xlu0 %v9074_v63, %s9086_s27 }
0xaace   :  { %7270 = vrot.lane.b32.xlu0 %v7268_v29, %s9087_s28 }
0xab3c   :  { %v7380_v2 = vpop.permute.xlu0 %7379 }
0xab3d   :  { %v7382_v3 = vmul.f32 %v7380_v2, %v7361_v47 }
0xab3f   :  { %7384 = vrot.lane.b32.xlu1 %v7382_v3, %s9087_s28 }
0xab40   :  { %v7271_v4 = vpop.permute.xlu0 %7270 }
0xab41   :  { %7274 = vst.msk [vmem:[#allocation2 + $0x38] sm:$0x30] %vm7273_vm8, %v7271_v4 }
0xabb1   :  { %v7385_v49 = vpop.permute.xlu1 %7384 }
0xabb2   :  { %7388 = vst.msk [vmem:[#allocation2 + $0x38] sm:$0xc0] %vm7387_vm9, %v7385_v49 }
0xabb9   :  { %v7389_v27 = vld [vmem:[#allocation2 + $0x38] sm:$0xff] }
0xabba   :  { %8680 = vmatmul.mubr.msk.f32.vlgmr.msra.gmra.mxu0 %vm413_vm6, %v7389_v27 }
0xac7a   :  { %v7470_v6 = vpop.f32.mrf.mxu0 }
0xac7b   :  { %v7471_v28 = vadd.f32 %v7566_v5, %v7470_v6 }
0xac7c   :  { %v8681_v33 = vpop.f32.mrf.mxu0 }
0xac7d   :  { %7474 = vst.msk [vmem:[%s10600_s11] sm:$0xff] %vm202_vm3, %v7471_v28 }

</bundles_post_ra>
